<compile_context>
chip_gen: v5e
topology: v5e:2x2
jax: 0.10.0
libtpu: 0.0.40
codegen_flags: <defaults>
</compile_context>

<pallas_src>
import functools

import jax
import jax.numpy as jnp
from jax import lax
from jax.experimental import pallas as pl
from jax.experimental.pallas import tpu as pltpu


_NEG_INF = -1e9
_VMEM_LIMIT = 48 * 1024 * 1024   # <= v7x's 64 MiB physical VMEM, fine on v5e/v6e


def _proj_kernel(x_ref, w_ref, h_ref, *, apply_elu_to_input):
    """Head-batched projection: h_all = (ELU?)(x) @ W_all  (bf16 out)."""
    x = x_ref[...].astype(jnp.float32)
    if apply_elu_to_input:
        # ELU activation of the previous layer, fused here (f32 elementwise).
        x = jnp.where(x > 0, x, jnp.exp(x) - 1.0)
    h = jnp.dot(x.astype(jnp.bfloat16), w_ref[...],
                preferred_element_type=jnp.float32)
    h_ref[...] = h.astype(h_ref.dtype)


def _attn_kernel(hall_ref, bias_ref, asrc_ref, adst_ref, out_ref,
                 *, n_heads, head_dim, alpha, tm):
    """Adjacency-masked multi-head attention for one tile of query rows."""
    H, D = n_heads, head_dim
    row0 = pl.multiple_of(pl.program_id(0) * tm, tm)

    h_all = hall_ref[...]                        # (N, H*D)  bf16 keys/values
    h_q = hall_ref[pl.ds(row0, tm), :]           # (tm, H*D) bf16 query rows
    bias = bias_ref[...].astype(jnp.float32)     # (tm, N)   additive adj mask

    # per-query "source" scores, all heads at once: (tm, H)
    f_src = jnp.dot(h_q, asrc_ref[...], preferred_element_type=jnp.float32)
    # per-key "dest" scores, produced already transposed: (H, N)
    f_dst_t = lax.dot_general(adst_ref[...], h_all, (((0,), (1,)), ((), ())),
                              preferred_element_type=jnp.float32)

    for h in range(H):
        e = f_src[:, h:h + 1] + f_dst_t[h:h + 1, :]          # (tm, N)
        e = jnp.where(e > 0, e, alpha * e)                   # LeakyReLU(alpha)
        e = e + bias                                         # mask non-edges
        m = jnp.max(e, axis=-1, keepdims=True)
        p = jnp.exp(e - m)
        denom = jnp.sum(p, axis=-1, keepdims=True)
        # TODO(synk): attention-coefficient dropout (p=0.6) omitted — eval mode.
        o = jnp.dot(p.astype(jnp.bfloat16), h_all[:, h * D:(h + 1) * D],
                    preferred_element_type=jnp.float32)      # (tm, D)
        o = o * pl.reciprocal(denom, approx=True)            # fold 1/denom
        out_ref[:, h * D:(h + 1) * D] = o.astype(out_ref.dtype)


def _project(x, w_all, *, apply_elu_to_input, tm):
    Np, F = x.shape
    HD = w_all.shape[1]
    kernel = functools.partial(_proj_kernel,
                               apply_elu_to_input=apply_elu_to_input)
    return pl.pallas_call(
        kernel,
        out_shape=jax.ShapeDtypeStruct((Np, HD), jnp.bfloat16),
        grid_spec=pltpu.PrefetchScalarGridSpec(
            num_scalar_prefetch=0,
            grid=(Np // tm,),
            in_specs=[pl.BlockSpec((tm, F), lambda i: (i, 0)),
                      pl.BlockSpec((F, HD), lambda i: (0, 0))],
            out_specs=pl.BlockSpec((tm, HD), lambda i: (i, 0))),
        compiler_params=pltpu.CompilerParams(
            dimension_semantics=("parallel",),
            vmem_limit_bytes=_VMEM_LIMIT),
    )(x, w_all)


def _attention(h_all, bias, a_src_bd, a_dst_bd, *, n_heads, head_dim, alpha,
               tm, out_dtype):
    Np, HD = h_all.shape
    kernel = functools.partial(_attn_kernel, n_heads=n_heads,
                               head_dim=head_dim, alpha=alpha, tm=tm)
    return pl.pallas_call(
        kernel,
        out_shape=jax.ShapeDtypeStruct((Np, HD), out_dtype),
        grid_spec=pltpu.PrefetchScalarGridSpec(
            num_scalar_prefetch=0,
            grid=(Np // tm,),
            in_specs=[
                pl.BlockSpec((Np, HD), lambda i: (0, 0)),       # full h (K/V)
                pl.BlockSpec((tm, Np), lambda i: (i, 0)),       # bias row tile
                pl.BlockSpec((HD, n_heads), lambda i: (0, 0)),  # A_src blockdiag
                pl.BlockSpec((HD, n_heads), lambda i: (0, 0)),  # A_dst blockdiag
            ],
            out_specs=pl.BlockSpec((tm, HD), lambda i: (i, 0))),
        compiler_params=pltpu.CompilerParams(
            dimension_semantics=("parallel",),
            vmem_limit_bytes=_VMEM_LIMIT),
    )(h_all, bias, a_src_bd, a_dst_bd)


def gat_multihead_layer(x, bias, w, a_src, a_dst, *, alpha=0.2,
                        apply_elu_to_input=False, tm=128,
                        out_dtype=jnp.bfloat16):
    """Multi-head GAT layer with 'concat' aggregation (head-batched)."""
    H, F, D = w.shape
    # head-batched weights: (F, H*D)  so  h_all[:, h*D:(h+1)*D] = x @ W[h]
    w_all = jnp.transpose(w, (1, 0, 2)).reshape(F, H * D).astype(jnp.bfloat16)
    # block-diagonal attention vectors: (H*D, H); f_src = h_all @ A_src, etc.
    eye = jnp.eye(H, dtype=jnp.float32)
    a_src_bd = (a_src[:, 0, :, None] * eye[:, None, :]).reshape(H * D, H)
    a_dst_bd = (a_dst[:, 0, :, None] * eye[:, None, :]).reshape(H * D, H)
    a_src_bd = a_src_bd.astype(jnp.bfloat16)
    a_dst_bd = a_dst_bd.astype(jnp.bfloat16)

    h_all = _project(x, w_all, apply_elu_to_input=apply_elu_to_input, tm=tm)
    return _attention(h_all, bias, a_src_bd, a_dst_bd, n_heads=H, head_dim=D,
                      alpha=alpha, tm=tm, out_dtype=out_dtype)


def init_params(key, input_dim, num_classes):
    """Deterministic (xavier-ish) parameter init matching the module shapes."""
    n_heads_1, repr_1 = 8, 8
    n_heads_2, repr_2 = 1, num_classes
    hidden = n_heads_1 * repr_1  # 64

    k = jax.random.split(key, 6)

    def xavier(k, shape, fan_in, fan_out):
        scale = jnp.sqrt(2.0 / (fan_in + fan_out))
        return (scale * jax.random.normal(k, shape)).astype(jnp.float32)

    params = {
        "w1":     xavier(k[0], (n_heads_1, input_dim, repr_1), input_dim, repr_1),
        "a1_src": xavier(k[1], (n_heads_1, 1, repr_1), repr_1, 1),
        "a1_dst": xavier(k[2], (n_heads_1, 1, repr_1), repr_1, 1),
        "w2":     xavier(k[3], (n_heads_2, hidden, repr_2), hidden, repr_2),
        "a2_src": xavier(k[4], (n_heads_2, 1, repr_2), repr_2, 1),
        "a2_dst": xavier(k[5], (n_heads_2, 1, repr_2), repr_2, 1),
    }
    return params


def gat_transductive_forward(params, node_matrix, adj_matrix, *, tm=128):
    N = node_matrix.shape[0]
    pad = (-N) % tm
    Np = N + pad

    x = jnp.pad(node_matrix.astype(jnp.float32), ((0, pad), (0, 0)))
    # Additive adjacency mask shared by both layers; bf16 halves its DMA bytes
    # and -1e9 is comfortably within bf16 range.  Padded key columns are masked
    # so padded nodes are never attended to.
    bias = jnp.where(adj_matrix > 0, 0.0, _NEG_INF)
    bias = jnp.pad(bias, ((0, pad), (0, pad)), constant_values=_NEG_INF)
    bias = bias.astype(jnp.bfloat16)

    # dropout_1 (p=0.6): identity at inference
    z1 = gat_multihead_layer(x, bias, params["w1"], params["a1_src"],
                             params["a1_dst"], alpha=0.2, tm=tm,
                             out_dtype=jnp.bfloat16)          # (Np, 64) bf16
    # activation_1 (ELU) fused into the layer-2 projection; dropout_2 identity
    z2 = gat_multihead_layer(z1, bias, params["w2"], params["a2_src"],
                             params["a2_dst"], alpha=0.2,
                             apply_elu_to_input=True, tm=tm,
                             out_dtype=jnp.float32)           # (Np, C) f32
    return z2[:N]  # (N, num_classes) raw, unnormalised class scores


if __name__ == "__main__":
    N = 128            # number of nodes
    input_dim = 64     # node feature dim
    num_classes = 8

    key = jax.random.PRNGKey(0)
    k_params, k_x, k_adj = jax.random.split(key, 3)

    params = init_params(k_params, input_dim, num_classes)

    node_matrix = jax.random.normal(k_x, (N, input_dim), dtype=jnp.float32)

    # random symmetric adjacency with self-loops
    adj_rand = jax.random.uniform(k_adj, (N, N))
    adj = (adj_rand < 0.05).astype(jnp.float32)
    adj = jnp.maximum(adj, adj.T)
    adj = jnp.maximum(adj, jnp.eye(N, dtype=jnp.float32))

    out = jax.jit(gat_transductive_forward)(params, node_matrix, adj)
    out = jax.block_until_ready(out)

    assert out.shape == (N, num_classes), out.shape
    assert bool(jnp.all(jnp.isfinite(out)))
    print("KERNEL_OK")
</pallas_src>

<mosaic_0001>
module attributes {stable_mosaic.version = 11 : i64} {
  func.func @_proj_kernel(%arg0: i32, %arg1: memref<128x64xf32, #tpu.memory_space<vmem>>, %arg2: memref<64x64xbf16, #tpu.memory_space<vmem>>, %arg3: memref<128x64xbf16, #tpu.memory_space<vmem>>) attributes {dimension_semantics = [#tpu.dimension_semantics<parallel>], iteration_bounds = array<i64: 1>, scalar_prefetch = 0 : i64, scratch_operands = 0 : i64, tpu.core_type = #tpu.core_type<tc>, window_params = [{transform_indices = @transform_0, window_bounds = array<i64: 128, 64>}, {pipeline_mode = #tpu.pipeline_mode<synchronous>, transform_indices = @transform_1, window_bounds = array<i64: 64, 64>}, {transform_indices = @transform_2, window_bounds = array<i64: 128, 64>}]} {
    %c0 = arith.constant 0 : index
    %c0_0 = arith.constant 0 : index
    %0 = vector.load %arg1[%c0, %c0_0] : memref<128x64xf32, #tpu.memory_space<vmem>>, vector<128x64xf32>
    %1 = arith.truncf %0 : vector<128x64xf32> to vector<128x64xbf16>
    %c0_1 = arith.constant 0 : index
    %c0_2 = arith.constant 0 : index
    %2 = vector.load %arg2[%c0_1, %c0_2] : memref<64x64xbf16, #tpu.memory_space<vmem>>, vector<64x64xbf16>
    %cst = arith.constant dense<0.000000e+00> : vector<128x64xf32>
    %3 = tpu.matmul %1, %2, %cst {dimension_numbers = #tpu.dot_dimension_numbers<[1], [0], [0], [1], [0, 0, 1, 1], [], []>} : vector<128x64xbf16>, vector<64x64xbf16>, vector<128x64xf32> -> vector<128x64xf32>
    %4 = arith.truncf %3 : vector<128x64xf32> to vector<128x64xbf16>
    %c0_3 = arith.constant 0 : index
    %c0_4 = arith.constant 0 : index
    %5 = vector.load %arg3[%c0_3, %c0_4] : memref<128x64xbf16, #tpu.memory_space<vmem>>, vector<128x64xbf16>
    tpu.vector_store %arg3[%c0_3, %c0_4], %4 {strides = array<i32>} : memref<128x64xbf16, #tpu.memory_space<vmem>>, vector<128x64xbf16>,
    return
  }
  func.func @transform_0(%arg0: i32) -> (i32, i32) {
    %c0_i32 = arith.constant 0 : i32
    %c0_i32_0 = arith.constant 0 : i32
    return %arg0, %c0_i32 : i32, i32
  }
  func.func @transform_1(%arg0: i32) -> (i32, i32) {
    %c0_i32 = arith.constant 0 : i32
    %c0_i32_0 = arith.constant 0 : i32
    %c0_i32_1 = arith.constant 0 : i32
    return %c0_i32, %c0_i32_0 : i32, i32
  }
  func.func @transform_2(%arg0: i32) -> (i32, i32) {
    %c0_i32 = arith.constant 0 : i32
    %c0_i32_0 = arith.constant 0 : i32
    return %arg0, %c0_i32 : i32, i32
  }
}

module attributes {stable_mosaic.version = 11 : i64} {
  func.func @_attn_kernel(%arg0: i32, %arg1: memref<128x64xbf16, #tpu.memory_space<vmem>>, %arg2: memref<128x128xbf16, #tpu.memory_space<vmem>>, %arg3: memref<64x8xbf16, #tpu.memory_space<vmem>>, %arg4: memref<64x8xbf16, #tpu.memory_space<vmem>>, %arg5: memref<128x64xbf16, #tpu.memory_space<vmem>>) attributes {dimension_semantics = [#tpu.dimension_semantics<parallel>], iteration_bounds = array<i64: 1>, scalar_prefetch = 0 : i64, scratch_operands = 0 : i64, tpu.core_type = #tpu.core_type<tc>, window_params = [{pipeline_mode = #tpu.pipeline_mode<synchronous>, transform_indices = @transform_0, window_bounds = array<i64: 128, 64>}, {transform_indices = @transform_1, window_bounds = array<i64: 128, 128>}, {pipeline_mode = #tpu.pipeline_mode<synchronous>, transform_indices = @transform_2, window_bounds = array<i64: 64, 8>}, {pipeline_mode = #tpu.pipeline_mode<synchronous>, transform_indices = @transform_3, window_bounds = array<i64: 64, 8>}, {transform_indices = @transform_4, window_bounds = array<i64: 128, 64>}]} {
    %c128_i32 = arith.constant 128 : i32
    %0 = arith.muli %arg0, %c128_i32 : i32
    %1 = tpu.assume_multiple %0, 128 : i32
    %c0 = arith.constant 0 : index
    %c0_0 = arith.constant 0 : index
    %2 = vector.load %arg1[%c0, %c0_0] : memref<128x64xbf16, #tpu.memory_space<vmem>>, vector<128x64xbf16>
    %3 = arith.index_cast %1 : i32 to index
    %c0_1 = arith.constant 0 : index
    %4 = vector.load %arg1[%3, %c0_1] : memref<128x64xbf16, #tpu.memory_space<vmem>>, vector<128x64xbf16>
    %c0_2 = arith.constant 0 : index
    %c0_3 = arith.constant 0 : index
    %5 = vector.load %arg2[%c0_2, %c0_3] : memref<128x128xbf16, #tpu.memory_space<vmem>>, vector<128x128xbf16>
    %6 = arith.extf %5 : vector<128x128xbf16> to vector<128x128xf32>
    %c0_4 = arith.constant 0 : index
    %c0_5 = arith.constant 0 : index
    %7 = vector.load %arg3[%c0_4, %c0_5] : memref<64x8xbf16, #tpu.memory_space<vmem>>, vector<64x8xbf16>
    %cst = arith.constant dense<0.000000e+00> : vector<128x8xf32>
    %8 = tpu.matmul %4, %7, %cst {dimension_numbers = #tpu.dot_dimension_numbers<[1], [0], [0], [1], [0, 0, 1, 1], [], []>} : vector<128x64xbf16>, vector<64x8xbf16>, vector<128x8xf32> -> vector<128x8xf32>
    %c0_6 = arith.constant 0 : index
    %c0_7 = arith.constant 0 : index
    %9 = vector.load %arg4[%c0_6, %c0_7] : memref<64x8xbf16, #tpu.memory_space<vmem>>, vector<64x8xbf16>
    %cst_8 = arith.constant dense<0.000000e+00> : vector<8x128xf32>
    %10 = tpu.matmul %9, %2, %cst_8 {dimension_numbers = #tpu.dot_dimension_numbers<[0], [1], [1], [0], [0, 1, 1, 0], [], []>} : vector<64x8xbf16>, vector<128x64xbf16>, vector<8x128xf32> -> vector<8x128xf32>
    %11 = vector.extract_strided_slice %8 {offsets = [0, 0], sizes = [128, 1], strides = [1, 1]} : vector<128x8xf32> to vector<128x1xf32>
    %12 = vector.extract_strided_slice %10 {offsets = [0, 0], sizes = [1, 128], strides = [1, 1]} : vector<8x128xf32> to vector<1x128xf32>
    %13 = vector.broadcast %11 : vector<128x1xf32> to vector<128x128xf32>
    %14 = vector.broadcast %12 : vector<1x128xf32> to vector<128x128xf32>
    %15 = arith.addf %13, %14 : vector<128x128xf32>
    %cst_9 = arith.constant 0.000000e+00 : f32
    %16 = vector.broadcast %cst_9 : f32 to vector<128x128xf32>
    %17 = arith.cmpf ogt, %15, %16 : vector<128x128xf32>
    %cst_10 = arith.constant 2.000000e-01 : f32
    %18 = vector.broadcast %cst_10 : f32 to vector<128x128xf32>
    %19 = arith.mulf %18, %15 : vector<128x128xf32>
    %20 = arith.select %17, %15, %19 : vector<128x128xi1>, vector<128x128xf32>
    %21 = arith.addf %20, %6 : vector<128x128xf32>
    %cst_11 = arith.constant dense<0xFF800000> : vector<128xf32>
    %22 = vector.multi_reduction <maximumf>, %21, %cst_11 [1] : vector<128x128xf32> to vector<128xf32>
    %23 = vector.shape_cast %22 : vector<128xf32> to vector<128x1xf32>
    %24 = vector.broadcast %23 : vector<128x1xf32> to vector<128x128xf32>
    %25 = arith.subf %21, %24 : vector<128x128xf32>
    %26 = math.exp %25 : vector<128x128xf32>
    %cst_12 = arith.constant dense<0.000000e+00> : vector<128xf32>
    %27 = vector.multi_reduction <add>, %26, %cst_12 [1] : vector<128x128xf32> to vector<128xf32>
    %28 = vector.shape_cast %27 : vector<128xf32> to vector<128x1xf32>
    %29 = arith.truncf %26 : vector<128x128xf32> to vector<128x128xbf16>
    %30 = vector.extract_strided_slice %2 {offsets = [0, 0], sizes = [128, 8], strides = [1, 1]} : vector<128x64xbf16> to vector<128x8xbf16>
    %cst_13 = arith.constant dense<0.000000e+00> : vector<128x8xf32>
    %31 = tpu.matmul %29, %30, %cst_13 {dimension_numbers = #tpu.dot_dimension_numbers<[1], [0], [0], [1], [0, 0, 1, 1], [], []>} : vector<128x128xbf16>, vector<128x8xbf16>, vector<128x8xf32> -> vector<128x8xf32>
    %32 = tpu.reciprocal %28 {approx = true} : vector<128x1xf32> -> vector<128x1xf32>
    %33 = vector.broadcast %32 : vector<128x1xf32> to vector<128x8xf32>
    %34 = arith.mulf %31, %33 : vector<128x8xf32>
    %35 = arith.truncf %34 : vector<128x8xf32> to vector<128x8xbf16>
    %c0_14 = arith.constant 0 : index
    %c0_15 = arith.constant 0 : index
    %36 = vector.load %arg5[%c0_14, %c0_15] : memref<128x64xbf16, #tpu.memory_space<vmem>>, vector<128x8xbf16>
    tpu.vector_store %arg5[%c0_14, %c0_15], %35 {strides = array<i32>} : memref<128x64xbf16, #tpu.memory_space<vmem>>, vector<128x8xbf16>,
    %37 = vector.extract_strided_slice %8 {offsets = [0, 1], sizes = [128, 1], strides = [1, 1]} : vector<128x8xf32> to vector<128x1xf32>
    %38 = vector.extract_strided_slice %10 {offsets = [1, 0], sizes = [1, 128], strides = [1, 1]} : vector<8x128xf32> to vector<1x128xf32>
    %39 = vector.broadcast %37 : vector<128x1xf32> to vector<128x128xf32>
    %40 = vector.broadcast %38 : vector<1x128xf32> to vector<128x128xf32>
    %41 = arith.addf %39, %40 : vector<128x128xf32>
    %cst_16 = arith.constant 0.000000e+00 : f32
    %42 = vector.broadcast %cst_16 : f32 to vector<128x128xf32>
    %43 = arith.cmpf ogt, %41, %42 : vector<128x128xf32>
    %cst_17 = arith.constant 2.000000e-01 : f32
    %44 = vector.broadcast %cst_17 : f32 to vector<128x128xf32>
    %45 = arith.mulf %44, %41 : vector<128x128xf32>
    %46 = arith.select %43, %41, %45 : vector<128x128xi1>, vector<128x128xf32>
    %47 = arith.addf %46, %6 : vector<128x128xf32>
    %cst_18 = arith.constant dense<0xFF800000> : vector<128xf32>
    %48 = vector.multi_reduction <maximumf>, %47, %cst_18 [1] : vector<128x128xf32> to vector<128xf32>
    %49 = vector.shape_cast %48 : vector<128xf32> to vector<128x1xf32>
    %50 = vector.broadcast %49 : vector<128x1xf32> to vector<128x128xf32>
    %51 = arith.subf %47, %50 : vector<128x128xf32>
    %52 = math.exp %51 : vector<128x128xf32>
    %cst_19 = arith.constant dense<0.000000e+00> : vector<128xf32>
    %53 = vector.multi_reduction <add>, %52, %cst_19 [1] : vector<128x128xf32> to vector<128xf32>
    %54 = vector.shape_cast %53 : vector<128xf32> to vector<128x1xf32>
    %55 = arith.truncf %52 : vector<128x128xf32> to vector<128x128xbf16>
    %56 = vector.extract_strided_slice %2 {offsets = [0, 8], sizes = [128, 8], strides = [1, 1]} : vector<128x64xbf16> to vector<128x8xbf16>
    %cst_20 = arith.constant dense<0.000000e+00> : vector<128x8xf32>
    %57 = tpu.matmul %55, %56, %cst_20 {dimension_numbers = #tpu.dot_dimension_numbers<[1], [0], [0], [1], [0, 0, 1, 1], [], []>} : vector<128x128xbf16>, vector<128x8xbf16>, vector<128x8xf32> -> vector<128x8xf32>
    %58 = tpu.reciprocal %54 {approx = true} : vector<128x1xf32> -> vector<128x1xf32>
    %59 = vector.broadcast %58 : vector<128x1xf32> to vector<128x8xf32>
    %60 = arith.mulf %57, %59 : vector<128x8xf32>
    %61 = arith.truncf %60 : vector<128x8xf32> to vector<128x8xbf16>
    %c0_21 = arith.constant 0 : index
    %c8 = arith.constant 8 : index
    %62 = vector.load %arg5[%c0_21, %c8] : memref<128x64xbf16, #tpu.memory_space<vmem>>, vector<128x8xbf16>
    tpu.vector_store %arg5[%c0_21, %c8], %61 {strides = array<i32>} : memref<128x64xbf16, #tpu.memory_space<vmem>>, vector<128x8xbf16>,
    %63 = vector.extract_strided_slice %8 {offsets = [0, 2], sizes = [128, 1], strides = [1, 1]} : vector<128x8xf32> to vector<128x1xf32>
    %64 = vector.extract_strided_slice %10 {offsets = [2, 0], sizes = [1, 128], strides = [1, 1]} : vector<8x128xf32> to vector<1x128xf32>
    %65 = vector.broadcast %63 : vector<128x1xf32> to vector<128x128xf32>
    %66 = vector.broadcast %64 : vector<1x128xf32> to vector<128x128xf32>
    %67 = arith.addf %65, %66 : vector<128x128xf32>
    %cst_22 = arith.constant 0.000000e+00 : f32
    %68 = vector.broadcast %cst_22 : f32 to vector<128x128xf32>
    %69 = arith.cmpf ogt, %67, %68 : vector<128x128xf32>
    %cst_23 = arith.constant 2.000000e-01 : f32
    %70 = vector.broadcast %cst_23 : f32 to vector<128x128xf32>
    %71 = arith.mulf %70, %67 : vector<128x128xf32>
    %72 = arith.select %69, %67, %71 : vector<128x128xi1>, vector<128x128xf32>
    %73 = arith.addf %72, %6 : vector<128x128xf32>
    %cst_24 = arith.constant dense<0xFF800000> : vector<128xf32>
    %74 = vector.multi_reduction <maximumf>, %73, %cst_24 [1] : vector<128x128xf32> to vector<128xf32>
    %75 = vector.shape_cast %74 : vector<128xf32> to vector<128x1xf32>
    %76 = vector.broadcast %75 : vector<128x1xf32> to vector<128x128xf32>
    %77 = arith.subf %73, %76 : vector<128x128xf32>
    %78 = math.exp %77 : vector<128x128xf32>
    %cst_25 = arith.constant dense<0.000000e+00> : vector<128xf32>
    %79 = vector.multi_reduction <add>, %78, %cst_25 [1] : vector<128x128xf32> to vector<128xf32>
    %80 = vector.shape_cast %79 : vector<128xf32> to vector<128x1xf32>
    %81 = arith.truncf %78 : vector<128x128xf32> to vector<128x128xbf16>
    %82 = vector.extract_strided_slice %2 {offsets = [0, 16], sizes = [128, 8], strides = [1, 1]} : vector<128x64xbf16> to vector<128x8xbf16>
    %cst_26 = arith.constant dense<0.000000e+00> : vector<128x8xf32>
    %83 = tpu.matmul %81, %82, %cst_26 {dimension_numbers = #tpu.dot_dimension_numbers<[1], [0], [0], [1], [0, 0, 1, 1], [], []>} : vector<128x128xbf16>, vector<128x8xbf16>, vector<128x8xf32> -> vector<128x8xf32>
    %84 = tpu.reciprocal %80 {approx = true} : vector<128x1xf32> -> vector<128x1xf32>
    %85 = vector.broadcast %84 : vector<128x1xf32> to vector<128x8xf32>
    %86 = arith.mulf %83, %85 : vector<128x8xf32>
    %87 = arith.truncf %86 : vector<128x8xf32> to vector<128x8xbf16>
    %c0_27 = arith.constant 0 : index
    %c16 = arith.constant 16 : index
    %88 = vector.load %arg5[%c0_27, %c16] : memref<128x64xbf16, #tpu.memory_space<vmem>>, vector<128x8xbf16>
    tpu.vector_store %arg5[%c0_27, %c16], %87 {strides = array<i32>} : memref<128x64xbf16, #tpu.memory_space<vmem>>, vector<128x8xbf16>,
    %89 = vector.extract_strided_slice %8 {offsets = [0, 3], sizes = [128, 1], strides = [1, 1]} : vector<128x8xf32> to vector<128x1xf32>
    %90 = vector.extract_strided_slice %10 {offsets = [3, 0], sizes = [1, 128], strides = [1, 1]} : vector<8x128xf32> to vector<1x128xf32>
    %91 = vector.broadcast %89 : vector<128x1xf32> to vector<128x128xf32>
    %92 = vector.broadcast %90 : vector<1x128xf32> to vector<128x128xf32>
    %93 = arith.addf %91, %92 : vector<128x128xf32>
    %cst_28 = arith.constant 0.000000e+00 : f32
    %94 = vector.broadcast %cst_28 : f32 to vector<128x128xf32>
    %95 = arith.cmpf ogt, %93, %94 : vector<128x128xf32>
    %cst_29 = arith.constant 2.000000e-01 : f32
    %96 = vector.broadcast %cst_29 : f32 to vector<128x128xf32>
    %97 = arith.mulf %96, %93 : vector<128x128xf32>
    %98 = arith.select %95, %93, %97 : vector<128x128xi1>, vector<128x128xf32>
    %99 = arith.addf %98, %6 : vector<128x128xf32>
    %cst_30 = arith.constant dense<0xFF800000> : vector<128xf32>
    %100 = vector.multi_reduction <maximumf>, %99, %cst_30 [1] : vector<128x128xf32> to vector<128xf32>
    %101 = vector.shape_cast %100 : vector<128xf32> to vector<128x1xf32>
    %102 = vector.broadcast %101 : vector<128x1xf32> to vector<128x128xf32>
    %103 = arith.subf %99, %102 : vector<128x128xf32>
    %104 = math.exp %103 : vector<128x128xf32>
    %cst_31 = arith.constant dense<0.000000e+00> : vector<128xf32>
    %105 = vector.multi_reduction <add>, %104, %cst_31 [1] : vector<128x128xf32> to vector<128xf32>
    %106 = vector.shape_cast %105 : vector<128xf32> to vector<128x1xf32>
    %107 = arith.truncf %104 : vector<128x128xf32> to vector<128x128xbf16>
    %108 = vector.extract_strided_slice %2 {offsets = [0, 24], sizes = [128, 8], strides = [1, 1]} : vector<128x64xbf16> to vector<128x8xbf16>
    %cst_32 = arith.constant dense<0.000000e+00> : vector<128x8xf32>
    %109 = tpu.matmul %107, %108, %cst_32 {dimension_numbers = #tpu.dot_dimension_numbers<[1], [0], [0], [1], [0, 0, 1, 1], [], []>} : vector<128x128xbf16>, vector<128x8xbf16>, vector<128x8xf32> -> vector<128x8xf32>
    %110 = tpu.reciprocal %106 {approx = true} : vector<128x1xf32> -> vector<128x1xf32>
    %111 = vector.broadcast %110 : vector<128x1xf32> to vector<128x8xf32>
    %112 = arith.mulf %109, %111 : vector<128x8xf32>
    %113 = arith.truncf %112 : vector<128x8xf32> to vector<128x8xbf16>
    %c0_33 = arith.constant 0 : index
    %c24 = arith.constant 24 : index
    %114 = vector.load %arg5[%c0_33, %c24] : memref<128x64xbf16, #tpu.memory_space<vmem>>, vector<128x8xbf16>
    tpu.vector_store %arg5[%c0_33, %c24], %113 {strides = array<i32>} : memref<128x64xbf16, #tpu.memory_space<vmem>>, vector<128x8xbf16>,
    %115 = vector.extract_strided_slice %8 {offsets = [0, 4], sizes = [128, 1], strides = [1, 1]} : vector<128x8xf32> to vector<128x1xf32>
    %116 = vector.extract_strided_slice %10 {offsets = [4, 0], sizes = [1, 128], strides = [1, 1]} : vector<8x128xf32> to vector<1x128xf32>
    %117 = vector.broadcast %115 : vector<128x1xf32> to vector<128x128xf32>
    %118 = vector.broadcast %116 : vector<1x128xf32> to vector<128x128xf32>
    %119 = arith.addf %117, %118 : vector<128x128xf32>
    %cst_34 = arith.constant 0.000000e+00 : f32
    %120 = vector.broadcast %cst_34 : f32 to vector<128x128xf32>
    %121 = arith.cmpf ogt, %119, %120 : vector<128x128xf32>
    %cst_35 = arith.constant 2.000000e-01 : f32
    %122 = vector.broadcast %cst_35 : f32 to vector<128x128xf32>
    %123 = arith.mulf %122, %119 : vector<128x128xf32>
    %124 = arith.select %121, %119, %123 : vector<128x128xi1>, vector<128x128xf32>
    %125 = arith.addf %124, %6 : vector<128x128xf32>
    %cst_36 = arith.constant dense<0xFF800000> : vector<128xf32>
    %126 = vector.multi_reduction <maximumf>, %125, %cst_36 [1] : vector<128x128xf32> to vector<128xf32>
    %127 = vector.shape_cast %126 : vector<128xf32> to vector<128x1xf32>
    %128 = vector.broadcast %127 : vector<128x1xf32> to vector<128x128xf32>
    %129 = arith.subf %125, %128 : vector<128x128xf32>
    %130 = math.exp %129 : vector<128x128xf32>
    %cst_37 = arith.constant dense<0.000000e+00> : vector<128xf32>
    %131 = vector.multi_reduction <add>, %130, %cst_37 [1] : vector<128x128xf32> to vector<128xf32>
    %132 = vector.shape_cast %131 : vector<128xf32> to vector<128x1xf32>
    %133 = arith.truncf %130 : vector<128x128xf32> to vector<128x128xbf16>
    %134 = vector.extract_strided_slice %2 {offsets = [0, 32], sizes = [128, 8], strides = [1, 1]} : vector<128x64xbf16> to vector<128x8xbf16>
    %cst_38 = arith.constant dense<0.000000e+00> : vector<128x8xf32>
    %135 = tpu.matmul %133, %134, %cst_38 {dimension_numbers = #tpu.dot_dimension_numbers<[1], [0], [0], [1], [0, 0, 1, 1], [], []>} : vector<128x128xbf16>, vector<128x8xbf16>, vector<128x8xf32> -> vector<128x8xf32>
    %136 = tpu.reciprocal %132 {approx = true} : vector<128x1xf32> -> vector<128x1xf32>
    %137 = vector.broadcast %136 : vector<128x1xf32> to vector<128x8xf32>
    %138 = arith.mulf %135, %137 : vector<128x8xf32>
    %139 = arith.truncf %138 : vector<128x8xf32> to vector<128x8xbf16>
    %c0_39 = arith.constant 0 : index
    %c32 = arith.constant 32 : index
    %140 = vector.load %arg5[%c0_39, %c32] : memref<128x64xbf16, #tpu.memory_space<vmem>>, vector<128x8xbf16>
    tpu.vector_store %arg5[%c0_39, %c32], %139 {strides = array<i32>} : memref<128x64xbf16, #tpu.memory_space<vmem>>, vector<128x8xbf16>,
    %141 = vector.extract_strided_slice %8 {offsets = [0, 5], sizes = [128, 1], strides = [1, 1]} : vector<128x8xf32> to vector<128x1xf32>
    %142 = vector.extract_strided_slice %10 {offsets = [5, 0], sizes = [1, 128], strides = [1, 1]} : vector<8x128xf32> to vector<1x128xf32>
    %143 = vector.broadcast %141 : vector<128x1xf32> to vector<128x128xf32>
    %144 = vector.broadcast %142 : vector<1x128xf32> to vector<128x128xf32>
    %145 = arith.addf %143, %144 : vector<128x128xf32>
    %cst_40 = arith.constant 0.000000e+00 : f32
    %146 = vector.broadcast %cst_40 : f32 to vector<128x128xf32>
    %147 = arith.cmpf ogt, %145, %146 : vector<128x128xf32>
    %cst_41 = arith.constant 2.000000e-01 : f32
    %148 = vector.broadcast %cst_41 : f32 to vector<128x128xf32>
    %149 = arith.mulf %148, %145 : vector<128x128xf32>
    %150 = arith.select %147, %145, %149 : vector<128x128xi1>, vector<128x128xf32>
    %151 = arith.addf %150, %6 : vector<128x128xf32>
    %cst_42 = arith.constant dense<0xFF800000> : vector<128xf32>
    %152 = vector.multi_reduction <maximumf>, %151, %cst_42 [1] : vector<128x128xf32> to vector<128xf32>
    %153 = vector.shape_cast %152 : vector<128xf32> to vector<128x1xf32>
    %154 = vector.broadcast %153 : vector<128x1xf32> to vector<128x128xf32>
    %155 = arith.subf %151, %154 : vector<128x128xf32>
    %156 = math.exp %155 : vector<128x128xf32>
    %cst_43 = arith.constant dense<0.000000e+00> : vector<128xf32>
    %157 = vector.multi_reduction <add>, %156, %cst_43 [1] : vector<128x128xf32> to vector<128xf32>
    %158 = vector.shape_cast %157 : vector<128xf32> to vector<128x1xf32>
    %159 = arith.truncf %156 : vector<128x128xf32> to vector<128x128xbf16>
    %160 = vector.extract_strided_slice %2 {offsets = [0, 40], sizes = [128, 8], strides = [1, 1]} : vector<128x64xbf16> to vector<128x8xbf16>
    %cst_44 = arith.constant dense<0.000000e+00> : vector<128x8xf32>
    %161 = tpu.matmul %159, %160, %cst_44 {dimension_numbers = #tpu.dot_dimension_numbers<[1], [0], [0], [1], [0, 0, 1, 1], [], []>} : vector<128x128xbf16>, vector<128x8xbf16>, vector<128x8xf32> -> vector<128x8xf32>
    %162 = tpu.reciprocal %158 {approx = true} : vector<128x1xf32> -> vector<128x1xf32>
    %163 = vector.broadcast %162 : vector<128x1xf32> to vector<128x8xf32>
    %164 = arith.mulf %161, %163 : vector<128x8xf32>
    %165 = arith.truncf %164 : vector<128x8xf32> to vector<128x8xbf16>
    %c0_45 = arith.constant 0 : index
    %c40 = arith.constant 40 : index
    %166 = vector.load %arg5[%c0_45, %c40] : memref<128x64xbf16, #tpu.memory_space<vmem>>, vector<128x8xbf16>
    tpu.vector_store %arg5[%c0_45, %c40], %165 {strides = array<i32>} : memref<128x64xbf16, #tpu.memory_space<vmem>>, vector<128x8xbf16>,
    %167 = vector.extract_strided_slice %8 {offsets = [0, 6], sizes = [128, 1], strides = [1, 1]} : vector<128x8xf32> to vector<128x1xf32>
    %168 = vector.extract_strided_slice %10 {offsets = [6, 0], sizes = [1, 128], strides = [1, 1]} : vector<8x128xf32> to vector<1x128xf32>
    %169 = vector.broadcast %167 : vector<128x1xf32> to vector<128x128xf32>
    %170 = vector.broadcast %168 : vector<1x128xf32> to vector<128x128xf32>
    %171 = arith.addf %169, %170 : vector<128x128xf32>
    %cst_46 = arith.constant 0.000000e+00 : f32
    %172 = vector.broadcast %cst_46 : f32 to vector<128x128xf32>
    %173 = arith.cmpf ogt, %171, %172 : vector<128x128xf32>
    %cst_47 = arith.constant 2.000000e-01 : f32
    %174 = vector.broadcast %cst_47 : f32 to vector<128x128xf32>
    %175 = arith.mulf %174, %171 : vector<128x128xf32>
    %176 = arith.select %173, %171, %175 : vector<128x128xi1>, vector<128x128xf32>
    %177 = arith.addf %176, %6 : vector<128x128xf32>
    %cst_48 = arith.constant dense<0xFF800000> : vector<128xf32>
    %178 = vector.multi_reduction <maximumf>, %177, %cst_48 [1] : vector<128x128xf32> to vector<128xf32>
    %179 = vector.shape_cast %178 : vector<128xf32> to vector<128x1xf32>
    %180 = vector.broadcast %179 : vector<128x1xf32> to vector<128x128xf32>
    %181 = arith.subf %177, %180 : vector<128x128xf32>
    %182 = math.exp %181 : vector<128x128xf32>
    %cst_49 = arith.constant dense<0.000000e+00> : vector<128xf32>
    %183 = vector.multi_reduction <add>, %182, %cst_49 [1] : vector<128x128xf32> to vector<128xf32>
    %184 = vector.shape_cast %183 : vector<128xf32> to vector<128x1xf32>
    %185 = arith.truncf %182 : vector<128x128xf32> to vector<128x128xbf16>
    %186 = vector.extract_strided_slice %2 {offsets = [0, 48], sizes = [128, 8], strides = [1, 1]} : vector<128x64xbf16> to vector<128x8xbf16>
    %cst_50 = arith.constant dense<0.000000e+00> : vector<128x8xf32>
    %187 = tpu.matmul %185, %186, %cst_50 {dimension_numbers = #tpu.dot_dimension_numbers<[1], [0], [0], [1], [0, 0, 1, 1], [], []>} : vector<128x128xbf16>, vector<128x8xbf16>, vector<128x8xf32> -> vector<128x8xf32>
    %188 = tpu.reciprocal %184 {approx = true} : vector<128x1xf32> -> vector<128x1xf32>
    %189 = vector.broadcast %188 : vector<128x1xf32> to vector<128x8xf32>
    %190 = arith.mulf %187, %189 : vector<128x8xf32>
    %191 = arith.truncf %190 : vector<128x8xf32> to vector<128x8xbf16>
    %c0_51 = arith.constant 0 : index
    %c48 = arith.constant 48 : index
    %192 = vector.load %arg5[%c0_51, %c48] : memref<128x64xbf16, #tpu.memory_space<vmem>>, vector<128x8xbf16>
    tpu.vector_store %arg5[%c0_51, %c48], %191 {strides = array<i32>} : memref<128x64xbf16, #tpu.memory_space<vmem>>, vector<128x8xbf16>,
    %193 = vector.extract_strided_slice %8 {offsets = [0, 7], sizes = [128, 1], strides = [1, 1]} : vector<128x8xf32> to vector<128x1xf32>
    %194 = vector.extract_strided_slice %10 {offsets = [7, 0], sizes = [1, 128], strides = [1, 1]} : vector<8x128xf32> to vector<1x128xf32>
    %195 = vector.broadcast %193 : vector<128x1xf32> to vector<128x128xf32>
    %196 = vector.broadcast %194 : vector<1x128xf32> to vector<128x128xf32>
    %197 = arith.addf %195, %196 : vector<128x128xf32>
    %cst_52 = arith.constant 0.000000e+00 : f32
    %198 = vector.broadcast %cst_52 : f32 to vector<128x128xf32>
    %199 = arith.cmpf ogt, %197, %198 : vector<128x128xf32>
    %cst_53 = arith.constant 2.000000e-01 : f32
    %200 = vector.broadcast %cst_53 : f32 to vector<128x128xf32>
    %201 = arith.mulf %200, %197 : vector<128x128xf32>
    %202 = arith.select %199, %197, %201 : vector<128x128xi1>, vector<128x128xf32>
    %203 = arith.addf %202, %6 : vector<128x128xf32>
    %cst_54 = arith.constant dense<0xFF800000> : vector<128xf32>
    %204 = vector.multi_reduction <maximumf>, %203, %cst_54 [1] : vector<128x128xf32> to vector<128xf32>
    %205 = vector.shape_cast %204 : vector<128xf32> to vector<128x1xf32>
    %206 = vector.broadcast %205 : vector<128x1xf32> to vector<128x128xf32>
    %207 = arith.subf %203, %206 : vector<128x128xf32>
    %208 = math.exp %207 : vector<128x128xf32>
    %cst_55 = arith.constant dense<0.000000e+00> : vector<128xf32>
    %209 = vector.multi_reduction <add>, %208, %cst_55 [1] : vector<128x128xf32> to vector<128xf32>
    %210 = vector.shape_cast %209 : vector<128xf32> to vector<128x1xf32>
    %211 = arith.truncf %208 : vector<128x128xf32> to vector<128x128xbf16>
    %212 = vector.extract_strided_slice %2 {offsets = [0, 56], sizes = [128, 8], strides = [1, 1]} : vector<128x64xbf16> to vector<128x8xbf16>
    %cst_56 = arith.constant dense<0.000000e+00> : vector<128x8xf32>
    %213 = tpu.matmul %211, %212, %cst_56 {dimension_numbers = #tpu.dot_dimension_numbers<[1], [0], [0], [1], [0, 0, 1, 1], [], []>} : vector<128x128xbf16>, vector<128x8xbf16>, vector<128x8xf32> -> vector<128x8xf32>
    %214 = tpu.reciprocal %210 {approx = true} : vector<128x1xf32> -> vector<128x1xf32>
    %215 = vector.broadcast %214 : vector<128x1xf32> to vector<128x8xf32>
    %216 = arith.mulf %213, %215 : vector<128x8xf32>
    %217 = arith.truncf %216 : vector<128x8xf32> to vector<128x8xbf16>
    %c0_57 = arith.constant 0 : index
    %c56 = arith.constant 56 : index
    %218 = vector.load %arg5[%c0_57, %c56] : memref<128x64xbf16, #tpu.memory_space<vmem>>, vector<128x8xbf16>
    tpu.vector_store %arg5[%c0_57, %c56], %217 {strides = array<i32>} : memref<128x64xbf16, #tpu.memory_space<vmem>>, vector<128x8xbf16>,
    return
  }
  func.func @transform_0(%arg0: i32) -> (i32, i32) {
    %c0_i32 = arith.constant 0 : i32
    %c0_i32_0 = arith.constant 0 : i32
    %c0_i32_1 = arith.constant 0 : i32
    return %c0_i32, %c0_i32_0 : i32, i32
  }
  func.func @transform_1(%arg0: i32) -> (i32, i32) {
    %c0_i32 = arith.constant 0 : i32
    %c0_i32_0 = arith.constant 0 : i32
    return %arg0, %c0_i32 : i32, i32
  }
  func.func @transform_2(%arg0: i32) -> (i32, i32) {
    %c0_i32 = arith.constant 0 : i32
    %c0_i32_0 = arith.constant 0 : i32
    %c0_i32_1 = arith.constant 0 : i32
    return %c0_i32, %c0_i32_0 : i32, i32
  }
  func.func @transform_3(%arg0: i32) -> (i32, i32) {
    %c0_i32 = arith.constant 0 : i32
    %c0_i32_0 = arith.constant 0 : i32
    %c0_i32_1 = arith.constant 0 : i32
    return %c0_i32, %c0_i32_0 : i32, i32
  }
  func.func @transform_4(%arg0: i32) -> (i32, i32) {
    %c0_i32 = arith.constant 0 : i32
    %c0_i32_0 = arith.constant 0 : i32
    return %arg0, %c0_i32 : i32, i32
  }
}

module attributes {stable_mosaic.version = 11 : i64} {
  func.func @_proj_kernel(%arg0: i32, %arg1: memref<128x64xbf16, #tpu.memory_space<vmem>>, %arg2: memref<64x8xbf16, #tpu.memory_space<vmem>>, %arg3: memref<128x8xbf16, #tpu.memory_space<vmem>>) attributes {dimension_semantics = [#tpu.dimension_semantics<parallel>], iteration_bounds = array<i64: 1>, scalar_prefetch = 0 : i64, scratch_operands = 0 : i64, tpu.core_type = #tpu.core_type<tc>, window_params = [{transform_indices = @transform_0, window_bounds = array<i64: 128, 64>}, {pipeline_mode = #tpu.pipeline_mode<synchronous>, transform_indices = @transform_1, window_bounds = array<i64: 64, 8>}, {transform_indices = @transform_2, window_bounds = array<i64: 128, 8>}]} {
    %c0 = arith.constant 0 : index
    %c0_0 = arith.constant 0 : index
    %0 = vector.load %arg1[%c0, %c0_0] : memref<128x64xbf16, #tpu.memory_space<vmem>>, vector<128x64xbf16>
    %1 = arith.extf %0 : vector<128x64xbf16> to vector<128x64xf32>
    %cst = arith.constant 0.000000e+00 : f32
    %2 = vector.broadcast %cst : f32 to vector<128x64xf32>
    %3 = arith.cmpf ogt, %1, %2 : vector<128x64xf32>
    %4 = math.exp %1 : vector<128x64xf32>
    %cst_1 = arith.constant 1.000000e+00 : f32
    %5 = vector.broadcast %cst_1 : f32 to vector<128x64xf32>
    %6 = arith.subf %4, %5 : vector<128x64xf32>
    %7 = arith.select %3, %1, %6 : vector<128x64xi1>, vector<128x64xf32>
    %8 = arith.truncf %7 : vector<128x64xf32> to vector<128x64xbf16>
    %c0_2 = arith.constant 0 : index
    %c0_3 = arith.constant 0 : index
    %9 = vector.load %arg2[%c0_2, %c0_3] : memref<64x8xbf16, #tpu.memory_space<vmem>>, vector<64x8xbf16>
    %cst_4 = arith.constant dense<0.000000e+00> : vector<128x8xf32>
    %10 = tpu.matmul %8, %9, %cst_4 {dimension_numbers = #tpu.dot_dimension_numbers<[1], [0], [0], [1], [0, 0, 1, 1], [], []>} : vector<128x64xbf16>, vector<64x8xbf16>, vector<128x8xf32> -> vector<128x8xf32>
    %11 = arith.truncf %10 : vector<128x8xf32> to vector<128x8xbf16>
    %c0_5 = arith.constant 0 : index
    %c0_6 = arith.constant 0 : index
    %12 = vector.load %arg3[%c0_5, %c0_6] : memref<128x8xbf16, #tpu.memory_space<vmem>>, vector<128x8xbf16>
    tpu.vector_store %arg3[%c0_5, %c0_6], %11 {strides = array<i32>} : memref<128x8xbf16, #tpu.memory_space<vmem>>, vector<128x8xbf16>,
    return
  }
  func.func @transform_0(%arg0: i32) -> (i32, i32) {
    %c0_i32 = arith.constant 0 : i32
    %c0_i32_0 = arith.constant 0 : i32
    return %arg0, %c0_i32 : i32, i32
  }
  func.func @transform_1(%arg0: i32) -> (i32, i32) {
    %c0_i32 = arith.constant 0 : i32
    %c0_i32_0 = arith.constant 0 : i32
    %c0_i32_1 = arith.constant 0 : i32
    return %c0_i32, %c0_i32_0 : i32, i32
  }
  func.func @transform_2(%arg0: i32) -> (i32, i32) {
    %c0_i32 = arith.constant 0 : i32
    %c0_i32_0 = arith.constant 0 : i32
    return %arg0, %c0_i32 : i32, i32
  }
}

module attributes {stable_mosaic.version = 11 : i64} {
  func.func @_attn_kernel(%arg0: i32, %arg1: memref<128x8xbf16, #tpu.memory_space<vmem>>, %arg2: memref<128x128xbf16, #tpu.memory_space<vmem>>, %arg3: memref<8x1xbf16, #tpu.memory_space<vmem>>, %arg4: memref<8x1xbf16, #tpu.memory_space<vmem>>, %arg5: memref<128x8xf32, #tpu.memory_space<vmem>>) attributes {dimension_semantics = [#tpu.dimension_semantics<parallel>], iteration_bounds = array<i64: 1>, scalar_prefetch = 0 : i64, scratch_operands = 0 : i64, tpu.core_type = #tpu.core_type<tc>, window_params = [{pipeline_mode = #tpu.pipeline_mode<synchronous>, transform_indices = @transform_0, window_bounds = array<i64: 128, 8>}, {transform_indices = @transform_1, window_bounds = array<i64: 128, 128>}, {pipeline_mode = #tpu.pipeline_mode<synchronous>, transform_indices = @transform_2, window_bounds = array<i64: 8, 1>}, {pipeline_mode = #tpu.pipeline_mode<synchronous>, transform_indices = @transform_3, window_bounds = array<i64: 8, 1>}, {transform_indices = @transform_4, window_bounds = array<i64: 128, 8>}]} {
    %c128_i32 = arith.constant 128 : i32
    %0 = arith.muli %arg0, %c128_i32 : i32
    %1 = tpu.assume_multiple %0, 128 : i32
    %c0 = arith.constant 0 : index
    %c0_0 = arith.constant 0 : index
    %2 = vector.load %arg1[%c0, %c0_0] : memref<128x8xbf16, #tpu.memory_space<vmem>>, vector<128x8xbf16>
    %3 = arith.index_cast %1 : i32 to index
    %c0_1 = arith.constant 0 : index
    %4 = vector.load %arg1[%3, %c0_1] : memref<128x8xbf16, #tpu.memory_space<vmem>>, vector<128x8xbf16>
    %c0_2 = arith.constant 0 : index
    %c0_3 = arith.constant 0 : index
    %5 = vector.load %arg2[%c0_2, %c0_3] : memref<128x128xbf16, #tpu.memory_space<vmem>>, vector<128x128xbf16>
    %6 = arith.extf %5 : vector<128x128xbf16> to vector<128x128xf32>
    %c0_4 = arith.constant 0 : index
    %c0_5 = arith.constant 0 : index
    %7 = vector.load %arg3[%c0_4, %c0_5] : memref<8x1xbf16, #tpu.memory_space<vmem>>, vector<8x1xbf16>
    %cst = arith.constant dense<0.000000e+00> : vector<128x1xf32>
    %8 = tpu.matmul %4, %7, %cst {dimension_numbers = #tpu.dot_dimension_numbers<[1], [0], [0], [1], [0, 0, 1, 1], [], []>} : vector<128x8xbf16>, vector<8x1xbf16>, vector<128x1xf32> -> vector<128x1xf32>
    %c0_6 = arith.constant 0 : index
    %c0_7 = arith.constant 0 : index
    %9 = vector.load %arg4[%c0_6, %c0_7] : memref<8x1xbf16, #tpu.memory_space<vmem>>, vector<8x1xbf16>
    %cst_8 = arith.constant dense<0.000000e+00> : vector<1x128xf32>
    %10 = tpu.matmul %9, %2, %cst_8 {dimension_numbers = #tpu.dot_dimension_numbers<[0], [1], [1], [0], [0, 1, 1, 0], [], []>} : vector<8x1xbf16>, vector<128x8xbf16>, vector<1x128xf32> -> vector<1x128xf32>
    %11 = vector.broadcast %8 : vector<128x1xf32> to vector<128x128xf32>
    %12 = vector.broadcast %10 : vector<1x128xf32> to vector<128x128xf32>
    %13 = arith.addf %11, %12 : vector<128x128xf32>
    %cst_9 = arith.constant 0.000000e+00 : f32
    %14 = vector.broadcast %cst_9 : f32 to vector<128x128xf32>
    %15 = arith.cmpf ogt, %13, %14 : vector<128x128xf32>
    %cst_10 = arith.constant 2.000000e-01 : f32
    %16 = vector.broadcast %cst_10 : f32 to vector<128x128xf32>
    %17 = arith.mulf %16, %13 : vector<128x128xf32>
    %18 = arith.select %15, %13, %17 : vector<128x128xi1>, vector<128x128xf32>
    %19 = arith.addf %18, %6 : vector<128x128xf32>
    %cst_11 = arith.constant dense<0xFF800000> : vector<128xf32>
    %20 = vector.multi_reduction <maximumf>, %19, %cst_11 [1] : vector<128x128xf32> to vector<128xf32>
    %21 = vector.shape_cast %20 : vector<128xf32> to vector<128x1xf32>
    %22 = vector.broadcast %21 : vector<128x1xf32> to vector<128x128xf32>
    %23 = arith.subf %19, %22 : vector<128x128xf32>
    %24 = math.exp %23 : vector<128x128xf32>
    %cst_12 = arith.constant dense<0.000000e+00> : vector<128xf32>
    %25 = vector.multi_reduction <add>, %24, %cst_12 [1] : vector<128x128xf32> to vector<128xf32>
    %26 = vector.shape_cast %25 : vector<128xf32> to vector<128x1xf32>
    %27 = arith.truncf %24 : vector<128x128xf32> to vector<128x128xbf16>
    %cst_13 = arith.constant dense<0.000000e+00> : vector<128x8xf32>
    %28 = tpu.matmul %27, %2, %cst_13 {dimension_numbers = #tpu.dot_dimension_numbers<[1], [0], [0], [1], [0, 0, 1, 1], [], []>} : vector<128x128xbf16>, vector<128x8xbf16>, vector<128x8xf32> -> vector<128x8xf32>
    %29 = tpu.reciprocal %26 {approx = true} : vector<128x1xf32> -> vector<128x1xf32>
    %30 = vector.broadcast %29 : vector<128x1xf32> to vector<128x8xf32>
    %31 = arith.mulf %28, %30 : vector<128x8xf32>
    %c0_14 = arith.constant 0 : index
    %c0_15 = arith.constant 0 : index
    %32 = vector.load %arg5[%c0_14, %c0_15] : memref<128x8xf32, #tpu.memory_space<vmem>>, vector<128x8xf32>
    tpu.vector_store %arg5[%c0_14, %c0_15], %31 {strides = array<i32>} : memref<128x8xf32, #tpu.memory_space<vmem>>, vector<128x8xf32>,
    return
  }
  func.func @transform_0(%arg0: i32) -> (i32, i32) {
    %c0_i32 = arith.constant 0 : i32
    %c0_i32_0 = arith.constant 0 : i32
    %c0_i32_1 = arith.constant 0 : i32
    return %c0_i32, %c0_i32_0 : i32, i32
  }
  func.func @transform_1(%arg0: i32) -> (i32, i32) {
    %c0_i32 = arith.constant 0 : i32
    %c0_i32_0 = arith.constant 0 : i32
    return %arg0, %c0_i32 : i32, i32
  }
  func.func @transform_2(%arg0: i32) -> (i32, i32) {
    %c0_i32 = arith.constant 0 : i32
    %c0_i32_0 = arith.constant 0 : i32
    %c0_i32_1 = arith.constant 0 : i32
    return %c0_i32, %c0_i32_0 : i32, i32
  }
  func.func @transform_3(%arg0: i32) -> (i32, i32) {
    %c0_i32 = arith.constant 0 : i32
    %c0_i32_0 = arith.constant 0 : i32
    %c0_i32_1 = arith.constant 0 : i32
    return %c0_i32, %c0_i32_0 : i32, i32
  }
  func.func @transform_4(%arg0: i32) -> (i32, i32) {
    %c0_i32 = arith.constant 0 : i32
    %c0_i32_0 = arith.constant 0 : i32
    return %arg0, %c0_i32 : i32, i32
  }
}

</mosaic_0001>

<bundles_post_ra>
// kernel: gat_transductive_forward.4
= control target key start
LH: loop header
LB: loop body
LE: loop exit
PB: predicated region body
PF: predicated region fallthrough
CT: control target
= control target key end

     0   :  { %vm68_vm0 = vcmask 523264   ;;  %vm158_vm1 = vcmask 519168   ;;  %s366_s1 = inlined_call_operand.vmem [shape: bf16[64,64], index: 1, kind: input, shape index: {}]   ;;  %s367_s0 = inlined_call_operand.vmem [shape: f32[128,64], index: 0, kind: input, shape index: {}]   ;;  %s368_s2 = inlined_call_operand.vmem [shape: bf16[128,64], index: 2, kind: output, shape index: {}]  }
   0x1   :  { %v206_v0 = vld [vmem:[%s366_s1 + $0x18] sm:$0xff]  ;;  %v205_v1 = vld [vmem:[%s366_s1 + $0x10] sm:$0xff]  ;;  %v204_v2 = vld [vmem:[%s366_s1 + $0x8] sm:$0xff] }
   0x2   :  { %97 = vmatpush.bf16.msra.mxu0 %v206_v0  ;;  %207 = vmatpush.bf16.msra.mxu1 %v206_v0  ;;  %v203_v3 = vld [vmem:[%s366_s1] sm:$0xff]  ;;  %v13_v5 = vld [vmem:[%s367_s0 + $0x8] sm:$0xff]  ;;  %v14_v16 = vld [vmem:[%s367_s0 + $0x10] sm:$0xff] }
   0x3   :  { %208 = vmatpush.bf16.msra.mxu2 %v206_v0  ;;  %209 = vmatpush.bf16.msra.mxu3 %v206_v0  ;;  %v12_v4 = vld [vmem:[%s367_s0] sm:$0xff]  ;;  %v17_v7 = vld [vmem:[%s367_s0 + $0x28] sm:$0xff]  ;;  %v15_v17 = vld [vmem:[%s367_s0 + $0x18] sm:$0xff] }
   0x4   :  { %v16_v6 = vld [vmem:[%s367_s0 + $0x20] sm:$0xff]  ;;  %v21_v9 = vld [vmem:[%s367_s0 + $0x48] sm:$0xff]  ;;  %v28_v12 = vpack.c.bf16 %v13_v5, %v12_v4  ;;  %v18_v18 = vld [vmem:[%s367_s0 + $0x30] sm:$0xff]  ;;  %v29_v24 = vpack.c.bf16 %v15_v17, %v14_v16 }
   0x5   :  { %v20_v8 = vld [vmem:[%s367_s0 + $0x40] sm:$0xff]  ;;  %v25_v11 = vld [vmem:[%s367_s0 + $0x68] sm:$0xff]  ;;  %v30_v13 = vpack.c.bf16 %v17_v7, %v16_v6  ;;  %v19_v19 = vld [vmem:[%s367_s0 + $0x38] sm:$0xff] }
   0x6   :  { %98 = vmatpush.bf16.msra.mxu0 %v205_v1  ;;  %210 = vmatpush.bf16.msra.mxu1 %v205_v1  ;;  %v24_v10 = vld [vmem:[%s367_s0 + $0x60] sm:$0xff]  ;;  %v32_v14 = vpack.c.bf16 %v21_v9, %v20_v8  ;;  %v22_v20 = vld [vmem:[%s367_s0 + $0x50] sm:$0xff]  ;;  %v23_v21 = vld [vmem:[%s367_s0 + $0x58] sm:$0xff]  ;;  %v31_v25 = vpack.c.bf16 %v19_v19, %v18_v18 }
   0x7   :  { %211 = vmatpush.bf16.msra.mxu2 %v205_v1  ;;  %212 = vmatpush.bf16.msra.mxu3 %v205_v1  ;;  %v34_v15 = vpack.c.bf16 %v25_v11, %v24_v10  ;;  %v26_v22 = vld [vmem:[%s367_s0 + $0x70] sm:$0xff]  ;;  %v27_v23 = vld [vmem:[%s367_s0 + $0x78] sm:$0xff]  ;;  %v33_v26 = vpack.c.bf16 %v23_v21, %v22_v20 }
   0x8   :  { %v35_v27 = vpack.c.bf16 %v27_v23, %v26_v22 }
   0xa   :  { %99 = vmatpush.bf16.msra.mxu0 %v204_v2  ;;  %213 = vmatpush.bf16.msra.mxu1 %v204_v2 }
   0xb   :  { %214 = vmatpush.bf16.msra.mxu2 %v204_v2  ;;  %215 = vmatpush.bf16.msra.mxu3 %v204_v2 }
   0xe   :  { %100 = vmatpush.bf16.msra.mxu0 %v203_v3  ;;  %216 = vmatpush.bf16.msra.mxu1 %v203_v3 }
   0xf   :  { %217 = vmatpush.bf16.msra.mxu2 %v203_v3  ;;  %218 = vmatpush.bf16.msra.mxu3 %v203_v3 }
  0x11   :  { %195 = vmatmul.msk.bf16.vlgmr.msra.gmra.mxu0 %vm68_vm0, %v28_v12  ;;  %197 = vmatmul.msk.bf16.vlgmr.msra.gmra.mxu1 %vm68_vm0, %v30_v13 }
  0x12   :  { %199 = vmatmul.msk.bf16.vlgmr.msra.gmra.mxu2 %vm68_vm0, %v32_v14  ;;  %201 = vmatmul.msk.bf16.vlgmr.msra.gmra.mxu3 %vm68_vm0, %v34_v15 }
  0x21   :  { %196 = vmatmul.msk.bf16.gmra.mxu0 %vm68_vm0, %v29_v24  ;;  %198 = vmatmul.msk.bf16.gmra.mxu1 %vm68_vm0, %v31_v25 }
  0x22   :  { %200 = vmatmul.msk.bf16.gmra.mxu2 %vm68_vm0, %v33_v26  ;;  %202 = vmatmul.msk.bf16.gmra.mxu3 %vm68_vm0, %v35_v27 }
  0x8e   :  { %v102_v28 = vpop.f32.mrf.mxu0  ;;  %v112_v29 = vpop.f32.mrf.mxu1 }
  0x8f   :  { %v142_v30 = vpack.c.bf16 %v102_v28, %v102_v28  ;;  %v146_v31 = vpack.c.bf16 %v112_v29, %v112_v29 }
  0x91   :  { %159 = vst.msk [vmem:[%s368_s2] sm:$0xf] %vm158_vm1, %v142_v30 }
  0x92   :  { %163 = vst.msk [vmem:[%s368_s2 + $0x10] sm:$0xf] %vm158_vm1, %v146_v31 }
  0x95   :  { %v122_v32 = vpop.f32.mrf.mxu2  ;;  %v132_v33 = vpop.f32.mrf.mxu3 }
  0x96   :  { %v150_v34 = vpack.c.bf16 %v122_v32, %v122_v32  ;;  %v154_v35 = vpack.c.bf16 %v132_v33, %v132_v33  ;;  %v104_v36 = vpop.f32.mrf.mxu0  ;;  %v114_v37 = vpop.f32.mrf.mxu1 }
  0x97   :  { %v143_v38 = vpack.c.bf16 %v104_v36, %v104_v36  ;;  %v147_v39 = vpack.c.bf16 %v114_v37, %v114_v37 }
  0x98   :  { %167 = vst.msk [vmem:[%s368_s2 + $0x20] sm:$0xf] %vm158_vm1, %v150_v34 }
  0x99   :  { %171 = vst.msk [vmem:[%s368_s2 + $0x30] sm:$0xf] %vm158_vm1, %v154_v35 }
  0x9a   :  { %160 = vst.msk [vmem:[%s368_s2 + $0x4] sm:$0xf] %vm158_vm1, %v143_v38 }
  0x9b   :  { %164 = vst.msk [vmem:[%s368_s2 + $0x14] sm:$0xf] %vm158_vm1, %v147_v39 }
  0x9d   :  { %v124_v40 = vpop.f32.mrf.mxu2  ;;  %v134_v41 = vpop.f32.mrf.mxu3 }
  0x9e   :  { %v151_v42 = vpack.c.bf16 %v124_v40, %v124_v40  ;;  %v155_v43 = vpack.c.bf16 %v134_v41, %v134_v41  ;;  %v107_v44 = vpop.f32.mrf.mxu0  ;;  %v117_v45 = vpop.f32.mrf.mxu1 }
  0x9f   :  { %v144_v46 = vpack.c.bf16 %v107_v44, %v107_v44  ;;  %v148_v47 = vpack.c.bf16 %v117_v45, %v117_v45 }
  0xa0   :  { %168 = vst.msk [vmem:[%s368_s2 + $0x24] sm:$0xf] %vm158_vm1, %v151_v42 }
  0xa1   :  { %172 = vst.msk [vmem:[%s368_s2 + $0x34] sm:$0xf] %vm158_vm1, %v155_v43 }
  0xa2   :  { %161 = vst.msk [vmem:[%s368_s2 + $0x8] sm:$0xf] %vm158_vm1, %v144_v46 }
  0xa3   :  { %165 = vst.msk [vmem:[%s368_s2 + $0x18] sm:$0xf] %vm158_vm1, %v148_v47 }
  0xa5   :  { %v127_v48 = vpop.f32.mrf.mxu2  ;;  %v137_v49 = vpop.f32.mrf.mxu3 }
  0xa6   :  { %v152_v50 = vpack.c.bf16 %v127_v48, %v127_v48  ;;  %v156_v51 = vpack.c.bf16 %v137_v49, %v137_v49  ;;  %v109_v52 = vpop.f32.mrf.mxu0  ;;  %v119_v53 = vpop.f32.mrf.mxu1 }
  0xa7   :  { %v145_v54 = vpack.c.bf16 %v109_v52, %v109_v52  ;;  %v149_v55 = vpack.c.bf16 %v119_v53, %v119_v53 }
  0xa8   :  { %169 = vst.msk [vmem:[%s368_s2 + $0x28] sm:$0xf] %vm158_vm1, %v152_v50 }
  0xa9   :  { %173 = vst.msk [vmem:[%s368_s2 + $0x38] sm:$0xf] %vm158_vm1, %v156_v51 }
  0xaa   :  { %162 = vst.msk [vmem:[%s368_s2 + $0xc] sm:$0xf] %vm158_vm1, %v145_v54 }
  0xab   :  { %166 = vst.msk [vmem:[%s368_s2 + $0x1c] sm:$0xf] %vm158_vm1, %v149_v55 }
  0xad   :  { %v129_v56 = vpop.f32.mrf.mxu2  ;;  %v139_v57 = vpop.f32.mrf.mxu3 }
  0xae   :  { %v153_v58 = vpack.c.bf16 %v129_v56, %v129_v56  ;;  %v157_v59 = vpack.c.bf16 %v139_v57, %v139_v57 }
  0xb0   :  { %170 = vst.msk [vmem:[%s368_s2 + $0x2c] sm:$0xf] %vm158_vm1, %v153_v58 }
  0xb1   :  { %174 = vst.msk [vmem:[%s368_s2 + $0x3c] sm:$0xf] %vm158_vm1, %v157_v59 }

// kernel: gat_transductive_forward.6
= control target key start
LH: loop header
LB: loop body
LE: loop exit
PB: predicated region body
PF: predicated region fallthrough
CT: control target
= control target key end

     0   :  { %vm164_vm2 = vcmask 523264   ;;  %s616_s1 = inlined_call_operand.vmem [shape: bf16[64,8], index: 1, kind: input, shape index: {}]   ;;  %s617_s0 = inlined_call_operand.vmem [shape: bf16[128,64], index: 0, kind: input, shape index: {}]   ;;  %s618_s2 = inlined_call_operand.vmem [shape: bf16[128,8], index: 2, kind: output, shape index: {}]  }
   0x1   :  { %v318_v0 = vld [vmem:[%s616_s1 + $0x18] sm:$0xff]  ;;  %v320_v1 = vld [vmem:[%s617_s0] sm:$0xff]   ;;  %v352_v2 = vld [vmem:[%s617_s0 + $0x10] sm:$0xff]  }
   0x2   :  { %193 = vmatpush.bf16.msra.mxu0 %v318_v0  ;;  %358 = vmatpush.bf16.msra.mxu1 %v318_v0  ;;  %v317_v3 = vld [vmem:[%s616_s1 + $0x10] sm:$0xff]  ;;  %v429_v4 = vunpack.c.l.bf16 %v320_v1  ;;  %v431_v5 = vunpack.c.h.bf16 %v320_v1  ;;  %v433_v6 = vunpack.c.l.bf16 %v352_v2  ;;  %v435_v7 = vunpack.c.h.bf16 %v352_v2  ;;  %v354_v8 = vld [vmem:[%s617_s0 + $0x20] sm:$0xff]   ;;  %v351_v18 = vld [vmem:[%s617_s0 + $0x8] sm:$0xff]  }
   0x3   :  { %v356_v9 = vld [vmem:[%s617_s0 + $0x30] sm:$0xff]   ;;  %359 = vmatpush.bf16.msra.mxu2 %v318_v0  ;;  %360 = vmatpush.bf16.msra.mxu3 %v318_v0  ;;  %v443_v10 = vunpack.c.l.bf16 %v354_v8  ;;  %v445_v11 = vunpack.c.h.bf16 %v354_v8  ;;  %v316_v19 = vld [vmem:[%s616_s1 + $0x8] sm:$0xff]  ;;  %v353_v21 = vld [vmem:[%s617_s0 + $0x18] sm:$0xff]   ;;  %v473_v26 = vunpack.c.l.bf16 %v351_v18  ;;  %v475_v27 = vunpack.c.h.bf16 %v351_v18 }
   0x4   :  { %v60_v12 = vmul.f32 1.442695, %v429_v4  ;;  %v62_v13 = vmul.f32 1.442695, %v431_v5  ;;  %v449_v14 = vunpack.c.l.bf16 %v356_v9  ;;  %v451_v15 = vunpack.c.h.bf16 %v356_v9  ;;  %v355_v23 = vld [vmem:[%s617_s0 + $0x28] sm:$0xff]   ;;  %v315_v30 = vld [vmem:[%s616_s1] sm:$0xff] }
   0x5   :  { %v68_v16 = vmul.f32 1.442695, %v433_v6  ;;  %v70_v17 = vmul.f32 1.442695, %v435_v7  ;;  %v76_v20 = vmul.f32 1.442695, %v443_v10  ;;  %v477_v28 = vunpack.c.l.bf16 %v353_v21 }
   0x6   :  { %194 = vmatpush.bf16.msra.mxu0 %v317_v3  ;;  %361 = vmatpush.bf16.msra.mxu1 %v317_v3  ;;  %370 = vpow2.f32 %v60_v12  ;;  %vm44_vm0 = vcmp.gt.f32.partialorder %v429_v4, 0.0  ;;  %vm45_vm1 = vcmp.gt.f32.partialorder %v431_v5, 0.0  ;;  %v78_v22 = vmul.f32 1.442695, %v445_v11  ;;  %v357_v36 = vld [vmem:[%s617_s0 + $0x38] sm:$0xff]  }
   0x7   :  { %362 = vmatpush.bf16.msra.mxu2 %v317_v3  ;;  %363 = vmatpush.bf16.msra.mxu3 %v317_v3  ;;  %372 = vpow2.f32 %v62_v13  ;;  %v84_v24 = vmul.f32 1.442695, %v449_v14  ;;  %v86_v25 = vmul.f32 1.442695, %v451_v15  ;;  %v479_v29 = vunpack.c.h.bf16 %v353_v21 }
   0x8   :  { %374 = vpow2.f32 %v68_v16  ;;  %vm48_vm3 = vcmp.gt.f32.partialorder %v433_v6, 0.0  ;;  %v64_v31 = vmul.f32 1.442695, %v473_v26  ;;  %v486_v32 = vunpack.c.l.bf16 %v355_v23 }
   0x9   :  { %376 = vpow2.f32 %v70_v17  ;;  %vm49_vm4 = vcmp.gt.f32.partialorder %v435_v7, 0.0  ;;  %vm52_vm5 = vcmp.gt.f32.partialorder %v443_v10, 0.0  ;;  %v66_v33 = vmul.f32 1.442695, %v475_v27 }
   0xa   :  { %195 = vmatpush.bf16.msra.mxu0 %v316_v19  ;;  %364 = vmatpush.bf16.msra.mxu1 %v316_v19  ;;  %378 = vpow2.f32 %v76_v20  ;;  %vm53_vm6 = vcmp.gt.f32.partialorder %v445_v11, 0.0  ;;  %vm56_vm7 = vcmp.gt.f32.partialorder %v449_v14, 0.0  ;;  %v72_v35 = vmul.f32 1.442695, %v477_v28 }
   0xb   :  { %365 = vmatpush.bf16.msra.mxu2 %v316_v19  ;;  %366 = vmatpush.bf16.msra.mxu3 %v316_v19  ;;  %380 = vpow2.f32 %v78_v22  ;;  %v74_v39 = vmul.f32 1.442695, %v479_v29  ;;  %v498_v40 = vunpack.c.h.bf16 %v355_v23  ;;  %vm57_vm8 = vcmp.gt.f32.partialorder %v451_v15, 0.0 }
   0xc   :  { %v371_v34 = vpop.eup %370  ;;  %382 = vpow2.f32 %v84_v24  ;;  %v80_v43 = vmul.f32 1.442695, %v486_v32  ;;  %v505_v47 = vunpack.c.l.bf16 %v357_v36  ;;  %v350_v59 = vunpack.c.h.bf16 %v357_v36 }
   0xd   :  { %v373_v37 = vpop.eup %372  ;;  %v275_v38 = vadd.f32 -1.0, %v371_v34  ;;  %384 = vpow2.f32 %v86_v25  ;;  %v82_v51 = vmul.f32 1.442695, %v498_v40  ;;  %vm46_vm9 = vcmp.gt.f32.partialorder %v473_v26, 0.0 }
   0xe   :  { %v375_v41 = vpop.eup %374  ;;  %196 = vmatpush.bf16.msra.mxu0 %v315_v30  ;;  %367 = vmatpush.bf16.msra.mxu1 %v315_v30  ;;  %v276_v42 = vadd.f32 -1.0, %v373_v37  ;;  %386 = vpow2.f32 %v64_v31  ;;  %v90_v9 = vmul.f32 1.442695, %v350_v59  ;;  %vm47_vm10 = vcmp.gt.f32.partialorder %v475_v27, 0.0 }
   0xf   :  { %v377_v44 = vpop.eup %376  ;;  %368 = vmatpush.bf16.msra.mxu2 %v315_v30  ;;  %369 = vmatpush.bf16.msra.mxu3 %v315_v30  ;;  %v108_v45 = vsel %vm44_vm0, %v429_v4, %v275_v38  ;;  %v279_v46 = vadd.f32 -1.0, %v375_v41  ;;  %388 = vpow2.f32 %v66_v33  ;;  %vm50_vm11 = vcmp.gt.f32.partialorder %v477_v28, 0.0 }
  0x10   :  { %v379_v48 = vpop.eup %378  ;;  %v109_v49 = vsel %vm45_vm1, %v431_v5, %v276_v42  ;;  %v280_v50 = vadd.f32 -1.0, %v377_v44  ;;  %390 = vpow2.f32 %v72_v35  ;;  %vm51_vm12 = vcmp.gt.f32.partialorder %v479_v29, 0.0 }
  0x11   :  { %v381_v52 = vpop.eup %380  ;;  %v124_v53 = vpack.c.bf16 %v109_v49, %v108_v45  ;;  %v112_v54 = vsel %vm48_vm3, %v433_v6, %v279_v46  ;;  %v283_v55 = vadd.f32 -1.0, %v379_v48  ;;  %392 = vpow2.f32 %v74_v39 }
  0x12   :  { %v383_v56 = vpop.eup %382  ;;  %v113_v57 = vsel %vm49_vm4, %v435_v7, %v280_v50  ;;  %v284_v58 = vadd.f32 -1.0, %v381_v52  ;;  %394 = vpow2.f32 %v80_v43  ;;  %v88_v6 = vmul.f32 1.442695, %v505_v47 }
  0x13   :  { %v385_v60 = vpop.eup %384  ;;  %307 = vmatmul.msk.bf16.vlgmr.msra.gmra.mxu0 %vm164_vm2, %v124_v53  ;;  %v126_v61 = vpack.c.bf16 %v113_v57, %v112_v54  ;;  %v116_v62 = vsel %vm52_vm5, %v443_v10, %v283_v55  ;;  %v287_v63 = vadd.f32 -1.0, %v383_v56  ;;  %396 = vpow2.f32 %v82_v51 }
  0x14   :  { %v387_v0 = vpop.eup %386  ;;  %v117_v1 = vsel %vm53_vm6, %v445_v11, %v284_v58  ;;  %v288_v2 = vadd.f32 -1.0, %v385_v60  ;;  %398 = vpow2.f32 %v88_v6  ;;  %vm54_vm13 = vcmp.gt.f32.partialorder %v486_v32, 0.0 }
  0x15   :  { %v389_v3 = vpop.eup %388  ;;  %309 = vmatmul.msk.bf16.vlgmr.msra.gmra.mxu1 %vm164_vm2, %v126_v61  ;;  %v128_v4 = vpack.c.bf16 %v117_v1, %v116_v62  ;;  %v120_v5 = vsel %vm56_vm7, %v449_v14, %v287_v63  ;;  %v277_v13 = vadd.f32 -1.0, %v387_v0  ;;  %400 = vpow2.f32 %v90_v9 }
  0x16   :  { %v391_v7 = vpop.eup %390  ;;  %v121_v8 = vsel %vm57_vm8, %v451_v15, %v288_v2  ;;  %v278_v16 = vadd.f32 -1.0, %v389_v3  ;;  %vm55_vm14 = vcmp.gt.f32.partialorder %v498_v40, 0.0  ;;  %vm58_vm15 = vcmp.gt.f32.partialorder %v505_v47, 0.0 }
  0x17   :  { %v393_v10 = vpop.eup %392  ;;  %311 = vmatmul.msk.bf16.vlgmr.msra.gmra.mxu2 %vm164_vm2, %v128_v4  ;;  %v130_v11 = vpack.c.bf16 %v121_v8, %v120_v5  ;;  %v281_v14 = vadd.f32 -1.0, %v391_v7  ;;  %v110_v15 = vsel %vm46_vm9, %v473_v26, %v277_v13  ;;  %vm59_vm0 = vcmp.gt.f32.partialorder %v350_v59, 0.0 }
  0x18   :  { %v395_v12 = vpop.eup %394  ;;  %v282_v18 = vadd.f32 -1.0, %v393_v10  ;;  %v111_v19 = vsel %vm47_vm10, %v475_v27, %v278_v16  ;;  %vm254_vm1 = vcmask 60416  }
  0x19   :  { %v397_v17 = vpop.eup %396  ;;  %313 = vmatmul.msk.bf16.vlgmr.msra.gmra.mxu3 %vm164_vm2, %v130_v11  ;;  %v285_v20 = vadd.f32 -1.0, %v395_v12  ;;  %v114_v24 = vsel %vm50_vm11, %v477_v28, %v281_v14  ;;  %v125_v31 = vpack.c.bf16 %v111_v19, %v110_v15 }
  0x1a   :  { %v286_v21 = vadd.f32 -1.0, %v397_v17  ;;  %v399_v22 = vpop.eup %398  ;;  %v115_v25 = vsel %vm51_vm12, %v479_v29, %v282_v18 }
  0x1b   :  { %v401_v23 = vpop.eup %400  ;;  %v289_v30 = vadd.f32 -1.0, %v399_v22  ;;  %v118_v27 = vsel %vm54_vm13, %v486_v32, %v285_v20  ;;  %v127_v34 = vpack.c.bf16 %v115_v25, %v114_v24 }
  0x1c   :  { %v290_v26 = vadd.f32 -1.0, %v401_v23  ;;  %v119_v33 = vsel %vm55_vm14, %v498_v40, %v286_v21 }
  0x1d   :  { %v122_v35 = vsel %vm58_vm15, %v505_v47, %v289_v30  ;;  %v129_v37 = vpack.c.bf16 %v119_v33, %v118_v27 }
  0x1e   :  { %v123_v36 = vsel %vm59_vm0, %v350_v59, %v290_v26 }
  0x1f   :  { %v131_v28 = vpack.c.bf16 %v123_v36, %v122_v35 }
  0x23   :  { %308 = vmatmul.msk.bf16.gmra.mxu0 %vm164_vm2, %v125_v31 }
  0x25   :  { %310 = vmatmul.msk.bf16.gmra.mxu1 %vm164_vm2, %v127_v34 }
  0x27   :  { %312 = vmatmul.msk.bf16.gmra.mxu2 %vm164_vm2, %v129_v37 }
  0x29   :  { %314 = vmatmul.msk.bf16.gmra.mxu3 %vm164_vm2, %v131_v28 }
  0x90   :  { %v198_v29 = vpop.f32.mrf.mxu0 }
  0x91   :  { %v238_v38 = vpack.c.bf16 %v198_v29, %v198_v29 }
  0x92   :  { %v208_v32 = vpop.f32.mrf.mxu1 }
  0x93   :  { %255 = vst.msk [vmem:[%s618_s2] sm:$0xf] %vm254_vm1, %v238_v38  ;;  %v242_v39 = vpack.c.bf16 %v208_v32, %v208_v32 }
  0x95   :  { %259 = vst.msk [vmem:[%s618_s2 + $0x10] sm:$0xf] %vm254_vm1, %v242_v39 }
  0x98   :  { %v200_v40 = vpop.f32.mrf.mxu0 }
  0x99   :  { %v239_v41 = vpack.c.bf16 %v200_v40, %v200_v40 }
  0x9a   :  { %v218_v42 = vpop.f32.mrf.mxu2  ;;  %v210_v43 = vpop.f32.mrf.mxu1 }
  0x9b   :  { %v246_v44 = vpack.c.bf16 %v218_v42, %v218_v42  ;;  %256 = vst.msk [vmem:[%s618_s2 + $0x4] sm:$0xf] %vm254_vm1, %v239_v41  ;;  %v243_v45 = vpack.c.bf16 %v210_v43, %v210_v43 }
  0x9c   :  { %v228_v46 = vpop.f32.mrf.mxu3 }
  0x9d   :  { %263 = vst.msk [vmem:[%s618_s2 + $0x20] sm:$0xf] %vm254_vm1, %v246_v44  ;;  %v250_v47 = vpack.c.bf16 %v228_v46, %v228_v46 }
  0x9e   :  { %260 = vst.msk [vmem:[%s618_s2 + $0x14] sm:$0xf] %vm254_vm1, %v243_v45 }
  0x9f   :  { %267 = vst.msk [vmem:[%s618_s2 + $0x30] sm:$0xf] %vm254_vm1, %v250_v47 }
  0xa0   :  { %v203_v48 = vpop.f32.mrf.mxu0 }
  0xa1   :  { %v240_v49 = vpack.c.bf16 %v203_v48, %v203_v48 }
  0xa2   :  { %v220_v50 = vpop.f32.mrf.mxu2  ;;  %v213_v51 = vpop.f32.mrf.mxu1 }
  0xa3   :  { %v247_v52 = vpack.c.bf16 %v220_v50, %v220_v50  ;;  %257 = vst.msk [vmem:[%s618_s2 + $0x8] sm:$0xf] %vm254_vm1, %v240_v49  ;;  %v244_v53 = vpack.c.bf16 %v213_v51, %v213_v51 }
  0xa4   :  { %v230_v54 = vpop.f32.mrf.mxu3 }
  0xa5   :  { %264 = vst.msk [vmem:[%s618_s2 + $0x24] sm:$0xf] %vm254_vm1, %v247_v52  ;;  %v251_v55 = vpack.c.bf16 %v230_v54, %v230_v54 }
  0xa6   :  { %261 = vst.msk [vmem:[%s618_s2 + $0x18] sm:$0xf] %vm254_vm1, %v244_v53 }
  0xa7   :  { %268 = vst.msk [vmem:[%s618_s2 + $0x34] sm:$0xf] %vm254_vm1, %v251_v55 }
  0xa8   :  { %v205_v56 = vpop.f32.mrf.mxu0 }
  0xa9   :  { %v241_v57 = vpack.c.bf16 %v205_v56, %v205_v56 }
  0xaa   :  { %v223_v58 = vpop.f32.mrf.mxu2  ;;  %v215_v59 = vpop.f32.mrf.mxu1 }
  0xab   :  { %v248_v60 = vpack.c.bf16 %v223_v58, %v223_v58  ;;  %258 = vst.msk [vmem:[%s618_s2 + $0xc] sm:$0xf] %vm254_vm1, %v241_v57  ;;  %v245_v61 = vpack.c.bf16 %v215_v59, %v215_v59 }
  0xac   :  { %v233_v62 = vpop.f32.mrf.mxu3 }
  0xad   :  { %265 = vst.msk [vmem:[%s618_s2 + $0x28] sm:$0xf] %vm254_vm1, %v248_v60  ;;  %v252_v63 = vpack.c.bf16 %v233_v62, %v233_v62 }
  0xae   :  { %262 = vst.msk [vmem:[%s618_s2 + $0x1c] sm:$0xf] %vm254_vm1, %v245_v61 }
  0xaf   :  { %269 = vst.msk [vmem:[%s618_s2 + $0x38] sm:$0xf] %vm254_vm1, %v252_v63 }
  0xb2   :  { %v225_v0 = vpop.f32.mrf.mxu2 }
  0xb3   :  { %v249_v1 = vpack.c.bf16 %v225_v0, %v225_v0 }
  0xb4   :  { %v235_v2 = vpop.f32.mrf.mxu3 }
  0xb5   :  { %266 = vst.msk [vmem:[%s618_s2 + $0x2c] sm:$0xf] %vm254_vm1, %v249_v1  ;;  %v253_v3 = vpack.c.bf16 %v235_v2, %v235_v2 }
  0xb7   :  { %270 = vst.msk [vmem:[%s618_s2 + $0x3c] sm:$0xf] %vm254_vm1, %v253_v3 }

// kernel: gat_transductive_forward.7
= control target key start
LH: loop header
LB: loop body
LE: loop exit
PB: predicated region body
PF: predicated region fallthrough
CT: control target
= control target key end

     0   :  { %vm153_vm0 = vcmask 1043456   ;;  %vm128_vm1 = vcmask 64512   ;;  %v899_v24 = vmov 0   ;;  %s1173_s3 = inlined_call_operand.vmem [shape: bf16[8,1], index: 3, kind: input, shape index: {}]   ;;  %s1174_s2 = inlined_call_operand.vmem [shape: bf16[8,1], index: 2, kind: input, shape index: {}]   ;;  %s1175_s0 = inlined_call_operand.vmem [shape: bf16[128,8], index: 0, kind: input, shape index: {}]   ;;  %s1176_s1 = inlined_call_operand.vmem [shape: bf16[128,128], index: 1, kind: input, shape index: {}]   ;;  %s1177_s4 = inlined_call_operand.vmem [shape: f32[128,8], index: 4, kind: output, shape index: {}]  }
   0x1   :  { %v206_v0 = vld [vmem:[%s1173_s3] sm:$0xf]  ;;  %v777_v4 = vld [vmem:[%s1175_s0 + $0x8] sm:$0xff]  ;;  %v778_v5 = vld [vmem:[%s1175_s0 + $0x10] sm:$0xff]  ;;  %833 = vset.pattern.permute.xlu1 %v899_v24  ;;  %834 = vset.pattern.permute.xlu2 %v899_v24 }
   0x2   :  { %v87_v1 = vld [vmem:[%s1174_s2] sm:$0xf]  ;;  %207 = vxpose.xlu0.c.b16.start.end [1/1] (short) (narrow) %v206_v0, 16  ;;  %v779_v6 = vld [vmem:[%s1175_s0 + $0x18] sm:$0xff]  ;;  %v781_v10 = vld [vmem:[%s1175_s0 + $0x28] sm:$0xff] }
   0x3   :  { %v155_v2 = vsel %vm153_vm0, %v87_v1, 0  ;;  %v776_v3 = vld [vmem:[%s1175_s0] sm:$0xff]  ;;  %v775_v8 = vld [vmem:[%s1175_s0 + $0x38] sm:$0xff]  ;;  %v774_v11 = vld [vmem:[%s1175_s0 + $0x30] sm:$0xff] }
   0x4   :  { %164 = vmatpush.bf16.msra.mxu0 %v155_v2  ;;  %v780_v7 = vld [vmem:[%s1175_s0 + $0x20] sm:$0xff]  ;;  %v288_v9 = vsel %vm128_vm1, %v775_v8, 0  ;;  %592 = vmatpush.bf16.msra.mxu2 %v775_v8  ;;  %v285_v12 = vsel %vm128_vm1, %v774_v11, 0  ;;  %v773_v13 = vld [vmem:[%s1175_s0 + $0x28] sm:$0xff]  ;;  %v782_v15 = vld [vmem:[%s1175_s0 + $0x30] sm:$0xff] }
   0x5   :  { %823 = vmatpush.bf16.msra.mxu3 %v775_v8  ;;  %290 = vmatpush.bf16.xpose.msra.mxu1 %v288_v9  ;;  %v282_v14 = vsel %vm128_vm1, %v773_v13, 0  ;;  %v772_v16 = vld [vmem:[%s1175_s0 + $0x20] sm:$0xff]  ;;  %v771_v18 = vld [vmem:[%s1175_s0 + $0x18] sm:$0xff]  ;;  %v770_v21 = vld [vmem:[%s1175_s0 + $0x10] sm:$0xff] }
   0x6   :  { %v279_v17 = vsel %vm128_vm1, %v772_v16, 0  ;;  %v276_v19 = vsel %vm128_vm1, %v771_v18, 0  ;;  %v783_v20 = vld [vmem:[%s1175_s0 + $0x38] sm:$0xff]  ;;  %v273_v22 = vsel %vm128_vm1, %v770_v21, 0  ;;  %v769_v23 = vld [vmem:[%s1175_s0 + $0x8] sm:$0xff]  ;;  %v768_v27 = vld [vmem:[%s1175_s0] sm:$0xff] }
   0x7   :  { %727 = vmatmul.msk.bf16.vlgmr.msra.gmra.mxu0 %vm128_vm1, %v776_v3  ;;  %v270_v25 = vsel %vm128_vm1, %v769_v23, 0  ;;  %v267_v28 = vsel %vm128_vm1, %v768_v27, 0  ;;  %v817_v50 = vld [vmem:[%s1176_s1 + $0x10] sm:$0xff]   ;;  %v785_v51 = vld [vmem:[%s1176_s1] sm:$0xff]   ;;  %v816_v9 = vld [vmem:[%s1176_s1 + $0x8] sm:$0xff]  }
   0x8   :  { %593 = vmatpush.bf16.msra.mxu2 %v774_v11  ;;  %v794_v56 = vunpack.c.l.bf16 %v817_v50  ;;  %v787_v58 = vunpack.c.h.bf16 %v785_v51  ;;  %v786_v59 = vunpack.c.l.bf16 %v785_v51 }
   0x9   :  { %824 = vmatpush.bf16.msra.mxu3 %v774_v11 }
   0xc   :  { %594 = vmatpush.bf16.msra.mxu2 %v773_v13 }
   0xd   :  { %291 = vmatpush.bf16.xpose.msra.mxu1 %v285_v12  ;;  %825 = vmatpush.bf16.msra.mxu3 %v773_v13  ;;  %v790_v12 = vunpack.c.l.bf16 %v816_v9 }
  0x10   :  { %595 = vmatpush.bf16.msra.mxu2 %v772_v16 }
  0x11   :  { %826 = vmatpush.bf16.msra.mxu3 %v772_v16 }
  0x14   :  { %596 = vmatpush.bf16.msra.mxu2 %v771_v18 }
  0x15   :  { %292 = vmatpush.bf16.xpose.msra.mxu1 %v282_v14  ;;  %827 = vmatpush.bf16.msra.mxu3 %v771_v18 }
  0x17   :  { %728 = vmatmul.msk.bf16.gmra.mxu0 %vm128_vm1, %v777_v4 }
  0x18   :  { %597 = vmatpush.bf16.msra.mxu2 %v770_v21 }
  0x19   :  { %828 = vmatpush.bf16.msra.mxu3 %v770_v21 }
  0x1c   :  { %598 = vmatpush.bf16.msra.mxu2 %v769_v23 }
  0x1d   :  { %293 = vmatpush.bf16.xpose.msra.mxu1 %v279_v17  ;;  %829 = vmatpush.bf16.msra.mxu3 %v769_v23  ;;  %v795_v23 = vunpack.c.h.bf16 %v817_v50 }
  0x20   :  { %599 = vmatpush.bf16.msra.mxu2 %v768_v27 }
  0x21   :  { %830 = vmatpush.bf16.msra.mxu3 %v768_v27 }
  0x25   :  { %294 = vmatpush.bf16.xpose.msra.mxu1 %v276_v19 }
  0x27   :  { %729 = vmatmul.msk.bf16.gmra.mxu0 %vm128_vm1, %v778_v5 }
  0x2d   :  { %295 = vmatpush.bf16.xpose.msra.mxu1 %v273_v22 }
  0x35   :  { %296 = vmatpush.bf16.xpose.msra.mxu1 %v270_v25 }
  0x37   :  { %730 = vmatmul.msk.bf16.gmra.mxu0 %vm128_vm1, %v779_v6 }
  0x3d   :  { %297 = vmatpush.bf16.xpose.msra.mxu1 %v267_v28 }
  0x47   :  { %731 = vmatmul.msk.bf16.gmra.mxu0 %vm128_vm1, %v780_v7 }
  0x57   :  { %732 = vmatmul.msk.bf16.gmra.mxu0 %vm128_vm1, %v781_v10 }
  0x67   :  { %733 = vmatmul.msk.bf16.gmra.mxu0 %vm128_vm1, %v782_v15  ;;  %v791_v15 = vunpack.c.h.bf16 %v816_v9 }
  0x69   :  { %832 = vset.pattern.permute.xlu0 %v899_v24 }
  0x77   :  { %734 = vmatmul.msk.bf16.gmra.mxu0 %vm128_vm1, %v783_v20 }
  0x84   :  { %v166_v26 = vpop.f32.mrf.mxu0 }
  0x85   :  { %305 = vperm.xlu0 %832, %v166_v26  }
  0x8c   :  { %v168_v29 = vpop.f32.mrf.mxu0 }
  0x8d   :  { %310 = vperm.xlu1 %833, %v168_v29  }
  0x94   :  { %v171_v30 = vpop.f32.mrf.mxu0 }
  0x95   :  { %315 = vperm.xlu1 %833, %v171_v30  }
  0x9c   :  { %v173_v31 = vpop.f32.mrf.mxu0 }
  0x9d   :  { %320 = vperm.xlu2 %834, %v173_v31  }
  0xa4   :  { %v176_v32 = vpop.f32.mrf.mxu0 }
  0xa5   :  { %325 = vperm.xlu2 %834, %v176_v32   ;;  %v821_v32 = vld [vmem:[%s1176_s1 + $0x30] sm:$0xff]  }
  0xac   :  { %v178_v33 = vpop.f32.mrf.mxu0 }
  0xad   :  { %330 = vperm.xlu1 %833, %v178_v33   ;;  %v820_v33 = vld [vmem:[%s1176_s1 + $0x28] sm:$0xff]  }
  0xae   :  { %v215_v34 = vpop.trf.xlu0 }
  0xaf   :  { %767 = vmatmul.msk.bf16.vlgmr.msra.gmra.mxu1 %vm128_vm1, %v215_v34  ;;  %v811_v34 = vunpack.c.h.bf16 %v821_v32 }
  0xb4   :  { %v181_v35 = vpop.f32.mrf.mxu0 }
  0xb5   :  { %335 = vperm.xlu2 %834, %v181_v35  }
  0xbc   :  { %v183_v36 = vpop.f32.mrf.mxu0 }
  0xbd   :  { %340 = vperm.xlu1 %833, %v183_v36  }
  0xc4   :  { %v186_v37 = vpop.f32.mrf.mxu0 }
  0xc5   :  { %345 = vperm.xlu0 %832, %v186_v37   ;;  %v806_v37 = vunpack.c.l.bf16 %v820_v33 }
  0xcc   :  { %v188_v38 = vpop.f32.mrf.mxu0 }
  0xcd   :  { %350 = vperm.xlu0 %832, %v188_v38  }
  0xd4   :  { %v191_v39 = vpop.f32.mrf.mxu0 }
  0xd5   :  { %355 = vperm.xlu2 %834, %v191_v39  }
  0xdc   :  { %v193_v40 = vpop.f32.mrf.mxu0 }
  0xdd   :  { %360 = vperm.xlu1 %833, %v193_v40  }
  0xe4   :  { %v196_v41 = vpop.f32.mrf.mxu0 }
  0xe5   :  { %365 = vperm.xlu2 %834, %v196_v41  }
  0xec   :  { %v198_v42 = vpop.f32.mrf.mxu0 }
  0xed   :  { %370 = vperm.xlu2 %834, %v198_v42  }
  0xf4   :  { %v201_v43 = vpop.f32.mrf.mxu0 }
  0xf5   :  { %375 = vperm.xlu0 %832, %v201_v43  }
  0xf7   :  { %v321_v44 = vpop.permute.xlu2 %320  ;;  %v306_v52 = vpop.permute.xlu0 %305 }
  0xff   :  { %v326_v45 = vpop.permute.xlu2 %325  ;;  %v311_v46 = vpop.permute.xlu1 %310 }
 0x107   :  { %v316_v55 = vpop.permute.xlu1 %315 }
 0x10f   :  { %v996_v47 = vpop.permute.xlu2 %335 }
 0x11f   :  { %v331_v13 = vpop.permute.xlu1 %330 }
 0x12c   :  { %v299_v48 = vpop.f32.mrf.mxu1 }
 0x12d   :  { %v998_v49 = vperm.slane %v299_v48, 0  ;;  %v807_v48 = vunpack.c.h.bf16 %v820_v33 }
 0x12f   :  { %v388_v53 = vadd.f32 %v998_v49, %v326_v45  ;;  %v385_v54 = vadd.f32 %v998_v49, %v311_v46  ;;  %v384_v57 = vadd.f32 %v998_v49, %v306_v52  ;;  %v386_v62 = vadd.f32 %v998_v49, %v316_v55  ;;  %v356_v7 = vpop.permute.xlu2 %355  ;;  %v341_v26 = vpop.permute.xlu1 %340  ;;  %v819_v45 = vld [vmem:[%s1176_s1 + $0x20] sm:$0xff]  }
 0x130   :  { %v387_v0 = vadd.f32 %v998_v49, %v321_v44  ;;  %v389_v17 = vadd.f32 %v998_v49, %v331_v13  ;;  %v394_v24 = vadd.f32 %v998_v49, %v356_v7  ;;  %v803_v46 = vunpack.c.h.bf16 %v819_v45 }
 0x131   :  { %vm404_vm2 = vcmp.gt.f32.partialorder %v388_v53, 0.0  ;;  %vm401_vm3 = vcmp.gt.f32.partialorder %v385_v54, 0.0  ;;  %v420_v60 = vmul.f32 0.2, %v388_v53  ;;  %v417_v61 = vmul.f32 0.2, %v385_v54 }
 0x132   :  { %vm400_vm4 = vcmp.gt.f32.partialorder %v384_v57, 0.0  ;;  %v416_v63 = vmul.f32 0.2, %v384_v57  ;;  %v418_v10 = vmul.f32 0.2, %v386_v62  ;;  %vm402_vm5 = vcmp.gt.f32.partialorder %v386_v62, 0.0 }
 0x133   :  { %v436_v2 = vsel %vm404_vm2, %v388_v53, %v420_v60  ;;  %v433_v3 = vsel %vm401_vm3, %v385_v54, %v417_v61  ;;  %v419_v11 = vmul.f32 0.2, %v387_v0  ;;  %vm403_vm6 = vcmp.gt.f32.partialorder %v387_v0, 0.0 }
 0x134   :  { %v301_v1 = vpop.f32.mrf.mxu1  ;;  %v1011_v4 = vadd.f32 %v794_v56, %v436_v2  ;;  %v1013_v5 = vadd.f32 %v787_v58, %v433_v3  ;;  %v432_v6 = vsel %vm400_vm4, %v384_v57, %v416_v63  ;;  %v434_v14 = vsel %vm402_vm5, %v386_v62, %v418_v10  ;;  %v203_v57 = vpop.f32.mrf.mxu0  ;;  %v818_v58 = vld [vmem:[%s1176_s1 + $0x18] sm:$0xff]  }
 0x135   :  { %v1015_v8 = vadd.f32 %v786_v59, %v432_v6  ;;  %v435_v16 = vsel %vm403_vm6, %v387_v0, %v419_v11  ;;  %v1024_v19 = vadd.f32 %v790_v12, %v434_v14  ;;  %v421_v22 = vmul.f32 0.2, %v389_v17  ;;  %v1076_v14 = vld [vmem:[%s1176_s1 + $0x38] sm:$0xff]  }
 0x136   :  { %472 = vmax.xlane.f32.xlu0 %v1011_v4  ;;  %466 = vmax.xlane.f32.xlu1 %v1013_v5  ;;  %v1026_v21 = vadd.f32 %v791_v15, %v435_v16  ;;  %vm405_vm7 = vcmp.gt.f32.partialorder %v389_v17, 0.0  ;;  %v426_v30 = vmul.f32 0.2, %v394_v24  ;;  %vm410_vm8 = vcmp.gt.f32.partialorder %v394_v24, 0.0 }
 0x137   :  { %464 = vmax.xlane.f32.xlu2 %v1015_v8  ;;  %v346_v18 = vpop.permute.xlu0 %345  ;;  %v437_v25 = vsel %vm405_vm7, %v389_v17, %v421_v22  ;;  %v391_v52 = vadd.f32 %v998_v49, %v341_v26  ;;  %v799_v59 = vunpack.c.h.bf16 %v818_v58  ;;  %v810_v0 = vunpack.c.l.bf16 %v821_v32 }
 0x138   :  { %v1031_v29 = vadd.f32 %v795_v23, %v437_v25  ;;  %v442_v39 = vsel %vm410_vm8, %v394_v24, %v426_v30  ;;  %v392_v1 = vadd.f32 %v998_v49, %v346_v18  ;;  %v802_v9 = vunpack.c.l.bf16 %v819_v45 }
 0x139   :  { %v1045_v43 = vadd.f32 %v806_v37, %v442_v39  ;;  %v423_v56 = vmul.f32 0.2, %v391_v52  ;;  %vm407_vm12 = vcmp.gt.f32.partialorder %v391_v52, 0.0  ;;  %v814_v15 = vunpack.c.l.bf16 %v1076_v14 }
 0x13a   :  { %v424_v6 = vmul.f32 0.2, %v392_v1  ;;  %vm408_vm14 = vcmp.gt.f32.partialorder %v392_v1, 0.0  ;;  %v390_v17 = vadd.f32 %v998_v49, %v996_v47  ;;  %v798_v22 = vunpack.c.l.bf16 %v818_v58 }
 0x13b   :  { %v439_v61 = vsel %vm407_vm12, %v391_v52, %v423_v56 }
 0x13c   :  { %v1063_v62 = vadd.f32 %v799_v59, %v439_v61  ;;  %v440_v11 = vsel %vm408_vm14, %v392_v1, %v424_v6  ;;  %vm406_vm0 = vcmp.gt.f32.partialorder %v390_v17, 0.0 }
 0x13d   :  { %v1071_v12 = vadd.f32 %v802_v9, %v440_v11 }
 0x13e   :  { %468 = vmax.xlane.f32.xlu1 %v1024_v19 }
 0x13f   :  { %v366_v20 = vpop.permute.xlu2 %365  ;;  %470 = vmax.xlane.f32.xlu2 %v1026_v21  ;;  %v351_v27 = vpop.permute.xlu0 %350 }
 0x140   :  { %v393_v35 = vadd.f32 %v998_v49, %v351_v27  ;;  %v396_v60 = vadd.f32 %v998_v49, %v366_v20  ;;  %v422_v20 = vmul.f32 0.2, %v390_v17 }
 0x142   :  { %v425_v41 = vmul.f32 0.2, %v393_v35  ;;  %vm409_vm10 = vcmp.gt.f32.partialorder %v393_v35, 0.0  ;;  %v428_v63 = vmul.f32 0.2, %v396_v60  ;;  %vm412_vm13 = vcmp.gt.f32.partialorder %v396_v60, 0.0 }
 0x143   :  { %v438_v23 = vsel %vm406_vm0, %v390_v17, %v422_v20 }
 0x144   :  { %v441_v51 = vsel %vm409_vm10, %v393_v35, %v425_v41  ;;  %v444_v2 = vsel %vm412_vm13, %v396_v60, %v428_v63  ;;  %v1085_v24 = vadd.f32 %v798_v22, %v438_v23 }
 0x145   :  { %v1053_v54 = vadd.f32 %v803_v46, %v441_v51  ;;  %v1067_v3 = vadd.f32 %v810_v0, %v444_v2 }
 0x147   :  { %v371_v28 = vpop.permute.xlu2 %370  ;;  %474 = vmax.xlane.f32.xlu2 %v1031_v29 }
 0x148   :  { %v397_v31 = vadd.f32 %v998_v49, %v371_v28 }
 0x14a   :  { %v429_v36 = vmul.f32 0.2, %v397_v31  ;;  %vm413_vm9 = vcmp.gt.f32.partialorder %v397_v31, 0.0 }
 0x14c   :  { %v445_v38 = vsel %vm413_vm9, %v397_v31, %v429_v36 }
 0x14d   :  { %v1042_v40 = vadd.f32 %v811_v34, %v445_v38 }
 0x14f   :  { %v361_v42 = vpop.permute.xlu1 %360  ;;  %490 = vmax.xlane.f32.xlu0 %v1042_v40  ;;  %484 = vmax.xlane.f32.xlu2 %v1045_v43 }
 0x150   :  { %v395_v44 = vadd.f32 %v998_v49, %v361_v42 }
 0x152   :  { %v427_v50 = vmul.f32 0.2, %v395_v44  ;;  %vm411_vm11 = vcmp.gt.f32.partialorder %v395_v44, 0.0 }
 0x154   :  { %v443_v53 = vsel %vm411_vm11, %v395_v44, %v427_v50 }
 0x155   :  { %v1055_v55 = vadd.f32 %v807_v48, %v443_v53 }
 0x157   :  { %482 = vmax.xlane.f32.xlu0 %v1053_v54  ;;  %486 = vmax.xlane.f32.xlu2 %v1055_v55 }
 0x158   :  { %380 = vperm.xlu1 %833, %v203_v57   ;;  %v815_v57 = vunpack.c.h.bf16 %v1076_v14 }
 0x15f   :  { %478 = vmax.xlane.f32.xlu2 %v1063_v62 }
 0x167   :  { %v376_v7 = vpop.permute.xlu0 %375  ;;  %488 = vmax.xlane.f32.xlu2 %v1067_v3 }
 0x168   :  { %v398_v10 = vadd.f32 %v998_v49, %v376_v7 }
 0x16a   :  { %v430_v13 = vmul.f32 0.2, %v398_v10  ;;  %vm414_vm15 = vcmp.gt.f32.partialorder %v398_v10, 0.0 }
 0x16c   :  { %v446_v16 = vsel %vm414_vm15, %v398_v10, %v430_v13 }
 0x16d   :  { %v1082_v18 = vadd.f32 %v814_v15, %v446_v16 }
 0x16f   :  { %480 = vmax.xlane.f32.xlu2 %v1071_v12 }
 0x177   :  { %492 = vmax.xlane.f32.xlu2 %v1082_v18 }
 0x182   :  { %476 = vmax.xlane.f32.xlu1 %v1085_v24 }
 0x1a9   :  { %v467_v25 = vpop.xlane.xlu1 %466  ;;  %v473_v45 = vpop.xlane.xlu0 %472 }
 0x1aa   :  { %v497_v26 = vsub.f32 %v1013_v5, %v467_v25  ;;  %v465_v27 = vpop.xlane.xlu2 %464  ;;  %v500_v50 = vsub.f32 %v1011_v4, %v473_v45 }
 0x1ab   :  { %v496_v28 = vsub.f32 %v1015_v8, %v465_v27 }
 0x1ac   :  { %v514_v30 = vmul.f32 1.442695, %v497_v26  ;;  %v520_v58 = vmul.f32 1.442695, %v500_v50 }
 0x1ad   :  { %v512_v47 = vmul.f32 1.442695, %v496_v28 }
 0x1ae   :  { %835 = vpow2.f32 %v514_v30 }
 0x1af   :  { %837 = vpow2.f32 %v512_v47 }
 0x1b1   :  { %v469_v31 = vpop.xlane.xlu1 %468 }
 0x1b2   :  { %v498_v32 = vsub.f32 %v1024_v19, %v469_v31  ;;  %v471_v33 = vpop.xlane.xlu2 %470 }
 0x1b3   :  { %v499_v34 = vsub.f32 %v1026_v21, %v471_v33 }
 0x1b4   :  { %v516_v35 = vmul.f32 1.442695, %v498_v32  ;;  %v836_v36 = vpop.eup %835 }
 0x1b5   :  { %v518_v37 = vmul.f32 1.442695, %v499_v34  ;;  %v838_v38 = vpop.eup %837 }
 0x1b6   :  { %839 = vpow2.f32 %v516_v35  ;;  %544 = vadd.xlane.f32.xlu2 %v838_v38  ;;  %v576_v5 = vpack.c.bf16 %v836_v36, %v838_v38 }
 0x1b7   :  { %841 = vpow2.f32 %v518_v37 }
 0x1b8   :  { %600 = vmatmul.bf16.vlgmr.msra.gmra.mxu2 %v576_v5 }
 0x1ba   :  { %v475_v8 = vpop.xlane.xlu2 %474 }
 0x1bb   :  { %v501_v39 = vsub.f32 %v1031_v29, %v475_v8 }
 0x1bc   :  { %v840_v41 = vpop.eup %839 }
 0x1bd   :  { %v842_v42 = vpop.eup %841  ;;  %v522_v44 = vmul.f32 1.442695, %v501_v39  ;;  %548 = vadd.xlane.f32.xlu1 %v840_v41 }
 0x1be   :  { %550 = vadd.xlane.f32.xlu2 %v842_v42  ;;  %v577_v48 = vpack.c.bf16 %v842_v42, %v840_v41 }
 0x1bf   :  { %843 = vpow2.f32 %v522_v44 }
 0x1c2   :  { %v485_v19 = vpop.xlane.xlu2 %484  ;;  %v491_v63 = vpop.xlane.xlu0 %490 }
 0x1c3   :  { %v506_v46 = vsub.f32 %v1045_v43, %v485_v19 }
 0x1c5   :  { %v844_v21 = vpop.eup %843  ;;  %v532_v52 = vmul.f32 1.442695, %v506_v46 }
 0x1c6   :  { %554 = vadd.xlane.f32.xlu1 %v844_v21 }
 0x1c7   :  { %845 = vpow2.f32 %v532_v52 }
 0x1c8   :  { %605 = vmatmul.bf16.gmra.mxu2 %v577_v48 }
 0x1ca   :  { %v381_v51 = vpop.permute.xlu1 %380  ;;  %v487_v53 = vpop.xlane.xlu2 %486 }
 0x1cb   :  { %v399_v29 = vadd.f32 %v998_v49, %v381_v51  ;;  %v507_v56 = vsub.f32 %v1055_v55, %v487_v53  ;;  %v509_v55 = vsub.f32 %v1042_v40, %v491_v63  ;;  %v483_v30 = vpop.xlane.xlu0 %482 }
 0x1cc   :  { %v505_v47 = vsub.f32 %v1053_v54, %v483_v30 }
 0x1cd   :  { %v431_v59 = vmul.f32 0.2, %v399_v29  ;;  %vm415_vm2 = vcmp.gt.f32.partialorder %v399_v29, 0.0  ;;  %v534_v60 = vmul.f32 1.442695, %v507_v56  ;;  %v846_v49 = vpop.eup %845 }
 0x1ce   :  { %v538_v7 = vmul.f32 1.442695, %v509_v55  ;;  %v530_v32 = vmul.f32 1.442695, %v505_v47 }
 0x1cf   :  { %v447_v43 = vsel %vm415_vm2, %v399_v29, %v431_v59  ;;  %847 = vpow2.f32 %v534_v60 }
 0x1d0   :  { %v1098_v61 = vadd.f32 %v815_v57, %v447_v43  ;;  %849 = vpow2.f32 %v520_v58 }
 0x1d1   :  { %851 = vpow2.f32 %v538_v7 }
 0x1d2   :  { %494 = vmax.xlane.f32.xlu0 %v1098_v61  ;;  %v479_v4 = vpop.xlane.xlu2 %478 }
 0x1d3   :  { %v503_v9 = vsub.f32 %v1063_v62, %v479_v4 }
 0x1d5   :  { %v848_v0 = vpop.eup %847  ;;  %v526_v14 = vmul.f32 1.442695, %v503_v9 }
 0x1d6   :  { %v850_v1 = vpop.eup %849  ;;  %v581_v2 = vpack.c.bf16 %v848_v0, %v846_v49 }
 0x1d7   :  { %v578_v6 = vpack.c.bf16 %v844_v21, %v850_v1  ;;  %v852_v16 = vpop.eup %851 }
 0x1d8   :  { %625 = vmatmul.bf16.vlgmr.msra.gmra.mxu3 %v581_v2 }
 0x1d9   :  { %610 = vmatmul.bf16.gmra.mxu2 %v578_v6 }
 0x1da   :  { %546 = vadd.xlane.f32.xlu0 %v836_v36  ;;  %v489_v10 = vpop.xlane.xlu2 %488 }
 0x1db   :  { %v508_v11 = vsub.f32 %v1067_v3, %v489_v10 }
 0x1dd   :  { %v536_v13 = vmul.f32 1.442695, %v508_v11 }
 0x1df   :  { %853 = vpow2.f32 %v536_v13 }
 0x1e0   :  { %855 = vpow2.f32 %v526_v14 }
 0x1e2   :  { %552 = vadd.xlane.f32.xlu0 %v850_v1  ;;  %v481_v15 = vpop.xlane.xlu2 %480 }
 0x1e3   :  { %v504_v40 = vsub.f32 %v1071_v12, %v481_v15 }
 0x1e5   :  { %v854_v17 = vpop.eup %853  ;;  %v528_v20 = vmul.f32 1.442695, %v504_v40 }
 0x1e6   :  { %v582_v22 = vpack.c.bf16 %v852_v16, %v854_v17  ;;  %v856_v23 = vpop.eup %855 }
 0x1e7   :  { %857 = vpow2.f32 %v528_v20 }
 0x1e8   :  { %630 = vmatmul.bf16.gmra.mxu3 %v582_v22 }
 0x1ea   :  { %558 = vadd.xlane.f32.xlu0 %v856_v23  ;;  %v493_v62 = vpop.xlane.xlu2 %492 }
 0x1eb   :  { %v510_v3 = vsub.f32 %v1082_v18, %v493_v62 }
 0x1ed   :  { %v858_v25 = vpop.eup %857  ;;  %v540_v26 = vmul.f32 1.442695, %v510_v3 }
 0x1ee   :  { %560 = vadd.xlane.f32.xlu1 %v858_v25 }
 0x1ef   :  { %859 = vpow2.f32 %v540_v26 }
 0x1f2   :  { %564 = vadd.xlane.f32.xlu0 %v846_v49 }
 0x1f5   :  { %v477_v27 = vpop.xlane.xlu1 %476  ;;  %v860_v31 = vpop.eup %859 }
 0x1f6   :  { %v502_v28 = vsub.f32 %v1085_v24, %v477_v27  ;;  %566 = vadd.xlane.f32.xlu1 %v848_v0 }
 0x1f8   :  { %v524_v12 = vmul.f32 1.442695, %v502_v28 }
 0x1fa   :  { %861 = vpow2.f32 %v524_v12  ;;  %570 = vadd.xlane.f32.xlu0 %v852_v16 }
 0x1fb   :  { %863 = vpow2.f32 %v530_v32 }
 0x1fe   :  { %572 = vadd.xlane.f32.xlu1 %v860_v31 }
 0x200   :  { %v862_v33 = vpop.eup %861 }
 0x201   :  { %556 = vadd.xlane.f32.xlu2 %v862_v33  ;;  %v579_v34 = vpack.c.bf16 %v856_v23, %v862_v33  ;;  %v864_v18 = vpop.eup %863 }
 0x202   :  { %v580_v24 = vpack.c.bf16 %v864_v18, %v858_v25 }
 0x203   :  { %615 = vmatmul.bf16.gmra.mxu2 %v579_v34 }
 0x209   :  { %562 = vadd.xlane.f32.xlu2 %v864_v18 }
 0x211   :  { %568 = vadd.xlane.f32.xlu2 %v854_v17 }
 0x213   :  { %620 = vmatmul.bf16.gmra.mxu2 %v580_v24 }
 0x229   :  { %v545_v35 = vpop.xlane.xlu2 %544 }
 0x22a   :  { %865 = vrcp.f32 %v545_v35 }
 0x230   :  { %v866_v36 = vpop.eup %865  ;;  %v549_v38 = vpop.xlane.xlu1 %548 }
 0x231   :  { %867 = vrcp.f32 %v549_v38  ;;  %v551_v42 = vpop.xlane.xlu2 %550 }
 0x237   :  { %v868_v44 = vpop.eup %867 }
 0x239   :  { %v555_v57 = vpop.xlane.xlu1 %554 }
 0x23b   :  { %v601_v37 = vpop.f32.mrf.mxu2 }
 0x23c   :  { %v657_v54 = vmul.f32 %v866_v36, %v601_v37 }
 0x23e   :  { %673 = vst.msk [vmem:[%s1177_s4] sm:$0xff] %vm128_vm1, %v657_v54 }
 0x243   :  { %v603_v5 = vpop.f32.mrf.mxu2 }
 0x245   :  { %v495_v8 = vpop.xlane.xlu0 %494 }
 0x246   :  { %v511_v39 = vsub.f32 %v1098_v61, %v495_v8 }
 0x248   :  { %v542_v41 = vmul.f32 1.442695, %v511_v39 }
 0x24a   :  { %869 = vpow2.f32 %v542_v41 }
 0x24b   :  { %v606_v19 = vpop.f32.mrf.mxu2 }
 0x24c   :  { %v659_v45 = vmul.f32 %v868_v44, %v606_v19 }
 0x24d   :  { %v547_v21 = vpop.xlane.xlu0 %546 }
 0x24e   :  { %871 = vrcp.f32 %v547_v21  ;;  %675 = vst.msk [vmem:[%s1177_s4 + $0x10] sm:$0xff] %vm128_vm1, %v659_v45 }
 0x24f   :  { %873 = vrcp.f32 %v551_v42 }
 0x250   :  { %v870_v46 = vpop.eup %869 }
 0x251   :  { %574 = vadd.xlane.f32.xlu2 %v870_v46  ;;  %v583_v48 = vpack.c.bf16 %v870_v46, %v860_v31 }
 0x253   :  { %635 = vmatmul.bf16.gmra.mxu3 %v583_v48  ;;  %v608_v29 = vpop.f32.mrf.mxu2 }
 0x254   :  { %v872_v50 = vpop.eup %871 }
 0x255   :  { %v874_v51 = vpop.eup %873  ;;  %v658_v52 = vmul.f32 %v872_v50, %v603_v5  ;;  %v553_v53 = vpop.xlane.xlu0 %552 }
 0x256   :  { %v660_v56 = vmul.f32 %v874_v51, %v608_v29  ;;  %875 = vrcp.f32 %v553_v53 }
 0x257   :  { %674 = vst.msk [vmem:[%s1177_s4 + $0x8] sm:$0xff] %vm128_vm1, %v658_v52  ;;  %877 = vrcp.f32 %v555_v57 }
 0x258   :  { %676 = vst.msk [vmem:[%s1177_s4 + $0x18] sm:$0xff] %vm128_vm1, %v660_v56 }
 0x25b   :  { %v626_v59 = vpop.f32.mrf.mxu3 }
 0x25c   :  { %v876_v58 = vpop.eup %875  ;;  %v611_v60 = vpop.f32.mrf.mxu2 }
 0x25d   :  { %v559_v43 = vpop.xlane.xlu0 %558  ;;  %v661_v61 = vmul.f32 %v876_v58, %v611_v60  ;;  %v878_v49 = vpop.eup %877 }
 0x25f   :  { %677 = vst.msk [vmem:[%s1177_s4 + $0x20] sm:$0xff] %vm128_vm1, %v661_v61 }
 0x261   :  { %v561_v4 = vpop.xlane.xlu1 %560 }
 0x263   :  { %v628_v63 = vpop.f32.mrf.mxu3 }
 0x264   :  { %v613_v0 = vpop.f32.mrf.mxu2 }
 0x265   :  { %v565_v1 = vpop.xlane.xlu0 %564  ;;  %v662_v55 = vmul.f32 %v878_v49, %v613_v0 }
 0x266   :  { %879 = vrcp.f32 %v565_v1 }
 0x267   :  { %678 = vst.msk [vmem:[%s1177_s4 + $0x28] sm:$0xff] %vm128_vm1, %v662_v55 }
 0x269   :  { %v567_v2 = vpop.xlane.xlu1 %566 }
 0x26a   :  { %881 = vrcp.f32 %v567_v2 }
 0x26b   :  { %v631_v7 = vpop.f32.mrf.mxu3 }
 0x26c   :  { %v880_v6 = vpop.eup %879 }
 0x26d   :  { %v667_v9 = vmul.f32 %v880_v6, %v626_v59  ;;  %v571_v10 = vpop.xlane.xlu0 %570 }
 0x26e   :  { %883 = vrcp.f32 %v571_v10 }
 0x26f   :  { %683 = vst.msk [vmem:[%s1177_s4 + $0x50] sm:$0xff] %vm128_vm1, %v667_v9 }
 0x270   :  { %v882_v11 = vpop.eup %881 }
 0x271   :  { %v668_v13 = vmul.f32 %v882_v11, %v628_v63  ;;  %v573_v34 = vpop.xlane.xlu1 %572 }
 0x273   :  { %684 = vst.msk [vmem:[%s1177_s4 + $0x58] sm:$0xff] %vm128_vm1, %v668_v13  ;;  %v633_v15 = vpop.f32.mrf.mxu3 }
 0x274   :  { %v884_v14 = vpop.eup %883  ;;  %v557_v40 = vpop.xlane.xlu2 %556 }
 0x275   :  { %v670_v16 = vmul.f32 %v884_v14, %v633_v15  ;;  %885 = vrcp.f32 %v557_v40 }
 0x277   :  { %686 = vst.msk [vmem:[%s1177_s4 + $0x68] sm:$0xff] %vm128_vm1, %v670_v16 }
 0x27b   :  { %v886_v22 = vpop.eup %885 }
 0x27c   :  { %v563_v17 = vpop.xlane.xlu2 %562 }
 0x284   :  { %v569_v20 = vpop.xlane.xlu2 %568 }
 0x285   :  { %887 = vrcp.f32 %v569_v20 }
 0x286   :  { %v616_v23 = vpop.f32.mrf.mxu2  ;;  %889 = vrcp.f32 %v559_v43 }
 0x287   :  { %v663_v62 = vmul.f32 %v886_v22, %v616_v23  ;;  %891 = vrcp.f32 %v561_v4 }
 0x288   :  { %893 = vrcp.f32 %v563_v17 }
 0x289   :  { %679 = vst.msk [vmem:[%s1177_s4 + $0x30] sm:$0xff] %vm128_vm1, %v663_v62  ;;  %895 = vrcp.f32 %v573_v34 }
 0x28b   :  { %v888_v25 = vpop.eup %887 }
 0x28c   :  { %v669_v3 = vmul.f32 %v888_v25, %v631_v7  ;;  %v890_v26 = vpop.eup %889 }
 0x28d   :  { %v892_v30 = vpop.eup %891 }
 0x28e   :  { %685 = vst.msk [vmem:[%s1177_s4 + $0x60] sm:$0xff] %vm128_vm1, %v669_v3  ;;  %v618_v27 = vpop.f32.mrf.mxu2  ;;  %v894_v31 = vpop.eup %893 }
 0x28f   :  { %v664_v28 = vmul.f32 %v890_v26, %v618_v27  ;;  %v896_v24 = vpop.eup %895 }
 0x291   :  { %680 = vst.msk [vmem:[%s1177_s4 + $0x38] sm:$0xff] %vm128_vm1, %v664_v28 }
 0x296   :  { %v621_v12 = vpop.f32.mrf.mxu2 }
 0x297   :  { %v665_v47 = vmul.f32 %v892_v30, %v621_v12 }
 0x299   :  { %681 = vst.msk [vmem:[%s1177_s4 + $0x40] sm:$0xff] %vm128_vm1, %v665_v47 }
 0x29e   :  { %v623_v32 = vpop.f32.mrf.mxu2 }
 0x29f   :  { %v666_v33 = vmul.f32 %v894_v31, %v623_v32 }
 0x2a1   :  { %682 = vst.msk [vmem:[%s1177_s4 + $0x48] sm:$0xff] %vm128_vm1, %v666_v33 }
 0x2c4   :  { %v575_v18 = vpop.xlane.xlu2 %574 }
 0x2c5   :  { %897 = vrcp.f32 %v575_v18 }
 0x2cb   :  { %v898_v37 = vpop.eup %897 }
 0x2d6   :  { %v636_v35 = vpop.f32.mrf.mxu3 }
 0x2d7   :  { %v671_v36 = vmul.f32 %v896_v24, %v636_v35 }
 0x2d9   :  { %687 = vst.msk [vmem:[%s1177_s4 + $0x70] sm:$0xff] %vm128_vm1, %v671_v36 }
 0x2de   :  { %v638_v54 = vpop.f32.mrf.mxu3 }
 0x2df   :  { %v672_v38 = vmul.f32 %v898_v37, %v638_v54 }
 0x2e1   :  { %688 = vst.msk [vmem:[%s1177_s4 + $0x78] sm:$0xff] %vm128_vm1, %v672_v38 }

// kernel: gat_transductive_forward.5
= control target key start
LH: loop header
LB: loop body
LE: loop exit
PB: predicated region body
PF: predicated region fallthrough
CT: control target
= control target key end

     0   :  { %vm159_vm0 = vcmask 523264   ;;  %v4815_v14 = vmov 0   ;;  %v4816_v36 = vmov 1   ;;  %s4817_s8 = smov 120   ;;  %s4819_s24 = smov 8   ;;  %s7661_s3 = inlined_call_operand.vmem [shape: bf16[64,8], index: 3, kind: input, shape index: {}]   ;;  %s7662_s2 = inlined_call_operand.vmem [shape: bf16[64,8], index: 2, kind: input, shape index: {}]   ;;  %s7663_s0 = inlined_call_operand.vmem [shape: bf16[128,64], index: 0, kind: input, shape index: {}]   ;;  %s7664_s1 = inlined_call_operand.vmem [shape: bf16[128,128], index: 1, kind: input, shape index: {}]   ;;  %s7665_s4 = inlined_call_operand.vmem [shape: bf16[128,64], index: 4, kind: output, shape index: {}]  }
   0x1   :  { %v4164_v0 = vld [vmem:[%s7661_s3] sm:$0xff]  ;;  %v4163_v1 = vld [vmem:[%s7662_s2 + $0x18] sm:$0xff]  ;;  %v4162_v2 = vld [vmem:[%s7662_s2 + $0x10] sm:$0xff]  ;;  %4245 = vset.pattern.permute.xlu1 %v4815_v14  ;;  %4248 = vset.pattern.permute.xlu2 %v4815_v14  ;;  %s4820_s16 = smov 112   ;;  %s4821_s20 = smov 16  }
   0x2   :  { %265 = vxpose.xlu0.c.b16.start [1/4] (short) (narrow) %v4164_v0, 16  ;;  %188 = vmatpush.bf16.msra.mxu0 %v4163_v1  ;;  %v4161_v3 = vld [vmem:[%s7662_s2 + $0x8] sm:$0xff]  ;;  %v4160_v4 = vld [vmem:[%s7662_s2] sm:$0xff]  ;;  %v4154_v6 = vld [vmem:[%s7663_s0 + $0x10] sm:$0xff]  ;;  %s4824_s25 = smov 24   ;;  %s4826_s30 = smov 96  }
   0x3   :  { %4207 = vmatpush.bf16.msra.mxu2 %v4163_v1  ;;  %4208 = vmatpush.bf16.msra.mxu3 %v4163_v1  ;;  %v4152_v5 = vld [vmem:[%s7663_s0] sm:$0xff]  ;;  %v4158_v7 = vld [vmem:[%s7663_s0 + $0x30] sm:$0xff]  ;;  %v4165_v8 = vld [vmem:[%s7661_s3 + $0x8] sm:$0xff]  ;;  %s4827_s17 = smov 32   ;;  %s4829_s21 = smov 88  }
   0x4   :  { %v4153_v9 = vld [vmem:[%s7663_s0 + $0x8] sm:$0xff]  ;;  %v4155_v10 = vld [vmem:[%s7663_s0 + $0x18] sm:$0xff]  ;;  %v4166_v12 = vld [vmem:[%s7661_s3 + $0x10] sm:$0xff]  ;;  %s4830_s22 = smov 40   ;;  %s4836_s15 = smov 56  }
   0x5   :  { %v4159_v11 = vld [vmem:[%s7663_s0 + $0x38] sm:$0xff]  ;;  %v4920_v16 = vld [vmem:[%s7663_s0 + $0x30] sm:$0xff]  ;;  %v4928_v18 = vld [vmem:[%s7663_s0 + $0x28] sm:$0xff] }
   0x6   :  { %189 = vmatpush.bf16.msra.mxu0 %v4162_v2  ;;  %v4910_v13 = vld [vmem:[%s7663_s0 + $0x38] sm:$0xff]  ;;  %v343_v17 = vsel %vm159_vm0, %v4920_v16, 0  ;;  %v4156_v19 = vld [vmem:[%s7663_s0 + $0x20] sm:$0xff]  ;;  %v340_v22 = vsel %vm159_vm0, %v4928_v18, 0  ;;  %v4157_v24 = vld [vmem:[%s7663_s0 + $0x28] sm:$0xff] }
   0x7   :  { %4209 = vmatpush.bf16.msra.mxu2 %v4162_v2  ;;  %4210 = vmatpush.bf16.msra.mxu3 %v4162_v2  ;;  %v346_v15 = vsel %vm159_vm0, %v4910_v13, 0  ;;  %v4937_v20 = vld [vmem:[%s7663_s0 + $0x20] sm:$0xff]  ;;  %v4167_v21 = vld [vmem:[%s7661_s3 + $0x18] sm:$0xff]  ;;  %v4963_v27 = vld [vmem:[%s7663_s0 + $0x10] sm:$0xff]  ;;  %s4833_s3 = smov 72  }
   0x8   :  { %348 = vmatpush.bf16.xpose.msra.mxu1 %v346_v15  ;;  %v337_v23 = vsel %vm159_vm0, %v4937_v20, 0  ;;  %v4955_v25 = vld [vmem:[%s7663_s0 + $0x18] sm:$0xff]  ;;  %v331_v28 = vsel %vm159_vm0, %v4963_v27, 0  ;;  %v4971_v29 = vld [vmem:[%s7663_s0 + $0x8] sm:$0xff]  ;;  %v4979_v31 = vld [vmem:[%s7663_s0] sm:$0xff] }
   0x9   :  { %v334_v26 = vsel %vm159_vm0, %v4955_v25, 0  ;;  %v328_v30 = vsel %vm159_vm0, %v4971_v29, 0  ;;  %v325_v32 = vsel %vm159_vm0, %v4979_v31, 0 }
   0xa   :  { %190 = vmatpush.bf16.msra.mxu0 %v4161_v3 }
   0xb   :  { %4211 = vmatpush.bf16.msra.mxu2 %v4161_v3  ;;  %4212 = vmatpush.bf16.msra.mxu3 %v4161_v3 }
   0xe   :  { %191 = vmatpush.bf16.msra.mxu0 %v4160_v4 }
   0xf   :  { %4213 = vmatpush.bf16.msra.mxu2 %v4160_v4  ;;  %4214 = vmatpush.bf16.msra.mxu3 %v4160_v4  ;;  %v4201_v4 = vld [vmem:[%s7664_s1 + $0x10] sm:$0xff]  }
  0x10   :  { %349 = vmatpush.bf16.xpose.msra.mxu1 %v343_v17 }
  0x11   :  { %4087 = vmatmul.msk.bf16.vlgmr.msra.gmra.mxu0 %vm159_vm0, %v4152_v5  ;;  %v4169_v5 = vld [vmem:[%s7664_s1] sm:$0xff]  }
  0x12   :  { %4089 = vmatmul.msk.bf16.vlgmr.msra.gmra.mxu2 %vm159_vm0, %v4154_v6  ;;  %4093 = vmatmul.msk.bf16.vlgmr.msra.gmra.mxu3 %vm159_vm0, %v4158_v7 }
  0x13   :  { %266 = vxpose.xlu0.c.b16.cont [2/4] (short) (narrow) %v4165_v8, 16  ;;  %650 = vmatpush.bf16.msrb.mxu2 %v4910_v13 }
  0x17   :  { %651 = vmatpush.bf16.msrb.mxu2 %v4920_v16 }
  0x18   :  { %350 = vmatpush.bf16.xpose.msra.mxu1 %v340_v22 }
  0x1b   :  { %652 = vmatpush.bf16.msrb.mxu2 %v4928_v18 }
  0x1f   :  { %653 = vmatpush.bf16.msrb.mxu2 %v4937_v20 }
  0x20   :  { %351 = vmatpush.bf16.xpose.msra.mxu1 %v337_v23 }
  0x21   :  { %4088 = vmatmul.msk.bf16.gmra.mxu0 %vm159_vm0, %v4153_v9 }
  0x22   :  { %4090 = vmatmul.msk.bf16.gmra.mxu2 %vm159_vm0, %v4155_v10  ;;  %4094 = vmatmul.msk.bf16.gmra.mxu3 %vm159_vm0, %v4159_v11  ;;  %v5092_v10 = vunpack.c.l.bf16 %v4201_v4  ;;  %v5094_v11 = vunpack.c.l.bf16 %v4169_v5 }
  0x23   :  { %267 = vxpose.xlu0.c.b16.cont [3/4] (short) (narrow) %v4166_v12, 16  ;;  %654 = vmatpush.bf16.msrb.mxu2 %v4955_v25 }
  0x24   :  { %7750 = vst [vmem:[#allocation13_spill] sm:$0xff] %v5092_v10 }
  0x25   :  { %7751 = vst [vmem:[#allocation14_spill] sm:$0xff] %v5094_v11 }
  0x27   :  { %655 = vmatpush.bf16.msrb.mxu2 %v4963_v27 }
  0x28   :  { %352 = vmatpush.bf16.xpose.msra.mxu1 %v334_v26 }
  0x2b   :  { %656 = vmatpush.bf16.msrb.mxu2 %v4971_v29 }
  0x2f   :  { %657 = vmatpush.bf16.msrb.mxu2 %v4979_v31 }
  0x30   :  { %353 = vmatpush.bf16.xpose.msra.mxu1 %v331_v28 }
  0x32   :  { %4091 = vmatmul.msk.bf16.gmra.mxu2 %vm159_vm0, %v4156_v19 }
  0x33   :  { %268 = vxpose.xlu0.c.b16.end [4/4] (short) (narrow) %v4167_v21, 16 }
  0x38   :  { %354 = vmatpush.bf16.xpose.msra.mxu1 %v328_v30 }
  0x40   :  { %355 = vmatpush.bf16.xpose.msra.mxu1 %v325_v32 }
  0x42   :  { %4092 = vmatmul.msk.bf16.gmra.mxu2 %vm159_vm0, %v4157_v24 }
  0x8e   :  { %v4984_v33 = vpop.f32.mrf.mxu0 }
  0x8f   :  { %363 = vperm.xlu1 %4245, %v4984_v33  }
  0x95   :  { %v4987_v34 = vpop.f32.mrf.mxu2  ;;  %v4989_v35 = vpop.f32.mrf.mxu3 }
  0x96   :  { %7739 = vst [vmem:[#allocation2_spill] sm:$0xff] %v4987_v34  ;;  %v5000_v39 = vpop.f32.mrf.mxu0 }
  0x97   :  { %4246 = vset.pattern.permute.xlu1 %v4816_v36 }
  0x98   :  { %765 = vperm.xlu1 %4246, %v4984_v33  }
  0x9a   :  { %4249 = vset.pattern.permute.xlu0 %v4815_v14 }
  0x9d   :  { %v4993_v37 = vpop.f32.mrf.mxu2  ;;  %v4995_v38 = vpop.f32.mrf.mxu3 }
  0x9e   :  { %7740 = vst [vmem:[#allocation3_spill] sm:$0xff] %v4993_v37  ;;  %388 = vperm.xlu2 %4248, %v4993_v37   ;;  %v5009_v42 = vpop.f32.mrf.mxu0 }
  0x9f   :  { %7741 = vst [vmem:[#allocation4_spill] sm:$0xff] %v4995_v38 }
  0xa0   :  { %4247 = vset.pattern.permute.xlu1 %v4815_v14 }
  0xa1   :  { %383 = vperm.xlu1 %4247, %v4987_v34  }
  0xa5   :  { %v5002_v40 = vpop.f32.mrf.mxu2  ;;  %v5004_v41 = vpop.f32.mrf.mxu3 }
  0xa6   :  { %7742 = vst [vmem:[#allocation5_spill] sm:$0xff] %v5004_v41  ;;  %433 = vperm.xlu0 %4249, %v5004_v41   ;;  %428 = vperm.xlu2 %4248, %v4995_v38   ;;  %v5029_v48 = vpop.f32.mrf.mxu0 }
  0xa7   :  { %7746 = vst [vmem:[#allocation9_spill] sm:$0xff] %v5029_v48 }
  0xa9   :  { %423 = vperm.xlu1 %4247, %v4989_v35  }
  0xad   :  { %v5011_v43 = vpop.f32.mrf.mxu2  ;;  %v5037_v50 = vpop.f32.mrf.mxu3 }
  0xae   :  { %7743 = vst [vmem:[#allocation6_spill] sm:$0xff] %v5011_v43  ;;  %4250 = vset.pattern.permute.xlu0 %v4816_v36  ;;  %373 = vperm.xlu2 %4248, %v5009_v42  }
  0xaf   :  { %v273_v44 = vpop.trf.xlu0  ;;  %769 = vperm.xlu0 %4250, %v5000_v39   ;;  %7748 = vst [vmem:[#allocation11_spill] sm:$0xff] %v5037_v50 }
  0xb0   :  { %4143 = vmatmul.msk.bf16.vlgmr.msra.gmra.mxu1 %vm159_vm0, %v273_v44 }
  0xb1   :  { %368 = vperm.xlu1 %4247, %v5000_v39  }
  0xb5   :  { %v5017_v45 = vpop.f32.mrf.mxu2 }
  0xb6   :  { %7744 = vst [vmem:[#allocation7_spill] sm:$0xff] %v5017_v45  ;;  %4251 = vset.pattern.permute.xlu2 %v4816_v36 }
  0xb7   :  { %773 = vperm.xlu2 %4251, %v5009_v42   ;;  %797 = vperm.xlu0 %4250, %v5017_v45  }
  0xb9   :  { %393 = vperm.xlu1 %4247, %v5002_v40  }
  0xbd   :  { %v5022_v46 = vpop.f32.mrf.mxu2 }
  0xbf   :  { %781 = vperm.xlu2 %4251, %v4987_v34  }
  0xc1   :  { %4252 = vset.pattern.permute.xlu1 %v4816_v36 }
  0xc2   :  { %785 = vperm.xlu1 %4252, %v4993_v37  }
  0xc5   :  { %v5026_v47 = vpop.f32.mrf.mxu2 }
  0xc6   :  { %7745 = vst [vmem:[#allocation8_spill] sm:$0xff] %v5026_v47 }
  0xc7   :  { %789 = vperm.xlu2 %4251, %v5002_v40  }
  0xca   :  { %777 = vperm.xlu1 %4252, %v5029_v48  }
  0xcd   :  { %v5032_v49 = vpop.f32.mrf.mxu2 }
  0xce   :  { %7747 = vst [vmem:[#allocation10_spill] sm:$0xff] %v5032_v49  ;;  %809 = vperm.xlu0 %4250, %v5032_v49  }
  0xcf   :  { %4253 = vset.pattern.permute.xlu2 %v4815_v14 }
  0xd0   :  { %378 = vperm.xlu2 %4253, %v5029_v48  }
  0xd2   :  { %4254 = vset.pattern.permute.xlu1 %v4815_v14 }
  0xd3   :  { %438 = vperm.xlu1 %4254, %v5037_v50  }
  0xd6   :  { %821 = vperm.xlu0 %4250, %v5004_v41  }
  0xd8   :  { %398 = vperm.xlu2 %4253, %v5011_v43  }
  0xdb   :  { %4255 = vset.pattern.permute.xlu1 %v4816_v36 }
  0xdc   :  { %793 = vperm.xlu1 %4255, %v5011_v43  }
  0xe0   :  { %408 = vperm.xlu2 %4253, %v5022_v46  }
  0xe4   :  { %4256 = vset.pattern.permute.xlu1 %v4815_v14 }
  0xe5   :  { %403 = vperm.xlu1 %4256, %v5017_v45  }
  0xe8   :  { %4257 = vset.pattern.permute.xlu2 %v4816_v36 }
  0xe9   :  { %801 = vperm.xlu2 %4257, %v5022_v46  }
  0xed   :  { %413 = vperm.xlu1 %4256, %v5026_v47  }
  0xf1   :  { %4259 = vset.pattern.permute.xlu2 %v4815_v14 }
  0xf2   :  { %418 = vperm.xlu2 %4259, %v5032_v49  }
  0xf5   :  { %4258 = vset.pattern.permute.xlu1 %v4816_v36 }
  0xf6   :  { %805 = vperm.xlu1 %4258, %v5026_v47  }
  0xf8   :  { %v389_v51 = vpop.permute.xlu2 %388 }
  0xfa   :  { %4260 = vset.pattern.permute.xlu2 %v4816_v36 }
  0xfb   :  { %813 = vperm.xlu2 %4260, %v4989_v35  }
  0xfe   :  { %817 = vperm.xlu1 %4258, %v4995_v38  }
 0x100   :  { %v5054_v52 = vpop.permute.xlu2 %428 }
 0x101   :  { %v364_v53 = vpop.permute.xlu1 %363 }
 0x103   :  { %825 = vperm.xlu2 %4260, %v5037_v50  }
 0x106   :  { %1031 = vrot.lane.b32.xlu1 %v4971_v29, %s4817_s8 }
 0x108   :  { %v5059_v54 = vpop.permute.xlu2 %373 }
 0x10a   :  { %v766_v55 = vpop.permute.xlu1 %765 }
 0x10b   :  { %1029 = vrot.lane.b32.xlu2 %v4979_v31, %s4817_s8 }
 0x111   :  { %v5063_v56 = vpop.permute.xlu2 %773 }
 0x113   :  { %v384_v57 = vpop.permute.xlu1 %383 }
 0x118   :  { %v5069_v62 = vpop.permute.xlu0 %433 }
 0x119   :  { %v782_v58 = vpop.permute.xlu2 %781 }
 0x11b   :  { %v424_v59 = vpop.permute.xlu1 %423 }
 0x121   :  { %v5065_v60 = vpop.permute.xlu2 %789  ;;  %v770_v9 = vpop.permute.xlu0 %769 }
 0x123   :  { %v5067_v61 = vpop.permute.xlu1 %368 }
 0x12a   :  { %v5071_v63 = vpop.permute.xlu2 %378 }
 0x12b   :  { %v5073_v0 = vpop.permute.xlu1 %393 }
 0x12d   :  { %v5075_v1 = vpop.f32.mrf.mxu1 }
 0x12e   :  { %7749 = vst [vmem:[#allocation12_spill] sm:$0xff] %v5075_v1  ;;  %v5078_v2 = vperm.slane %v5075_v1, 0  ;;  %v5081_v3 = vperm.slane %v5075_v1, 1 }
 0x130   :  { %v833_v6 = vadd.f32 %v5081_v3, %v782_v58  ;;  %v829_v7 = vadd.f32 %v5081_v3, %v766_v55  ;;  %v442_v8 = vadd.f32 %v5078_v2, %v364_v53  ;;  %v830_v15 = vadd.f32 %v5081_v3, %v770_v9 }
 0x131   :  { %v446_v21 = vadd.f32 %v5078_v2, %v384_v57  ;;  %v447_v24 = vadd.f32 %v5078_v2, %v389_v51  ;;  %v5113_v53 = vunpack.c.h.bf16 %v4169_v5  ;;  %v443_v41 = vadd.f32 %v5078_v2, %v5067_v61 }
 0x132   :  { %v5096_v12 = vpop.permute.xlu2 %398  ;;  %vm849_vm1 = vcmp.gt.f32.partialorder %v833_v6, 0.0  ;;  %v865_v14 = vmul.f32 0.2, %v833_v6  ;;  %vm845_vm2 = vcmp.gt.f32.partialorder %v829_v7, 0.0  ;;  %v861_v17 = vmul.f32 0.2, %v829_v7 }
 0x133   :  { %vm458_vm3 = vcmp.gt.f32.partialorder %v442_v8, 0.0  ;;  %v474_v19 = vmul.f32 0.2, %v442_v8  ;;  %v862_v32 = vmul.f32 0.2, %v830_v15  ;;  %vm846_vm4 = vcmp.gt.f32.partialorder %v830_v15, 0.0 }
 0x134   :  { %v786_v22 = vpop.permute.xlu1 %785  ;;  %v881_v23 = vsel %vm849_vm1, %v833_v6, %v865_v14  ;;  %v877_v29 = vsel %vm845_vm2, %v829_v7, %v861_v17  ;;  %v478_v44 = vmul.f32 0.2, %v446_v21  ;;  %vm462_vm5 = vcmp.gt.f32.partialorder %v446_v21, 0.0  ;;  %7752 = vst [vmem:[#allocation15_spill] sm:$0xff] %v5113_v53 }
 0x135   :  { %v359_v26 = vpop.f32.mrf.mxu1  ;;  %v5102_v28 = vadd.f32 %v5092_v10, %v881_v23  ;;  %v5105_v30 = vadd.f32 %v5094_v11, %v877_v29  ;;  %v490_v31 = vsel %vm458_vm3, %v442_v8, %v474_v19  ;;  %v479_v51 = vmul.f32 0.2, %v447_v24 }
 0x136   :  { %v5109_v36 = vadd.f32 %v5094_v11, %v490_v31  ;;  %vm463_vm6 = vcmp.gt.f32.partialorder %v447_v24, 0.0  ;;  %v878_v57 = vsel %vm846_vm4, %v830_v15, %v862_v32  ;;  %v494_v58 = vsel %vm462_vm5, %v446_v21, %v478_v44  ;;  %v5151_v44 = vpop.permute.xlu0 %797 }
 0x137   :  { %917 = vmax.xlane.f32.xlu0 %v5102_v28  ;;  %909 = vmax.xlane.f32.xlu1 %v5105_v30  ;;  %v5117_v6 = vunpack.c.h.bf16 %v4201_v4  ;;  %v454_v7 = vadd.f32 %v5078_v2, %v424_v59  ;;  %v495_v9 = vsel %vm463_vm6, %v447_v24, %v479_v51  ;;  %v455_v14 = vadd.f32 %v5078_v2, %v5054_v52  ;;  %v4205_v59 = vld [vmem:[%s7664_s1 + $0x30] sm:$0xff]  }
 0x138   :  { %522 = vmax.xlane.f32.xlu2 %v5109_v36  ;;  %v5125_v17 = vadd.f32 %v5113_v53, %v878_v57  ;;  %v5128_v5 = vadd.f32 %v5092_v10, %v494_v58  ;;  %v5139_v19 = vunpack.c.l.bf16 %v4205_v59  ;;  %v5143_v24 = vunpack.c.h.bf16 %v4205_v59 }
 0x139   :  { %7753 = vst [vmem:[#allocation16_spill] sm:$0xff] %v5117_v6  ;;  %v5132_v15 = vadd.f32 %v5117_v6, %v495_v9  ;;  %v486_v4 = vmul.f32 0.2, %v454_v7  ;;  %vm470_vm7 = vcmp.gt.f32.partialorder %v454_v7, 0.0  ;;  %v487_v52 = vmul.f32 0.2, %v455_v14 }
 0x13a   :  { %v5115_v55 = vpop.permute.xlu2 %408  ;;  %vm471_vm8 = vcmp.gt.f32.partialorder %v455_v14, 0.0  ;;  %7754 = vst [vmem:[#allocation17_spill] sm:$0xff] %v5139_v19  ;;  %v834_v26 = vadd.f32 %v5081_v3, %v786_v22  ;;  %vm459_vm13 = vcmp.gt.f32.partialorder %v443_v41, 0.0 }
 0x13b   :  { %v502_v23 = vsel %vm470_vm7, %v454_v7, %v486_v4  ;;  %7755 = vst [vmem:[#allocation18_spill] sm:$0xff] %v5143_v24  ;;  %v503_v29 = vsel %vm471_vm8, %v455_v14, %v487_v52  ;;  %v444_v7 = vadd.f32 %v5078_v2, %v5059_v54  ;;  %v4200_v4 = vld [vmem:[%s7664_s1 + $0x8] sm:$0xff]   ;;  %v831_v54 = vadd.f32 %v5081_v3, %v5063_v56 }
 0x13c   :  { %v5120_v8 = vpop.permute.xlu1 %777  ;;  %v5149_v32 = vadd.f32 %v5139_v19, %v502_v23  ;;  %v5154_v51 = vadd.f32 %v5143_v24, %v503_v29  ;;  %v866_v57 = vmul.f32 0.2, %v834_v26  ;;  %vm850_vm9 = vcmp.gt.f32.partialorder %v834_v26, 0.0 }
 0x13d   :  { %v476_v52 = vmul.f32 0.2, %v444_v7  ;;  %vm460_vm10 = vcmp.gt.f32.partialorder %v444_v7, 0.0  ;;  %v5173_v23 = vunpack.c.l.bf16 %v4200_v4  ;;  %v863_v11 = vmul.f32 0.2, %v831_v54 }
 0x13e   :  { %v882_v22 = vsel %vm850_vm9, %v834_v26, %v866_v57  ;;  %vm847_vm12 = vcmp.gt.f32.partialorder %v831_v54, 0.0 }
 0x13f   :  { %911 = vmax.xlane.f32.xlu0 %v5125_v17  ;;  %530 = vmax.xlane.f32.xlu1 %v5128_v5  ;;  %v5167_v59 = vadd.f32 %v5117_v6, %v882_v22  ;;  %7756 = vst [vmem:[#allocation19_spill] sm:$0xff] %v5173_v23  ;;  %v492_v26 = vsel %vm460_vm10, %v444_v7, %v476_v52 }
 0x140   :  { %532 = vmax.xlane.f32.xlu2 %v5132_v15  ;;  %v5164_v14 = vpop.permute.xlu0 %809  ;;  %v5179_v22 = vadd.f32 %v5173_v23, %v492_v26  ;;  %v879_v26 = vsel %vm847_vm12, %v831_v54, %v863_v11 }
 0x141   :  { %v5192_v45 = vadd.f32 %v5173_v23, %v879_v26 }
 0x143   :  { %v5141_v21 = vpop.permute.xlu2 %801 }
 0x145   :  { %v5146_v31 = vpop.permute.xlu1 %438 }
 0x147   :  { %546 = vmax.xlane.f32.xlu1 %v5149_v32 }
 0x148   :  { %548 = vmax.xlane.f32.xlu2 %v5154_v51  ;;  %v822_v49 = vpop.permute.xlu0 %821 }
 0x149   :  { %v843_v52 = vadd.f32 %v5081_v3, %v822_v49  ;;  %v4206_v49 = vld [vmem:[%s7664_s1 + $0x38] sm:$0xff]  }
 0x14b   :  { %v875_v61 = vmul.f32 0.2, %v843_v52  ;;  %vm859_vm14 = vcmp.gt.f32.partialorder %v843_v52, 0.0 }
 0x14c   :  { %v5158_v58 = vpop.permute.xlu2 %418 }
 0x14d   :  { %v891_v54 = vsel %vm859_vm14, %v843_v52, %v875_v61 }
 0x14e   :  { %v5162_v9 = vpop.permute.xlu1 %793 }
 0x150   :  { %919 = vmax.xlane.f32.xlu2 %v5167_v59 }
 0x155   :  { %v814_v29 = vpop.permute.xlu2 %813 }
 0x156   :  { %v841_v57 = vadd.f32 %v5081_v3, %v814_v29  ;;  %v475_v29 = vmul.f32 0.2, %v443_v41 }
 0x157   :  { %v5181_v6 = vpop.permute.xlu1 %403 }
 0x158   :  { %v873_v10 = vmul.f32 0.2, %v841_v57  ;;  %vm857_vm11 = vcmp.gt.f32.partialorder %v841_v57, 0.0  ;;  %526 = vmax.xlane.f32.xlu2 %v5179_v22  ;;  %v491_v37 = vsel %vm459_vm13, %v443_v41, %v475_v29  ;;  %v445_v41 = vadd.f32 %v5078_v2, %v5071_v63 }
 0x159   :  { %v5203_v11 = vadd.f32 %v5113_v53, %v491_v37  ;;  %v5226_v53 = vunpack.c.h.bf16 %v4200_v4 }
 0x15a   :  { %v889_v7 = vsel %vm857_vm11, %v841_v57, %v873_v10  ;;  %v448_v10 = vadd.f32 %v5078_v2, %v5073_v0  ;;  %v4202_v57 = vld [vmem:[%s7664_s1 + $0x18] sm:$0xff]   ;;  %v5211_v0 = vunpack.c.l.bf16 %v4206_v49  ;;  %v477_v61 = vmul.f32 0.2, %v445_v41 }
 0x15b   :  { %v5187_v56 = vadd.f32 %v5139_v19, %v889_v7  ;;  %v5216_v29 = vunpack.c.l.bf16 %v4202_v57  ;;  %v456_v19 = vadd.f32 %v5078_v2, %v5069_v62  ;;  %vm461_vm0 = vcmp.gt.f32.partialorder %v445_v41, 0.0  ;;  %7759 = vst [vmem:[#allocation22_spill] sm:$0xff] %v5226_v53 }
 0x15c   :  { %v480_v7 = vmul.f32 0.2, %v448_v10  ;;  %7757 = vst [vmem:[#allocation20_spill] sm:$0xff] %v5211_v0  ;;  %vm464_vm15 = vcmp.gt.f32.partialorder %v448_v10, 0.0  ;;  %v5214_v26 = vadd.f32 %v5211_v0, %v891_v54  ;;  %v449_v54 = vadd.f32 %v5078_v2, %v5096_v12 }
 0x15d   :  { %933 = vmax.xlane.f32.xlu1 %v5187_v56  ;;  %7758 = vst [vmem:[#allocation21_spill] sm:$0xff] %v5216_v29  ;;  %v493_v23 = vsel %vm461_vm0, %v445_v41, %v477_v61  ;;  %v488_v38 = vmul.f32 0.2, %v456_v19  ;;  %vm472_vm1 = vcmp.gt.f32.partialorder %v456_v19, 0.0  ;;  %v5238_v12 = vunpack.c.h.bf16 %v4202_v57 }
 0x15e   :  { %v496_v52 = vsel %vm464_vm15, %v448_v10, %v480_v7  ;;  %v5232_v10 = vadd.f32 %v5226_v53, %v493_v23  ;;  %v481_v62 = vmul.f32 0.2, %v449_v54  ;;  %vm465_vm2 = vcmp.gt.f32.partialorder %v449_v54, 0.0 }
 0x15f   :  { %v5194_v1 = vpop.permute.xlu1 %413  ;;  %v5224_v63 = vadd.f32 %v5216_v29, %v496_v52  ;;  %v504_v48 = vsel %vm472_vm1, %v456_v19, %v488_v38  ;;  %v835_v52 = vadd.f32 %v5081_v3, %v5065_v60  ;;  %7760 = vst [vmem:[#allocation23_spill] sm:$0xff] %v5238_v12  ;;  %v836_v41 = vadd.f32 %v5081_v3, %v5162_v9 }
 0x160   :  { %913 = vmax.xlane.f32.xlu2 %v5192_v45  ;;  %v5243_v23 = vadd.f32 %v5211_v0, %v504_v48  ;;  %v457_v38 = vadd.f32 %v5078_v2, %v5146_v31  ;;  %v497_v19 = vsel %vm465_vm2, %v449_v54, %v481_v62  ;;  %v832_v48 = vadd.f32 %v5081_v3, %v5120_v8 }
 0x161   :  { %v867_v60 = vmul.f32 0.2, %v835_v52  ;;  %vm851_vm4 = vcmp.gt.f32.partialorder %v835_v52, 0.0  ;;  %v5252_v9 = vadd.f32 %v5238_v12, %v497_v19  ;;  %vm852_vm5 = vcmp.gt.f32.partialorder %v836_v41, 0.0  ;;  %v826_v19 = vpop.permute.xlu2 %825 }
 0x162   :  { %v489_v0 = vmul.f32 0.2, %v457_v38  ;;  %vm473_vm6 = vcmp.gt.f32.partialorder %v457_v38, 0.0  ;;  %vm848_vm7 = vcmp.gt.f32.partialorder %v832_v48, 0.0  ;;  %vm747_vm1 = vcmask 60416  }
 0x163   :  { %v883_v31 = vsel %vm851_vm4, %v835_v52, %v867_v60  ;;  %v844_v60 = vadd.f32 %v5081_v3, %v826_v19 }
 0x164   :  { %v5259_v54 = vadd.f32 %v5216_v29, %v883_v31 }
 0x165   :  { %524 = vmax.xlane.f32.xlu1 %v5203_v11  ;;  %vm860_vm8 = vcmp.gt.f32.partialorder %v844_v60, 0.0 }
 0x168   :  { %v5218_v37 = vpop.permute.xlu1 %805  ;;  %937 = vmax.xlane.f32.xlu2 %v5214_v26 }
 0x16d   :  { %534 = vmax.xlane.f32.xlu1 %v5224_v63 }
 0x170   :  { %v818_v7 = vpop.permute.xlu1 %817  ;;  %528 = vmax.xlane.f32.xlu2 %v5232_v10 }
 0x171   :  { %v842_v4 = vadd.f32 %v5081_v3, %v818_v7  ;;  %v868_v7 = vmul.f32 0.2, %v836_v41 }
 0x173   :  { %v874_v61 = vmul.f32 0.2, %v842_v4  ;;  %vm858_vm3 = vcmp.gt.f32.partialorder %v842_v4, 0.0  ;;  %v884_v62 = vsel %vm852_vm5, %v836_v41, %v868_v7  ;;  %v450_v41 = vadd.f32 %v5078_v2, %v5181_v6 }
 0x174   :  { %v5265_v8 = vadd.f32 %v5238_v12, %v884_v62 }
 0x175   :  { %550 = vmax.xlane.f32.xlu1 %v5243_v23  ;;  %v890_v47 = vsel %vm858_vm3, %v842_v4, %v874_v61  ;;  %v864_v4 = vmul.f32 0.2, %v832_v48  ;;  %v505_v61 = vsel %vm473_vm6, %v457_v38, %v489_v0  ;;  %v876_v0 = vmul.f32 0.2, %v844_v60 }
 0x176   :  { %v5249_v57 = vadd.f32 %v5143_v24, %v890_v47  ;;  %v5261_v47 = vunpack.c.h.bf16 %v4206_v49  ;;  %v482_v62 = vmul.f32 0.2, %v450_v41  ;;  %vm466_vm9 = vcmp.gt.f32.partialorder %v450_v41, 0.0 }
 0x177   :  { %v880_v31 = vsel %vm848_vm7, %v832_v48, %v864_v4  ;;  %v892_v38 = vsel %vm860_vm8, %v844_v60, %v876_v0  ;;  %v4203_v48 = vld [vmem:[%s7664_s1 + $0x20] sm:$0xff]   ;;  %v838_v4 = vadd.f32 %v5081_v3, %v5141_v21 }
 0x178   :  { %935 = vmax.xlane.f32.xlu0 %v5249_v57  ;;  %536 = vmax.xlane.f32.xlu2 %v5252_v9  ;;  %7761 = vst [vmem:[#allocation24_spill] sm:$0xff] %v5261_v47  ;;  %v5268_v52 = vadd.f32 %v5261_v47, %v505_v61  ;;  %v5274_v49 = vadd.f32 %v5226_v53, %v880_v31  ;;  %v5288_v19 = vunpack.c.l.bf16 %v4203_v48  ;;  %v5300_v21 = vunpack.c.h.bf16 %v4203_v48  ;;  %v5316_v48 = vpop.permute.xlu2 %1029 }
 0x179   :  { %v5280_v7 = vadd.f32 %v5261_v47, %v892_v38  ;;  %v498_v61 = vsel %vm466_vm9, %v450_v41, %v482_v62  ;;  %v870_v60 = vmul.f32 0.2, %v838_v4  ;;  %vm854_vm10 = vcmp.gt.f32.partialorder %v838_v4, 0.0  ;;  %7766 = vst [vmem:[#allocation29_spill] sm:$0xff] %v5316_v48 }
 0x17a   :  { %7762 = vst [vmem:[#allocation25_spill] sm:$0xff] %v5288_v19  ;;  %v5291_v6 = vadd.f32 %v5288_v19, %v498_v61  ;;  %v452_v31 = vadd.f32 %v5078_v2, %v5194_v1 }
 0x17b   :  { %v886_v0 = vsel %vm854_vm10, %v838_v4, %v870_v60  ;;  %7763 = vst [vmem:[#allocation26_spill] sm:$0xff] %v5300_v21  ;;  %v5311_v4 = vpop.permute.xlu1 %1031 }
 0x17c   :  { %v5303_v41 = vadd.f32 %v5300_v21, %v886_v0  ;;  %v484_v38 = vmul.f32 0.2, %v452_v31  ;;  %vm468_vm11 = vcmp.gt.f32.partialorder %v452_v31, 0.0  ;;  %7765 = vst [vmem:[#allocation28_spill] sm:$0xff] %v5311_v4  ;;  %v839_v0 = vadd.f32 %v5081_v3, %v5218_v37 }
 0x17d   :  { %921 = vmax.xlane.f32.xlu1 %v5259_v54  ;;  %v451_v37 = vadd.f32 %v5078_v2, %v5115_v55 }
 0x17e   :  { %v500_v1 = vsel %vm468_vm11, %v452_v31, %v484_v38  ;;  %v837_v31 = vadd.f32 %v5081_v3, %v5151_v44  ;;  %v871_v38 = vmul.f32 0.2, %v839_v0  ;;  %vm855_vm12 = vcmp.gt.f32.partialorder %v839_v0, 0.0 }
 0x17f   :  { %vm467_vm14 = vcmp.gt.f32.partialorder %v451_v37, 0.0 }
 0x180   :  { %923 = vmax.xlane.f32.xlu0 %v5265_v8  ;;  %552 = vmax.xlane.f32.xlu2 %v5268_v52  ;;  %v887_v12 = vsel %vm855_vm12, %v839_v0, %v871_v38  ;;  %vm853_vm13 = vcmp.gt.f32.partialorder %v837_v31, 0.0  ;;  %v840_v0 = vadd.f32 %v5081_v3, %v5164_v14 }
 0x182   :  { %vm856_vm0 = vcmp.gt.f32.partialorder %v840_v0, 0.0 }
 0x185   :  { %915 = vmax.xlane.f32.xlu1 %v5274_v49 }
 0x18d   :  { %939 = vmax.xlane.f32.xlu1 %v5280_v7 }
 0x194   :  { %1033 = vrot.lane.b32.xlu0 %v4963_v27, %s4817_s8  ;;  %v4204_v27 = vld [vmem:[%s7664_s1 + $0x28] sm:$0xff]   ;;  %s4823_s1 = smov 104  }
 0x195   :  { %538 = vmax.xlane.f32.xlu1 %v5291_v6  ;;  %v5309_v62 = vunpack.c.l.bf16 %v4204_v27 }
 0x197   :  { %7764 = vst [vmem:[#allocation27_spill] sm:$0xff] %v5309_v62  ;;  %v5331_v50 = vadd.f32 %v5309_v62, %v887_v12 }
 0x198   :  { %1035 = vrot.lane.b32.xlu2 %v4955_v25, %s4817_s8  ;;  %v5314_v25 = vadd.f32 %v5309_v62, %v500_v1  ;;  %v869_v1 = vmul.f32 0.2, %v837_v31 }
 0x19a   :  { %v885_v4 = vsel %vm853_vm13, %v837_v31, %v869_v1  ;;  %v872_v1 = vmul.f32 0.2, %v840_v0 }
 0x19d   :  { %927 = vmax.xlane.f32.xlu1 %v5303_v41 }
 0x1a5   :  { %542 = vmax.xlane.f32.xlu1 %v5314_v25 }
 0x1aa   :  { %v5319_v61 = vpop.xlane.xlu1 %909 }
 0x1ab   :  { %v523_v60 = vpop.xlane.xlu2 %522 }
 0x1b2   :  { %v5323_v24 = vpop.xlane.xlu1 %530 }
 0x1b3   :  { %v5325_v47 = vpop.xlane.xlu2 %532 }
 0x1ba   :  { %v547_v29 = vpop.xlane.xlu1 %546 }
 0x1bb   :  { %v566_v53 = vsub.f32 %v5149_v32, %v547_v29  ;;  %v549_v43 = vpop.xlane.xlu2 %548  ;;  %v5340_v32 = vadd.f32 %v5288_v19, %v885_v4  ;;  %v483_v29 = vmul.f32 0.2, %v451_v37 }
 0x1bc   :  { %v567_v48 = vsub.f32 %v5154_v51, %v549_v43  ;;  %v453_v43 = vadd.f32 %v5078_v2, %v5158_v58  ;;  %v5359_v58 = vunpack.c.h.bf16 %v4204_v27 }
 0x1bd   :  { %v594_v34 = vmul.f32 1.442695, %v566_v53  ;;  %v499_v53 = vsel %vm467_vm14, %v451_v37, %v483_v29  ;;  %v554_v37 = vsub.f32 %v5109_v36, %v523_v60  ;;  %v888_v29 = vsel %vm856_vm0, %v840_v0, %v872_v1 }
 0x1be   :  { %1039 = vrot.lane.b32.xlu1 %v4928_v18, %s4817_s8  ;;  %929 = vmax.xlane.f32.xlu0 %v5331_v50  ;;  %v596_v44 = vmul.f32 1.442695, %v567_v48  ;;  %v485_v4 = vmul.f32 0.2, %v453_v43  ;;  %vm469_vm15 = vcmp.gt.f32.partialorder %v453_v43, 0.0  ;;  %7767 = vst [vmem:[#allocation30_spill] sm:$0xff] %v5359_v58  ;;  %v5371_v27 = vadd.f32 %v5359_v58, %v888_v29 }
 0x1bf   :  { %4279 = vpow2.f32 %v594_v34  ;;  %v5352_v34 = vadd.f32 %v5300_v21, %v499_v53  ;;  %v570_v3 = vmul.f32 1.442695, %v554_v37  ;;  %v559_v0 = vsub.f32 %v5132_v15, %v5325_v47 }
 0x1c0   :  { %4281 = vpow2.f32 %v596_v44  ;;  %v501_v2 = vsel %vm469_vm15, %v453_v43, %v485_v4  ;;  %v5373_v43 = vpop.xlane.xlu0 %917  ;;  %v4818_v4 = vmov 2  }
 0x1c1   :  { %925 = vmax.xlane.f32.xlu2 %v5340_v32  ;;  %v5364_v38 = vadd.f32 %v5359_v58, %v501_v2  ;;  %4262 = vset.pattern.permute.xlu0 %v4818_v4  ;;  %4283 = vpow2.f32 %v570_v3  ;;  %v580_v29 = vmul.f32 1.442695, %v559_v0 }
 0x1c2   :  { %4261 = vset.pattern.permute.xlu2 %v4818_v4  ;;  %4263 = vset.pattern.permute.xlu1 %v4818_v4 }
 0x1c3   :  { %v5343_v55 = vpop.xlane.xlu2 %919 }
 0x1c5   :  { %v5347_v51 = vpop.eup %4279 }
 0x1c6   :  { %v5349_v18 = vpop.eup %4281 }
 0x1c8   :  { %v5387_v1 = vpop.xlane.xlu0 %911 }
 0x1c9   :  { %540 = vmax.xlane.f32.xlu2 %v5352_v34 }
 0x1cb   :  { %v527_v48 = vpop.xlane.xlu2 %526 }
 0x1cc   :  { %v556_v3 = vsub.f32 %v5179_v22, %v527_v48  ;;  %v946_v22 = vsub.f32 %v5167_v59, %v5343_v55  ;;  %v941_v48 = vsub.f32 %v5105_v30, %v5319_v61 }
 0x1ce   :  { %v574_v15 = vmul.f32 1.442695, %v556_v3  ;;  %v967_v55 = vmul.f32 1.442695, %v946_v22 }
 0x1d0   :  { %v5361_v31 = vpop.xlane.xlu1 %933 }
 0x1d1   :  { %544 = vmax.xlane.f32.xlu2 %v5364_v38 }
 0x1d2   :  { %1037 = vrot.lane.b32.xlu0 %v4937_v20, %s4817_s8 }
 0x1d3   :  { %v914_v44 = vpop.xlane.xlu2 %913 }
 0x1d8   :  { %v525_v14 = vpop.xlane.xlu1 %524 }
 0x1d9   :  { %v555_v53 = vsub.f32 %v5203_v11, %v525_v14  ;;  %931 = vmax.xlane.f32.xlu2 %v5371_v27  ;;  %v4284_v11 = vpop.eup %4283 }
 0x1da   :  { %1043 = vrot.lane.b32.xlu0 %v4910_v13, %s4817_s8 }
 0x1db   :  { %v572_v20 = vmul.f32 1.442695, %v555_v53  ;;  %v5379_v36 = vpop.xlane.xlu2 %937 }
 0x1dd   :  { %4285 = vpow2.f32 %v572_v20 }
 0x1de   :  { %4287 = vpow2.f32 %v580_v29  ;;  %v943_v29 = vsub.f32 %v5192_v45, %v914_v44  ;;  %v953_v45 = vsub.f32 %v5187_v56, %v5361_v31 }
 0x1e0   :  { %v5381_v60 = vpop.xlane.xlu1 %534  ;;  %v961_v61 = vmul.f32 1.442695, %v943_v29 }
 0x1e1   :  { %v560_v29 = vsub.f32 %v5224_v63, %v5381_v60 }
 0x1e3   :  { %v5385_v2 = vpop.eup %4285  ;;  %v529_v13 = vpop.xlane.xlu2 %528 }
 0x1e4   :  { %v634_v37 = vpack.c.bf16 %v5385_v2, %v4284_v11  ;;  %v557_v14 = vsub.f32 %v5232_v10, %v529_v13  ;;  %v4288_v4 = vpop.eup %4287 }
 0x1e6   :  { %658 = vmatmul.bf16.vlgmr.msrb.gmra.mxu2 %v634_v37  ;;  %v576_v53 = vmul.f32 1.442695, %v557_v14 }
 0x1e8   :  { %v5392_v20 = vpop.xlane.xlu1 %550  ;;  %602 = vadd.xlane.f32.xlu1 %v4284_v11  ;;  %4289 = vpow2.f32 %v576_v53  ;;  %v558_v11 = vsub.f32 %v5128_v5, %v5323_v24 }
 0x1e9   :  { %4291 = vpow2.f32 %v574_v15 }
 0x1ea   :  { %v578_v30 = vmul.f32 1.442695, %v558_v11 }
 0x1eb   :  { %v5394_v47 = vpop.xlane.xlu0 %935  ;;  %v537_v56 = vpop.xlane.xlu2 %536 }
 0x1ee   :  { %v5396_v58 = vpop.eup %4289 }
 0x1ef   :  { %v4292_v0 = vpop.eup %4291 }
 0x1f0   :  { %v922_v12 = vpop.xlane.xlu1 %921  ;;  %612 = vadd.xlane.f32.xlu1 %v4288_v4  ;;  %v635_v59 = vpack.c.bf16 %v5396_v58, %v4292_v0 }
 0x1f1   :  { %v947_v10 = vsub.f32 %v5259_v54, %v922_v12  ;;  %1041 = vrot.lane.b32.xlu2 %v4920_v16, %s4817_s8  ;;  %v957_v54 = vmul.f32 1.442695, %v941_v48  ;;  %s4834_s8 = smov 80  }
 0x1f3   :  { %v969_v13 = vmul.f32 1.442695, %v947_v10  ;;  %v924_v37 = vpop.xlane.xlu0 %923 }
 0x1f4   :  { %v948_v3 = vsub.f32 %v5265_v8, %v924_v37  ;;  %v955_v8 = vsub.f32 %v5214_v26, %v5379_v36 }
 0x1f5   :  { %4293 = vpow2.f32 %v969_v13  ;;  %v561_v13 = vsub.f32 %v5252_v9, %v537_v56 }
 0x1f6   :  { %v971_v12 = vmul.f32 1.442695, %v948_v3  ;;  %663 = vmatmul.bf16.gmra.mxu2 %v635_v59  ;;  %v985_v10 = vmul.f32 1.442695, %v955_v8 }
 0x1f8   :  { %4295 = vpow2.f32 %v971_v12  ;;  %v916_v16 = vpop.xlane.xlu1 %915  ;;  %628 = vadd.xlane.f32.xlu1 %v5349_v18 }
 0x1f9   :  { %4297 = vpow2.f32 %v967_v55  ;;  %v944_v5 = vsub.f32 %v5274_v49, %v916_v16  ;;  %1232 = vperm.xlu2 %4261, %v4984_v33   ;;  %v981_v49 = vmul.f32 1.442695, %v953_v45  ;;  %v584_v55 = vmul.f32 1.442695, %v561_v13  ;;  %v553_v16 = vpop.xlane.xlu2 %552 }
 0x1fa   :  { %4299 = vpow2.f32 %v957_v54  ;;  %v582_v54 = vmul.f32 1.442695, %v560_v29 }
 0x1fb   :  { %4301 = vpow2.f32 %v578_v30  ;;  %v963_v24 = vmul.f32 1.442695, %v944_v5  ;;  %v5417_v44 = vpop.eup %4293  ;;  %v945_v5 = vsub.f32 %v5102_v28, %v5373_v43  ;;  %v942_v28 = vsub.f32 %v5125_v17, %v5387_v1 }
 0x1fc   :  { %4303 = vpow2.f32 %v961_v61 }
 0x1fd   :  { %4305 = vpow2.f32 %v963_v24  ;;  %v965_v45 = vmul.f32 1.442695, %v945_v5 }
 0x1fe   :  { %v5419_v14 = vpop.eup %4295  ;;  %4307 = vpow2.f32 %v981_v49 }
 0x1ff   :  { %v5421_v53 = vpop.eup %4297  ;;  %v1024_v15 = vpack.c.bf16 %v5419_v14, %v5417_v44  ;;  %4309 = vpow2.f32 %v985_v10 }
 0x200   :  { %v5425_v22 = vpop.eup %4299  ;;  %v940_v31 = vpop.xlane.xlu1 %939  ;;  %999 = vadd.xlane.f32.xlu1 %v5421_v53 }
 0x201   :  { %v4302_v48 = vpop.eup %4301  ;;  %v956_v26 = vsub.f32 %v5280_v7, %v940_v31  ;;  %v568_v7 = vsub.f32 %v5243_v23, %v5392_v20  ;;  %v5464_v8 = vpop.permute.xlu2 %1035 }
 0x202   :  { %v5429_v36 = vpop.eup %4303  ;;  %v636_v3 = vpack.c.bf16 %v4288_v4, %v4302_v48 }
 0x203   :  { %v5431_v11 = vpop.eup %4305  ;;  %v987_v37 = vmul.f32 1.442695, %v956_v26  ;;  %v598_v12 = vmul.f32 1.442695, %v568_v7 }
 0x204   :  { %989 = vadd.xlane.f32.xlu0 %v5425_v22  ;;  %v1022_v59 = vpack.c.bf16 %v5431_v11, %v5429_v36  ;;  %v5441_v9 = vpop.eup %4307 }
 0x205   :  { %4311 = vpow2.f32 %v987_v37  ;;  %v5443_v30 = vpop.eup %4309  ;;  %v954_v37 = vsub.f32 %v5249_v57, %v5394_v47 }
 0x206   :  { %668 = vmatmul.bf16.gmra.mxu2 %v636_v3  ;;  %4313 = vpow2.f32 %v584_v55  ;;  %v5469_v31 = vpop.permute.xlu0 %1033 }
 0x207   :  { %4315 = vpow2.f32 %v582_v54 }
 0x208   :  { %606 = vadd.xlane.f32.xlu1 %v4292_v0  ;;  %4317 = vpow2.f32 %v598_v12  ;;  %v539_v61 = vpop.xlane.xlu1 %538 }
 0x209   :  { %4319 = vpow2.f32 %v965_v45  ;;  %v569_v45 = vsub.f32 %v5268_v52, %v553_v16 }
 0x20b   :  { %v5445_v63 = vpop.eup %4311 }
 0x20c   :  { %1013 = vadd.xlane.f32.xlu0 %v5441_v9  ;;  %v1028_v60 = vpack.c.bf16 %v5445_v63, %v5443_v30  ;;  %v4314_v23 = vpop.eup %4313 }
 0x20d   :  { %v5451_v20 = vpop.eup %4315 }
 0x20e   :  { %v5453_v4 = vpop.eup %4317  ;;  %v637_v0 = vpack.c.bf16 %v4314_v23, %v5451_v20 }
 0x20f   :  { %v5467_v56 = vpop.eup %4319 }
 0x210   :  { %993 = vadd.xlane.f32.xlu1 %v5429_v36  ;;  %v928_v24 = vpop.xlane.xlu1 %927 }
 0x211   :  { %v950_v49 = vsub.f32 %v5303_v41, %v928_v24  ;;  %v562_v41 = vsub.f32 %v5291_v6, %v539_v61  ;;  %v983_v6 = vmul.f32 1.442695, %v954_v37 }
 0x213   :  { %v975_v10 = vmul.f32 1.442695, %v950_v49  ;;  %v586_v1 = vmul.f32 1.442695, %v562_v41 }
 0x214   :  { %630 = vadd.xlane.f32.xlu0 %v5453_v4 }
 0x215   :  { %4321 = vpow2.f32 %v975_v10 }
 0x216   :  { %673 = vmatmul.bf16.gmra.mxu2 %v637_v0 }
 0x218   :  { %1017 = vadd.xlane.f32.xlu1 %v5443_v30 }
 0x21b   :  { %v5477_v13 = vpop.eup %4321 }
 0x21c   :  { %1001 = vadd.xlane.f32.xlu0 %v5417_v44 }
 0x220   :  { %616 = vadd.xlane.f32.xlu1 %v4314_v23 }
 0x222   :  { %610 = vadd.xlane.f32.xlu2 %v4302_v48  ;;  %v959_v48 = vmul.f32 1.442695, %v942_v28 }
 0x224   :  { %608 = vadd.xlane.f32.xlu0 %v5396_v58 }
 0x22a   :  { %626 = vadd.xlane.f32.xlu2 %v5347_v51 }
 0x22c   :  { %995 = vadd.xlane.f32.xlu0 %v5431_v11  ;;  %v1023_v11 = vpack.c.bf16 %v5421_v53, %v5467_v56 }
 0x231   :  { %v5482_v17 = vpop.xlane.xlu0 %929 }
 0x232   :  { %997 = vadd.xlane.f32.xlu2 %v5467_v56 }
 0x234   :  { %1019 = vadd.xlane.f32.xlu0 %v5445_v63  ;;  %v926_v58 = vpop.xlane.xlu2 %925 }
 0x235   :  { %v949_v43 = vsub.f32 %v5340_v32, %v926_v58  ;;  %v600_v58 = vmul.f32 1.442695, %v569_v45 }
 0x237   :  { %v973_v26 = vmul.f32 1.442695, %v949_v43 }
 0x239   :  { %4323 = vpow2.f32 %v973_v26 }
 0x23a   :  { %604 = vadd.xlane.f32.xlu2 %v5385_v2  ;;  %4325 = vpow2.f32 %v959_v48 }
 0x23b   :  { %4327 = vpow2.f32 %v586_v1  ;;  %v7768_v1 = vld [vmem:[#allocation2_spill] sm:$0xff] }
 0x23c   :  { %1007 = vadd.xlane.f32.xlu0 %v5477_v13  ;;  %v541_v29 = vpop.xlane.xlu2 %540 }
 0x23d   :  { %v563_v32 = vsub.f32 %v5352_v34, %v541_v29  ;;  %v543_v34 = vpop.xlane.xlu1 %542  ;;  %v7769_v29 = vld [vmem:[#allocation28_spill] sm:$0xff] }
 0x23e   :  { %v564_v5 = vsub.f32 %v5314_v25, %v543_v34 }
 0x23f   :  { %v5486_v3 = vpop.eup %4323  ;;  %v588_v7 = vmul.f32 1.442695, %v563_v32 }
 0x240   :  { %1005 = vadd.xlane.f32.xlu1 %v5486_v3  ;;  %v1025_v2 = vpack.c.bf16 %v5477_v13, %v5486_v3  ;;  %v5491_v55 = vpop.eup %4325  ;;  %v590_v28 = vmul.f32 1.442695, %v564_v5  ;;  %v7776_v13 = vld [vmem:[#allocation4_spill] sm:$0xff] }
 0x241   :  { %4329 = vpow2.f32 %v588_v7  ;;  %v4328_v54 = vpop.eup %4327 }
 0x242   :  { %991 = vadd.xlane.f32.xlu2 %v5491_v55  ;;  %4331 = vpow2.f32 %v983_v6 }
 0x244   :  { %v1038_v57 = vpop.permute.xlu0 %1037  ;;  %v545_v47 = vpop.xlane.xlu2 %544 }
 0x245   :  { %v565_v23 = vsub.f32 %v5364_v38, %v545_v47  ;;  %v1040_v38 = vpop.permute.xlu1 %1039  ;;  %v7772_v47 = vld [vmem:[#allocation11_spill] sm:$0xff] }
 0x247   :  { %v4330_v12 = vpop.eup %4329  ;;  %v592_v24 = vmul.f32 1.442695, %v565_v23 }
 0x248   :  { %620 = vadd.xlane.f32.xlu1 %v4330_v12  ;;  %v638_v0 = vpack.c.bf16 %v4330_v12, %v4328_v54  ;;  %v5495_v61 = vpop.eup %4331 }
 0x249   :  { %4333 = vpow2.f32 %v592_v24 }
 0x24a   :  { %1015 = vadd.xlane.f32.xlu2 %v5495_v61  ;;  %678 = vmatmul.bf16.gmra.mxu2 %v638_v0  ;;  %4335 = vpow2.f32 %v590_v28  ;;  %v7774_v0 = vld [vmem:[#allocation8_spill] sm:$0xff] }
 0x24b   :  { %4337 = vpow2.f32 %v600_v58 }
 0x24c   :  { %v1044_v49 = vpop.permute.xlu0 %1043  ;;  %v5500_v10 = vpop.xlane.xlu2 %931 }
 0x24d   :  { %1053 = vmatpush.bf16.msrb.mxu3 %v1044_v49  ;;  %v7775_v49 = vld [vmem:[#allocation9_spill] sm:$0xff]  ;;  %v952_v56 = vsub.f32 %v5371_v27, %v5500_v10 }
 0x24f   :  { %v5504_v43 = vpop.eup %4333 }
 0x250   :  { %1236 = vperm.xlu0 %4262, %v5000_v39   ;;  %v5506_v52 = vpop.eup %4335 }
 0x251   :  { %v639_v16 = vpack.c.bf16 %v5504_v43, %v5506_v52  ;;  %v4338_v48 = vpop.eup %4337 }
 0x252   :  { %614 = vadd.xlane.f32.xlu2 %v5451_v20  ;;  %v641_v23 = vpack.c.bf16 %v4338_v48, %v5453_v4 }
 0x254   :  { %v1042_v25 = vpop.permute.xlu2 %1041 }
 0x255   :  { %1054 = vmatpush.bf16.msrb.mxu3 %v1042_v25 }
 0x258   :  { %1256 = vperm.xlu0 %4262, %v5002_v40  }
 0x259   :  { %1055 = vmatpush.bf16.msrb.mxu3 %v1040_v38 }
 0x25a   :  { %632 = vadd.xlane.f32.xlu2 %v4338_v48  ;;  %683 = vmatmul.bf16.gmra.mxu2 %v639_v16 }
 0x25b   :  { %v603_v26 = vpop.xlane.xlu1 %602 }
 0x25c   :  { %4339 = vrcp.f32 %v603_v26  ;;  %v5555_v25 = vpop.permute.xlu2 %1232 }
 0x25d   :  { %1056 = vmatpush.bf16.msrb.mxu3 %v1038_v57  ;;  %v1021_v57 = vpack.c.bf16 %v5491_v55, %v5425_v22 }
 0x260   :  { %1268 = vperm.xlu0 %4262, %v5022_v46  }
 0x261   :  { %1240 = vperm.xlu1 %4263, %v5009_v42   ;;  %1057 = vmatpush.bf16.msrb.mxu3 %v5464_v8  ;;  %v7770_v8 = vpack.c.bf16 %v5349_v18, %v5347_v51  ;;  %v7773_v51 = vld [vmem:[#allocation6_spill] sm:$0xff] }
 0x262   :  { %1003 = vadd.xlane.f32.xlu2 %v5419_v14  ;;  %v4340_v41 = vpop.eup %4339 }
 0x263   :  { %v613_v20 = vpop.xlane.xlu1 %612 }
 0x265   :  { %1058 = vmatpush.bf16.msrb.mxu3 %v5469_v31  ;;  %v7771_v31 = vld [vmem:[#allocation29_spill] sm:$0xff] }
 0x268   :  { %1280 = vperm.xlu0 %4262, %v4989_v35  }
 0x269   :  { %v659_v37 = vpop.f32.mrf.mxu2  ;;  %1248 = vperm.xlu1 %4263, %v7768_v1   ;;  %1059 = vmatpush.bf16.msrb.mxu3 %v7769_v29 }
 0x26a   :  { %v715_v32 = vmul.f32 %v4340_v41, %v659_v37  ;;  %618 = vadd.xlane.f32.xlu2 %v4328_v54  ;;  %688 = vmatmul.bf16.gmra.mxu2 %v7770_v8 }
 0x26b   :  { %v5522_v6 = vpop.xlane.xlu1 %628 }
 0x26c   :  { %v731_v7 = vpack.c.bf16 %v715_v32, %v715_v32 }
 0x26d   :  { %1060 = vmatpush.bf16.msrb.mxu3 %v7771_v31 }
 0x26e   :  { %748 = vst.msk [vmem:[%s7665_s4] sm:$0xf] %vm747_vm1, %v731_v7 }
 0x270   :  { %1292 = vperm.xlu0 %4262, %v7772_v47   ;;  %1061 = vmatmul.bf16.vlgmr.msrb.gmra.mxu3 %v1021_v57 }
 0x271   :  { %v5532_v54 = vpop.f32.mrf.mxu2  ;;  %1260 = vperm.xlu1 %4263, %v7773_v51  }
 0x273   :  { %v5535_v18 = vpop.xlane.xlu1 %999 }
 0x277   :  { %v5537_v34 = vpop.xlane.xlu0 %989 }
 0x279   :  { %v664_v12 = vpop.f32.mrf.mxu2  ;;  %1272 = vperm.xlu1 %4263, %v7774_v0  }
 0x27a   :  { %693 = vmatmul.bf16.gmra.mxu2 %v641_v23 }
 0x27b   :  { %v607_v5 = vpop.xlane.xlu1 %606 }
 0x27c   :  { %4341 = vrcp.f32 %v607_v5  ;;  %v979_v5 = vmul.f32 1.442695, %v952_v56 }
 0x27d   :  { %4343 = vrcp.f32 %v613_v20 }
 0x27f   :  { %v5541_v22 = vpop.xlane.xlu0 %1013 }
 0x280   :  { %1066 = vmatmul.bf16.gmra.mxu3 %v1022_v59 }
 0x281   :  { %v666_v55 = vpop.f32.mrf.mxu2 }
 0x282   :  { %v4342_v45 = vpop.eup %4341  ;;  %1244 = vperm.xlu2 %4261, %v7775_v49  }
 0x283   :  { %v717_v24 = vmul.f32 %v4342_v45, %v664_v12  ;;  %v5547_v28 = vpop.xlane.xlu1 %993  ;;  %v4344_v16 = vpop.eup %4343 }
 0x285   :  { %v733_v58 = vpack.c.bf16 %v717_v24, %v717_v24 }
 0x287   :  { %750 = vst.msk [vmem:[%s7665_s4 + $0x8] sm:$0xf] %vm747_vm1, %v733_v58  ;;  %v5553_v4 = vpop.xlane.xlu0 %630 }
 0x289   :  { %v669_v38 = vpop.f32.mrf.mxu2 }
 0x28b   :  { %v5557_v36 = vpop.xlane.xlu1 %1017 }
 0x28f   :  { %v5561_v59 = vpop.xlane.xlu0 %1001 }
 0x290   :  { %1071 = vmatmul.bf16.gmra.mxu3 %v1023_v11 }
 0x291   :  { %v671_v48 = vpop.f32.mrf.mxu2 }
 0x292   :  { %v720_v26 = vmul.f32 %v4344_v16, %v671_v48 }
 0x293   :  { %v617_v29 = vpop.xlane.xlu1 %616 }
 0x294   :  { %v736_v41 = vpack.c.bf16 %v720_v26, %v720_v26  ;;  %v7777_v26 = vld [vmem:[#allocation3_spill] sm:$0xff] }
 0x295   :  { %v611_v20 = vpop.xlane.xlu2 %610 }
 0x296   :  { %753 = vst.msk [vmem:[%s7665_s4 + $0x14] sm:$0xf] %vm747_vm1, %v736_v41  ;;  %4345 = vrcp.f32 %v611_v20 }
 0x297   :  { %v609_v37 = vpop.xlane.xlu0 %608 }
 0x298   :  { %4347 = vrcp.f32 %v609_v37 }
 0x299   :  { %v674_v32 = vpop.f32.mrf.mxu2  ;;  %4349 = vrcp.f32 %v617_v29 }
 0x29a   :  { %4351 = vpow2.f32 %v979_v5 }
 0x29c   :  { %v4346_v53 = vpop.eup %4345 }
 0x29d   :  { %v719_v7 = vmul.f32 %v4346_v53, %v669_v38  ;;  %v5569_v31 = vpop.xlane.xlu2 %626  ;;  %v1027_v53 = vpack.c.bf16 %v5495_v61, %v5441_v9 }
 0x29e   :  { %v4348_v8 = vpop.eup %4347 }
 0x29f   :  { %v718_v57 = vmul.f32 %v4348_v8, %v666_v55  ;;  %v735_v12 = vpack.c.bf16 %v719_v7, %v719_v7  ;;  %v4350_v23 = vpop.eup %4349  ;;  %v951_v55 = vsub.f32 %v5331_v50, %v5482_v17  ;;  %v7778_v7 = vld [vmem:[#allocation12_spill] sm:$0xff] }
 0x2a0   :  { %1076 = vmatmul.bf16.gmra.mxu3 %v1024_v15  ;;  %v4352_v15 = vpop.eup %4351 }
 0x2a1   :  { %v734_v45 = vpack.c.bf16 %v718_v57, %v718_v57  ;;  %v676_v24 = vpop.f32.mrf.mxu2  ;;  %752 = vst.msk [vmem:[%s7665_s4 + $0x10] sm:$0xf] %vm747_vm1, %v735_v12  ;;  %v977_v14 = vmul.f32 1.442695, %v951_v55  ;;  %v5621_v57 = vperm.slane %v7778_v7, 2  ;;  %v7780_v55 = vld [vmem:[#allocation19_spill] sm:$0xff] }
 0x2a2   :  { %v722_v27 = vmul.f32 %v4350_v23, %v676_v24 }
 0x2a3   :  { %751 = vst.msk [vmem:[%s7665_s4 + $0xc] sm:$0xf] %vm747_vm1, %v734_v45  ;;  %624 = vadd.xlane.f32.xlu1 %v5504_v43  ;;  %4353 = vpow2.f32 %v977_v14 }
 0x2a4   :  { %v738_v10 = vpack.c.bf16 %v722_v27, %v722_v27 }
 0x2a5   :  { %v5589_v44 = vpop.xlane.xlu2 %997 }
 0x2a6   :  { %755 = vst.msk [vmem:[%s7665_s4 + $0x1c] sm:$0xf] %vm747_vm1, %v738_v10 }
 0x2a9   :  { %v4354_v50 = vpop.eup %4353 }
 0x2aa   :  { %v1026_v16 = vpack.c.bf16 %v4352_v15, %v4354_v50 }
 0x2ab   :  { %622 = vadd.xlane.f32.xlu2 %v5506_v52  ;;  %1011 = vadd.xlane.f32.xlu1 %v4352_v15 }
 0x2ad   :  { %v605_v58 = vpop.xlane.xlu2 %604 }
 0x2ae   :  { %4355 = vrcp.f32 %v605_v58  ;;  %v7781_v58 = vld [vmem:[#allocation10_spill] sm:$0xff] }
 0x2b0   :  { %1081 = vmatmul.bf16.gmra.mxu3 %v1025_v2  ;;  %v5607_v2 = vpop.xlane.xlu0 %995 }
 0x2b3   :  { %1009 = vadd.xlane.f32.xlu2 %v4354_v50  ;;  %v5604_v48 = vpop.xlane.xlu1 %1005 }
 0x2b4   :  { %v4356_v17 = vpop.eup %4355 }
 0x2b5   :  { %v716_v43 = vmul.f32 %v4356_v17, %v5532_v54  ;;  %v5596_v38 = vpop.xlane.xlu2 %991 }
 0x2b7   :  { %v732_v11 = vpack.c.bf16 %v716_v43, %v716_v43  ;;  %v1296_v43 = vadd.f32 %v5621_v57, %v5555_v25  ;;  %v7783_v25 = vld [vmem:[#allocation14_spill] sm:$0xff] }
 0x2b8   :  { %v5614_v8 = vpop.xlane.xlu0 %1019 }
 0x2b9   :  { %749 = vst.msk [vmem:[%s7665_s4 + $0x4] sm:$0xf] %vm747_vm1, %v732_v11  ;;  %vm1312_vm3 = vcmp.gt.f32.partialorder %v1296_v43, 0.0 }
 0x2bb   :  { %v621_v54 = vpop.xlane.xlu1 %620 }
 0x2bd   :  { %v5602_v52 = vpop.xlane.xlu2 %1015 }
 0x2c0   :  { %1086 = vmatmul.bf16.gmra.mxu3 %v1026_v16  ;;  %v5630_v15 = vpop.xlane.xlu0 %1007  ;;  %v7782_v16 = vld [vmem:[#allocation5_spill] sm:$0xff] }
 0x2c4   :  { %1284 = vperm.xlu1 %4263, %v7776_v13  }
 0x2c5   :  { %v615_v3 = vpop.xlane.xlu2 %614 }
 0x2c6   :  { %4357 = vrcp.f32 %v615_v3 }
 0x2c7   :  { %4359 = vrcp.f32 %v621_v54  ;;  %v1328_v54 = vmul.f32 0.2, %v1296_v43 }
 0x2c8   :  { %v1237_v11 = vpop.permute.xlu0 %1236 }
 0x2c9   :  { %v1344_v63 = vsel %vm1312_vm3, %v1296_v43, %v1328_v54  ;;  %vm1681_vm3 = vcmask 191616  }
 0x2cb   :  { %1252 = vperm.xlu2 %4261, %v7777_v26  }
 0x2cc   :  { %v4358_v41 = vpop.eup %4357 }
 0x2cd   :  { %v721_v20 = vmul.f32 %v4358_v41, %v674_v32  ;;  %v679_v37 = vpop.f32.mrf.mxu2  ;;  %v5610_v29 = vpop.xlane.xlu2 %632  ;;  %v7779_v32 = vld [vmem:[#allocation7_spill] sm:$0xff] }
 0x2ce   :  { %v4360_v5 = vpop.eup %4359 }
 0x2cf   :  { %v737_v56 = vpack.c.bf16 %v721_v20, %v721_v20 }
 0x2d0   :  { %1091 = vmatmul.bf16.gmra.mxu3 %v1027_v53 }
 0x2d1   :  { %754 = vst.msk [vmem:[%s7665_s4 + $0x18] sm:$0xf] %vm747_vm1, %v737_v56 }
 0x2d3   :  { %1264 = vperm.xlu2 %4261, %v7779_v32   ;;  %v1241_v12 = vpop.permute.xlu1 %1240 }
 0x2d4   :  { %v1298_v23 = vadd.f32 %v5621_v57, %v1241_v12  ;;  %v5655_v12 = vadd.f32 %v7783_v25, %v1344_v63  ;;  %v7785_v63 = vld [vmem:[#allocation21_spill] sm:$0xff] }
 0x2d5   :  { %v681_v9 = vpop.f32.mrf.mxu2  ;;  %v5625_v61 = vpop.xlane.xlu2 %1003 }
 0x2d6   :  { %v1330_v45 = vmul.f32 0.2, %v1298_v23  ;;  %v724_v24 = vmul.f32 %v4360_v5, %v681_v9  ;;  %vm1314_vm2 = vcmp.gt.f32.partialorder %v1298_v23, 0.0 }
 0x2d8   :  { %v740_v27 = vpack.c.bf16 %v724_v24, %v724_v24  ;;  %v1346_v10 = vsel %vm1314_vm2, %v1298_v23, %v1330_v45  ;;  %vm1214_vm2 = vcmask 126016  }
 0x2d9   :  { %v5628_v14 = vadd.f32 %v7780_v55, %v1346_v10 }
 0x2da   :  { %757 = vst.msk [vmem:[%s7665_s4 + $0x24] sm:$0xf] %vm747_vm1, %v740_v27  ;;  %v7784_v27 = vld [vmem:[#allocation22_spill] sm:$0xff] }
 0x2db   :  { %1276 = vperm.xlu2 %4261, %v7781_v58   ;;  %1380 = vmax.xlane.f32.xlu0 %v5628_v14 }
 0x2dd   :  { %v5638_v50 = vpop.f32.mrf.mxu2  ;;  %v619_v17 = vpop.xlane.xlu2 %618 }
 0x2de   :  { %4361 = vrcp.f32 %v619_v17 }
 0x2df   :  { %4363 = vrcp.f32 %v5569_v31 }
 0x2e0   :  { %1096 = vmatmul.bf16.gmra.mxu3 %v1028_v60  ;;  %v1257_v60 = vpop.permute.xlu0 %1256  ;;  %4365 = vrcp.f32 %v5522_v6 }
 0x2e1   :  { %v1302_v45 = vadd.f32 %v5621_v57, %v1257_v60  ;;  %4367 = vrcp.f32 %v5553_v4  ;;  %v1297_v4 = vadd.f32 %v5621_v57, %v1237_v11 }
 0x2e2   :  { %4369 = vrcp.f32 %v5610_v29 }
 0x2e3   :  { %1288 = vperm.xlu2 %4261, %v7782_v16   ;;  %v1334_v43 = vmul.f32 0.2, %v1302_v45  ;;  %vm1318_vm5 = vcmp.gt.f32.partialorder %v1302_v45, 0.0  ;;  %vm1313_vm7 = vcmp.gt.f32.partialorder %v1297_v4, 0.0  ;;  %4371 = vrcp.f32 %v5537_v34 }
 0x2e4   :  { %v4362_v3 = vpop.eup %4361 }
 0x2e5   :  { %v723_v41 = vmul.f32 %v4362_v3, %v679_v37  ;;  %v5646_v20 = vpop.f32.mrf.mxu2  ;;  %v1245_v53 = vpop.permute.xlu2 %1244 }
 0x2e6   :  { %v1299_v30 = vadd.f32 %v5621_v57, %v1245_v53  ;;  %v4364_v37 = vpop.eup %4363 }
 0x2e7   :  { %v739_v56 = vpack.c.bf16 %v723_v41, %v723_v41  ;;  %v4366_v17 = vpop.eup %4365 }
 0x2e8   :  { %v1331_v23 = vmul.f32 0.2, %v1299_v30  ;;  %vm1315_vm4 = vcmp.gt.f32.partialorder %v1299_v30, 0.0  ;;  %v1269_v54 = vpop.permute.xlu0 %1268 }
 0x2e9   :  { %756 = vst.msk [vmem:[%s7665_s4 + $0x20] sm:$0xf] %vm747_vm1, %v739_v56  ;;  %v1305_v53 = vadd.f32 %v5621_v57, %v1269_v54  ;;  %v1350_v56 = vsel %vm1318_vm5, %v1302_v45, %v1334_v43 }
 0x2ea   :  { %v1347_v24 = vsel %vm1315_vm4, %v1299_v30, %v1331_v23  ;;  %v1249_v30 = vpop.permute.xlu1 %1248  ;;  %v5675_v60 = vadd.f32 %v7785_v63, %v1350_v56 }
 0x2eb   :  { %v5665_v10 = vadd.f32 %v7784_v27, %v1347_v24  ;;  %v1337_v23 = vmul.f32 0.2, %v1305_v53  ;;  %vm1321_vm6 = vcmp.gt.f32.partialorder %v1305_v53, 0.0  ;;  %v1329_v24 = vmul.f32 0.2, %v1297_v4 }
 0x2ec   :  { %v1300_v29 = vadd.f32 %v5621_v57, %v1249_v30  ;;  %v7787_v30 = vld [vmem:[#allocation13_spill] sm:$0xff] }
 0x2ed   :  { %v689_v5 = vpop.f32.mrf.mxu2  ;;  %v1353_v45 = vsel %vm1321_vm6, %v1305_v53, %v1337_v23  ;;  %v1345_v11 = vsel %vm1313_vm7, %v1297_v4, %v1329_v24  ;;  %v7786_v53 = vld [vmem:[#allocation15_spill] sm:$0xff] }
 0x2ee   :  { %v727_v9 = vmul.f32 %v4364_v37, %v689_v5  ;;  %1376 = vmax.xlane.f32.xlu1 %v5655_v12  ;;  %v4368_v37 = vpop.eup %4367  ;;  %v5685_v43 = vadd.f32 %v5300_v21, %v1353_v45  ;;  %v5694_v56 = vadd.f32 %v7786_v53, %v1345_v11  ;;  %vm1316_vm8 = vcmp.gt.f32.partialorder %v1300_v29, 0.0 }
 0x2f0   :  { %v743_v31 = vpack.c.bf16 %v727_v9, %v727_v9 }
 0x2f2   :  { %760 = vst.msk [vmem:[%s7665_s4 + $0x30] sm:$0xf] %vm747_vm1, %v743_v31 }
 0x2f3   :  { %v1062_v45 = vpop.f32.mrf.mxu3 }
 0x2f5   :  { %v691_v3 = vpop.f32.mrf.mxu2 }
 0x2f6   :  { %v728_v41 = vmul.f32 %v4366_v17, %v691_v3  ;;  %1382 = vmax.xlane.f32.xlu1 %v5665_v10  ;;  %v1261_v17 = vpop.permute.xlu1 %1260  ;;  %v4370_v3 = vpop.eup %4369 }
 0x2f8   :  { %v744_v6 = vpack.c.bf16 %v728_v41, %v728_v41 }
 0x2fa   :  { %761 = vst.msk [vmem:[%s7665_s4 + $0x34] sm:$0xf] %vm747_vm1, %v744_v6 }
 0x2fd   :  { %v694_v5 = vpop.f32.mrf.mxu2 }
 0x2fe   :  { %v729_v9 = vmul.f32 %v4368_v37, %v694_v5  ;;  %1388 = vmax.xlane.f32.xlu1 %v5675_v60  ;;  %v1332_v37 = vmul.f32 0.2, %v1300_v29  ;;  %v1273_v23 = vpop.permute.xlu1 %1272  ;;  %v1303_v5 = vadd.f32 %v5621_v57, %v1261_v17 }
 0x300   :  { %v745_v31 = vpack.c.bf16 %v729_v9, %v729_v9  ;;  %v1348_v9 = vsel %vm1316_vm8, %v1300_v29, %v1332_v37  ;;  %vm1319_vm9 = vcmp.gt.f32.partialorder %v1303_v5, 0.0 }
 0x301   :  { %v5700_v4 = vadd.f32 %v7787_v30, %v1348_v9 }
 0x302   :  { %762 = vst.msk [vmem:[%s7665_s4 + $0x38] sm:$0xf] %vm747_vm1, %v745_v31  ;;  %v1335_v31 = vmul.f32 0.2, %v1303_v5 }
 0x305   :  { %v696_v54 = vpop.f32.mrf.mxu2 }
 0x306   :  { %v730_v41 = vmul.f32 %v4370_v3, %v696_v54  ;;  %1394 = vmax.xlane.f32.xlu1 %v5685_v43  ;;  %v1306_v3 = vadd.f32 %v5621_v57, %v1273_v23  ;;  %v1351_v54 = vsel %vm1319_vm9, %v1303_v5, %v1335_v31 }
 0x308   :  { %v746_v6 = vpack.c.bf16 %v730_v41, %v730_v41  ;;  %v4372_v41 = vpop.eup %4371  ;;  %v1338_v29 = vmul.f32 0.2, %v1306_v3  ;;  %vm1322_vm10 = vcmp.gt.f32.partialorder %v1306_v3, 0.0 }
 0x309   :  { %v1118_v11 = vmul.f32 %v4372_v41, %v1062_v45 }
 0x30a   :  { %763 = vst.msk [vmem:[%s7665_s4 + $0x3c] sm:$0xf] %vm747_vm1, %v746_v6  ;;  %v7788_v6 = vld [vmem:[#allocation23_spill] sm:$0xff]  ;;  %v1354_v23 = vsel %vm1322_vm10, %v1306_v3, %v1338_v29 }
 0x30b   :  { %v5705_v17 = vadd.f32 %v7788_v6, %v1351_v54  ;;  %v1134_v37 = vpack.c.bf16 %v1118_v11, %v1118_v11  ;;  %v5715_v5 = vadd.f32 %v5309_v62, %v1354_v23  ;;  %v1064_v11 = vpop.f32.mrf.mxu3 }
 0x30c   :  { %1378 = vmax.xlane.f32.xlu2 %v5694_v56 }
 0x314   :  { %1384 = vmax.xlane.f32.xlu2 %v5700_v4 }
 0x316   :  { %v625_v24 = vpop.xlane.xlu1 %624 }
 0x317   :  { %4373 = vrcp.f32 %v625_v24 }
 0x31c   :  { %1390 = vmax.xlane.f32.xlu2 %v5705_v17 }
 0x31d   :  { %v4374_v34 = vpop.eup %4373 }
 0x31e   :  { %v726_v9 = vmul.f32 %v4374_v34, %v5646_v20  ;;  %v623_v21 = vpop.xlane.xlu2 %622  ;;  %v7789_v34 = vld [vmem:[#allocation16_spill] sm:$0xff]  ;;  %v5749_v63 = vpop.xlane.xlu1 %1011 }
 0x31f   :  { %1166 = vrot.lane.b32.xlu1 %v1134_v37, %s4819_s24  ;;  %4375 = vrcp.f32 %v623_v21 }
 0x320   :  { %v742_v24 = vpack.c.bf16 %v726_v9, %v726_v9  ;;  %4377 = vrcp.f32 %v5596_v38 }
 0x321   :  { %4379 = vrcp.f32 %v5547_v28 }
 0x322   :  { %759 = vst.msk [vmem:[%s7665_s4 + $0x2c] sm:$0xf] %vm747_vm1, %v742_v24  ;;  %v1281_v24 = vpop.permute.xlu0 %1280  ;;  %4381 = vrcp.f32 %v5607_v2 }
 0x324   :  { %1396 = vmax.xlane.f32.xlu2 %v5715_v5 }
 0x325   :  { %v4376_v31 = vpop.eup %4375 }
 0x326   :  { %v5718_v45 = vpop.xlane.xlu2 %1009  ;;  %v725_v20 = vmul.f32 %v4376_v31, %v5638_v50  ;;  %v4378_v9 = vpop.eup %4377 }
 0x327   :  { %v1119_v50 = vmul.f32 %v4378_v9, %v1064_v11 }
 0x328   :  { %v741_v54 = vpack.c.bf16 %v725_v20, %v725_v20 }
 0x329   :  { %v1135_v38 = vpack.c.bf16 %v1119_v50, %v1119_v50 }
 0x32a   :  { %758 = vst.msk [vmem:[%s7665_s4 + $0x28] sm:$0xf] %vm747_vm1, %v741_v54  ;;  %v1293_v9 = vpop.permute.xlu0 %1292 }
 0x32b   :  { %v1311_v50 = vadd.f32 %v5621_v57, %v1293_v9 }
 0x32d   :  { %v1343_v6 = vmul.f32 0.2, %v1311_v50  ;;  %vm1327_vm15 = vcmp.gt.f32.partialorder %v1311_v50, 0.0 }
 0x32e   :  { %v1253_v21 = vpop.permute.xlu2 %1252 }
 0x32f   :  { %v1301_v3 = vadd.f32 %v5621_v57, %v1253_v21  ;;  %v1308_v21 = vadd.f32 %v5621_v57, %v1281_v24 }
 0x331   :  { %v1333_v41 = vmul.f32 0.2, %v1301_v3  ;;  %vm1317_vm11 = vcmp.gt.f32.partialorder %v1301_v3, 0.0  ;;  %vm1324_vm13 = vcmp.gt.f32.partialorder %v1308_v21, 0.0 }
 0x333   :  { %v1349_v29 = vsel %vm1317_vm11, %v1301_v3, %v1333_v41 }
 0x334   :  { %v5728_v37 = vadd.f32 %v7789_v34, %v1349_v29  ;;  %v1340_v29 = vmul.f32 0.2, %v1308_v21 }
 0x336   :  { %1386 = vmax.xlane.f32.xlu0 %v5728_v37  ;;  %v1265_v23 = vpop.permute.xlu2 %1264 }
 0x337   :  { %v1304_v31 = vadd.f32 %v5621_v57, %v1265_v23 }
 0x339   :  { %v1336_v20 = vmul.f32 0.2, %v1304_v31  ;;  %vm1320_vm12 = vcmp.gt.f32.partialorder %v1304_v31, 0.0 }
 0x33b   :  { %v1352_v54 = vsel %vm1320_vm12, %v1304_v31, %v1336_v20  ;;  %v7790_v31 = vld [vmem:[#allocation30_spill] sm:$0xff]  ;;  %v1356_v20 = vsel %vm1324_vm13, %v1308_v21, %v1340_v29  ;;  %v4380_v21 = vpop.eup %4379 }
 0x33c   :  { %1168 = vrot.lane.b32.xlu2 %v1135_v38, %s4819_s24  ;;  %v5735_v3 = vadd.f32 %v5288_v19, %v1352_v54  ;;  %v7791_v38 = vld [vmem:[#allocation17_spill] sm:$0xff]  ;;  %v4382_v30 = vpop.eup %4381  ;;  %v7793_v19 = vld [vmem:[#allocation18_spill] sm:$0xff] }
 0x33d   :  { %v5745_v54 = vadd.f32 %v7791_v38, %v1356_v20 }
 0x33e   :  { %1392 = vmax.xlane.f32.xlu0 %v5735_v3  ;;  %v1277_v41 = vpop.permute.xlu2 %1276 }
 0x33f   :  { %v1307_v11 = vadd.f32 %v5621_v57, %v1277_v41  ;;  %v1359_v41 = vsel %vm1327_vm15, %v1311_v50, %v1343_v6 }
 0x341   :  { %v1339_v23 = vmul.f32 0.2, %v1307_v11  ;;  %vm1323_vm14 = vcmp.gt.f32.partialorder %v1307_v11, 0.0 }
 0x343   :  { %v1355_v62 = vsel %vm1323_vm14, %v1307_v11, %v1339_v23  ;;  %v7792_v11 = vld [vmem:[#allocation24_spill] sm:$0xff]  ;;  %v1285_v23 = vpop.permute.xlu1 %1284 }
 0x344   :  { %v5741_v24 = vadd.f32 %v7790_v31, %v1355_v62  ;;  %v5752_v9 = vadd.f32 %v7792_v11, %v1359_v41  ;;  %v1067_v62 = vpop.f32.mrf.mxu3  ;;  %v1309_v38 = vadd.f32 %v5621_v57, %v1285_v23 }
 0x345   :  { %v1120_v29 = vmul.f32 %v4380_v21, %v1067_v62 }
 0x346   :  { %1398 = vmax.xlane.f32.xlu0 %v5741_v24  ;;  %v1341_v31 = vmul.f32 0.2, %v1309_v38  ;;  %vm1325_vm0 = vcmp.gt.f32.partialorder %v1309_v38, 0.0 }
 0x347   :  { %v1136_v20 = vpack.c.bf16 %v1120_v29, %v1120_v29 }
 0x348   :  { %v1357_v28 = vsel %vm1325_vm0, %v1309_v38, %v1341_v31 }
 0x349   :  { %1400 = vmax.xlane.f32.xlu1 %v5745_v54  ;;  %v5760_v27 = vadd.f32 %v7793_v19, %v1357_v28 }
 0x34c   :  { %v1069_v6 = vpop.f32.mrf.mxu3 }
 0x34d   :  { %v1121_v62 = vmul.f32 %v4382_v30, %v1069_v6 }
 0x34e   :  { %v1381_v41 = vpop.xlane.xlu0 %1380 }
 0x34f   :  { %v1410_v29 = vsub.f32 %v5628_v14, %v1381_v41  ;;  %v1137_v23 = vpack.c.bf16 %v1121_v62, %v1121_v62 }
 0x351   :  { %1406 = vmax.xlane.f32.xlu1 %v5752_v9  ;;  %v1428_v2 = vmul.f32 1.442695, %v1410_v29 }
 0x35a   :  { %1170 = vrot.lane.b32.xlu0 %v1136_v20, %s4819_s24 }
 0x361   :  { %v1377_v50 = vpop.xlane.xlu1 %1376 }
 0x362   :  { %v1408_v11 = vsub.f32 %v5655_v12, %v1377_v50  ;;  %v1072_v50 = vpop.f32.mrf.mxu3 }
 0x364   :  { %v1424_v21 = vmul.f32 1.442695, %v1408_v11  ;;  %v1289_v11 = vpop.permute.xlu2 %1288 }
 0x365   :  { %1402 = vmax.xlane.f32.xlu2 %v5760_v27  ;;  %v1310_v6 = vadd.f32 %v5621_v57, %v1289_v11 }
 0x366   :  { %4383 = vpow2.f32 %v1424_v21 }
 0x367   :  { %4385 = vpow2.f32 %v1428_v2  ;;  %vm1326_vm1 = vcmp.gt.f32.partialorder %v1310_v6, 0.0 }
 0x369   :  { %v1383_v20 = vpop.xlane.xlu1 %1382 }
 0x36a   :  { %v1411_v31 = vsub.f32 %v5665_v10, %v1383_v20  ;;  %1172 = vrot.lane.b32.xlu1 %v1137_v23, %s4819_s24  ;;  %v1342_v10 = vmul.f32 0.2, %v1310_v6 }
 0x36c   :  { %v5766_v38 = vpop.eup %4383  ;;  %v1430_v12 = vmul.f32 1.442695, %v1411_v31  ;;  %v1358_v23 = vsel %vm1326_vm1, %v1310_v6, %v1342_v10  ;;  %v7794_v31 = vld [vmem:[#allocation20_spill] sm:$0xff] }
 0x36d   :  { %1456 = vadd.xlane.f32.xlu2 %v5766_v38  ;;  %v5769_v30 = vpop.eup %4385 }
 0x36e   :  { %4387 = vpow2.f32 %v1430_v12  ;;  %v5779_v12 = vadd.f32 %v7794_v31, %v1358_v23 }
 0x36f   :  { %4389 = vrcp.f32 %v5589_v44 }
 0x371   :  { %v1389_v21 = vpop.xlane.xlu1 %1388 }
 0x374   :  { %v5771_v14 = vpop.eup %4387 }
 0x375   :  { %v4390_v41 = vpop.eup %4389 }
 0x376   :  { %v1122_v62 = vmul.f32 %v4390_v41, %v1072_v50  ;;  %v1414_v50 = vsub.f32 %v5675_v60, %v1389_v21  ;;  %v1074_v60 = vpop.f32.mrf.mxu3 }
 0x378   :  { %v1138_v19 = vpack.c.bf16 %v1122_v62, %v1122_v62 }
 0x379   :  { %v1395_v57 = vpop.xlane.xlu1 %1394 }
 0x37f   :  { %v1379_v29 = vpop.xlane.xlu2 %1378 }
 0x380   :  { %v1409_v2 = vsub.f32 %v5694_v56, %v1379_v29  ;;  %v1436_v56 = vmul.f32 1.442695, %v1414_v50 }
 0x382   :  { %v1426_v20 = vmul.f32 1.442695, %v1409_v2 }
 0x384   :  { %4391 = vpow2.f32 %v1426_v20  ;;  %1404 = vmax.xlane.f32.xlu0 %v5779_v12 }
 0x385   :  { %1174 = vrot.lane.b32.xlu2 %v1138_v19, %s4819_s24  ;;  %4393 = vrcp.f32 %v5535_v18 }
 0x386   :  { %4395 = vpow2.f32 %v1436_v56 }
 0x387   :  { %v1385_v44 = vpop.xlane.xlu2 %1384 }
 0x388   :  { %v1412_v56 = vsub.f32 %v5700_v4, %v1385_v44  ;;  %v1077_v44 = vpop.f32.mrf.mxu3 }
 0x38a   :  { %v5783_v11 = vpop.eup %4391 }
 0x38b   :  { %v4394_v29 = vpop.eup %4393 }
 0x38c   :  { %1458 = vadd.xlane.f32.xlu0 %v5783_v11  ;;  %v5798_v23 = vpop.eup %4395  ;;  %v1123_v2 = vmul.f32 %v4394_v29, %v1074_v60  ;;  %v1417_v60 = vsub.f32 %v5685_v43, %v1395_v57 }
 0x38e   :  { %v1139_v20 = vpack.c.bf16 %v1123_v2, %v1123_v2  ;;  %v1442_v29 = vmul.f32 1.442695, %v1417_v60 }
 0x38f   :  { %v1391_v10 = vpop.xlane.xlu2 %1390 }
 0x390   :  { %v1415_v41 = vsub.f32 %v5705_v17, %v1391_v10  ;;  %v1432_v10 = vmul.f32 1.442695, %v1412_v56  ;;  %v1079_v56 = vpop.f32.mrf.mxu3 }
 0x391   :  { %v1167_v62 = vpop.permute.xlu1 %1166 }
 0x392   :  { %v1438_v19 = vmul.f32 1.442695, %v1415_v41  ;;  %1215 = vst.msk [vmem:[%s7665_s4] sm:$0xf] %vm1214_vm2, %v1167_v62 }
 0x394   :  { %4397 = vpow2.f32 %v1438_v19  ;;  %1460 = vadd.xlane.f32.xlu1 %v5769_v30 }
 0x395   :  { %4399 = vpow2.f32 %v1432_v10 }
 0x397   :  { %v5796_v21 = vpop.xlane.xlu2 %1396 }
 0x39a   :  { %v5800_v17 = vpop.eup %4397 }
 0x39f   :  { %v1169_v50 = vpop.permute.xlu2 %1168 }
 0x3a0   :  { %1216 = vst.msk [vmem:[%s7665_s4 + $0x4] sm:$0xf] %vm1214_vm2, %v1169_v50  ;;  %1176 = vrot.lane.b32.xlu0 %v1139_v20, %s4819_s24  ;;  %v5814_v50 = vpop.eup %4399 }
 0x3a9   :  { %v1387_v41 = vpop.xlane.xlu0 %1386 }
 0x3aa   :  { %v1413_v62 = vsub.f32 %v5728_v37, %v1387_v41 }
 0x3ac   :  { %v1434_v19 = vmul.f32 1.442695, %v1413_v62 }
 0x3ae   :  { %4401 = vpow2.f32 %v1434_v19  ;;  %1462 = vadd.xlane.f32.xlu2 %v5771_v14 }
 0x3af   :  { %4403 = vpow2.f32 %v1442_v29 }
 0x3b1   :  { %v1393_v2 = vpop.xlane.xlu0 %1392 }
 0x3b2   :  { %v1416_v18 = vsub.f32 %v5735_v3, %v1393_v2 }
 0x3b4   :  { %v5816_v20 = vpop.eup %4401  ;;  %v1440_v4 = vmul.f32 1.442695, %v1416_v18 }
 0x3b5   :  { %1466 = vadd.xlane.f32.xlu1 %v5816_v20  ;;  %v5822_v43 = vpop.eup %4403 }
 0x3b6   :  { %4405 = vpow2.f32 %v1440_v4  ;;  %1468 = vadd.xlane.f32.xlu2 %v5798_v23 }
 0x3b7   :  { %4407 = vrcp.f32 %v5561_v59 }
 0x3b8   :  { %4409 = vrcp.f32 %v5625_v61 }
 0x3b9   :  { %v1399_v18 = vpop.xlane.xlu0 %1398  ;;  %4411 = vrcp.f32 %v5604_v48 }
 0x3bc   :  { %v5824_v57 = vpop.eup %4405  ;;  %v1401_v60 = vpop.xlane.xlu1 %1400 }
 0x3bd   :  { %v4408_v10 = vpop.eup %4407  ;;  %v1420_v59 = vsub.f32 %v5745_v54, %v1401_v60 }
 0x3be   :  { %v4410_v41 = vpop.eup %4409  ;;  %v1124_v62 = vmul.f32 %v4408_v10, %v1077_v44 }
 0x3bf   :  { %v1125_v19 = vmul.f32 %v4410_v41, %v1079_v56  ;;  %v1448_v44 = vmul.f32 1.442695, %v1420_v59 }
 0x3c0   :  { %v1140_v29 = vpack.c.bf16 %v1124_v62, %v1124_v62 }
 0x3c1   :  { %v1141_v2 = vpack.c.bf16 %v1125_v19, %v1125_v19  ;;  %4413 = vpow2.f32 %v1448_v44  ;;  %v1082_v19 = vpop.f32.mrf.mxu3  ;;  %v1419_v44 = vsub.f32 %v5741_v24, %v1399_v18  ;;  %v1418_v18 = vsub.f32 %v5715_v5, %v5796_v21 }
 0x3c4   :  { %v1407_v61 = vpop.xlane.xlu1 %1406 }
 0x3ca   :  { %1464 = vadd.xlane.f32.xlu0 %v5814_v50 }
 0x3cc   :  { %v1171_v4 = vpop.permute.xlu0 %1170 }
 0x3cd   :  { %1217 = vst.msk [vmem:[%s7665_s4 + $0x8] sm:$0xf] %vm1214_vm2, %v1171_v4 }
 0x3ce   :  { %1180 = vrot.lane.b32.xlu2 %v1141_v2, %s4819_s24  ;;  %1178 = vrot.lane.b32.xlu1 %v1140_v29, %s4819_s24  ;;  %v4412_v29 = vpop.eup %4411 }
 0x3cf   :  { %v1126_v2 = vmul.f32 %v4412_v29, %v1082_v19  ;;  %v5847_v60 = vpop.eup %4413 }
 0x3d1   :  { %v1142_v48 = vpack.c.bf16 %v1126_v2, %v1126_v2 }
 0x3d2   :  { %1470 = vadd.xlane.f32.xlu0 %v5800_v17 }
 0x3d8   :  { %v1403_v56 = vpop.xlane.xlu2 %1402 }
 0x3d9   :  { %v1421_v10 = vsub.f32 %v5760_v27, %v1403_v56  ;;  %v1423_v56 = vsub.f32 %v5752_v9, %v1407_v61  ;;  %v1084_v9 = vpop.f32.mrf.mxu3 }
 0x3db   :  { %v1450_v41 = vmul.f32 1.442695, %v1421_v10  ;;  %v1446_v10 = vmul.f32 1.442695, %v1419_v44 }
 0x3dc   :  { %v1173_v62 = vpop.permute.xlu1 %1172 }
 0x3dd   :  { %4415 = vpow2.f32 %v1450_v41  ;;  %1218 = vst.msk [vmem:[%s7665_s4 + $0xc] sm:$0xf] %vm1214_vm2, %v1173_v62  ;;  %v1454_v41 = vmul.f32 1.442695, %v1423_v56 }
 0x3de   :  { %4417 = vpow2.f32 %v1446_v10 }
 0x3df   :  { %4419 = vpow2.f32 %v1454_v41 }
 0x3e0   :  { %v5845_v54 = vpop.xlane.xlu2 %1456 }
 0x3e1   :  { %v1087_v44 = vpop.f32.mrf.mxu3 }
 0x3e3   :  { %v5849_v4 = vpop.eup %4415 }
 0x3e4   :  { %v5863_v2 = vpop.eup %4417 }
 0x3e5   :  { %v5867_v24 = vpop.eup %4419 }
 0x3e6   :  { %1182 = vrot.lane.b32.xlu0 %v1142_v48, %s4819_s24  ;;  %v1444_v48 = vmul.f32 1.442695, %v1418_v18 }
 0x3e8   :  { %v1175_v59 = vpop.permute.xlu2 %1174 }
 0x3e9   :  { %1219 = vst.msk [vmem:[%s7665_s4 + $0x10] sm:$0xf] %vm1214_vm2, %v1175_v59 }
 0x3f7   :  { %1474 = vadd.xlane.f32.xlu2 %v5822_v43  ;;  %v1405_v62 = vpop.xlane.xlu0 %1404 }
 0x3f8   :  { %v1422_v19 = vsub.f32 %v5779_v12, %v1405_v62  ;;  %1472 = vadd.xlane.f32.xlu1 %v5824_v57 }
 0x3fa   :  { %v1452_v29 = vmul.f32 1.442695, %v1422_v19  ;;  %v1089_v19 = vpop.f32.mrf.mxu3 }
 0x3fc   :  { %4421 = vpow2.f32 %v1452_v29 }
 0x3fd   :  { %4423 = vpow2.f32 %v1444_v48 }
 0x3fe   :  { %4425 = vrcp.f32 %v5718_v45 }
 0x3ff   :  { %1480 = vadd.xlane.f32.xlu2 %v5847_v60  ;;  %v5876_v59 = vpop.xlane.xlu0 %1458  ;;  %4427 = vrcp.f32 %v5630_v15 }
 0x400   :  { %1478 = vadd.xlane.f32.xlu1 %v5863_v2  ;;  %4429 = vrcp.f32 %v5749_v63 }
 0x401   :  { %4431 = vrcp.f32 %v5557_v36 }
 0x402   :  { %v5871_v61 = vpop.eup %4421  ;;  %v1092_v15 = vpop.f32.mrf.mxu3  ;;  %4433 = vrcp.f32 %v5602_v52 }
 0x403   :  { %v5879_v56 = vpop.eup %4423  ;;  %4435 = vrcp.f32 %v5541_v22  ;;  %v5948_v22 = vld [vmem:[%s7663_s0 + $0x10] sm:$0xff] }
 0x404   :  { %v4426_v10 = vpop.eup %4425  ;;  %4437 = vrcp.f32 %v5614_v8  ;;  %7798 = vst [vmem:[#allocation11_spill] sm:$0xff] %v5948_v22  ;;  %v5962_v8 = vld [vmem:[%s7663_s0 + $0x28] sm:$0xff] }
 0x405   :  { %v1128_v5 = vmul.f32 %v4426_v10, %v1087_v44  ;;  %v4428_v21 = vpop.eup %4427  ;;  %7800 = vst [vmem:[#allocation8_spill] sm:$0xff] %v5962_v8  ;;  %4439 = vrcp.f32 %v5845_v54 }
 0x406   :  { %v1127_v62 = vmul.f32 %v4428_v21, %v1084_v9  ;;  %v4430_v9 = vpop.eup %4429  ;;  %4441 = vrcp.f32 %v5876_v59 }
 0x407   :  { %v1144_v45 = vpack.c.bf16 %v1128_v5, %v1128_v5  ;;  %v1129_v48 = vmul.f32 %v4430_v9, %v1089_v19  ;;  %v5896_v5 = vpop.xlane.xlu1 %1460 }
 0x408   :  { %v1143_v29 = vpack.c.bf16 %v1127_v62, %v1127_v62  ;;  %v5905_v62 = vld [vmem:[%s7663_s0] sm:$0xff]  ;;  %4443 = vrcp.f32 %v5896_v5 }
 0x409   :  { %v1145_v21 = vpack.c.bf16 %v1129_v48, %v1129_v48  ;;  %7795 = vst [vmem:[#allocation2_spill] sm:$0xff] %v5905_v62  ;;  %v5921_v48 = vld [vmem:[%s7663_s0 + $0x18] sm:$0xff] }
 0x40a   :  { %v1094_v44 = vpop.f32.mrf.mxu3  ;;  %7796 = vst [vmem:[#allocation28_spill] sm:$0xff] %v5921_v48 }
 0x410   :  { %1476 = vadd.xlane.f32.xlu0 %v5879_v56 }
 0x412   :  { %v1177_v41 = vpop.permute.xlu0 %1176  ;;  %v1097_v63 = vpop.f32.mrf.mxu3 }
 0x413   :  { %1220 = vst.msk [vmem:[%s7665_s4 + $0x14] sm:$0xf] %vm1214_vm2, %v1177_v41 }
 0x417   :  { %1186 = vrot.lane.b32.xlu2 %v1144_v45, %s4819_s24  ;;  %v4432_v45 = vpop.eup %4431 }
 0x418   :  { %1482 = vadd.xlane.f32.xlu0 %v5849_v4  ;;  %v1132_v36 = vmul.f32 %v4432_v45, %v1097_v63  ;;  %v4434_v45 = vpop.eup %4433 }
 0x419   :  { %1184 = vrot.lane.b32.xlu1 %v1143_v29, %s4819_s24 }
 0x41a   :  { %v1148_v29 = vpack.c.bf16 %v1132_v36, %v1132_v36  ;;  %v1131_v36 = vmul.f32 %v4434_v45, %v1094_v44 }
 0x41c   :  { %v1147_v12 = vpack.c.bf16 %v1131_v36, %v1131_v36 }
 0x421   :  { %v5890_v18 = vpop.xlane.xlu2 %1462 }
 0x422   :  { %4445 = vrcp.f32 %v5890_v18 }
 0x428   :  { %v5909_v19 = vpop.xlane.xlu1 %1466 }
 0x429   :  { %v5892_v10 = vpop.xlane.xlu2 %1468 }
 0x42c   :  { %1188 = vrot.lane.b32.xlu0 %v1145_v21, %s4819_s24 }
 0x431   :  { %v1181_v41 = vpop.permute.xlu2 %1180 }
 0x432   :  { %1222 = vst.msk [vmem:[%s7665_s4 + $0x1c] sm:$0xf] %vm1214_vm2, %v1181_v41  ;;  %v5931_v41 = vld [vmem:[%s7663_s0 + $0x30] sm:$0xff] }
 0x433   :  { %7797 = vst [vmem:[#allocation29_spill] sm:$0xff] %v5931_v41 }
 0x434   :  { %1496 = vrot.lane.b32.xlu0 %v5905_v62, %s4820_s16 }
 0x43c   :  { %1194 = vrot.lane.b32.xlu0 %v1148_v29, %s4819_s24  ;;  %v4436_v29 = vpop.eup %4435 }
 0x43d   :  { %v5925_v21 = vpop.xlane.xlu0 %1464 }
 0x43e   :  { %4447 = vrcp.f32 %v5925_v21 }
 0x43f   :  { %4449 = vrcp.f32 %v5909_v19 }
 0x440   :  { %1486 = vadd.xlane.f32.xlu2 %v5867_v24  ;;  %v1179_v9 = vpop.permute.xlu1 %1178  ;;  %4451 = vrcp.f32 %v5892_v10 }
 0x441   :  { %1221 = vst.msk [vmem:[%s7665_s4 + $0x18] sm:$0xf] %vm1214_vm2, %v1179_v9  ;;  %v1130_v9 = vmul.f32 %v4436_v29, %v1092_v15  ;;  %v5955_v15 = vld [vmem:[%s7663_s0 + $0x8] sm:$0xff] }
 0x442   :  { %7799 = vst [vmem:[#allocation6_spill] sm:$0xff] %v5955_v15 }
 0x443   :  { %1484 = vadd.xlane.f32.xlu1 %v5871_v61  ;;  %v1146_v27 = vpack.c.bf16 %v1130_v9, %v1130_v9  ;;  %v5974_v9 = vld [vmem:[%s7663_s0 + $0x20] sm:$0xff] }
 0x444   :  { %1502 = vrot.lane.b32.xlu0 %v5921_v48, %s4820_s16  ;;  %7801 = vst [vmem:[#allocation9_spill] sm:$0xff] %v5974_v9 }
 0x445   :  { %v5936_v63 = vpop.xlane.xlu0 %1470 }
 0x446   :  { %4453 = vrcp.f32 %v5936_v63 }
 0x44c   :  { %1508 = vrot.lane.b32.xlu0 %v5931_v41, %s4820_s16 }
 0x458   :  { %1192 = vrot.lane.b32.xlu2 %v1147_v12, %s4819_s24  ;;  %v1183_v52 = vpop.permute.xlu0 %1182  ;;  %v1099_v12 = vpop.f32.mrf.mxu3 }
 0x459   :  { %1223 = vst.msk [vmem:[%s7665_s4 + $0x20] sm:$0xf] %vm1214_vm2, %v1183_v52 }
 0x45c   :  { %1190 = vrot.lane.b32.xlu1 %v1146_v27, %s4819_s24  ;;  %v4438_v27 = vpop.eup %4437 }
 0x45d   :  { %v1133_v44 = vmul.f32 %v4438_v27, %v1099_v12  ;;  %v5987_v27 = vld [vmem:[%s7663_s0 + $0x38] sm:$0xff] }
 0x45e   :  { %7802 = vst [vmem:[#allocation4_spill] sm:$0xff] %v5987_v27 }
 0x45f   :  { %v1149_v45 = vpack.c.bf16 %v1133_v44, %v1133_v44 }
 0x460   :  { %1500 = vrot.lane.b32.xlu2 %v5948_v22, %s4820_s16 }
 0x464   :  { %1498 = vrot.lane.b32.xlu1 %v5955_v15, %s4820_s16 }
 0x468   :  { %1506 = vrot.lane.b32.xlu2 %v5962_v8, %s4820_s16 }
 0x46a   :  { %v5966_v36 = vpop.xlane.xlu2 %1474 }
 0x46b   :  { %v5978_v52 = vpop.xlane.xlu1 %1472 }
 0x46c   :  { %1196 = vrot.lane.b32.xlu1 %v1149_v45, %s4819_s24  ;;  %4455 = vrcp.f32 %v5978_v52 }
 0x46d   :  { %4457 = vrcp.f32 %v5966_v36 }
 0x472   :  { %v5969_v29 = vpop.xlane.xlu2 %1480 }
 0x473   :  { %v5991_v44 = vpop.xlane.xlu1 %1478 }
 0x474   :  { %1504 = vrot.lane.b32.xlu1 %v5974_v9, %s4820_s16 }
 0x47a   :  { %v1187_v12 = vpop.permute.xlu2 %1186 }
 0x47b   :  { %1225 = vst.msk [vmem:[%s7665_s4 + $0x28] sm:$0xf] %vm1214_vm2, %v1187_v12 }
 0x47c   :  { %1510 = vrot.lane.b32.xlu1 %v5987_v27, %s4820_s16 }
 0x483   :  { %v5993_v3 = vpop.xlane.xlu0 %1476 }
 0x484   :  { %4459 = vrcp.f32 %v5993_v3 }
 0x485   :  { %4461 = vrcp.f32 %v5991_v44 }
 0x486   :  { %4463 = vrcp.f32 %v5969_v29 }
 0x48b   :  { %v1185_v45 = vpop.permute.xlu1 %1184  ;;  %v5999_v37 = vpop.xlane.xlu0 %1482 }
 0x48c   :  { %1224 = vst.msk [vmem:[%s7665_s4 + $0x24] sm:$0xf] %vm1214_vm2, %v1185_v45  ;;  %4465 = vrcp.f32 %v5999_v37 }
 0x49e   :  { %v1189_v12 = vpop.permute.xlu0 %1188 }
 0x49f   :  { %1226 = vst.msk [vmem:[%s7665_s4 + $0x2c] sm:$0xf] %vm1214_vm2, %v1189_v12 }
 0x4a6   :  { %v1497_v28 = vpop.permute.xlu0 %1496 }
 0x4ae   :  { %v1195_v6 = vpop.permute.xlu0 %1194 }
 0x4af   :  { %1229 = vst.msk [vmem:[%s7665_s4 + $0x38] sm:$0xf] %vm1214_vm2, %v1195_v6 }
 0x4b3   :  { %v6009_v41 = vpop.xlane.xlu2 %1486 }
 0x4b6   :  { %v6015_v45 = vpop.xlane.xlu1 %1484  ;;  %v1503_v22 = vpop.permute.xlu0 %1502 }
 0x4b7   :  { %4467 = vrcp.f32 %v6015_v45 }
 0x4b8   :  { %4469 = vrcp.f32 %v6009_v41 }
 0x4bb   :  { %v1193_v27 = vpop.permute.xlu2 %1192 }
 0x4bc   :  { %1228 = vst.msk [vmem:[%s7665_s4 + $0x34] sm:$0xf] %vm1214_vm2, %v1193_v27 }
 0x4be   :  { %v1509_v27 = vpop.permute.xlu0 %1508 }
 0x4c3   :  { %v1501_v62 = vpop.permute.xlu2 %1500 }
 0x4cb   :  { %v1507_v15 = vpop.permute.xlu2 %1506 }
 0x4ce   :  { %v1191_v48 = vpop.permute.xlu1 %1190 }
 0x4cf   :  { %1227 = vst.msk [vmem:[%s7665_s4 + $0x30] sm:$0xf] %vm1214_vm2, %v1191_v48  ;;  %v7803_v48 = vpack.c.bf16 %v5783_v11, %v5766_v38  ;;  %v1493_v38 = vpack.c.bf16 %v5863_v2, %v5879_v56 }
 0x4d6   :  { %v1499_v12 = vpop.permute.xlu1 %1498 }
 0x4de   :  { %v1197_v9 = vpop.permute.xlu1 %1196 }
 0x4df   :  { %1230 = vst.msk [vmem:[%s7665_s4 + $0x3c] sm:$0xf] %vm1214_vm2, %v1197_v9  ;;  %v7804_v9 = vpack.c.bf16 %v5771_v14, %v5769_v30  ;;  %v7808_v30 = vpack.c.bf16 %v5849_v4, %v5847_v60  ;;  %v7809_v14 = vpack.c.bf16 %v5867_v24, %v5871_v61 }
 0x4e6   :  { %v1505_v6 = vpop.permute.xlu1 %1504 }
 0x4ee   :  { %v1511_v8 = vpop.permute.xlu1 %1510 }
 0x4ef   :  { %1520 = vmatpush.bf16.msrb.mxu1 %v1511_v8  ;;  %v7805_v8 = vpack.c.bf16 %v5816_v20, %v5814_v50 }
 0x4f3   :  { %1521 = vmatpush.bf16.msrb.mxu1 %v1509_v27 }
 0x4f7   :  { %1522 = vmatpush.bf16.msrb.mxu1 %v1507_v15  ;;  %v7806_v15 = vpack.c.bf16 %v5800_v17, %v5798_v23 }
 0x4fb   :  { %1523 = vmatpush.bf16.msrb.mxu1 %v1505_v6 }
 0x4ff   :  { %1524 = vmatpush.bf16.msrb.mxu1 %v1503_v22 }
 0x503   :  { %1525 = vmatpush.bf16.msrb.mxu1 %v1501_v62  ;;  %v7807_v62 = vpack.c.bf16 %v5822_v43, %v5824_v57 }
 0x507   :  { %1526 = vmatpush.bf16.msrb.mxu1 %v1499_v12 }
 0x50b   :  { %1527 = vmatpush.bf16.msrb.mxu1 %v1497_v28  ;;  %v4440_v28 = vpop.eup %4439 }
 0x50c   :  { %v4442_v50 = vpop.eup %4441 }
 0x50d   :  { %v4444_v60 = vpop.eup %4443 }
 0x50e   :  { %1528 = vmatmul.bf16.vlgmr.msrb.gmra.mxu1 %v7803_v48  ;;  %v4446_v24 = vpop.eup %4445 }
 0x50f   :  { %v4448_v5 = vpop.eup %4447 }
 0x510   :  { %v4450_v18 = vpop.eup %4449 }
 0x511   :  { %v4452_v21 = vpop.eup %4451 }
 0x512   :  { %v4454_v19 = vpop.eup %4453 }
 0x513   :  { %v4456_v10 = vpop.eup %4455 }
 0x514   :  { %v4458_v63 = vpop.eup %4457 }
 0x515   :  { %v4460_v52 = vpop.eup %4459 }
 0x516   :  { %v4462_v36 = vpop.eup %4461 }
 0x51e   :  { %1533 = vmatmul.bf16.gmra.mxu1 %v7804_v9 }
 0x52e   :  { %1538 = vmatmul.bf16.gmra.mxu1 %v7805_v8 }
 0x53e   :  { %1543 = vmatmul.bf16.gmra.mxu1 %v7806_v15 }
 0x54e   :  { %1548 = vmatmul.bf16.gmra.mxu1 %v7807_v62 }
 0x55e   :  { %1553 = vmatmul.bf16.gmra.mxu1 %v1493_v38 }
 0x56e   :  { %1558 = vmatmul.bf16.gmra.mxu1 %v7808_v30 }
 0x57e   :  { %1563 = vmatmul.bf16.gmra.mxu1 %v7809_v14 }
 0x58b   :  { %v1529_v11 = vpop.f32.mrf.mxu1 }
 0x58c   :  { %v1585_v23 = vmul.f32 %v4440_v28, %v1529_v11 }
 0x58e   :  { %v1601_v17 = vpack.c.bf16 %v1585_v23, %v1585_v23 }
 0x590   :  { %1633 = vrot.lane.b32.xlu2 %v1601_v17, %s4821_s20 }
 0x593   :  { %v1531_v20 = vpop.f32.mrf.mxu1 }
 0x594   :  { %v1586_v43 = vmul.f32 %v4442_v50, %v1531_v20 }
 0x596   :  { %v1602_v57 = vpack.c.bf16 %v1586_v43, %v1586_v43 }
 0x598   :  { %1635 = vrot.lane.b32.xlu0 %v1602_v57, %s4821_s20 }
 0x59b   :  { %v1534_v4 = vpop.f32.mrf.mxu1 }
 0x59c   :  { %v1587_v54 = vmul.f32 %v4444_v60, %v1534_v4  ;;  %v4822_v4 = vmov 3  }
 0x59d   :  { %4264 = vset.pattern.permute.xlu0 %v4822_v4  ;;  %4265 = vset.pattern.permute.xlu1 %v4822_v4 }
 0x59e   :  { %v1603_v2 = vpack.c.bf16 %v1587_v54, %v1587_v54  ;;  %4266 = vset.pattern.permute.xlu2 %v4822_v4 }
 0x5a0   :  { %1637 = vrot.lane.b32.xlu1 %v1603_v2, %s4821_s20 }
 0x5a3   :  { %v1536_v61 = vpop.f32.mrf.mxu1 }
 0x5a4   :  { %v1588_v59 = vmul.f32 %v4446_v24, %v1536_v61  ;;  %v4464_v61 = vpop.eup %4463 }
 0x5a6   :  { %v1604_v56 = vpack.c.bf16 %v1588_v59, %v1588_v59 }
 0x5a8   :  { %1639 = vrot.lane.b32.xlu2 %v1604_v56, %s4821_s20 }
 0x5ab   :  { %v1539_v22 = vpop.f32.mrf.mxu1 }
 0x5ac   :  { %v1589_v12 = vmul.f32 %v4448_v5, %v1539_v22  ;;  %v4466_v5 = vpop.eup %4465 }
 0x5ae   :  { %v1605_v6 = vpack.c.bf16 %v1589_v12, %v1589_v12 }
 0x5b0   :  { %1641 = vrot.lane.b32.xlu0 %v1605_v6, %s4821_s20  ;;  %v4468_v6 = vpop.eup %4467 }
 0x5b3   :  { %v1541_v27 = vpop.f32.mrf.mxu1 }
 0x5b4   :  { %v1590_v48 = vmul.f32 %v4450_v18, %v1541_v27 }
 0x5b6   :  { %v1606_v9 = vpack.c.bf16 %v1590_v48, %v1590_v48 }
 0x5b8   :  { %1643 = vrot.lane.b32.xlu1 %v1606_v9, %s4821_s20  ;;  %v4470_v9 = vpop.eup %4469 }
 0x5bb   :  { %v1544_v8 = vpop.f32.mrf.mxu1 }
 0x5bc   :  { %v1591_v15 = vmul.f32 %v4452_v21, %v1544_v8 }
 0x5be   :  { %v1607_v62 = vpack.c.bf16 %v1591_v15, %v1591_v15 }
 0x5c0   :  { %1645 = vrot.lane.b32.xlu2 %v1607_v62, %s4821_s20 }
 0x5c3   :  { %v1546_v38 = vpop.f32.mrf.mxu1 }
 0x5c4   :  { %v1592_v30 = vmul.f32 %v4454_v19, %v1546_v38 }
 0x5c6   :  { %v1608_v14 = vpack.c.bf16 %v1592_v30, %v1592_v30 }
 0x5c8   :  { %1647 = vrot.lane.b32.xlu0 %v1608_v14, %s4821_s20 }
 0x5cb   :  { %v1549_v28 = vpop.f32.mrf.mxu1 }
 0x5cc   :  { %v1593_v11 = vmul.f32 %v4456_v10, %v1549_v28 }
 0x5ce   :  { %v1609_v23 = vpack.c.bf16 %v1593_v11, %v1593_v11 }
 0x5d0   :  { %1649 = vrot.lane.b32.xlu1 %v1609_v23, %s4821_s20 }
 0x5d3   :  { %v1551_v17 = vpop.f32.mrf.mxu1 }
 0x5d4   :  { %v1594_v50 = vmul.f32 %v4458_v63, %v1551_v17  ;;  %v6153_v17 = vperm.slane %v7778_v7, 3 }
 0x5d6   :  { %v1610_v20 = vpack.c.bf16 %v1594_v50, %v1594_v50 }
 0x5d8   :  { %1651 = vrot.lane.b32.xlu2 %v1610_v20, %s4821_s20 }
 0x5db   :  { %v1554_v43 = vpop.f32.mrf.mxu1 }
 0x5dc   :  { %v1595_v57 = vmul.f32 %v4460_v52, %v1554_v43 }
 0x5de   :  { %v1611_v60 = vpack.c.bf16 %v1595_v57, %v1595_v57 }
 0x5e0   :  { %1653 = vrot.lane.b32.xlu0 %v1611_v60, %s4821_s20 }
 0x5e3   :  { %v1556_v54 = vpop.f32.mrf.mxu1 }
 0x5e4   :  { %v1596_v2 = vmul.f32 %v4462_v36, %v1556_v54 }
 0x5e6   :  { %v1612_v3 = vpack.c.bf16 %v1596_v2, %v1596_v2 }
 0x5e8   :  { %1655 = vrot.lane.b32.xlu1 %v1612_v3, %s4821_s20 }
 0x5ea   :  { %v1634_v24 = vpop.permute.xlu2 %1633 }
 0x5eb   :  { %1682 = vst.msk [vmem:[%s7665_s4] sm:$0xf] %vm1681_vm3, %v1634_v24  ;;  %v1559_v44 = vpop.f32.mrf.mxu1 }
 0x5ec   :  { %v1597_v59 = vmul.f32 %v4464_v61, %v1559_v44 }
 0x5ee   :  { %v1613_v56 = vpack.c.bf16 %v1597_v59, %v1597_v59 }
 0x5f0   :  { %1657 = vrot.lane.b32.xlu2 %v1613_v56, %s4821_s20 }
 0x5f3   :  { %v1561_v29 = vpop.f32.mrf.mxu1 }
 0x5f4   :  { %v1598_v22 = vmul.f32 %v4466_v5, %v1561_v29 }
 0x5f6   :  { %v1614_v12 = vpack.c.bf16 %v1598_v22, %v1598_v22 }
 0x5f8   :  { %1659 = vrot.lane.b32.xlu0 %v1614_v12, %s4821_s20 }
 0x5fb   :  { %v1564_v18 = vpop.f32.mrf.mxu1 }
 0x5fc   :  { %v1599_v27 = vmul.f32 %v4468_v6, %v1564_v18 }
 0x5fe   :  { %v1615_v48 = vpack.c.bf16 %v1599_v27, %v1599_v27 }
 0x600   :  { %1699 = vperm.xlu0 %4264, %v4984_v33   ;;  %1661 = vrot.lane.b32.xlu1 %v1615_v48, %s4821_s20 }
 0x602   :  { %v1640_v37 = vpop.permute.xlu2 %1639 }
 0x603   :  { %1685 = vst.msk [vmem:[%s7665_s4 + $0xc] sm:$0xf] %vm1681_vm3, %v1640_v37  ;;  %v1566_v45 = vpop.f32.mrf.mxu1 }
 0x604   :  { %v1600_v21 = vmul.f32 %v4470_v9, %v1566_v45 }
 0x606   :  { %v1616_v8 = vpack.c.bf16 %v1600_v21, %v1600_v21 }
 0x608   :  { %1719 = vperm.xlu0 %4264, %v7777_v26   ;;  %1703 = vperm.xlu1 %4265, %v5000_v39  }
 0x609   :  { %1663 = vrot.lane.b32.xlu2 %v1616_v8, %s4821_s20 }
 0x60a   :  { %v1636_v41 = vpop.permute.xlu0 %1635 }
 0x60b   :  { %1683 = vst.msk [vmem:[%s7665_s4 + $0x4] sm:$0xf] %vm1681_vm3, %v1636_v41 }
 0x610   :  { %1731 = vperm.xlu0 %4264, %v7779_v32   ;;  %1711 = vperm.xlu1 %4265, %v7775_v49  }
 0x611   :  { %1707 = vperm.xlu2 %4266, %v5009_v42  }
 0x612   :  { %v1638_v15 = vpop.permute.xlu1 %1637 }
 0x613   :  { %1684 = vst.msk [vmem:[%s7665_s4 + $0x8] sm:$0xf] %vm1681_vm3, %v1638_v15 }
 0x618   :  { %1743 = vperm.xlu0 %4264, %v7781_v58   ;;  %1723 = vperm.xlu1 %4265, %v5002_v40  }
 0x619   :  { %1715 = vperm.xlu2 %4266, %v7768_v1  }
 0x61a   :  { %v1646_v62 = vpop.permute.xlu2 %1645 }
 0x61b   :  { %1688 = vst.msk [vmem:[%s7665_s4 + $0x18] sm:$0xf] %vm1681_vm3, %v1646_v62 }
 0x620   :  { %1755 = vperm.xlu0 %4264, %v7782_v16   ;;  %1735 = vperm.xlu1 %4265, %v5022_v46  }
 0x621   :  { %1727 = vperm.xlu2 %4266, %v7773_v51  }
 0x622   :  { %v1642_v19 = vpop.permute.xlu0 %1641 }
 0x623   :  { %1686 = vst.msk [vmem:[%s7665_s4 + $0x10] sm:$0xf] %vm1681_vm3, %v1642_v19 }
 0x628   :  { %1747 = vperm.xlu1 %4265, %v4989_v35  }
 0x629   :  { %1739 = vperm.xlu2 %4266, %v7774_v0  }
 0x62a   :  { %v1644_v38 = vpop.permute.xlu1 %1643 }
 0x62b   :  { %1687 = vst.msk [vmem:[%s7665_s4 + $0x14] sm:$0xf] %vm1681_vm3, %v1644_v38 }
 0x630   :  { %1759 = vperm.xlu1 %4265, %v7772_v47  }
 0x631   :  { %1751 = vperm.xlu2 %4266, %v7776_v13  }
 0x632   :  { %v1652_v30 = vpop.permute.xlu2 %1651 }
 0x633   :  { %1691 = vst.msk [vmem:[%s7665_s4 + $0x24] sm:$0xf] %vm1681_vm3, %v1652_v30 }
 0x63a   :  { %v1648_v14 = vpop.permute.xlu0 %1647 }
 0x63b   :  { %1689 = vst.msk [vmem:[%s7665_s4 + $0x1c] sm:$0xf] %vm1681_vm3, %v1648_v14 }
 0x642   :  { %v1650_v10 = vpop.permute.xlu1 %1649 }
 0x643   :  { %1690 = vst.msk [vmem:[%s7665_s4 + $0x20] sm:$0xf] %vm1681_vm3, %v1650_v10  ;;  %v7810_v10 = vld [vmem:[#allocation22_spill] sm:$0xff] }
 0x64a   :  { %v1658_v28 = vpop.permute.xlu2 %1657 }
 0x64b   :  { %1694 = vst.msk [vmem:[%s7665_s4 + $0x30] sm:$0xf] %vm1681_vm3, %v1658_v28 }
 0x652   :  { %v1654_v11 = vpop.permute.xlu0 %1653 }
 0x653   :  { %1692 = vst.msk [vmem:[%s7665_s4 + $0x28] sm:$0xf] %vm1681_vm3, %v1654_v11  ;;  %v7811_v11 = vld [vmem:[#allocation25_spill] sm:$0xff] }
 0x65a   :  { %v1656_v23 = vpop.permute.xlu1 %1655 }
 0x65b   :  { %1693 = vst.msk [vmem:[%s7665_s4 + $0x2c] sm:$0xf] %vm1681_vm3, %v1656_v23 }
 0x663   :  { %v1664_v63 = vpop.permute.xlu2 %1663 }
 0x664   :  { %1697 = vst.msk [vmem:[%s7665_s4 + $0x3c] sm:$0xf] %vm1681_vm3, %v1664_v63 }
 0x66a   :  { %v1660_v50 = vpop.permute.xlu0 %1659 }
 0x66b   :  { %1695 = vst.msk [vmem:[%s7665_s4 + $0x34] sm:$0xf] %vm1681_vm3, %v1660_v50  ;;  %v1708_v20 = vpop.permute.xlu2 %1707  ;;  %v7812_v50 = vld [vmem:[#allocation13_spill] sm:$0xff] }
 0x66c   :  { %v1765_v52 = vadd.f32 %v6153_v17, %v1708_v20 }
 0x66e   :  { %vm1781_vm4 = vcmp.gt.f32.partialorder %v1765_v52, 0.0  ;;  %v1797_v43 = vmul.f32 0.2, %v1765_v52 }
 0x670   :  { %v1813_v57 = vsel %vm1781_vm4, %v1765_v52, %v1797_v43  ;;  %vm2148_vm4 = vcmask 257216  }
 0x671   :  { %v6161_v60 = vadd.f32 %v7780_v55, %v1813_v57 }
 0x672   :  { %v1700_v4 = vpop.permute.xlu0 %1699  ;;  %v1662_v36 = vpop.permute.xlu1 %1661 }
 0x673   :  { %v1763_v54 = vadd.f32 %v6153_v17, %v1700_v4  ;;  %1696 = vst.msk [vmem:[%s7665_s4 + $0x38] sm:$0xf] %vm1681_vm3, %v1662_v36  ;;  %1847 = vmax.xlane.f32.xlu1 %v6161_v60  ;;  %v1716_v3 = vpop.permute.xlu2 %1715 }
 0x674   :  { %v1767_v12 = vadd.f32 %v6153_v17, %v1716_v3 }
 0x675   :  { %vm1779_vm5 = vcmp.gt.f32.partialorder %v1763_v54, 0.0  ;;  %v1795_v2 = vmul.f32 0.2, %v1763_v54 }
 0x676   :  { %v1799_v9 = vmul.f32 0.2, %v1767_v12  ;;  %vm1783_vm8 = vcmp.gt.f32.partialorder %v1767_v12, 0.0 }
 0x677   :  { %v1811_v24 = vsel %vm1779_vm5, %v1763_v54, %v1795_v2 }
 0x678   :  { %v6170_v61 = vadd.f32 %v7783_v25, %v1811_v24  ;;  %v1815_v38 = vsel %vm1783_vm8, %v1767_v12, %v1799_v9  ;;  %v7815_v12 = vld [vmem:[#allocation23_spill] sm:$0xff] }
 0x679   :  { %v6194_v20 = vadd.f32 %v7812_v50, %v1815_v38 }
 0x67a   :  { %v1720_v44 = vpop.permute.xlu0 %1719  ;;  %v1704_v59 = vpop.permute.xlu1 %1703  ;;  %1843 = vmax.xlane.f32.xlu2 %v6170_v61 }
 0x67b   :  { %v1768_v56 = vadd.f32 %v6153_v17, %v1720_v44  ;;  %v1764_v5 = vadd.f32 %v6153_v17, %v1704_v59  ;;  %v1728_v6 = vpop.permute.xlu2 %1727 }
 0x67c   :  { %v1770_v19 = vadd.f32 %v6153_v17, %v1728_v6 }
 0x67d   :  { %vm1784_vm6 = vcmp.gt.f32.partialorder %v1768_v56, 0.0  ;;  %v1800_v29 = vmul.f32 0.2, %v1768_v56  ;;  %vm1780_vm7 = vcmp.gt.f32.partialorder %v1764_v5, 0.0  ;;  %v1796_v22 = vmul.f32 0.2, %v1764_v5 }
 0x67e   :  { %v1802_v52 = vmul.f32 0.2, %v1770_v19  ;;  %vm1786_vm11 = vcmp.gt.f32.partialorder %v1770_v19, 0.0 }
 0x67f   :  { %v1812_v18 = vsel %vm1780_vm7, %v1764_v5, %v1796_v22  ;;  %v1816_v27 = vsel %vm1784_vm6, %v1768_v56, %v1800_v29  ;;  %v7813_v56 = vld [vmem:[#allocation21_spill] sm:$0xff]  ;;  %v7814_v29 = vld [vmem:[#allocation30_spill] sm:$0xff] }
 0x680   :  { %v6177_v48 = vadd.f32 %v7786_v53, %v1812_v18  ;;  %v6180_v37 = vadd.f32 %v7789_v34, %v1816_v27  ;;  %v1818_v24 = vsel %vm1786_vm11, %v1770_v19, %v1802_v52 }
 0x681   :  { %v6209_v6 = vadd.f32 %v7815_v12, %v1818_v24 }
 0x682   :  { %v1732_v45 = vpop.permute.xlu0 %1731  ;;  %1845 = vmax.xlane.f32.xlu0 %v6177_v48  ;;  %v1712_v21 = vpop.permute.xlu1 %1711  ;;  %1853 = vmax.xlane.f32.xlu1 %v6180_v37 }
 0x683   :  { %v1771_v8 = vadd.f32 %v6153_v17, %v1732_v45  ;;  %v1766_v41 = vadd.f32 %v6153_v17, %v1712_v21  ;;  %v1740_v63 = vpop.permute.xlu2 %1739 }
 0x684   :  { %v1773_v3 = vadd.f32 %v6153_v17, %v1740_v63 }
 0x685   :  { %vm1787_vm9 = vcmp.gt.f32.partialorder %v1771_v8, 0.0  ;;  %v1803_v15 = vmul.f32 0.2, %v1771_v8  ;;  %vm1782_vm10 = vcmp.gt.f32.partialorder %v1766_v41, 0.0  ;;  %v1798_v62 = vmul.f32 0.2, %v1766_v41 }
 0x686   :  { %v1805_v18 = vmul.f32 0.2, %v1773_v3  ;;  %vm1789_vm14 = vcmp.gt.f32.partialorder %v1773_v3, 0.0 }
 0x687   :  { %v1814_v30 = vsel %vm1782_vm10, %v1766_v41, %v1798_v62  ;;  %v1819_v14 = vsel %vm1787_vm9, %v1771_v8, %v1803_v15 }
 0x688   :  { %v6188_v28 = vadd.f32 %v7810_v10, %v1814_v30  ;;  %v6191_v23 = vadd.f32 %v7811_v11, %v1819_v14  ;;  %v1821_v19 = vsel %vm1789_vm14, %v1773_v3, %v1805_v18  ;;  %v7816_v14 = vld [vmem:[#allocation26_spill] sm:$0xff] }
 0x689   :  { %v7819_v18 = vld [vmem:[#allocation18_spill] sm:$0xff] }
 0x68a   :  { %v1744_v43 = vpop.permute.xlu0 %1743  ;;  %v1724_v57 = vpop.permute.xlu1 %1723  ;;  %1849 = vmax.xlane.f32.xlu2 %v6188_v28  ;;  %1859 = vmax.xlane.f32.xlu1 %v6191_v23 }
 0x68b   :  { %v1774_v4 = vadd.f32 %v6153_v17, %v1744_v43  ;;  %v1769_v36 = vadd.f32 %v6153_v17, %v1724_v57  ;;  %1851 = vmax.xlane.f32.xlu0 %v6194_v20  ;;  %v1752_v45 = vpop.permute.xlu2 %1751  ;;  %v7817_v43 = vld [vmem:[#allocation27_spill] sm:$0xff] }
 0x68c   :  { %v1776_v62 = vadd.f32 %v6153_v17, %v1752_v45  ;;  %v6224_v57 = vadd.f32 %v7817_v43, %v1821_v19 }
 0x68d   :  { %vm1790_vm12 = vcmp.gt.f32.partialorder %v1774_v4, 0.0  ;;  %v1806_v54 = vmul.f32 0.2, %v1774_v4  ;;  %vm1785_vm13 = vcmp.gt.f32.partialorder %v1769_v36, 0.0  ;;  %v1801_v2 = vmul.f32 0.2, %v1769_v36 }
 0x68e   :  { %vm1792_vm1 = vcmp.gt.f32.partialorder %v1776_v62, 0.0 }
 0x68f   :  { %v1817_v44 = vsel %vm1785_vm13, %v1769_v36, %v1801_v2  ;;  %v1822_v59 = vsel %vm1790_vm12, %v1774_v4, %v1806_v54  ;;  %v1808_v4 = vmul.f32 0.2, %v1776_v62 }
 0x690   :  { %v6203_v5 = vadd.f32 %v7813_v56, %v1817_v44  ;;  %v6206_v22 = vadd.f32 %v7814_v29, %v1822_v59  ;;  %v7818_v44 = vld [vmem:[#allocation17_spill] sm:$0xff] }
 0x691   :  { %v1824_v3 = vsel %vm1792_vm1, %v1776_v62, %v1808_v4 }
 0x692   :  { %v1756_v27 = vpop.permute.xlu0 %1755  ;;  %v1736_v9 = vpop.permute.xlu1 %1735  ;;  %1855 = vmax.xlane.f32.xlu2 %v6203_v5  ;;  %1865 = vmax.xlane.f32.xlu1 %v6206_v22 }
 0x693   :  { %v1777_v21 = vadd.f32 %v6153_v17, %v1756_v27  ;;  %v1772_v8 = vadd.f32 %v6153_v17, %v1736_v9  ;;  %1857 = vmax.xlane.f32.xlu0 %v6209_v6  ;;  %v6234_v27 = vadd.f32 %v7819_v18, %v1824_v3 }
 0x695   :  { %vm1793_vm15 = vcmp.gt.f32.partialorder %v1777_v21, 0.0  ;;  %v1809_v41 = vmul.f32 0.2, %v1777_v21  ;;  %vm1788_vm0 = vcmp.gt.f32.partialorder %v1772_v8, 0.0  ;;  %v1804_v15 = vmul.f32 0.2, %v1772_v8 }
 0x697   :  { %v1820_v38 = vsel %vm1788_vm0, %v1772_v8, %v1804_v15  ;;  %v1825_v30 = vsel %vm1793_vm15, %v1777_v21, %v1809_v41  ;;  %v7820_v41 = vld [vmem:[#allocation24_spill] sm:$0xff] }
 0x698   :  { %v6218_v63 = vadd.f32 %v7816_v14, %v1820_v38  ;;  %v6221_v52 = vadd.f32 %v7794_v31, %v1825_v30 }
 0x69a   :  { %v1748_v36 = vpop.permute.xlu1 %1747  ;;  %1861 = vmax.xlane.f32.xlu2 %v6218_v63  ;;  %1871 = vmax.xlane.f32.xlu1 %v6221_v52 }
 0x69b   :  { %v1775_v54 = vadd.f32 %v6153_v17, %v1748_v36  ;;  %1863 = vmax.xlane.f32.xlu0 %v6224_v57 }
 0x69d   :  { %vm1791_vm2 = vcmp.gt.f32.partialorder %v1775_v54, 0.0  ;;  %v1807_v2 = vmul.f32 0.2, %v1775_v54 }
 0x69f   :  { %v1823_v24 = vsel %vm1791_vm2, %v1775_v54, %v1807_v2 }
 0x6a0   :  { %v6231_v59 = vadd.f32 %v7818_v44, %v1823_v24 }
 0x6a2   :  { %v1760_v9 = vpop.permute.xlu1 %1759  ;;  %1867 = vmax.xlane.f32.xlu2 %v6231_v59 }
 0x6a3   :  { %v1778_v45 = vadd.f32 %v6153_v17, %v1760_v9  ;;  %1869 = vmax.xlane.f32.xlu0 %v6234_v27 }
 0x6a5   :  { %vm1794_vm3 = vcmp.gt.f32.partialorder %v1778_v45, 0.0  ;;  %v1810_v21 = vmul.f32 0.2, %v1778_v45 }
 0x6a7   :  { %v1826_v8 = vsel %vm1794_vm3, %v1778_v45, %v1810_v21 }
 0x6a8   :  { %v6240_v15 = vadd.f32 %v7820_v41, %v1826_v8 }
 0x6aa   :  { %1873 = vmax.xlane.f32.xlu2 %v6240_v15 }
 0x6e6   :  { %v1848_v62 = vpop.xlane.xlu1 %1847 }
 0x6e7   :  { %v1877_v19 = vsub.f32 %v6161_v60, %v1848_v62 }
 0x6e9   :  { %v1895_v38 = vmul.f32 1.442695, %v1877_v19 }
 0x6eb   :  { %4471 = vpow2.f32 %v1895_v38 }
 0x6ed   :  { %v1844_v30 = vpop.xlane.xlu2 %1843 }
 0x6ee   :  { %v1875_v4 = vsub.f32 %v6170_v61, %v1844_v30 }
 0x6f0   :  { %v1891_v36 = vmul.f32 1.442695, %v1875_v4 }
 0x6f1   :  { %v6245_v17 = vpop.eup %4471 }
 0x6f2   :  { %4473 = vpow2.f32 %v1891_v36  ;;  %1927 = vadd.xlane.f32.xlu2 %v6245_v17 }
 0x6f5   :  { %v1846_v54 = vpop.xlane.xlu0 %1845  ;;  %v1854_v2 = vpop.xlane.xlu1 %1853 }
 0x6f6   :  { %v1876_v3 = vsub.f32 %v6177_v48, %v1846_v54  ;;  %v1880_v24 = vsub.f32 %v6180_v37, %v1854_v2 }
 0x6f8   :  { %v6250_v9 = vpop.eup %4473  ;;  %v1893_v60 = vmul.f32 1.442695, %v1876_v3  ;;  %v1901_v45 = vmul.f32 1.442695, %v1880_v24 }
 0x6f9   :  { %1923 = vadd.xlane.f32.xlu0 %v6250_v9 }
 0x6fa   :  { %4475 = vpow2.f32 %v1893_v60 }
 0x6fb   :  { %4477 = vpow2.f32 %v1901_v45 }
 0x6fd   :  { %v1860_v61 = vpop.xlane.xlu1 %1859  ;;  %v1850_v21 = vpop.xlane.xlu2 %1849 }
 0x6fe   :  { %v1883_v8 = vsub.f32 %v6191_v23, %v1860_v61  ;;  %v1852_v62 = vpop.xlane.xlu0 %1851  ;;  %v1878_v19 = vsub.f32 %v6188_v28, %v1850_v21 }
 0x6ff   :  { %v1879_v38 = vsub.f32 %v6194_v20, %v1852_v62 }
 0x700   :  { %v6256_v48 = vpop.eup %4475  ;;  %v1907_v37 = vmul.f32 1.442695, %v1883_v8  ;;  %v1897_v30 = vmul.f32 1.442695, %v1878_v19 }
 0x701   :  { %v6258_v4 = vpop.eup %4477  ;;  %v1899_v36 = vmul.f32 1.442695, %v1879_v38  ;;  %1925 = vadd.xlane.f32.xlu1 %v6256_v48  ;;  %v7829_v43 = vpack.c.bf16 %v6256_v48, %v6250_v9 }
 0x702   :  { %4479 = vpow2.f32 %v1907_v37  ;;  %1933 = vadd.xlane.f32.xlu2 %v6258_v4 }
 0x703   :  { %4481 = vpow2.f32 %v1899_v36 }
 0x704   :  { %4483 = vpow2.f32 %v1897_v30 }
 0x705   :  { %v1866_v28 = vpop.xlane.xlu1 %1865  ;;  %v1856_v23 = vpop.xlane.xlu2 %1855 }
 0x706   :  { %v1886_v20 = vsub.f32 %v6206_v22, %v1866_v28  ;;  %v1858_v2 = vpop.xlane.xlu0 %1857  ;;  %v1881_v3 = vsub.f32 %v6203_v5, %v1856_v23 }
 0x707   :  { %v1882_v24 = vsub.f32 %v6209_v6, %v1858_v2 }
 0x708   :  { %v6267_v60 = vpop.eup %4479  ;;  %v1913_v45 = vmul.f32 1.442695, %v1886_v20  ;;  %v1903_v61 = vmul.f32 1.442695, %v1881_v3 }
 0x709   :  { %v6269_v21 = vpop.eup %4481  ;;  %v1905_v8 = vmul.f32 1.442695, %v1882_v24 }
 0x70a   :  { %v6271_v62 = vpop.eup %4483  ;;  %4485 = vpow2.f32 %v1913_v45  ;;  %1939 = vadd.xlane.f32.xlu2 %v6267_v60  ;;  %1931 = vadd.xlane.f32.xlu1 %v6269_v21 }
 0x70b   :  { %4487 = vpow2.f32 %v1905_v8  ;;  %1929 = vadd.xlane.f32.xlu0 %v6271_v62  ;;  %v7830_v14 = vpack.c.bf16 %v6271_v62, %v6245_v17 }
 0x70c   :  { %4489 = vpow2.f32 %v1903_v61 }
 0x70d   :  { %v1872_v6 = vpop.xlane.xlu1 %1871  ;;  %v1862_v19 = vpop.xlane.xlu2 %1861 }
 0x70e   :  { %v1889_v38 = vsub.f32 %v6221_v52, %v1872_v6  ;;  %v1864_v37 = vpop.xlane.xlu0 %1863  ;;  %v1884_v30 = vsub.f32 %v6218_v63, %v1862_v19 }
 0x70f   :  { %v1885_v36 = vsub.f32 %v6224_v57, %v1864_v37 }
 0x710   :  { %v6283_v28 = vpop.eup %4485  ;;  %v1919_v23 = vmul.f32 1.442695, %v1889_v38  ;;  %v1909_v20 = vmul.f32 1.442695, %v1884_v30 }
 0x711   :  { %v6285_v2 = vpop.eup %4487  ;;  %v1911_v3 = vmul.f32 1.442695, %v1885_v36 }
 0x712   :  { %v6287_v24 = vpop.eup %4489  ;;  %4491 = vpow2.f32 %v1919_v23  ;;  %1945 = vadd.xlane.f32.xlu2 %v6283_v28  ;;  %1937 = vadd.xlane.f32.xlu1 %v6285_v2 }
 0x713   :  { %4493 = vpow2.f32 %v1911_v3  ;;  %1935 = vadd.xlane.f32.xlu0 %v6287_v24 }
 0x714   :  { %4495 = vpow2.f32 %v1909_v20 }
 0x715   :  { %v1868_v52 = vpop.xlane.xlu2 %1867 }
 0x716   :  { %v1870_v57 = vpop.xlane.xlu0 %1869  ;;  %v1887_v45 = vsub.f32 %v6231_v59, %v1868_v52 }
 0x717   :  { %v1888_v61 = vsub.f32 %v6234_v27, %v1870_v57 }
 0x718   :  { %v6296_v8 = vpop.eup %4491  ;;  %v1915_v6 = vmul.f32 1.442695, %v1887_v45 }
 0x719   :  { %v6298_v19 = vpop.eup %4493  ;;  %v1917_v38 = vmul.f32 1.442695, %v1888_v61  ;;  %v7822_v61 = vld [vmem:[#allocation8_spill] sm:$0xff] }
 0x71a   :  { %v6300_v37 = vpop.eup %4495  ;;  %4497 = vpow2.f32 %v1915_v6  ;;  %1951 = vadd.xlane.f32.xlu2 %v6296_v8  ;;  %1943 = vadd.xlane.f32.xlu1 %v6298_v19  ;;  %v1960_v30 = vpack.c.bf16 %v6283_v28, %v6298_v19  ;;  %v7821_v28 = vld [vmem:[#allocation6_spill] sm:$0xff]  ;;  %v7824_v6 = vld [vmem:[#allocation11_spill] sm:$0xff]  ;;  %v7826_v19 = vld [vmem:[#allocation28_spill] sm:$0xff] }
 0x71b   :  { %4499 = vpow2.f32 %v1917_v38  ;;  %1941 = vadd.xlane.f32.xlu0 %v6300_v37  ;;  %v1959_v59 = vpack.c.bf16 %v6300_v37, %v6267_v60  ;;  %v7823_v60 = vld [vmem:[#allocation2_spill] sm:$0xff]  ;;  %v7827_v38 = vld [vmem:[#allocation4_spill] sm:$0xff]  ;;  %v7828_v37 = vld [vmem:[#allocation29_spill] sm:$0xff] }
 0x71d   :  { %v1874_v27 = vpop.xlane.xlu2 %1873 }
 0x71e   :  { %v1890_v36 = vsub.f32 %v6240_v15, %v1874_v27  ;;  %v7825_v15 = vld [vmem:[#allocation9_spill] sm:$0xff] }
 0x720   :  { %v4498_v23 = vpop.eup %4497  ;;  %v1921_v20 = vmul.f32 1.442695, %v1890_v36 }
 0x721   :  { %v4500_v3 = vpop.eup %4499 }
 0x722   :  { %4501 = vpow2.f32 %v1921_v20  ;;  %1949 = vadd.xlane.f32.xlu1 %v4500_v3  ;;  %v1961_v52 = vpack.c.bf16 %v4500_v3, %v4498_v23 }
 0x723   :  { %1947 = vadd.xlane.f32.xlu0 %v4498_v23 }
 0x728   :  { %v4502_v57 = vpop.eup %4501 }
 0x729   :  { %v1962_v45 = vpack.c.bf16 %v4502_v57, %v6296_v8 }
 0x72b   :  { %1953 = vadd.xlane.f32.xlu0 %v4502_v57 }
 0x732   :  { %1965 = vrot.lane.b32.xlu2 %v7821_v28, %s4823_s1 }
 0x73a   :  { %1973 = vrot.lane.b32.xlu2 %v7822_v61, %s4823_s1 }
 0x73b   :  { %1963 = vrot.lane.b32.xlu1 %v7823_v60, %s4823_s1 }
 0x73f   :  { %1967 = vrot.lane.b32.xlu0 %v7824_v6, %s4823_s1 }
 0x743   :  { %1971 = vrot.lane.b32.xlu1 %v7825_v15, %s4823_s1 }
 0x747   :  { %1969 = vrot.lane.b32.xlu0 %v7826_v19, %s4823_s1 }
 0x74b   :  { %1977 = vrot.lane.b32.xlu1 %v7827_v38, %s4823_s1 }
 0x74f   :  { %1975 = vrot.lane.b32.xlu0 %v7828_v37, %s4823_s1 }
 0x765   :  { %v1928_v20 = vpop.xlane.xlu2 %1927 }
 0x76c   :  { %v1924_v27 = vpop.xlane.xlu0 %1923 }
 0x76d   :  { %4503 = vrcp.f32 %v1924_v27 }
 0x774   :  { %v1926_v8 = vpop.xlane.xlu1 %1925 }
 0x775   :  { %v1934_v28 = vpop.xlane.xlu2 %1933  ;;  %4505 = vrcp.f32 %v1926_v8 }
 0x776   :  { %4507 = vrcp.f32 %v1928_v20 }
 0x77d   :  { %v1932_v23 = vpop.xlane.xlu1 %1931  ;;  %v6327_v6 = vpop.xlane.xlu2 %1939 }
 0x77e   :  { %v1930_v36 = vpop.xlane.xlu0 %1929 }
 0x77f   :  { %4509 = vrcp.f32 %v1930_v36 }
 0x780   :  { %4511 = vrcp.f32 %v1932_v23 }
 0x781   :  { %4513 = vrcp.f32 %v1934_v28 }
 0x785   :  { %v6321_v57 = vpop.xlane.xlu1 %1937  ;;  %v6333_v38 = vpop.xlane.xlu2 %1945 }
 0x786   :  { %v6319_v3 = vpop.xlane.xlu0 %1935 }
 0x787   :  { %4515 = vrcp.f32 %v6319_v3 }
 0x788   :  { %4517 = vrcp.f32 %v6321_v57 }
 0x789   :  { %4519 = vrcp.f32 %v6327_v6 }
 0x78d   :  { %v6325_v60 = vpop.xlane.xlu1 %1943  ;;  %v6337_v22 = vpop.xlane.xlu2 %1951 }
 0x78e   :  { %v6323_v61 = vpop.xlane.xlu0 %1941 }
 0x78f   :  { %4521 = vrcp.f32 %v6323_v61 }
 0x790   :  { %4523 = vrcp.f32 %v6325_v60 }
 0x791   :  { %4525 = vrcp.f32 %v6333_v38 }
 0x795   :  { %v6331_v19 = vpop.xlane.xlu1 %1949  ;;  %v1966_v31 = vpop.permute.xlu2 %1965 }
 0x796   :  { %v6329_v15 = vpop.xlane.xlu0 %1947 }
 0x797   :  { %4527 = vrcp.f32 %v6329_v15 }
 0x798   :  { %4529 = vrcp.f32 %v6331_v19 }
 0x799   :  { %4531 = vrcp.f32 %v6337_v22 }
 0x79d   :  { %v1974_v29 = vpop.permute.xlu2 %1973 }
 0x79e   :  { %v6335_v37 = vpop.xlane.xlu0 %1953 }
 0x79f   :  { %4533 = vrcp.f32 %v6335_v37 }
 0x7ad   :  { %v1964_v63 = vpop.permute.xlu1 %1963 }
 0x7b1   :  { %v1968_v5 = vpop.permute.xlu0 %1967 }
 0x7b5   :  { %v1972_v54 = vpop.permute.xlu1 %1971 }
 0x7b9   :  { %v1970_v41 = vpop.permute.xlu0 %1969 }
 0x7bd   :  { %v1978_v18 = vpop.permute.xlu1 %1977 }
 0x7be   :  { %1987 = vmatpush.bf16.msrb.mxu0 %v1978_v18  ;;  %v7831_v18 = vpack.c.bf16 %v6258_v4, %v6269_v21 }
 0x7c1   :  { %v1976_v44 = vpop.permute.xlu0 %1975 }
 0x7c2   :  { %1988 = vmatpush.bf16.msrb.mxu0 %v1976_v44 }
 0x7c6   :  { %1989 = vmatpush.bf16.msrb.mxu0 %v1974_v29  ;;  %v7832_v29 = vpack.c.bf16 %v6285_v2, %v6287_v24 }
 0x7ca   :  { %1990 = vmatpush.bf16.msrb.mxu0 %v1972_v54 }
 0x7ce   :  { %1991 = vmatpush.bf16.msrb.mxu0 %v1970_v41 }
 0x7d2   :  { %1992 = vmatpush.bf16.msrb.mxu0 %v1968_v5 }
 0x7d6   :  { %1993 = vmatpush.bf16.msrb.mxu0 %v1966_v31  ;;  %v4504_v31 = vpop.eup %4503 }
 0x7da   :  { %1994 = vmatpush.bf16.msrb.mxu0 %v1964_v63 }
 0x7dd   :  { %1995 = vmatmul.bf16.vlgmr.msrb.gmra.mxu0 %v7829_v43 }
 0x7ed   :  { %2000 = vmatmul.bf16.gmra.mxu0 %v7830_v14  ;;  %v4506_v14 = vpop.eup %4505 }
 0x7ee   :  { %v4508_v4 = vpop.eup %4507 }
 0x7ef   :  { %v4510_v5 = vpop.eup %4509 }
 0x7fd   :  { %2005 = vmatmul.bf16.gmra.mxu0 %v7831_v18 }
 0x80d   :  { %2010 = vmatmul.bf16.gmra.mxu0 %v7832_v29 }
 0x81d   :  { %2015 = vmatmul.bf16.gmra.mxu0 %v1959_v59 }
 0x82d   :  { %2020 = vmatmul.bf16.gmra.mxu0 %v1960_v30  ;;  %v4512_v30 = vpop.eup %4511 }
 0x82e   :  { %v4514_v27 = vpop.eup %4513 }
 0x82f   :  { %v4516_v18 = vpop.eup %4515 }
 0x830   :  { %v4518_v28 = vpop.eup %4517 }
 0x831   :  { %v4520_v3 = vpop.eup %4519 }
 0x832   :  { %v4522_v57 = vpop.eup %4521 }
 0x833   :  { %v4524_v6 = vpop.eup %4523 }
 0x834   :  { %v4526_v61 = vpop.eup %4525 }
 0x83d   :  { %2025 = vmatmul.bf16.gmra.mxu0 %v1961_v52 }
 0x84d   :  { %2030 = vmatmul.bf16.gmra.mxu0 %v1962_v45 }
 0x85a   :  { %v1996_v44 = vpop.f32.mrf.mxu0 }
 0x85b   :  { %v2052_v43 = vmul.f32 %v4504_v31, %v1996_v44 }
 0x85d   :  { %v2068_v41 = vpack.c.bf16 %v2052_v43, %v2052_v43 }
 0x85f   :  { %2100 = vrot.lane.b32.xlu2 %v2068_v41, %s4824_s25 }
 0x862   :  { %v1998_v17 = vpop.f32.mrf.mxu0 }
 0x863   :  { %v2053_v9 = vmul.f32 %v4506_v14, %v1998_v17 }
 0x865   :  { %v2069_v48 = vpack.c.bf16 %v2053_v9, %v2053_v9 }
 0x867   :  { %2102 = vrot.lane.b32.xlu0 %v2069_v48, %s4824_s25 }
 0x86a   :  { %v2001_v54 = vpop.f32.mrf.mxu0 }
 0x86b   :  { %v2054_v21 = vmul.f32 %v4508_v4, %v2001_v54 }
 0x86d   :  { %v2070_v62 = vpack.c.bf16 %v2054_v21, %v2054_v21 }
 0x86f   :  { %2104 = vrot.lane.b32.xlu1 %v2070_v62, %s4824_s25 }
 0x872   :  { %v2003_v2 = vpop.f32.mrf.mxu0 }
 0x873   :  { %v2055_v24 = vmul.f32 %v4510_v5, %v2003_v2  ;;  %v4825_v2 = vmov 4  }
 0x874   :  { %4267 = vset.pattern.permute.xlu0 %v4825_v2  ;;  %4268 = vset.pattern.permute.xlu1 %v4825_v2 }
 0x875   :  { %v2071_v63 = vpack.c.bf16 %v2055_v24, %v2055_v24  ;;  %4269 = vset.pattern.permute.xlu2 %v4825_v2 }
 0x877   :  { %2106 = vrot.lane.b32.xlu2 %v2071_v63, %s4824_s25 }
 0x87a   :  { %v2006_v59 = vpop.f32.mrf.mxu0 }
 0x87b   :  { %v2056_v52 = vmul.f32 %v4512_v30, %v2006_v59  ;;  %v4528_v59 = vpop.eup %4527 }
 0x87d   :  { %v2072_v45 = vpack.c.bf16 %v2056_v52, %v2056_v52 }
 0x87f   :  { %2108 = vrot.lane.b32.xlu0 %v2072_v45, %s4824_s25 }
 0x882   :  { %v2008_v8 = vpop.f32.mrf.mxu0 }
 0x883   :  { %v2057_v36 = vmul.f32 %v4514_v27, %v2008_v8  ;;  %v4530_v27 = vpop.eup %4529 }
 0x885   :  { %v2073_v20 = vpack.c.bf16 %v2057_v36, %v2057_v36 }
 0x887   :  { %2110 = vrot.lane.b32.xlu1 %v2073_v20, %s4824_s25  ;;  %v4532_v20 = vpop.eup %4531 }
 0x88a   :  { %v2011_v23 = vpop.f32.mrf.mxu0 }
 0x88b   :  { %v2058_v29 = vmul.f32 %v4516_v18, %v2011_v23 }
 0x88d   :  { %v2074_v31 = vpack.c.bf16 %v2058_v29, %v2058_v29 }
 0x88f   :  { %2112 = vrot.lane.b32.xlu2 %v2074_v31, %s4824_s25  ;;  %v4534_v31 = vpop.eup %4533 }
 0x892   :  { %v2013_v44 = vpop.f32.mrf.mxu0 }
 0x893   :  { %v2059_v43 = vmul.f32 %v4518_v28, %v2013_v44 }
 0x895   :  { %v2075_v41 = vpack.c.bf16 %v2059_v43, %v2059_v43 }
 0x897   :  { %2114 = vrot.lane.b32.xlu0 %v2075_v41, %s4824_s25 }
 0x89a   :  { %v2016_v14 = vpop.f32.mrf.mxu0 }
 0x89b   :  { %v2060_v17 = vmul.f32 %v4520_v3, %v2016_v14 }
 0x89d   :  { %v2076_v9 = vpack.c.bf16 %v2060_v17, %v2060_v17 }
 0x89f   :  { %2116 = vrot.lane.b32.xlu1 %v2076_v9, %s4824_s25 }
 0x8a2   :  { %v2018_v48 = vpop.f32.mrf.mxu0 }
 0x8a3   :  { %v2061_v4 = vmul.f32 %v4522_v57, %v2018_v48 }
 0x8a5   :  { %v2077_v54 = vpack.c.bf16 %v2061_v4, %v2061_v4 }
 0x8a7   :  { %2118 = vrot.lane.b32.xlu2 %v2077_v54, %s4824_s25 }
 0x8aa   :  { %v2021_v21 = vpop.f32.mrf.mxu0 }
 0x8ab   :  { %v2062_v62 = vmul.f32 %v4524_v6, %v2021_v21  ;;  %v6450_v21 = vperm.slane %v7778_v7, 4 }
 0x8ad   :  { %v2078_v5 = vpack.c.bf16 %v2062_v62, %v2062_v62 }
 0x8af   :  { %2120 = vrot.lane.b32.xlu0 %v2078_v5, %s4824_s25 }
 0x8b2   :  { %v2023_v24 = vpop.f32.mrf.mxu0 }
 0x8b3   :  { %v2063_v63 = vmul.f32 %v4526_v61, %v2023_v24 }
 0x8b5   :  { %v2079_v60 = vpack.c.bf16 %v2063_v63, %v2063_v63 }
 0x8b7   :  { %2122 = vrot.lane.b32.xlu1 %v2079_v60, %s4824_s25 }
 0x8b9   :  { %v2101_v30 = vpop.permute.xlu2 %2100 }
 0x8ba   :  { %2149 = vst.msk [vmem:[%s7665_s4] sm:$0xf] %vm2148_vm4, %v2101_v30  ;;  %v2026_v38 = vpop.f32.mrf.mxu0 }
 0x8bb   :  { %v2064_v52 = vmul.f32 %v4528_v59, %v2026_v38 }
 0x8bd   :  { %v2080_v45 = vpack.c.bf16 %v2064_v52, %v2064_v52 }
 0x8bf   :  { %2124 = vrot.lane.b32.xlu2 %v2080_v45, %s4824_s25 }
 0x8c2   :  { %v2028_v15 = vpop.f32.mrf.mxu0 }
 0x8c3   :  { %v2065_v8 = vmul.f32 %v4530_v27, %v2028_v15 }
 0x8c5   :  { %v2081_v36 = vpack.c.bf16 %v2065_v8, %v2065_v8 }
 0x8c7   :  { %2126 = vrot.lane.b32.xlu0 %v2081_v36, %s4824_s25 }
 0x8ca   :  { %v2031_v18 = vpop.f32.mrf.mxu0 }
 0x8cb   :  { %v2066_v23 = vmul.f32 %v4532_v20, %v2031_v18 }
 0x8cd   :  { %v2082_v29 = vpack.c.bf16 %v2066_v23, %v2066_v23 }
 0x8cf   :  { %2166 = vperm.xlu0 %4267, %v4984_v33   ;;  %2128 = vrot.lane.b32.xlu1 %v2082_v29, %s4824_s25 }
 0x8d1   :  { %v2107_v19 = vpop.permute.xlu2 %2106 }
 0x8d2   :  { %2152 = vst.msk [vmem:[%s7665_s4 + $0xc] sm:$0xf] %vm2148_vm4, %v2107_v19  ;;  %v2033_v22 = vpop.f32.mrf.mxu0 }
 0x8d3   :  { %v2067_v28 = vmul.f32 %v4534_v31, %v2033_v22 }
 0x8d5   :  { %v2083_v44 = vpack.c.bf16 %v2067_v28, %v2067_v28 }
 0x8d7   :  { %2186 = vperm.xlu0 %4267, %v7777_v26   ;;  %2170 = vperm.xlu1 %4268, %v5000_v39  }
 0x8d8   :  { %2130 = vrot.lane.b32.xlu2 %v2083_v44, %s4824_s25 }
 0x8d9   :  { %v2103_v37 = vpop.permute.xlu0 %2102 }
 0x8da   :  { %2150 = vst.msk [vmem:[%s7665_s4 + $0x4] sm:$0xf] %vm2148_vm4, %v2103_v37 }
 0x8df   :  { %2198 = vperm.xlu0 %4267, %v7779_v32   ;;  %2178 = vperm.xlu1 %4268, %v7775_v49  }
 0x8e0   :  { %2174 = vperm.xlu2 %4269, %v5009_v42  }
 0x8e1   :  { %v2105_v43 = vpop.permute.xlu1 %2104 }
 0x8e2   :  { %2151 = vst.msk [vmem:[%s7665_s4 + $0x8] sm:$0xf] %vm2148_vm4, %v2105_v43 }
 0x8e7   :  { %2210 = vperm.xlu0 %4267, %v7781_v58   ;;  %2190 = vperm.xlu1 %4268, %v5002_v40  }
 0x8e8   :  { %2182 = vperm.xlu2 %4269, %v7768_v1  }
 0x8e9   :  { %v2113_v41 = vpop.permute.xlu2 %2112 }
 0x8ea   :  { %2155 = vst.msk [vmem:[%s7665_s4 + $0x18] sm:$0xf] %vm2148_vm4, %v2113_v41 }
 0x8ef   :  { %2222 = vperm.xlu0 %4267, %v7782_v16   ;;  %2202 = vperm.xlu1 %4268, %v5022_v46  }
 0x8f0   :  { %2194 = vperm.xlu2 %4269, %v7773_v51  }
 0x8f1   :  { %v2109_v3 = vpop.permute.xlu0 %2108 }
 0x8f2   :  { %2153 = vst.msk [vmem:[%s7665_s4 + $0x10] sm:$0xf] %vm2148_vm4, %v2109_v3 }
 0x8f7   :  { %2214 = vperm.xlu1 %4268, %v4989_v35  }
 0x8f8   :  { %2206 = vperm.xlu2 %4269, %v7774_v0  }
 0x8f9   :  { %v2111_v14 = vpop.permute.xlu1 %2110 }
 0x8fa   :  { %2154 = vst.msk [vmem:[%s7665_s4 + $0x14] sm:$0xf] %vm2148_vm4, %v2111_v14 }
 0x8ff   :  { %2226 = vperm.xlu1 %4268, %v7772_v47  }
 0x900   :  { %2218 = vperm.xlu2 %4269, %v7776_v13  }
 0x901   :  { %v2119_v17 = vpop.permute.xlu2 %2118 }
 0x902   :  { %2158 = vst.msk [vmem:[%s7665_s4 + $0x24] sm:$0xf] %vm2148_vm4, %v2119_v17 }
 0x909   :  { %v2115_v9 = vpop.permute.xlu0 %2114 }
 0x90a   :  { %2156 = vst.msk [vmem:[%s7665_s4 + $0x1c] sm:$0xf] %vm2148_vm4, %v2115_v9 }
 0x911   :  { %v2117_v57 = vpop.permute.xlu1 %2116 }
 0x912   :  { %2157 = vst.msk [vmem:[%s7665_s4 + $0x20] sm:$0xf] %vm2148_vm4, %v2117_v57 }
 0x919   :  { %v2125_v48 = vpop.permute.xlu2 %2124 }
 0x91a   :  { %2161 = vst.msk [vmem:[%s7665_s4 + $0x30] sm:$0xf] %vm2148_vm4, %v2125_v48 }
 0x921   :  { %v2121_v4 = vpop.permute.xlu0 %2120 }
 0x922   :  { %2159 = vst.msk [vmem:[%s7665_s4 + $0x28] sm:$0xf] %vm2148_vm4, %v2121_v4 }
 0x929   :  { %v2123_v54 = vpop.permute.xlu1 %2122 }
 0x92a   :  { %2160 = vst.msk [vmem:[%s7665_s4 + $0x2c] sm:$0xf] %vm2148_vm4, %v2123_v54 }
 0x932   :  { %v2131_v6 = vpop.permute.xlu2 %2130 }
 0x933   :  { %2164 = vst.msk [vmem:[%s7665_s4 + $0x3c] sm:$0xf] %vm2148_vm4, %v2131_v6 }
 0x939   :  { %v2127_v62 = vpop.permute.xlu0 %2126 }
 0x93a   :  { %2162 = vst.msk [vmem:[%s7665_s4 + $0x34] sm:$0xf] %vm2148_vm4, %v2127_v62  ;;  %v2175_v5 = vpop.permute.xlu2 %2174 }
 0x93b   :  { %v2232_v2 = vadd.f32 %v6450_v21, %v2175_v5 }
 0x93d   :  { %vm2248_vm5 = vcmp.gt.f32.partialorder %v2232_v2, 0.0  ;;  %v2264_v61 = vmul.f32 0.2, %v2232_v2 }
 0x93f   :  { %v2280_v24 = vsel %vm2248_vm5, %v2232_v2, %v2264_v61  ;;  %vm2615_vm5 = vcmask 322816  }
 0x940   :  { %v6458_v63 = vadd.f32 %v7780_v55, %v2280_v24 }
 0x941   :  { %v2167_v60 = vpop.permute.xlu0 %2166  ;;  %v2129_v30 = vpop.permute.xlu1 %2128 }
 0x942   :  { %v2230_v59 = vadd.f32 %v6450_v21, %v2167_v60  ;;  %2163 = vst.msk [vmem:[%s7665_s4 + $0x38] sm:$0xf] %vm2148_vm4, %v2129_v30  ;;  %2314 = vmax.xlane.f32.xlu1 %v6458_v63  ;;  %v2183_v52 = vpop.permute.xlu2 %2182 }
 0x943   :  { %v2234_v20 = vadd.f32 %v6450_v21, %v2183_v52 }
 0x944   :  { %vm2246_vm6 = vcmp.gt.f32.partialorder %v2230_v59, 0.0  ;;  %v2262_v38 = vmul.f32 0.2, %v2230_v59 }
 0x945   :  { %v2266_v31 = vmul.f32 0.2, %v2234_v20  ;;  %vm2250_vm8 = vcmp.gt.f32.partialorder %v2234_v20, 0.0 }
 0x946   :  { %v2278_v45 = vsel %vm2246_vm6, %v2230_v59, %v2262_v38 }
 0x947   :  { %v6467_v27 = vadd.f32 %v7783_v25, %v2278_v45  ;;  %v2282_v43 = vsel %vm2250_vm8, %v2234_v20, %v2266_v31 }
 0x948   :  { %v6483_v9 = vadd.f32 %v7812_v50, %v2282_v43 }
 0x949   :  { %v2171_v15 = vpop.permute.xlu1 %2170  ;;  %2310 = vmax.xlane.f32.xlu2 %v6467_v27  ;;  %v2187_v36 = vpop.permute.xlu0 %2186 }
 0x94a   :  { %v2231_v8 = vadd.f32 %v6450_v21, %v2171_v15  ;;  %v2195_v23 = vpop.permute.xlu2 %2194  ;;  %v2235_v44 = vadd.f32 %v6450_v21, %v2187_v36 }
 0x94b   :  { %v2237_v41 = vadd.f32 %v6450_v21, %v2195_v23 }
 0x94c   :  { %vm2247_vm7 = vcmp.gt.f32.partialorder %v2231_v8, 0.0  ;;  %v2263_v18 = vmul.f32 0.2, %v2231_v8  ;;  %v2267_v57 = vmul.f32 0.2, %v2235_v44  ;;  %vm2251_vm10 = vcmp.gt.f32.partialorder %v2235_v44, 0.0 }
 0x94d   :  { %v2269_v4 = vmul.f32 0.2, %v2237_v41  ;;  %vm2253_vm11 = vcmp.gt.f32.partialorder %v2237_v41, 0.0 }
 0x94e   :  { %v2279_v29 = vsel %vm2247_vm7, %v2231_v8, %v2263_v18  ;;  %v2283_v2 = vsel %vm2251_vm10, %v2235_v44, %v2267_v57 }
 0x94f   :  { %v6473_v19 = vadd.f32 %v7786_v53, %v2279_v29  ;;  %v2285_v24 = vsel %vm2253_vm11, %v2237_v41, %v2269_v4  ;;  %v6491_v59 = vadd.f32 %v7789_v34, %v2283_v2 }
 0x950   :  { %v6497_v45 = vadd.f32 %v7815_v12, %v2285_v24  ;;  %v7835_v24 = vld [vmem:[#allocation30_spill] sm:$0xff] }
 0x951   :  { %2312 = vmax.xlane.f32.xlu0 %v6473_v19  ;;  %v2179_v22 = vpop.permute.xlu1 %2178  ;;  %v2199_v3 = vpop.permute.xlu0 %2198 }
 0x952   :  { %v2233_v28 = vadd.f32 %v6450_v21, %v2179_v22  ;;  %v2207_v48 = vpop.permute.xlu2 %2206  ;;  %v2238_v62 = vadd.f32 %v6450_v21, %v2199_v3  ;;  %v7834_v3 = vld [vmem:[#allocation27_spill] sm:$0xff] }
 0x953   :  { %v2240_v61 = vadd.f32 %v6450_v21, %v2207_v48 }
 0x954   :  { %vm2249_vm9 = vcmp.gt.f32.partialorder %v2233_v28, 0.0  ;;  %v2265_v37 = vmul.f32 0.2, %v2233_v28  ;;  %v2270_v52 = vmul.f32 0.2, %v2238_v62  ;;  %vm2254_vm13 = vcmp.gt.f32.partialorder %v2238_v62, 0.0 }
 0x955   :  { %v2272_v15 = vmul.f32 0.2, %v2240_v61  ;;  %vm2256_vm14 = vcmp.gt.f32.partialorder %v2240_v61, 0.0 }
 0x956   :  { %v2281_v14 = vsel %vm2249_vm9, %v2233_v28, %v2265_v37  ;;  %v2286_v29 = vsel %vm2254_vm13, %v2238_v62, %v2270_v52  ;;  %v7833_v37 = vld [vmem:[#allocation26_spill] sm:$0xff] }
 0x957   :  { %v6480_v17 = vadd.f32 %v7810_v10, %v2281_v14  ;;  %v2288_v22 = vsel %vm2256_vm14, %v2240_v61, %v2272_v15  ;;  %v6506_v44 = vadd.f32 %v7811_v11, %v2286_v29 }
 0x958   :  { %v6512_v14 = vadd.f32 %v7834_v3, %v2288_v22  ;;  %v7838_v22 = vld [vmem:[#allocation20_spill] sm:$0xff] }
 0x959   :  { %v2191_v54 = vpop.permute.xlu1 %2190  ;;  %2316 = vmax.xlane.f32.xlu2 %v6480_v17  ;;  %2318 = vmax.xlane.f32.xlu0 %v6483_v9  ;;  %v2211_v30 = vpop.permute.xlu0 %2210 }
 0x95a   :  { %v2236_v6 = vadd.f32 %v6450_v21, %v2191_v54  ;;  %v2219_v36 = vpop.permute.xlu2 %2218  ;;  %v2241_v18 = vadd.f32 %v6450_v21, %v2211_v30  ;;  %v7836_v30 = vld [vmem:[#allocation17_spill] sm:$0xff] }
 0x95b   :  { %v2243_v31 = vadd.f32 %v6450_v21, %v2219_v36 }
 0x95c   :  { %vm2252_vm12 = vcmp.gt.f32.partialorder %v2236_v6, 0.0  ;;  %v2268_v5 = vmul.f32 0.2, %v2236_v6  ;;  %v2273_v41 = vmul.f32 0.2, %v2241_v18  ;;  %vm2257_vm0 = vcmp.gt.f32.partialorder %v2241_v18, 0.0 }
 0x95d   :  { %v2275_v57 = vmul.f32 0.2, %v2243_v31  ;;  %vm2259_vm1 = vcmp.gt.f32.partialorder %v2243_v31, 0.0 }
 0x95e   :  { %v2284_v60 = vsel %vm2252_vm12, %v2236_v6, %v2268_v5  ;;  %v2289_v5 = vsel %vm2257_vm0, %v2241_v18, %v2273_v41  ;;  %v7839_v41 = vld [vmem:[#allocation24_spill] sm:$0xff] }
 0x95f   :  { %v6494_v38 = vadd.f32 %v7813_v56, %v2284_v60  ;;  %v2291_v2 = vsel %vm2259_vm1, %v2243_v31, %v2275_v57  ;;  %v6520_v60 = vadd.f32 %v7835_v24, %v2289_v5 }
 0x961   :  { %v2203_v8 = vpop.permute.xlu1 %2202  ;;  %2320 = vmax.xlane.f32.xlu2 %v6491_v59  ;;  %2322 = vmax.xlane.f32.xlu1 %v6494_v38  ;;  %v2223_v48 = vpop.permute.xlu0 %2222 }
 0x962   :  { %v2239_v20 = vadd.f32 %v6450_v21, %v2203_v8  ;;  %2324 = vmax.xlane.f32.xlu0 %v6497_v45  ;;  %v2244_v6 = vadd.f32 %v6450_v21, %v2223_v48  ;;  %v7837_v8 = vld [vmem:[#allocation18_spill] sm:$0xff] }
 0x963   :  { %v6526_v36 = vadd.f32 %v7837_v8, %v2291_v2 }
 0x964   :  { %vm2255_vm15 = vcmp.gt.f32.partialorder %v2239_v20, 0.0  ;;  %v2271_v23 = vmul.f32 0.2, %v2239_v20  ;;  %v2276_v15 = vmul.f32 0.2, %v2244_v6  ;;  %vm2260_vm3 = vcmp.gt.f32.partialorder %v2244_v6, 0.0 }
 0x966   :  { %v2287_v28 = vsel %vm2255_vm15, %v2239_v20, %v2271_v23  ;;  %v2292_v29 = vsel %vm2260_vm3, %v2244_v6, %v2276_v15 }
 0x967   :  { %v6509_v43 = vadd.f32 %v7833_v37, %v2287_v28  ;;  %v6533_v28 = vadd.f32 %v7838_v22, %v2292_v29 }
 0x969   :  { %v2215_v4 = vpop.permute.xlu1 %2214  ;;  %2326 = vmax.xlane.f32.xlu2 %v6506_v44  ;;  %2328 = vmax.xlane.f32.xlu1 %v6509_v43 }
 0x96a   :  { %v2242_v54 = vadd.f32 %v6450_v21, %v2215_v4  ;;  %2330 = vmax.xlane.f32.xlu0 %v6512_v14 }
 0x96c   :  { %vm2258_vm2 = vcmp.gt.f32.partialorder %v2242_v54, 0.0  ;;  %v2274_v62 = vmul.f32 0.2, %v2242_v54 }
 0x96e   :  { %v2290_v61 = vsel %vm2258_vm2, %v2242_v54, %v2274_v62 }
 0x96f   :  { %v6523_v52 = vadd.f32 %v7836_v30, %v2290_v61 }
 0x971   :  { %v2227_v20 = vpop.permute.xlu1 %2226  ;;  %2332 = vmax.xlane.f32.xlu2 %v6520_v60  ;;  %2334 = vmax.xlane.f32.xlu1 %v6523_v52 }
 0x972   :  { %v2245_v18 = vadd.f32 %v6450_v21, %v2227_v20  ;;  %2336 = vmax.xlane.f32.xlu0 %v6526_v36 }
 0x974   :  { %vm2261_vm4 = vcmp.gt.f32.partialorder %v2245_v18, 0.0  ;;  %v2277_v23 = vmul.f32 0.2, %v2245_v18 }
 0x976   :  { %v2293_v31 = vsel %vm2261_vm4, %v2245_v18, %v2277_v23 }
 0x977   :  { %v6536_v57 = vadd.f32 %v7839_v41, %v2293_v31 }
 0x979   :  { %2338 = vmax.xlane.f32.xlu2 %v6533_v28  ;;  %2340 = vmax.xlane.f32.xlu1 %v6536_v57 }
 0x9b5   :  { %v2315_v48 = vpop.xlane.xlu1 %2314 }
 0x9b6   :  { %v2344_v4 = vsub.f32 %v6458_v63, %v2315_v48 }
 0x9b8   :  { %v2362_v21 = vmul.f32 1.442695, %v2344_v4 }
 0x9ba   :  { %4535 = vpow2.f32 %v2362_v21 }
 0x9bc   :  { %v2311_v54 = vpop.xlane.xlu2 %2310 }
 0x9bd   :  { %v2342_v62 = vsub.f32 %v6467_v27, %v2311_v54 }
 0x9bf   :  { %v2358_v6 = vmul.f32 1.442695, %v2342_v62 }
 0x9c0   :  { %v6542_v5 = vpop.eup %4535 }
 0x9c1   :  { %4537 = vpow2.f32 %v2358_v6  ;;  %2394 = vadd.xlane.f32.xlu1 %v6542_v5 }
 0x9c4   :  { %v2313_v2 = vpop.xlane.xlu0 %2312 }
 0x9c5   :  { %v2343_v61 = vsub.f32 %v6473_v19, %v2313_v2 }
 0x9c7   :  { %v6546_v15 = vpop.eup %4537  ;;  %v2360_v20 = vmul.f32 1.442695, %v2343_v61 }
 0x9c8   :  { %2390 = vadd.xlane.f32.xlu0 %v6546_v15 }
 0x9c9   :  { %4539 = vpow2.f32 %v2360_v20 }
 0x9cc   :  { %v2319_v63 = vpop.xlane.xlu0 %2318  ;;  %v2317_v18 = vpop.xlane.xlu2 %2316 }
 0x9cd   :  { %v2346_v23 = vsub.f32 %v6483_v9, %v2319_v63  ;;  %v2345_v27 = vsub.f32 %v6480_v17, %v2317_v18 }
 0x9cf   :  { %v6551_v29 = vpop.eup %4539  ;;  %v2366_v31 = vmul.f32 1.442695, %v2346_v23  ;;  %v2364_v48 = vmul.f32 1.442695, %v2345_v27 }
 0x9d0   :  { %2392 = vadd.xlane.f32.xlu2 %v6551_v29  ;;  %v7848_v37 = vpack.c.bf16 %v6551_v29, %v6546_v15 }
 0x9d1   :  { %4541 = vpow2.f32 %v2366_v31 }
 0x9d2   :  { %4543 = vpow2.f32 %v2364_v48 }
 0x9d4   :  { %v2323_v19 = vpop.xlane.xlu1 %2322  ;;  %v2321_v21 = vpop.xlane.xlu2 %2320 }
 0x9d5   :  { %v2348_v54 = vsub.f32 %v6494_v38, %v2323_v19  ;;  %v2325_v62 = vpop.xlane.xlu0 %2324  ;;  %v2347_v9 = vsub.f32 %v6491_v59, %v2321_v21 }
 0x9d6   :  { %v2349_v17 = vsub.f32 %v6497_v45, %v2325_v62 }
 0x9d7   :  { %v6559_v6 = vpop.eup %4541  ;;  %v2370_v2 = vmul.f32 1.442695, %v2348_v54  ;;  %v2368_v61 = vmul.f32 1.442695, %v2347_v9 }
 0x9d8   :  { %v6561_v20 = vpop.eup %4543  ;;  %v2372_v63 = vmul.f32 1.442695, %v2349_v17  ;;  %2398 = vadd.xlane.f32.xlu2 %v6559_v6 }
 0x9d9   :  { %4545 = vpow2.f32 %v2370_v2  ;;  %2396 = vadd.xlane.f32.xlu0 %v6561_v20  ;;  %v7849_v12 = vpack.c.bf16 %v6561_v20, %v6542_v5 }
 0x9da   :  { %4547 = vpow2.f32 %v2372_v63 }
 0x9db   :  { %4549 = vpow2.f32 %v2368_v61 }
 0x9dc   :  { %v2329_v59 = vpop.xlane.xlu1 %2328  ;;  %v2327_v18 = vpop.xlane.xlu2 %2326 }
 0x9dd   :  { %v2351_v45 = vsub.f32 %v6509_v43, %v2329_v59  ;;  %v2331_v23 = vpop.xlane.xlu0 %2330  ;;  %v2350_v27 = vsub.f32 %v6506_v44, %v2327_v18 }
 0x9de   :  { %v2352_v31 = vsub.f32 %v6512_v14, %v2331_v23 }
 0x9df   :  { %v6570_v48 = vpop.eup %4545  ;;  %v2376_v19 = vmul.f32 1.442695, %v2351_v45  ;;  %v2374_v21 = vmul.f32 1.442695, %v2350_v27 }
 0x9e0   :  { %v6572_v54 = vpop.eup %4547  ;;  %v2378_v62 = vmul.f32 1.442695, %v2352_v31 }
 0x9e1   :  { %v6574_v9 = vpop.eup %4549  ;;  %4551 = vpow2.f32 %v2376_v19  ;;  %2404 = vadd.xlane.f32.xlu2 %v6572_v54  ;;  %2402 = vadd.xlane.f32.xlu0 %v6570_v48 }
 0x9e2   :  { %4553 = vpow2.f32 %v2378_v62  ;;  %2400 = vadd.xlane.f32.xlu1 %v6574_v9 }
 0x9e3   :  { %4555 = vpow2.f32 %v2374_v21 }
 0x9e4   :  { %v2335_v14 = vpop.xlane.xlu1 %2334  ;;  %v2333_v17 = vpop.xlane.xlu2 %2332 }
 0x9e5   :  { %v2354_v2 = vsub.f32 %v6523_v52, %v2335_v14  ;;  %v2337_v61 = vpop.xlane.xlu0 %2336  ;;  %v2353_v63 = vsub.f32 %v6520_v60, %v2333_v17 }
 0x9e6   :  { %v2355_v59 = vsub.f32 %v6526_v36, %v2337_v61 }
 0x9e7   :  { %v6586_v18 = vpop.eup %4551  ;;  %v2382_v45 = vmul.f32 1.442695, %v2354_v2  ;;  %v2380_v23 = vmul.f32 1.442695, %v2353_v63 }
 0x9e8   :  { %v6588_v27 = vpop.eup %4553  ;;  %v2384_v31 = vmul.f32 1.442695, %v2355_v59 }
 0x9e9   :  { %v6590_v19 = vpop.eup %4555  ;;  %4557 = vpow2.f32 %v2382_v45  ;;  %2410 = vadd.xlane.f32.xlu2 %v6588_v27  ;;  %2408 = vadd.xlane.f32.xlu0 %v6586_v18 }
 0x9ea   :  { %4559 = vpow2.f32 %v2384_v31  ;;  %2406 = vadd.xlane.f32.xlu1 %v6590_v19  ;;  %v6615_v31 = vld [vmem:[%s7663_s0] sm:$0xff] }
 0x9eb   :  { %4561 = vpow2.f32 %v2380_v23  ;;  %7840 = vst [vmem:[#allocation3_spill] sm:$0xff] %v6615_v31 }
 0x9ec   :  { %v2341_v52 = vpop.xlane.xlu1 %2340  ;;  %v2339_v36 = vpop.xlane.xlu2 %2338 }
 0x9ed   :  { %v2357_v21 = vsub.f32 %v6536_v57, %v2341_v52  ;;  %v2356_v62 = vsub.f32 %v6533_v28, %v2339_v36  ;;  %v6621_v52 = vld [vmem:[%s7663_s0 + $0x10] sm:$0xff]  ;;  %v6633_v36 = vld [vmem:[%s7663_s0 + $0x8] sm:$0xff] }
 0x9ee   :  { %7841 = vst [vmem:[#allocation12_spill] sm:$0xff] %v6621_v52 }
 0x9ef   :  { %v6599_v14 = vpop.eup %4557  ;;  %v2388_v17 = vmul.f32 1.442695, %v2357_v21  ;;  %v2386_v2 = vmul.f32 1.442695, %v2356_v62  ;;  %7843 = vst [vmem:[#allocation19_spill] sm:$0xff] %v6633_v36  ;;  %v6639_v21 = vld [vmem:[%s7663_s0 + $0x28] sm:$0xff] }
 0x9f0   :  { %v6601_v61 = vpop.eup %4559  ;;  %7844 = vst [vmem:[#allocation10_spill] sm:$0xff] %v6639_v21  ;;  %v6645_v62 = vld [vmem:[%s7663_s0 + $0x30] sm:$0xff] }
 0x9f1   :  { %v6603_v63 = vpop.eup %4561  ;;  %4563 = vpow2.f32 %v2388_v17  ;;  %2416 = vadd.xlane.f32.xlu2 %v6601_v61  ;;  %2414 = vadd.xlane.f32.xlu0 %v6599_v14  ;;  %7845 = vst [vmem:[#allocation5_spill] sm:$0xff] %v6645_v62  ;;  %v6651_v17 = vld [vmem:[%s7663_s0 + $0x20] sm:$0xff] }
 0x9f2   :  { %4565 = vpow2.f32 %v2386_v2  ;;  %2412 = vadd.xlane.f32.xlu1 %v6603_v63  ;;  %v2427_v28 = vpack.c.bf16 %v6603_v63, %v6588_v27  ;;  %v6627_v27 = vld [vmem:[%s7663_s0 + $0x18] sm:$0xff]  ;;  %7846 = vst [vmem:[#allocation14_spill] sm:$0xff] %v6651_v17 }
 0x9f3   :  { %7842 = vst [vmem:[#allocation7_spill] sm:$0xff] %v6627_v27  ;;  %v6657_v2 = vld [vmem:[%s7663_s0 + $0x38] sm:$0xff] }
 0x9f4   :  { %7847 = vst [vmem:[#allocation15_spill] sm:$0xff] %v6657_v2 }
 0x9f7   :  { %v4564_v57 = vpop.eup %4563 }
 0x9f8   :  { %v4566_v45 = vpop.eup %4565 }
 0x9f9   :  { %2420 = vadd.xlane.f32.xlu0 %v4564_v57  ;;  %v2429_v23 = vpack.c.bf16 %v4564_v57, %v4566_v45 }
 0x9fa   :  { %2418 = vadd.xlane.f32.xlu1 %v4566_v45 }
 0xa09   :  { %2430 = vrot.lane.b32.xlu2 %v6615_v31, %s4826_s30 }
 0xa0d   :  { %2434 = vrot.lane.b32.xlu0 %v6621_v52, %s4826_s30 }
 0xa11   :  { %2436 = vrot.lane.b32.xlu2 %v6627_v27, %s4826_s30 }
 0xa13   :  { %2432 = vrot.lane.b32.xlu1 %v6633_v36, %s4826_s30 }
 0xa15   :  { %2440 = vrot.lane.b32.xlu0 %v6639_v21, %s4826_s30 }
 0xa19   :  { %2442 = vrot.lane.b32.xlu2 %v6645_v62, %s4826_s30 }
 0xa1b   :  { %2438 = vrot.lane.b32.xlu1 %v6651_v17, %s4826_s30 }
 0xa23   :  { %2444 = vrot.lane.b32.xlu1 %v6657_v2, %s4826_s30 }
 0xa34   :  { %v2395_v57 = vpop.xlane.xlu1 %2394 }
 0xa3b   :  { %v2391_v45 = vpop.xlane.xlu0 %2390 }
 0xa3c   :  { %4567 = vrcp.f32 %v2391_v45 }
 0xa43   :  { %v2393_v63 = vpop.xlane.xlu2 %2392 }
 0xa44   :  { %4569 = vrcp.f32 %v2393_v63 }
 0xa45   :  { %4571 = vrcp.f32 %v2395_v57 }
 0xa4b   :  { %v2399_v59 = vpop.xlane.xlu2 %2398 }
 0xa4c   :  { %v2397_v43 = vpop.xlane.xlu0 %2396 }
 0xa4d   :  { %4573 = vrcp.f32 %v2397_v43 }
 0xa4e   :  { %4575 = vrcp.f32 %v2399_v59 }
 0xa54   :  { %v6662_v44 = vpop.xlane.xlu2 %2404  ;;  %v6666_v4 = vpop.xlane.xlu0 %2402 }
 0xa55   :  { %v6660_v60 = vpop.xlane.xlu1 %2400 }
 0xa56   :  { %4577 = vrcp.f32 %v6660_v60 }
 0xa57   :  { %4579 = vrcp.f32 %v6666_v4 }
 0xa58   :  { %4581 = vrcp.f32 %v6662_v44 }
 0xa5c   :  { %v6668_v21 = vpop.xlane.xlu2 %2410  ;;  %v6672_v27 = vpop.xlane.xlu0 %2408 }
 0xa5d   :  { %v6664_v38 = vpop.xlane.xlu1 %2406 }
 0xa5e   :  { %4583 = vrcp.f32 %v6664_v38 }
 0xa5f   :  { %4585 = vrcp.f32 %v6672_v27 }
 0xa60   :  { %4587 = vrcp.f32 %v6668_v21 }
 0xa64   :  { %v6674_v2 = vpop.xlane.xlu2 %2416  ;;  %v6678_v52 = vpop.xlane.xlu0 %2414 }
 0xa65   :  { %v6670_v62 = vpop.xlane.xlu1 %2412 }
 0xa66   :  { %4589 = vrcp.f32 %v6670_v62 }
 0xa67   :  { %4591 = vrcp.f32 %v6678_v52 }
 0xa68   :  { %4593 = vrcp.f32 %v6674_v2 }
 0xa6c   :  { %v2431_v36 = vpop.permute.xlu2 %2430  ;;  %v6680_v22 = vpop.xlane.xlu0 %2420 }
 0xa6d   :  { %v6676_v17 = vpop.xlane.xlu1 %2418 }
 0xa6e   :  { %4595 = vrcp.f32 %v6676_v17 }
 0xa6f   :  { %4597 = vrcp.f32 %v6680_v22 }
 0xa74   :  { %v2437_v8 = vpop.permute.xlu2 %2436 }
 0xa7c   :  { %v2443_v3 = vpop.permute.xlu2 %2442 }
 0xa7f   :  { %v2435_v24 = vpop.permute.xlu0 %2434 }
 0xa85   :  { %v2433_v31 = vpop.permute.xlu1 %2432 }
 0xa87   :  { %v2441_v11 = vpop.permute.xlu0 %2440 }
 0xa8d   :  { %v2439_v41 = vpop.permute.xlu1 %2438 }
 0xa95   :  { %v2445_v30 = vpop.permute.xlu1 %2444 }
 0xa96   :  { %2454 = vmatpush.bf16.msra.mxu2 %v2445_v30  ;;  %v7850_v30 = vpack.c.bf16 %v6574_v9, %v6559_v6 }
 0xa9a   :  { %2455 = vmatpush.bf16.msra.mxu2 %v2443_v3  ;;  %v7852_v3 = vpack.c.bf16 %v6586_v18, %v6590_v19 }
 0xa9e   :  { %2456 = vmatpush.bf16.msra.mxu2 %v2441_v11  ;;  %v7851_v11 = vpack.c.bf16 %v6572_v54, %v6570_v48 }
 0xaa2   :  { %2457 = vmatpush.bf16.msra.mxu2 %v2439_v41 }
 0xaa6   :  { %2458 = vmatpush.bf16.msra.mxu2 %v2437_v8 }
 0xaaa   :  { %2459 = vmatpush.bf16.msra.mxu2 %v2435_v24 }
 0xaae   :  { %2460 = vmatpush.bf16.msra.mxu2 %v2433_v31 }
 0xab2   :  { %2461 = vmatpush.bf16.msra.mxu2 %v2431_v36 }
 0xab5   :  { %2462 = vmatmul.bf16.vlgmr.msra.gmra.mxu2 %v7848_v37  ;;  %v7853_v37 = vpack.c.bf16 %v6601_v61, %v6599_v14 }
 0xac5   :  { %2467 = vmatmul.bf16.gmra.mxu2 %v7849_v12  ;;  %v4568_v12 = vpop.eup %4567 }
 0xac6   :  { %v4570_v5 = vpop.eup %4569 }
 0xac7   :  { %v4572_v20 = vpop.eup %4571 }
 0xac8   :  { %v4574_v18 = vpop.eup %4573 }
 0xad5   :  { %2472 = vmatmul.bf16.gmra.mxu2 %v7850_v30 }
 0xae5   :  { %2477 = vmatmul.bf16.gmra.mxu2 %v7851_v11 }
 0xaf5   :  { %2482 = vmatmul.bf16.gmra.mxu2 %v7852_v3 }
 0xb05   :  { %2487 = vmatmul.bf16.gmra.mxu2 %v2427_v28  ;;  %v4576_v28 = vpop.eup %4575 }
 0xb06   :  { %v4578_v63 = vpop.eup %4577 }
 0xb07   :  { %v4580_v59 = vpop.eup %4579 }
 0xb08   :  { %v4582_v60 = vpop.eup %4581 }
 0xb09   :  { %v4584_v4 = vpop.eup %4583 }
 0xb0a   :  { %v4586_v44 = vpop.eup %4585 }
 0xb0b   :  { %v4588_v38 = vpop.eup %4587 }
 0xb0c   :  { %v4590_v27 = vpop.eup %4589 }
 0xb15   :  { %2492 = vmatmul.bf16.gmra.mxu2 %v7853_v37 }
 0xb25   :  { %2497 = vmatmul.bf16.gmra.mxu2 %v2429_v23 }
 0xb38   :  { %v2463_v24 = vpop.f32.mrf.mxu2 }
 0xb39   :  { %v2519_v8 = vmul.f32 %v4568_v12, %v2463_v24 }
 0xb3b   :  { %v2535_v41 = vpack.c.bf16 %v2519_v8, %v2519_v8 }
 0xb3d   :  { %2567 = vrot.lane.b32.xlu0 %v2535_v41, %s4827_s17 }
 0xb40   :  { %v2465_v15 = vpop.f32.mrf.mxu2 }
 0xb41   :  { %v2520_v29 = vmul.f32 %v4570_v5, %v2465_v15 }
 0xb43   :  { %v2536_v6 = vpack.c.bf16 %v2520_v29, %v2520_v29 }
 0xb45   :  { %2569 = vrot.lane.b32.xlu2 %v2536_v6, %s4827_s17 }
 0xb48   :  { %v2468_v48 = vpop.f32.mrf.mxu2 }
 0xb49   :  { %v2521_v54 = vmul.f32 %v4572_v20, %v2468_v48 }
 0xb4b   :  { %v2537_v9 = vpack.c.bf16 %v2521_v54, %v2521_v54 }
 0xb4d   :  { %2571 = vrot.lane.b32.xlu1 %v2537_v9, %s4827_s17  ;;  %v4828_v9 = vmov 5  }
 0xb4e   :  { %4270 = vset.pattern.permute.xlu2 %v4828_v9  ;;  %4271 = vset.pattern.permute.xlu1 %v4828_v9 }
 0xb4f   :  { %4272 = vset.pattern.permute.xlu0 %v4828_v9 }
 0xb50   :  { %v2470_v19 = vpop.f32.mrf.mxu2 }
 0xb51   :  { %v2522_v14 = vmul.f32 %v4574_v18, %v2470_v19 }
 0xb53   :  { %v2538_v61 = vpack.c.bf16 %v2522_v14, %v2522_v14  ;;  %v4592_v14 = vpop.eup %4591 }
 0xb55   :  { %2573 = vrot.lane.b32.xlu0 %v2538_v61, %s4827_s17 }
 0xb58   :  { %v2473_v23 = vpop.f32.mrf.mxu2 }
 0xb59   :  { %v2523_v31 = vmul.f32 %v4576_v28, %v2473_v23 }
 0xb5b   :  { %v2539_v36 = vpack.c.bf16 %v2523_v31, %v2523_v31  ;;  %v4594_v31 = vpop.eup %4593 }
 0xb5d   :  { %2575 = vrot.lane.b32.xlu2 %v2539_v36, %s4827_s17 }
 0xb60   :  { %v2475_v43 = vpop.f32.mrf.mxu2 }
 0xb61   :  { %v2524_v57 = vmul.f32 %v4578_v63, %v2475_v43  ;;  %v4596_v43 = vpop.eup %4595 }
 0xb63   :  { %v2540_v45 = vpack.c.bf16 %v2524_v57, %v2524_v57 }
 0xb65   :  { %2577 = vrot.lane.b32.xlu1 %v2540_v45, %s4827_s17 }
 0xb68   :  { %v2478_v30 = vpop.f32.mrf.mxu2 }
 0xb69   :  { %v2525_v11 = vmul.f32 %v4580_v59, %v2478_v30  ;;  %v4598_v30 = vpop.eup %4597 }
 0xb6b   :  { %v2541_v3 = vpack.c.bf16 %v2525_v11, %v2525_v11 }
 0xb6d   :  { %2579 = vrot.lane.b32.xlu0 %v2541_v3, %s4827_s17 }
 0xb70   :  { %v2480_v37 = vpop.f32.mrf.mxu2 }
 0xb71   :  { %v2526_v12 = vmul.f32 %v4582_v60, %v2480_v37 }
 0xb73   :  { %v2542_v24 = vpack.c.bf16 %v2526_v12, %v2526_v12 }
 0xb75   :  { %2581 = vrot.lane.b32.xlu2 %v2542_v24, %s4827_s17 }
 0xb78   :  { %v2483_v8 = vpop.f32.mrf.mxu2 }
 0xb79   :  { %v2527_v41 = vmul.f32 %v4584_v4, %v2483_v8 }
 0xb7b   :  { %v2543_v5 = vpack.c.bf16 %v2527_v41, %v2527_v41 }
 0xb7d   :  { %2583 = vrot.lane.b32.xlu1 %v2543_v5, %s4827_s17 }
 0xb80   :  { %v2485_v15 = vpop.f32.mrf.mxu2 }
 0xb81   :  { %v2528_v29 = vmul.f32 %v4586_v44, %v2485_v15  ;;  %v6792_v15 = vperm.slane %v7778_v7, 5 }
 0xb83   :  { %v2544_v6 = vpack.c.bf16 %v2528_v29, %v2528_v29 }
 0xb85   :  { %2585 = vrot.lane.b32.xlu0 %v2544_v6, %s4827_s17 }
 0xb88   :  { %v2488_v20 = vpop.f32.mrf.mxu2 }
 0xb89   :  { %v2529_v48 = vmul.f32 %v4588_v38, %v2488_v20 }
 0xb8b   :  { %v2545_v54 = vpack.c.bf16 %v2529_v48, %v2529_v48 }
 0xb8d   :  { %2587 = vrot.lane.b32.xlu2 %v2545_v54, %s4827_s17 }
 0xb90   :  { %v2490_v18 = vpop.f32.mrf.mxu2 }
 0xb91   :  { %v2530_v19 = vmul.f32 %v4590_v27, %v2490_v18 }
 0xb93   :  { %v2546_v21 = vpack.c.bf16 %v2530_v19, %v2530_v19 }
 0xb95   :  { %2589 = vrot.lane.b32.xlu1 %v2546_v21, %s4827_s17 }
 0xb98   :  { %v2493_v61 = vpop.f32.mrf.mxu2 }
 0xb99   :  { %v2531_v28 = vmul.f32 %v4592_v14, %v2493_v61 }
 0xb9b   :  { %v2547_v62 = vpack.c.bf16 %v2531_v28, %v2531_v28 }
 0xb9d   :  { %2591 = vrot.lane.b32.xlu0 %v2547_v62, %s4827_s17 }
 0xb9f   :  { %v2570_v23 = vpop.permute.xlu2 %2569 }
 0xba0   :  { %2617 = vst.msk [vmem:[%s7665_s4 + $0x4] sm:$0xf] %vm2615_vm5, %v2570_v23  ;;  %v2495_v52 = vpop.f32.mrf.mxu2 }
 0xba1   :  { %v2532_v36 = vmul.f32 %v4594_v31, %v2495_v52 }
 0xba3   :  { %v2548_v63 = vpack.c.bf16 %v2532_v36, %v2532_v36 }
 0xba5   :  { %2593 = vrot.lane.b32.xlu2 %v2548_v63, %s4827_s17 }
 0xba8   :  { %v2498_v2 = vpop.f32.mrf.mxu2 }
 0xba9   :  { %v2533_v57 = vmul.f32 %v4596_v43, %v2498_v2 }
 0xbab   :  { %v2549_v45 = vpack.c.bf16 %v2533_v57, %v2533_v57 }
 0xbad   :  { %2633 = vperm.xlu2 %4270, %v4984_v33   ;;  %2595 = vrot.lane.b32.xlu1 %v2549_v45, %s4827_s17 }
 0xbaf   :  { %v2568_v59 = vpop.permute.xlu0 %2567 }
 0xbb0   :  { %2616 = vst.msk [vmem:[%s7665_s4] sm:$0xf] %vm2615_vm5, %v2568_v59  ;;  %v2500_v17 = vpop.f32.mrf.mxu2 }
 0xbb1   :  { %v2534_v11 = vmul.f32 %v4598_v30, %v2500_v17 }
 0xbb3   :  { %v2550_v3 = vpack.c.bf16 %v2534_v11, %v2534_v11 }
 0xbb5   :  { %2645 = vperm.xlu2 %4270, %v7775_v49   ;;  %2637 = vperm.xlu1 %4271, %v5000_v39  }
 0xbb6   :  { %2597 = vrot.lane.b32.xlu0 %v2550_v3, %s4827_s17 }
 0xbb7   :  { %v2576_v22 = vpop.permute.xlu2 %2575 }
 0xbb8   :  { %2620 = vst.msk [vmem:[%s7665_s4 + $0x10] sm:$0xf] %vm2615_vm5, %v2576_v22 }
 0xbbd   :  { %2653 = vperm.xlu2 %4270, %v7777_v26   ;;  %2649 = vperm.xlu1 %4271, %v7768_v1  }
 0xbbe   :  { %2641 = vperm.xlu0 %4272, %v5009_v42  }
 0xbbf   :  { %v2572_v60 = vpop.permute.xlu1 %2571 }
 0xbc0   :  { %2618 = vst.msk [vmem:[%s7665_s4 + $0x8] sm:$0xf] %vm2615_vm5, %v2572_v60 }
 0xbc5   :  { %2665 = vperm.xlu2 %4270, %v7779_v32   ;;  %2657 = vperm.xlu1 %4271, %v5002_v40  }
 0xbc6   :  { %2661 = vperm.xlu0 %4272, %v7773_v51  }
 0xbc7   :  { %v2574_v37 = vpop.permute.xlu0 %2573 }
 0xbc8   :  { %2619 = vst.msk [vmem:[%s7665_s4 + $0xc] sm:$0xf] %vm2615_vm5, %v2574_v37 }
 0xbcd   :  { %2677 = vperm.xlu2 %4270, %v7781_v58   ;;  %2669 = vperm.xlu1 %4271, %v5022_v46  }
 0xbce   :  { %2673 = vperm.xlu0 %4272, %v7774_v0  }
 0xbcf   :  { %v2582_v12 = vpop.permute.xlu2 %2581 }
 0xbd0   :  { %2623 = vst.msk [vmem:[%s7665_s4 + $0x1c] sm:$0xf] %vm2615_vm5, %v2582_v12 }
 0xbd5   :  { %2689 = vperm.xlu2 %4270, %v7782_v16   ;;  %2681 = vperm.xlu1 %4271, %v4989_v35  }
 0xbd6   :  { %2685 = vperm.xlu0 %4272, %v7776_v13  }
 0xbd7   :  { %v2578_v24 = vpop.permute.xlu1 %2577 }
 0xbd8   :  { %2621 = vst.msk [vmem:[%s7665_s4 + $0x14] sm:$0xf] %vm2615_vm5, %v2578_v24 }
 0xbdd   :  { %2693 = vperm.xlu1 %4271, %v7772_v47  }
 0xbdf   :  { %v2580_v4 = vpop.permute.xlu0 %2579 }
 0xbe0   :  { %2622 = vst.msk [vmem:[%s7665_s4 + $0x18] sm:$0xf] %vm2615_vm5, %v2580_v4 }
 0xbe7   :  { %v2588_v8 = vpop.permute.xlu2 %2587 }
 0xbe8   :  { %2626 = vst.msk [vmem:[%s7665_s4 + $0x28] sm:$0xf] %vm2615_vm5, %v2588_v8 }
 0xbef   :  { %v2584_v41 = vpop.permute.xlu1 %2583 }
 0xbf0   :  { %2624 = vst.msk [vmem:[%s7665_s4 + $0x20] sm:$0xf] %vm2615_vm5, %v2584_v41 }
 0xbf7   :  { %v2586_v5 = vpop.permute.xlu0 %2585 }
 0xbf8   :  { %2625 = vst.msk [vmem:[%s7665_s4 + $0x24] sm:$0xf] %vm2615_vm5, %v2586_v5 }
 0xbff   :  { %v2594_v44 = vpop.permute.xlu2 %2593 }
 0xc00   :  { %2629 = vst.msk [vmem:[%s7665_s4 + $0x34] sm:$0xf] %vm2615_vm5, %v2594_v44 }
 0xc07   :  { %v2590_v29 = vpop.permute.xlu1 %2589  ;;  %v2634_v6 = vpop.permute.xlu2 %2633 }
 0xc08   :  { %2627 = vst.msk [vmem:[%s7665_s4 + $0x2c] sm:$0xf] %vm2615_vm5, %v2590_v29  ;;  %v2697_v38 = vadd.f32 %v6792_v15, %v2634_v6 }
 0xc0a   :  { %vm2713_vm6 = vcmp.gt.f32.partialorder %v2697_v38, 0.0  ;;  %v2729_v20 = vmul.f32 0.2, %v2697_v38 }
 0xc0c   :  { %v2745_v48 = vsel %vm2713_vm6, %v2697_v38, %v2729_v20  ;;  %vm3082_vm6 = vcmask 388416  }
 0xc0d   :  { %v6800_v54 = vadd.f32 %v7783_v25, %v2745_v48 }
 0xc0f   :  { %v2592_v9 = vpop.permute.xlu0 %2591  ;;  %v2646_v27 = vpop.permute.xlu2 %2645  ;;  %2777 = vmax.xlane.f32.xlu0 %v6800_v54 }
 0xc10   :  { %2628 = vst.msk [vmem:[%s7665_s4 + $0x30] sm:$0xf] %vm2615_vm5, %v2592_v9  ;;  %v2700_v18 = vadd.f32 %v6792_v15, %v2646_v27 }
 0xc12   :  { %vm2716_vm7 = vcmp.gt.f32.partialorder %v2700_v18, 0.0  ;;  %v2732_v19 = vmul.f32 0.2, %v2700_v18 }
 0xc14   :  { %v2748_v21 = vsel %vm2716_vm7, %v2700_v18, %v2732_v19  ;;  %v7854_v18 = vld [vmem:[#allocation23_spill] sm:$0xff] }
 0xc15   :  { %v6809_v14 = vadd.f32 %v7810_v10, %v2748_v21 }
 0xc17   :  { %2783 = vmax.xlane.f32.xlu0 %v6809_v14  ;;  %v2654_v31 = vpop.permute.xlu2 %2653 }
 0xc18   :  { %v2702_v30 = vadd.f32 %v6792_v15, %v2654_v31 }
 0xc1a   :  { %v2734_v12 = vmul.f32 0.2, %v2702_v30  ;;  %vm2718_vm11 = vcmp.gt.f32.partialorder %v2702_v30, 0.0 }
 0xc1c   :  { %v2750_v6 = vsel %vm2718_vm11, %v2702_v30, %v2734_v12  ;;  %v7856_v30 = vld [vmem:[#allocation25_spill] sm:$0xff] }
 0xc1d   :  { %v6843_v27 = vadd.f32 %v7789_v34, %v2750_v6 }
 0xc1f   :  { %v2596_v61 = vpop.permute.xlu1 %2595  ;;  %v2666_v11 = vpop.permute.xlu2 %2665 }
 0xc20   :  { %2630 = vst.msk [vmem:[%s7665_s4 + $0x38] sm:$0xf] %vm2615_vm5, %v2596_v61  ;;  %v2705_v44 = vadd.f32 %v6792_v15, %v2666_v11  ;;  %v7857_v11 = vld [vmem:[#allocation27_spill] sm:$0xff] }
 0xc22   :  { %v2737_v21 = vmul.f32 0.2, %v2705_v44  ;;  %vm2721_vm14 = vcmp.gt.f32.partialorder %v2705_v44, 0.0 }
 0xc27   :  { %v2638_v28 = vpop.permute.xlu1 %2637  ;;  %v2678_v9 = vpop.permute.xlu2 %2677 }
 0xc28   :  { %v2698_v62 = vadd.f32 %v6792_v15, %v2638_v28  ;;  %v2598_v23 = vpop.permute.xlu0 %2597 }
 0xc29   :  { %2631 = vst.msk [vmem:[%s7665_s4 + $0x3c] sm:$0xf] %vm2615_vm5, %v2598_v23 }
 0xc2a   :  { %vm2714_vm8 = vcmp.gt.f32.partialorder %v2698_v62, 0.0  ;;  %v2730_v52 = vmul.f32 0.2, %v2698_v62 }
 0xc2c   :  { %v2746_v36 = vsel %vm2714_vm8, %v2698_v62, %v2730_v52  ;;  %v2708_v52 = vadd.f32 %v6792_v15, %v2678_v9 }
 0xc2d   :  { %v6822_v63 = vadd.f32 %v7786_v53, %v2746_v36 }
 0xc2e   :  { %vm2724_vm1 = vcmp.gt.f32.partialorder %v2708_v52, 0.0 }
 0xc2f   :  { %2779 = vmax.xlane.f32.xlu2 %v6822_v63  ;;  %v2650_v43 = vpop.permute.xlu1 %2649 }
 0xc30   :  { %v2701_v2 = vadd.f32 %v6792_v15, %v2650_v43  ;;  %v2642_v57 = vpop.permute.xlu0 %2641  ;;  %v2753_v43 = vsel %vm2721_vm14, %v2705_v44, %v2737_v21 }
 0xc31   :  { %v2699_v45 = vadd.f32 %v6792_v15, %v2642_v57  ;;  %v7855_v57 = vld [vmem:[#allocation26_spill] sm:$0xff] }
 0xc32   :  { %vm2717_vm9 = vcmp.gt.f32.partialorder %v2701_v2, 0.0  ;;  %v2733_v59 = vmul.f32 0.2, %v2701_v2 }
 0xc33   :  { %vm2715_vm10 = vcmp.gt.f32.partialorder %v2699_v45, 0.0  ;;  %v2731_v17 = vmul.f32 0.2, %v2699_v45 }
 0xc34   :  { %v2749_v3 = vsel %vm2717_vm9, %v2701_v2, %v2733_v59 }
 0xc35   :  { %v6829_v22 = vadd.f32 %v7812_v50, %v2749_v3  ;;  %v2747_v60 = vsel %vm2715_vm10, %v2699_v45, %v2731_v17  ;;  %v6858_v17 = vadd.f32 %v7856_v30, %v2753_v43 }
 0xc36   :  { %v6832_v37 = vadd.f32 %v7780_v55, %v2747_v60  ;;  %v2740_v60 = vmul.f32 0.2, %v2708_v52 }
 0xc37   :  { %2785 = vmax.xlane.f32.xlu2 %v6829_v22  ;;  %v2658_v24 = vpop.permute.xlu1 %2657 }
 0xc38   :  { %v2703_v4 = vadd.f32 %v6792_v15, %v2658_v24  ;;  %2781 = vmax.xlane.f32.xlu1 %v6832_v37  ;;  %v2662_v8 = vpop.permute.xlu0 %2661  ;;  %v2690_v24 = vpop.permute.xlu2 %2689  ;;  %v2756_v6 = vsel %vm2724_vm1, %v2708_v52, %v2740_v60  ;;  %v7861_v60 = vld [vmem:[#allocation24_spill] sm:$0xff] }
 0xc39   :  { %v2704_v41 = vadd.f32 %v6792_v15, %v2662_v8  ;;  %v2711_v44 = vadd.f32 %v6792_v15, %v2690_v24  ;;  %v7862_v24 = vld [vmem:[#allocation20_spill] sm:$0xff] }
 0xc3a   :  { %vm2719_vm12 = vcmp.gt.f32.partialorder %v2703_v4, 0.0  ;;  %v2735_v5 = vmul.f32 0.2, %v2703_v4 }
 0xc3b   :  { %vm2720_vm13 = vcmp.gt.f32.partialorder %v2704_v41, 0.0  ;;  %v2736_v29 = vmul.f32 0.2, %v2704_v41  ;;  %vm2727_vm4 = vcmp.gt.f32.partialorder %v2711_v44, 0.0 }
 0xc3c   :  { %v2751_v38 = vsel %vm2719_vm12, %v2703_v4, %v2735_v5 }
 0xc3d   :  { %v6840_v20 = vadd.f32 %v7813_v56, %v2751_v38  ;;  %v2752_v48 = vsel %vm2720_vm13, %v2704_v41, %v2736_v29 }
 0xc3e   :  { %v6846_v19 = vadd.f32 %v7854_v18, %v2752_v48  ;;  %v7858_v48 = vld [vmem:[#allocation17_spill] sm:$0xff] }
 0xc3f   :  { %v2670_v61 = vpop.permute.xlu1 %2669  ;;  %2789 = vmax.xlane.f32.xlu0 %v6840_v20 }
 0xc40   :  { %v2706_v28 = vadd.f32 %v6792_v15, %v2670_v61  ;;  %2787 = vmax.xlane.f32.xlu1 %v6843_v27  ;;  %2791 = vmax.xlane.f32.xlu2 %v6846_v19  ;;  %v2674_v62 = vpop.permute.xlu0 %2673  ;;  %v7859_v61 = vld [vmem:[#allocation30_spill] sm:$0xff] }
 0xc41   :  { %v2707_v23 = vadd.f32 %v6792_v15, %v2674_v62  ;;  %v7860_v62 = vld [vmem:[#allocation18_spill] sm:$0xff] }
 0xc42   :  { %vm2722_vm15 = vcmp.gt.f32.partialorder %v2706_v28, 0.0  ;;  %v2738_v31 = vmul.f32 0.2, %v2706_v28 }
 0xc43   :  { %vm2723_vm0 = vcmp.gt.f32.partialorder %v2707_v23, 0.0  ;;  %v2739_v36 = vmul.f32 0.2, %v2707_v23 }
 0xc44   :  { %v2754_v2 = vsel %vm2722_vm15, %v2706_v28, %v2738_v31  ;;  %v6873_v28 = vadd.f32 %v7859_v61, %v2756_v6  ;;  %v2743_v31 = vmul.f32 0.2, %v2711_v44 }
 0xc45   :  { %v6855_v45 = vadd.f32 %v7855_v57, %v2754_v2  ;;  %v2755_v59 = vsel %vm2723_vm0, %v2707_v23, %v2739_v36 }
 0xc46   :  { %v6861_v3 = vadd.f32 %v7857_v11, %v2755_v59  ;;  %v2759_v2 = vsel %vm2727_vm4, %v2711_v44, %v2743_v31 }
 0xc47   :  { %v2682_v12 = vpop.permute.xlu1 %2681  ;;  %2795 = vmax.xlane.f32.xlu0 %v6855_v45 }
 0xc48   :  { %v2709_v4 = vadd.f32 %v6792_v15, %v2682_v12  ;;  %2793 = vmax.xlane.f32.xlu1 %v6858_v17  ;;  %2797 = vmax.xlane.f32.xlu2 %v6861_v3  ;;  %v2686_v8 = vpop.permute.xlu0 %2685 }
 0xc49   :  { %v2710_v41 = vadd.f32 %v6792_v15, %v2686_v8 }
 0xc4a   :  { %vm2725_vm2 = vcmp.gt.f32.partialorder %v2709_v4, 0.0  ;;  %v2741_v5 = vmul.f32 0.2, %v2709_v4 }
 0xc4b   :  { %vm2726_vm3 = vcmp.gt.f32.partialorder %v2710_v41, 0.0  ;;  %v2742_v29 = vmul.f32 0.2, %v2710_v41 }
 0xc4c   :  { %v2757_v38 = vsel %vm2725_vm2, %v2709_v4, %v2741_v5  ;;  %v6886_v4 = vadd.f32 %v7862_v24, %v2759_v2 }
 0xc4d   :  { %v6870_v9 = vadd.f32 %v7858_v48, %v2757_v38  ;;  %v2758_v21 = vsel %vm2726_vm3, %v2710_v41, %v2742_v29 }
 0xc4e   :  { %v6876_v23 = vadd.f32 %v7860_v62, %v2758_v21 }
 0xc4f   :  { %v2694_v36 = vpop.permute.xlu1 %2693  ;;  %2801 = vmax.xlane.f32.xlu0 %v6870_v9 }
 0xc50   :  { %v2712_v43 = vadd.f32 %v6792_v15, %v2694_v36  ;;  %2799 = vmax.xlane.f32.xlu1 %v6873_v28  ;;  %2803 = vmax.xlane.f32.xlu2 %v6876_v23 }
 0xc52   :  { %vm2728_vm5 = vcmp.gt.f32.partialorder %v2712_v43, 0.0  ;;  %v2744_v52 = vmul.f32 0.2, %v2712_v43 }
 0xc54   :  { %v2760_v59 = vsel %vm2728_vm5, %v2712_v43, %v2744_v52 }
 0xc55   :  { %v6883_v12 = vadd.f32 %v7861_v60, %v2760_v59 }
 0xc57   :  { %2807 = vmax.xlane.f32.xlu0 %v6883_v12 }
 0xc58   :  { %2805 = vmax.xlane.f32.xlu1 %v6886_v4 }
 0xc82   :  { %v2778_v8 = vpop.xlane.xlu0 %2777 }
 0xc83   :  { %v2809_v15 = vsub.f32 %v6800_v54, %v2778_v8 }
 0xc85   :  { %v2825_v41 = vmul.f32 1.442695, %v2809_v15 }
 0xc87   :  { %4599 = vpow2.f32 %v2825_v41 }
 0xc8a   :  { %v2784_v5 = vpop.xlane.xlu0 %2783 }
 0xc8b   :  { %v2812_v29 = vsub.f32 %v6809_v14, %v2784_v5 }
 0xc8d   :  { %v6892_v44 = vpop.eup %4599  ;;  %v2831_v6 = vmul.f32 1.442695, %v2812_v29 }
 0xc8e   :  { %2857 = vadd.xlane.f32.xlu2 %v6892_v44 }
 0xc8f   :  { %4601 = vpow2.f32 %v2831_v6 }
 0xc95   :  { %v6895_v38 = vpop.eup %4601 }
 0xc96   :  { %2863 = vadd.xlane.f32.xlu2 %v6895_v38 }
 0xca2   :  { %v2780_v21 = vpop.xlane.xlu2 %2779 }
 0xca3   :  { %v2810_v31 = vsub.f32 %v6822_v63, %v2780_v21 }
 0xca5   :  { %v2827_v36 = vmul.f32 1.442695, %v2810_v31 }
 0xca7   :  { %4603 = vpow2.f32 %v2827_v36 }
 0xcaa   :  { %v2786_v54 = vpop.xlane.xlu2 %2785 }
 0xcab   :  { %v2813_v43 = vsub.f32 %v6829_v22, %v2786_v54  ;;  %v2782_v52 = vpop.xlane.xlu1 %2781 }
 0xcac   :  { %v2811_v14 = vsub.f32 %v6832_v37, %v2782_v52 }
 0xcad   :  { %v6901_v2 = vpop.eup %4603  ;;  %v2833_v59 = vmul.f32 1.442695, %v2813_v43 }
 0xcae   :  { %v2829_v8 = vmul.f32 1.442695, %v2811_v14  ;;  %2859 = vadd.xlane.f32.xlu1 %v6901_v2  ;;  %v7871_v30 = vpack.c.bf16 %v6901_v2, %v6892_v44 }
 0xcaf   :  { %4605 = vpow2.f32 %v2833_v59 }
 0xcb0   :  { %4607 = vpow2.f32 %v2829_v8 }
 0xcb2   :  { %v2790_v63 = vpop.xlane.xlu0 %2789 }
 0xcb3   :  { %v2788_v41 = vpop.xlane.xlu1 %2787  ;;  %v2792_v5 = vpop.xlane.xlu2 %2791  ;;  %v2815_v29 = vsub.f32 %v6840_v20, %v2790_v63 }
 0xcb4   :  { %v2814_v22 = vsub.f32 %v6843_v27, %v2788_v41  ;;  %v2816_v37 = vsub.f32 %v6846_v19, %v2792_v5 }
 0xcb5   :  { %v6909_v6 = vpop.eup %4605  ;;  %v2837_v21 = vmul.f32 1.442695, %v2815_v29 }
 0xcb6   :  { %v6911_v31 = vpop.eup %4607  ;;  %v2835_v36 = vmul.f32 1.442695, %v2814_v22  ;;  %v2839_v54 = vmul.f32 1.442695, %v2816_v37  ;;  %2865 = vadd.xlane.f32.xlu1 %v6909_v6 }
 0xcb7   :  { %4609 = vpow2.f32 %v2837_v21  ;;  %2861 = vadd.xlane.f32.xlu0 %v6911_v31  ;;  %v7872_v57 = vpack.c.bf16 %v6895_v38, %v6911_v31 }
 0xcb8   :  { %4611 = vpow2.f32 %v2835_v36 }
 0xcb9   :  { %4613 = vpow2.f32 %v2839_v54 }
 0xcba   :  { %v2796_v20 = vpop.xlane.xlu0 %2795 }
 0xcbb   :  { %v2794_v27 = vpop.xlane.xlu1 %2793  ;;  %v2798_v19 = vpop.xlane.xlu2 %2797  ;;  %v2818_v52 = vsub.f32 %v6855_v45, %v2796_v20 }
 0xcbc   :  { %v2817_v14 = vsub.f32 %v6858_v17, %v2794_v27  ;;  %v2819_v59 = vsub.f32 %v6861_v3, %v2798_v19 }
 0xcbd   :  { %v6920_v8 = vpop.eup %4609  ;;  %v2843_v63 = vmul.f32 1.442695, %v2818_v52 }
 0xcbe   :  { %v6922_v41 = vpop.eup %4611  ;;  %v2841_v5 = vmul.f32 1.442695, %v2817_v14  ;;  %v2845_v29 = vmul.f32 1.442695, %v2819_v59  ;;  %2869 = vadd.xlane.f32.xlu2 %v6920_v8 }
 0xcbf   :  { %v6925_v22 = vpop.eup %4613  ;;  %4615 = vpow2.f32 %v2843_v63  ;;  %2867 = vadd.xlane.f32.xlu0 %v6922_v41 }
 0xcc0   :  { %4617 = vpow2.f32 %v2841_v5  ;;  %2871 = vadd.xlane.f32.xlu1 %v6925_v22 }
 0xcc1   :  { %4619 = vpow2.f32 %v2845_v29 }
 0xcc2   :  { %v2802_v3 = vpop.xlane.xlu0 %2801 }
 0xcc3   :  { %v2800_v37 = vpop.xlane.xlu1 %2799  ;;  %v2804_v21 = vpop.xlane.xlu2 %2803  ;;  %v2821_v36 = vsub.f32 %v6870_v9, %v2802_v3 }
 0xcc4   :  { %v2820_v54 = vsub.f32 %v6873_v28, %v2800_v37  ;;  %v2822_v20 = vsub.f32 %v6876_v23, %v2804_v21 }
 0xcc5   :  { %v6936_v27 = vpop.eup %4615  ;;  %v2849_v19 = vmul.f32 1.442695, %v2821_v36 }
 0xcc6   :  { %v6938_v52 = vpop.eup %4617  ;;  %v2847_v14 = vmul.f32 1.442695, %v2820_v54  ;;  %v2851_v59 = vmul.f32 1.442695, %v2822_v20  ;;  %2875 = vadd.xlane.f32.xlu2 %v6936_v27 }
 0xcc7   :  { %v6941_v63 = vpop.eup %4619  ;;  %4621 = vpow2.f32 %v2849_v19  ;;  %2873 = vadd.xlane.f32.xlu0 %v6938_v52 }
 0xcc8   :  { %4623 = vpow2.f32 %v2847_v14  ;;  %2877 = vadd.xlane.f32.xlu1 %v6941_v63 }
 0xcc9   :  { %4625 = vpow2.f32 %v2851_v59  ;;  %v7863_v59 = vld [vmem:[#allocation3_spill] sm:$0xff] }
 0xcca   :  { %v2808_v28 = vpop.xlane.xlu0 %2807 }
 0xccb   :  { %v2806_v23 = vpop.xlane.xlu1 %2805  ;;  %v2824_v5 = vsub.f32 %v6883_v12, %v2808_v28  ;;  %v7864_v28 = vld [vmem:[#allocation19_spill] sm:$0xff] }
 0xccc   :  { %v2823_v29 = vsub.f32 %v6886_v4, %v2806_v23  ;;  %v7865_v23 = vld [vmem:[#allocation12_spill] sm:$0xff] }
 0xccd   :  { %v6949_v3 = vpop.eup %4621  ;;  %v2855_v37 = vmul.f32 1.442695, %v2824_v5  ;;  %v7866_v5 = vld [vmem:[#allocation14_spill] sm:$0xff] }
 0xcce   :  { %v4624_v21 = vpop.eup %4623  ;;  %v2853_v36 = vmul.f32 1.442695, %v2823_v29  ;;  %2881 = vadd.xlane.f32.xlu2 %v6949_v3  ;;  %v7867_v29 = vld [vmem:[#allocation7_spill] sm:$0xff] }
 0xccf   :  { %v4626_v54 = vpop.eup %4625  ;;  %4627 = vpow2.f32 %v2855_v37  ;;  %2879 = vadd.xlane.f32.xlu0 %v4624_v21  ;;  %v2894_v20 = vpack.c.bf16 %v4624_v21, %v6941_v63  ;;  %v7868_v63 = vld [vmem:[#allocation5_spill] sm:$0xff]  ;;  %v7869_v37 = vld [vmem:[#allocation15_spill] sm:$0xff] }
 0xcd0   :  { %4629 = vpow2.f32 %v2853_v36  ;;  %2883 = vadd.xlane.f32.xlu1 %v4626_v54  ;;  %v2895_v19 = vpack.c.bf16 %v4626_v54, %v6949_v3  ;;  %v7870_v3 = vld [vmem:[#allocation10_spill] sm:$0xff] }
 0xcd5   :  { %v4628_v14 = vpop.eup %4627 }
 0xcd6   :  { %v4630_v12 = vpop.eup %4629  ;;  %2887 = vadd.xlane.f32.xlu2 %v4628_v14 }
 0xcd7   :  { %2885 = vadd.xlane.f32.xlu0 %v4630_v12  ;;  %v2896_v4 = vpack.c.bf16 %v4628_v14, %v4630_v12 }
 0xce9   :  { %2897 = vrot.lane.b32.xlu1 %v7863_v59, %s4829_s21 }
 0xceb   :  { %2899 = vrot.lane.b32.xlu0 %v7864_v28, %s4829_s21 }
 0xcee   :  { %2901 = vrot.lane.b32.xlu2 %v7865_v23, %s4829_s21 }
 0xcf1   :  { %2905 = vrot.lane.b32.xlu1 %v7866_v5, %s4829_s21 }
 0xcf3   :  { %2903 = vrot.lane.b32.xlu0 %v7867_v29, %s4829_s21 }
 0xcf6   :  { %2909 = vrot.lane.b32.xlu2 %v7868_v63, %s4829_s21 }
 0xcf9   :  { %2911 = vrot.lane.b32.xlu1 %v7869_v37, %s4829_s21 }
 0xcfb   :  { %2907 = vrot.lane.b32.xlu0 %v7870_v3, %s4829_s21 }
 0xd01   :  { %v2858_v21 = vpop.xlane.xlu2 %2857 }
 0xd02   :  { %4631 = vrcp.f32 %v2858_v21 }
 0xd09   :  { %v2864_v14 = vpop.xlane.xlu2 %2863 }
 0xd21   :  { %v2860_v36 = vpop.xlane.xlu1 %2859 }
 0xd22   :  { %4633 = vrcp.f32 %v2860_v36 }
 0xd29   :  { %v2866_v12 = vpop.xlane.xlu1 %2865 }
 0xd2a   :  { %v2862_v54 = vpop.xlane.xlu0 %2861 }
 0xd2b   :  { %4635 = vrcp.f32 %v2862_v54 }
 0xd2c   :  { %4637 = vrcp.f32 %v2864_v14 }
 0xd2d   :  { %4639 = vrcp.f32 %v2866_v12 }
 0xd31   :  { %v6964_v28 = vpop.xlane.xlu2 %2869 }
 0xd32   :  { %v6962_v59 = vpop.xlane.xlu0 %2867 }
 0xd33   :  { %v6966_v23 = vpop.xlane.xlu1 %2871  ;;  %4641 = vrcp.f32 %v6962_v59 }
 0xd34   :  { %4643 = vrcp.f32 %v6964_v28 }
 0xd35   :  { %4645 = vrcp.f32 %v6966_v23 }
 0xd39   :  { %v6970_v29 = vpop.xlane.xlu2 %2875 }
 0xd3a   :  { %v6968_v5 = vpop.xlane.xlu0 %2873 }
 0xd3b   :  { %v6972_v63 = vpop.xlane.xlu1 %2877  ;;  %4647 = vrcp.f32 %v6968_v5 }
 0xd3c   :  { %4649 = vrcp.f32 %v6970_v29 }
 0xd3d   :  { %4651 = vrcp.f32 %v6972_v63 }
 0xd41   :  { %v6976_v3 = vpop.xlane.xlu2 %2881 }
 0xd42   :  { %v6974_v37 = vpop.xlane.xlu0 %2879 }
 0xd43   :  { %v6978_v9 = vpop.xlane.xlu1 %2883  ;;  %4653 = vrcp.f32 %v6974_v37 }
 0xd44   :  { %4655 = vrcp.f32 %v6976_v3 }
 0xd45   :  { %4657 = vrcp.f32 %v6978_v9 }
 0xd49   :  { %v6982_v45 = vpop.xlane.xlu2 %2887 }
 0xd4a   :  { %v6980_v17 = vpop.xlane.xlu0 %2885 }
 0xd4b   :  { %4659 = vrcp.f32 %v6980_v17 }
 0xd4c   :  { %4661 = vrcp.f32 %v6982_v45 }
 0xd51   :  { %v2902_v60 = vpop.permute.xlu2 %2901 }
 0xd59   :  { %v2910_v48 = vpop.permute.xlu2 %2909 }
 0xd5b   :  { %v2898_v43 = vpop.permute.xlu1 %2897 }
 0xd5d   :  { %v2900_v15 = vpop.permute.xlu0 %2899 }
 0xd63   :  { %v2906_v24 = vpop.permute.xlu1 %2905 }
 0xd65   :  { %v2904_v62 = vpop.permute.xlu0 %2903 }
 0xd6b   :  { %v2912_v61 = vpop.permute.xlu1 %2911 }
 0xd6c   :  { %2921 = vmatpush.bf16.msra.mxu3 %v2912_v61  ;;  %v7873_v61 = vpack.c.bf16 %v6922_v41, %v6909_v6 }
 0xd6d   :  { %v2908_v11 = vpop.permute.xlu0 %2907 }
 0xd70   :  { %2922 = vmatpush.bf16.msra.mxu3 %v2910_v48  ;;  %v7875_v48 = vpack.c.bf16 %v6936_v27, %v6938_v52 }
 0xd74   :  { %2923 = vmatpush.bf16.msra.mxu3 %v2908_v11  ;;  %v7874_v11 = vpack.c.bf16 %v6925_v22, %v6920_v8 }
 0xd78   :  { %2924 = vmatpush.bf16.msra.mxu3 %v2906_v24 }
 0xd7c   :  { %2925 = vmatpush.bf16.msra.mxu3 %v2904_v62 }
 0xd80   :  { %2926 = vmatpush.bf16.msra.mxu3 %v2902_v60 }
 0xd84   :  { %2927 = vmatpush.bf16.msra.mxu3 %v2900_v15 }
 0xd88   :  { %2928 = vmatpush.bf16.msra.mxu3 %v2898_v43 }
 0xd8b   :  { %2929 = vmatmul.bf16.vlgmr.msra.gmra.mxu3 %v7871_v30  ;;  %v4632_v30 = vpop.eup %4631 }
 0xd8c   :  { %v4634_v24 = vpop.eup %4633 }
 0xd8d   :  { %v4636_v15 = vpop.eup %4635 }
 0xd8e   :  { %v4638_v8 = vpop.eup %4637 }
 0xd8f   :  { %v4640_v52 = vpop.eup %4639 }
 0xd90   :  { %v4642_v21 = vpop.eup %4641 }
 0xd91   :  { %v4644_v12 = vpop.eup %4643 }
 0xd92   :  { %v4646_v59 = vpop.eup %4645 }
 0xd93   :  { %v4648_v28 = vpop.eup %4647 }
 0xd94   :  { %v4650_v23 = vpop.eup %4649 }
 0xd95   :  { %v4652_v5 = vpop.eup %4651 }
 0xd96   :  { %v4654_v29 = vpop.eup %4653 }
 0xd9b   :  { %2934 = vmatmul.bf16.gmra.mxu3 %v7872_v57 }
 0xdab   :  { %2939 = vmatmul.bf16.gmra.mxu3 %v7873_v61 }
 0xdbb   :  { %2944 = vmatmul.bf16.gmra.mxu3 %v7874_v11 }
 0xdcb   :  { %2949 = vmatmul.bf16.gmra.mxu3 %v7875_v48 }
 0xddb   :  { %2954 = vmatmul.bf16.gmra.mxu3 %v2894_v20 }
 0xdeb   :  { %2959 = vmatmul.bf16.gmra.mxu3 %v2895_v19 }
 0xdfb   :  { %2964 = vmatmul.bf16.gmra.mxu3 %v2896_v4 }
 0xe0e   :  { %v2930_v62 = vpop.f32.mrf.mxu3 }
 0xe0f   :  { %v2986_v60 = vmul.f32 %v4632_v30, %v2930_v62 }
 0xe11   :  { %v3002_v57 = vpack.c.bf16 %v2986_v60, %v2986_v60 }
 0xe13   :  { %3034 = vrot.lane.b32.xlu0 %v3002_v57, %s4830_s22 }
 0xe16   :  { %v2932_v44 = vpop.f32.mrf.mxu3 }
 0xe17   :  { %v2987_v38 = vmul.f32 %v4634_v24, %v2932_v44 }
 0xe19   :  { %v3003_v2 = vpack.c.bf16 %v2987_v38, %v2987_v38 }
 0xe1b   :  { %3036 = vrot.lane.b32.xlu2 %v3003_v2, %s4830_s22 }
 0xe1e   :  { %v2935_v6 = vpop.f32.mrf.mxu3 }
 0xe1f   :  { %v2988_v31 = vmul.f32 %v4636_v15, %v2935_v6 }
 0xe21   :  { %v3004_v43 = vpack.c.bf16 %v2988_v31, %v2988_v31 }
 0xe23   :  { %3038 = vrot.lane.b32.xlu1 %v3004_v43, %s4830_s22 }
 0xe26   :  { %v2937_v41 = vpop.f32.mrf.mxu3 }
 0xe27   :  { %v2989_v22 = vmul.f32 %v4638_v8, %v2937_v41  ;;  %v4831_v8 = vmov 6  }
 0xe28   :  { %4273 = vset.pattern.permute.xlu2 %v4831_v8  ;;  %4274 = vset.pattern.permute.xlu1 %v4831_v8 }
 0xe29   :  { %v3005_v27 = vpack.c.bf16 %v2989_v22, %v2989_v22  ;;  %4275 = vset.pattern.permute.xlu0 %v4831_v8 }
 0xe2b   :  { %3040 = vrot.lane.b32.xlu0 %v3005_v27, %s4830_s22  ;;  %v4656_v27 = vpop.eup %4655 }
 0xe2e   :  { %v2940_v20 = vpop.f32.mrf.mxu3 }
 0xe2f   :  { %v2990_v19 = vmul.f32 %v4640_v52, %v2940_v20 }
 0xe31   :  { %v3006_v4 = vpack.c.bf16 %v2990_v19, %v2990_v19 }
 0xe33   :  { %3042 = vrot.lane.b32.xlu2 %v3006_v4, %s4830_s22  ;;  %v4658_v4 = vpop.eup %4657 }
 0xe36   :  { %v2942_v36 = vpop.f32.mrf.mxu3 }
 0xe37   :  { %v2991_v54 = vmul.f32 %v4642_v21, %v2942_v36 }
 0xe39   :  { %v3007_v14 = vpack.c.bf16 %v2991_v54, %v2991_v54  ;;  %v4660_v54 = vpop.eup %4659 }
 0xe3b   :  { %3044 = vrot.lane.b32.xlu1 %v3007_v14, %s4830_s22 }
 0xe3e   :  { %v2945_v61 = vpop.f32.mrf.mxu3 }
 0xe3f   :  { %v2992_v11 = vmul.f32 %v4644_v12, %v2945_v61 }
 0xe41   :  { %v3008_v48 = vpack.c.bf16 %v2992_v11, %v2992_v11  ;;  %v4662_v11 = vpop.eup %4661 }
 0xe43   :  { %3046 = vrot.lane.b32.xlu0 %v3008_v48, %s4830_s22 }
 0xe46   :  { %v2947_v30 = vpop.f32.mrf.mxu3 }
 0xe47   :  { %v2993_v62 = vmul.f32 %v4646_v59, %v2947_v30 }
 0xe49   :  { %v3009_v60 = vpack.c.bf16 %v2993_v62, %v2993_v62 }
 0xe4b   :  { %3048 = vrot.lane.b32.xlu2 %v3009_v60, %s4830_s22 }
 0xe4e   :  { %v2950_v57 = vpop.f32.mrf.mxu3 }
 0xe4f   :  { %v2994_v24 = vmul.f32 %v4648_v28, %v2950_v57 }
 0xe51   :  { %v3010_v44 = vpack.c.bf16 %v2994_v24, %v2994_v24 }
 0xe53   :  { %3050 = vrot.lane.b32.xlu1 %v3010_v44, %s4830_s22 }
 0xe56   :  { %v2952_v38 = vpop.f32.mrf.mxu3 }
 0xe57   :  { %v2995_v2 = vmul.f32 %v4650_v23, %v2952_v38 }
 0xe59   :  { %v3011_v15 = vpack.c.bf16 %v2995_v2, %v2995_v2  ;;  %v7091_v2 = vperm.slane %v7778_v7, 6 }
 0xe5b   :  { %3052 = vrot.lane.b32.xlu0 %v3011_v15, %s4830_s22 }
 0xe5e   :  { %v2955_v6 = vpop.f32.mrf.mxu3 }
 0xe5f   :  { %v2996_v31 = vmul.f32 %v4652_v5, %v2955_v6 }
 0xe61   :  { %v3012_v43 = vpack.c.bf16 %v2996_v31, %v2996_v31 }
 0xe63   :  { %3054 = vrot.lane.b32.xlu2 %v3012_v43, %s4830_s22 }
 0xe66   :  { %v2957_v41 = vpop.f32.mrf.mxu3 }
 0xe67   :  { %v2997_v22 = vmul.f32 %v4654_v29, %v2957_v41 }
 0xe69   :  { %v3013_v63 = vpack.c.bf16 %v2997_v22, %v2997_v22 }
 0xe6b   :  { %3056 = vrot.lane.b32.xlu1 %v3013_v63, %s4830_s22 }
 0xe6e   :  { %v2960_v52 = vpop.f32.mrf.mxu3 }
 0xe6f   :  { %v2998_v20 = vmul.f32 %v4656_v27, %v2960_v52 }
 0xe71   :  { %v3014_v37 = vpack.c.bf16 %v2998_v20, %v2998_v20 }
 0xe73   :  { %3058 = vrot.lane.b32.xlu0 %v3014_v37, %s4830_s22 }
 0xe75   :  { %v3037_v19 = vpop.permute.xlu2 %3036 }
 0xe76   :  { %3084 = vst.msk [vmem:[%s7665_s4 + $0x4] sm:$0xf] %vm3082_vm6, %v3037_v19  ;;  %v2962_v3 = vpop.f32.mrf.mxu3 }
 0xe77   :  { %v2999_v21 = vmul.f32 %v4658_v4, %v2962_v3 }
 0xe79   :  { %v3015_v36 = vpack.c.bf16 %v2999_v21, %v2999_v21 }
 0xe7b   :  { %3060 = vrot.lane.b32.xlu2 %v3015_v36, %s4830_s22 }
 0xe7e   :  { %v2965_v9 = vpop.f32.mrf.mxu3 }
 0xe7f   :  { %v3000_v14 = vmul.f32 %v4660_v54, %v2965_v9 }
 0xe81   :  { %v3016_v12 = vpack.c.bf16 %v3000_v14, %v3000_v14 }
 0xe83   :  { %3100 = vperm.xlu2 %4273, %v4984_v33   ;;  %3062 = vrot.lane.b32.xlu1 %v3016_v12, %s4830_s22 }
 0xe85   :  { %v3035_v61 = vpop.permute.xlu0 %3034 }
 0xe86   :  { %3083 = vst.msk [vmem:[%s7665_s4] sm:$0xf] %vm3082_vm6, %v3035_v61  ;;  %v2967_v17 = vpop.f32.mrf.mxu3 }
 0xe87   :  { %v3001_v48 = vmul.f32 %v4662_v11, %v2967_v17 }
 0xe89   :  { %v3017_v59 = vpack.c.bf16 %v3001_v48, %v3001_v48 }
 0xe8b   :  { %3112 = vperm.xlu2 %4273, %v7775_v49   ;;  %3104 = vperm.xlu1 %4274, %v5000_v39  }
 0xe8c   :  { %3064 = vrot.lane.b32.xlu0 %v3017_v59, %s4830_s22 }
 0xe8d   :  { %v3043_v45 = vpop.permute.xlu2 %3042 }
 0xe8e   :  { %3087 = vst.msk [vmem:[%s7665_s4 + $0x10] sm:$0xf] %vm3082_vm6, %v3043_v45 }
 0xe93   :  { %3120 = vperm.xlu2 %4273, %v7777_v26   ;;  %3116 = vperm.xlu1 %4274, %v7768_v1  }
 0xe94   :  { %3108 = vperm.xlu0 %4275, %v5009_v42  }
 0xe95   :  { %v3039_v30 = vpop.permute.xlu1 %3038 }
 0xe96   :  { %3085 = vst.msk [vmem:[%s7665_s4 + $0x8] sm:$0xf] %vm3082_vm6, %v3039_v30 }
 0xe9b   :  { %3132 = vperm.xlu2 %4273, %v7779_v32   ;;  %3124 = vperm.xlu1 %4274, %v5002_v40  }
 0xe9c   :  { %3128 = vperm.xlu0 %4275, %v7773_v51  }
 0xe9d   :  { %v3041_v62 = vpop.permute.xlu0 %3040 }
 0xe9e   :  { %3086 = vst.msk [vmem:[%s7665_s4 + $0xc] sm:$0xf] %vm3082_vm6, %v3041_v62 }
 0xea3   :  { %3144 = vperm.xlu2 %4273, %v7781_v58   ;;  %3136 = vperm.xlu1 %4274, %v5022_v46  }
 0xea4   :  { %3140 = vperm.xlu0 %4275, %v7774_v0  }
 0xea5   :  { %v3049_v60 = vpop.permute.xlu2 %3048 }
 0xea6   :  { %3090 = vst.msk [vmem:[%s7665_s4 + $0x1c] sm:$0xf] %vm3082_vm6, %v3049_v60 }
 0xeab   :  { %3156 = vperm.xlu2 %4273, %v7782_v16   ;;  %3148 = vperm.xlu1 %4274, %v4989_v35  }
 0xeac   :  { %3152 = vperm.xlu0 %4275, %v7776_v13  }
 0xead   :  { %v3045_v28 = vpop.permute.xlu1 %3044 }
 0xeae   :  { %3088 = vst.msk [vmem:[%s7665_s4 + $0x14] sm:$0xf] %vm3082_vm6, %v3045_v28 }
 0xeb3   :  { %3160 = vperm.xlu1 %4274, %v7772_v47  }
 0xeb5   :  { %v3047_v57 = vpop.permute.xlu0 %3046 }
 0xeb6   :  { %3089 = vst.msk [vmem:[%s7665_s4 + $0x18] sm:$0xf] %vm3082_vm6, %v3047_v57 }
 0xebd   :  { %v3055_v24 = vpop.permute.xlu2 %3054 }
 0xebe   :  { %3093 = vst.msk [vmem:[%s7665_s4 + $0x28] sm:$0xf] %vm3082_vm6, %v3055_v24 }
 0xec5   :  { %v3051_v44 = vpop.permute.xlu1 %3050 }
 0xec6   :  { %3091 = vst.msk [vmem:[%s7665_s4 + $0x20] sm:$0xf] %vm3082_vm6, %v3051_v44 }
 0xecd   :  { %v3053_v23 = vpop.permute.xlu0 %3052 }
 0xece   :  { %3092 = vst.msk [vmem:[%s7665_s4 + $0x24] sm:$0xf] %vm3082_vm6, %v3053_v23 }
 0xed5   :  { %v3061_v38 = vpop.permute.xlu2 %3060 }
 0xed6   :  { %3096 = vst.msk [vmem:[%s7665_s4 + $0x34] sm:$0xf] %vm3082_vm6, %v3061_v38 }
 0xedd   :  { %v3057_v15 = vpop.permute.xlu1 %3056  ;;  %v3101_v5 = vpop.permute.xlu2 %3100 }
 0xede   :  { %3094 = vst.msk [vmem:[%s7665_s4 + $0x2c] sm:$0xf] %vm3082_vm6, %v3057_v15  ;;  %v3164_v6 = vadd.f32 %v7091_v2, %v3101_v5 }
 0xee0   :  { %vm3180_vm7 = vcmp.gt.f32.partialorder %v3164_v6, 0.0  ;;  %v3196_v31 = vmul.f32 0.2, %v3164_v6 }
 0xee2   :  { %v3212_v43 = vsel %vm3180_vm7, %v3164_v6, %v3196_v31 }
 0xee3   :  { %v7099_v8 = vadd.f32 %v7783_v25, %v3212_v43 }
 0xee5   :  { %v3059_v29 = vpop.permute.xlu0 %3058  ;;  %3244 = vmax.xlane.f32.xlu0 %v7099_v8  ;;  %v3113_v22 = vpop.permute.xlu2 %3112 }
 0xee6   :  { %3095 = vst.msk [vmem:[%s7665_s4 + $0x30] sm:$0xf] %vm3082_vm6, %v3059_v29  ;;  %v3167_v20 = vadd.f32 %v7091_v2, %v3113_v22 }
 0xee8   :  { %v3199_v21 = vmul.f32 0.2, %v3167_v20  ;;  %vm3183_vm9 = vcmp.gt.f32.partialorder %v3167_v20, 0.0 }
 0xeea   :  { %v3215_v61 = vsel %vm3183_vm9, %v3167_v20, %v3199_v21 }
 0xeeb   :  { %v7124_v45 = vadd.f32 %v7810_v10, %v3215_v61 }
 0xeed   :  { %v3121_v37 = vpop.permute.xlu2 %3120 }
 0xeee   :  { %v3169_v11 = vadd.f32 %v7091_v2, %v3121_v37 }
 0xef0   :  { %v3201_v28 = vmul.f32 0.2, %v3169_v11  ;;  %vm3185_vm12 = vcmp.gt.f32.partialorder %v3169_v11, 0.0 }
 0xef2   :  { %v3217_v6 = vsel %vm3185_vm12, %v3169_v11, %v3201_v28  ;;  %v7877_v11 = vld [vmem:[#allocation25_spill] sm:$0xff] }
 0xef3   :  { %v7142_v22 = vadd.f32 %v7789_v34, %v3217_v6 }
 0xef5   :  { %v3063_v41 = vpop.permute.xlu1 %3062  ;;  %v3133_v48 = vpop.permute.xlu2 %3132 }
 0xef6   :  { %3097 = vst.msk [vmem:[%s7665_s4 + $0x38] sm:$0xf] %vm3082_vm6, %v3063_v41  ;;  %v3172_v15 = vadd.f32 %v7091_v2, %v3133_v48  ;;  %v7878_v48 = vld [vmem:[#allocation27_spill] sm:$0xff] }
 0xef8   :  { %vm3188_vm15 = vcmp.gt.f32.partialorder %v3172_v15, 0.0 }
 0xefd   :  { %v3105_v63 = vpop.permute.xlu1 %3104  ;;  %v3145_v41 = vpop.permute.xlu2 %3144 }
 0xefe   :  { %v3165_v27 = vadd.f32 %v7091_v2, %v3105_v63  ;;  %v3065_v52 = vpop.permute.xlu0 %3064  ;;  %v3175_v21 = vadd.f32 %v7091_v2, %v3145_v41 }
 0xeff   :  { %3098 = vst.msk [vmem:[%s7665_s4 + $0x3c] sm:$0xf] %vm3082_vm6, %v3065_v52 }
 0xf00   :  { %vm3181_vm8 = vcmp.gt.f32.partialorder %v3165_v27, 0.0  ;;  %v3197_v19 = vmul.f32 0.2, %v3165_v27  ;;  %vm3191_vm2 = vcmp.gt.f32.partialorder %v3175_v21, 0.0 }
 0xf02   :  { %v3213_v4 = vsel %vm3181_vm8, %v3165_v27, %v3197_v19  ;;  %v3204_v27 = vmul.f32 0.2, %v3172_v15 }
 0xf03   :  { %v7117_v3 = vadd.f32 %v7786_v53, %v3213_v4 }
 0xf05   :  { %3246 = vmax.xlane.f32.xlu2 %v7117_v3  ;;  %v3117_v36 = vpop.permute.xlu1 %3116 }
 0xf06   :  { %v3168_v54 = vadd.f32 %v7091_v2, %v3117_v36  ;;  %v3109_v9 = vpop.permute.xlu0 %3108 }
 0xf07   :  { %v3166_v14 = vadd.f32 %v7091_v2, %v3109_v9 }
 0xf08   :  { %vm3184_vm10 = vcmp.gt.f32.partialorder %v3168_v54, 0.0  ;;  %v3200_v12 = vmul.f32 0.2, %v3168_v54 }
 0xf09   :  { %vm3182_vm11 = vcmp.gt.f32.partialorder %v3166_v14, 0.0  ;;  %v3198_v17 = vmul.f32 0.2, %v3166_v14 }
 0xf0a   :  { %v3216_v59 = vsel %vm3184_vm10, %v3168_v54, %v3200_v12  ;;  %v3220_v54 = vsel %vm3188_vm15, %v3172_v15, %v3204_v27 }
 0xf0b   :  { %v7127_v30 = vadd.f32 %v7812_v50, %v3216_v59  ;;  %v3214_v62 = vsel %vm3182_vm11, %v3166_v14, %v3198_v17  ;;  %v7876_v14 = vld [vmem:[#allocation26_spill] sm:$0xff]  ;;  %v7157_v17 = vadd.f32 %v7877_v11, %v3220_v54 }
 0xf0c   :  { %v7130_v60 = vadd.f32 %v7780_v55, %v3214_v62  ;;  %v3207_v62 = vmul.f32 0.2, %v3175_v21 }
 0xf0d   :  { %3250 = vmax.xlane.f32.xlu2 %v7124_v45  ;;  %v3125_v57 = vpop.permute.xlu1 %3124  ;;  %3252 = vmax.xlane.f32.xlu0 %v7127_v30 }
 0xf0e   :  { %v3170_v24 = vadd.f32 %v7091_v2, %v3125_v57  ;;  %3248 = vmax.xlane.f32.xlu1 %v7130_v60  ;;  %v3129_v44 = vpop.permute.xlu0 %3128  ;;  %v3157_v57 = vpop.permute.xlu2 %3156  ;;  %v3223_v6 = vsel %vm3191_vm2, %v3175_v21, %v3207_v62  ;;  %v7882_v62 = vld [vmem:[#allocation24_spill] sm:$0xff] }
 0xf0f   :  { %v3171_v23 = vadd.f32 %v7091_v2, %v3129_v44  ;;  %v3178_v15 = vadd.f32 %v7091_v2, %v3157_v57  ;;  %v7883_v57 = vld [vmem:[#allocation20_spill] sm:$0xff] }
 0xf10   :  { %vm3186_vm13 = vcmp.gt.f32.partialorder %v3170_v24, 0.0  ;;  %v3202_v38 = vmul.f32 0.2, %v3170_v24 }
 0xf11   :  { %vm3187_vm14 = vcmp.gt.f32.partialorder %v3171_v23, 0.0  ;;  %v3203_v5 = vmul.f32 0.2, %v3171_v23  ;;  %vm3194_vm5 = vcmp.gt.f32.partialorder %v3178_v15, 0.0 }
 0xf12   :  { %v3218_v31 = vsel %vm3186_vm13, %v3170_v24, %v3202_v38 }
 0xf13   :  { %v7139_v43 = vadd.f32 %v7813_v56, %v3218_v31  ;;  %v3219_v29 = vsel %vm3187_vm14, %v3171_v23, %v3203_v5 }
 0xf14   :  { %v7145_v63 = vadd.f32 %v7854_v18, %v3219_v29  ;;  %v7879_v29 = vld [vmem:[#allocation17_spill] sm:$0xff] }
 0xf15   :  { %3256 = vmax.xlane.f32.xlu2 %v7139_v43  ;;  %v3137_v52 = vpop.permute.xlu1 %3136 }
 0xf16   :  { %v3173_v20 = vadd.f32 %v7091_v2, %v3137_v52  ;;  %3254 = vmax.xlane.f32.xlu1 %v7142_v22  ;;  %3258 = vmax.xlane.f32.xlu0 %v7145_v63  ;;  %v3141_v37 = vpop.permute.xlu0 %3140  ;;  %v7880_v52 = vld [vmem:[#allocation30_spill] sm:$0xff] }
 0xf17   :  { %v3174_v19 = vadd.f32 %v7091_v2, %v3141_v37  ;;  %v7881_v37 = vld [vmem:[#allocation18_spill] sm:$0xff] }
 0xf18   :  { %vm3189_vm0 = vcmp.gt.f32.partialorder %v3173_v20, 0.0  ;;  %v3205_v4 = vmul.f32 0.2, %v3173_v20 }
 0xf19   :  { %vm3190_vm1 = vcmp.gt.f32.partialorder %v3174_v19, 0.0  ;;  %v3206_v36 = vmul.f32 0.2, %v3174_v19 }
 0xf1a   :  { %v3221_v9 = vsel %vm3189_vm0, %v3173_v20, %v3205_v4  ;;  %v3239_v20 = vadd.f32 %v7880_v52, %v3223_v6  ;;  %v3210_v4 = vmul.f32 0.2, %v3178_v15 }
 0xf1b   :  { %v7154_v12 = vadd.f32 %v7876_v14, %v3221_v9  ;;  %v3222_v61 = vsel %vm3190_vm1, %v3174_v19, %v3206_v36 }
 0xf1c   :  { %v7160_v59 = vadd.f32 %v7878_v48, %v3222_v61  ;;  %v3226_v9 = vsel %vm3194_vm5, %v3178_v15, %v3210_v4  ;;  %v4832_v4 = vmov 7  }
 0xf1d   :  { %3262 = vmax.xlane.f32.xlu2 %v7154_v12  ;;  %v3149_v28 = vpop.permute.xlu1 %3148  ;;  %4277 = vset.pattern.permute.xlu0 %v4832_v4 }
 0xf1e   :  { %v3176_v24 = vadd.f32 %v7091_v2, %v3149_v28  ;;  %3260 = vmax.xlane.f32.xlu1 %v7157_v17  ;;  %3264 = vmax.xlane.f32.xlu0 %v7160_v59  ;;  %v3153_v44 = vpop.permute.xlu0 %3152 }
 0xf1f   :  { %v3177_v23 = vadd.f32 %v7091_v2, %v3153_v44  ;;  %4276 = vset.pattern.permute.xlu2 %v4832_v4  ;;  %4278 = vset.pattern.permute.xlu1 %v4832_v4 }
 0xf20   :  { %vm3192_vm3 = vcmp.gt.f32.partialorder %v3176_v24, 0.0  ;;  %v3208_v38 = vmul.f32 0.2, %v3176_v24 }
 0xf21   :  { %vm3193_vm4 = vcmp.gt.f32.partialorder %v3177_v23, 0.0  ;;  %v3209_v5 = vmul.f32 0.2, %v3177_v23 }
 0xf22   :  { %v3224_v31 = vsel %vm3192_vm3, %v3176_v24, %v3208_v38  ;;  %v7182_v24 = vadd.f32 %v7883_v57, %v3226_v9 }
 0xf23   :  { %v7169_v41 = vadd.f32 %v7879_v29, %v3224_v31  ;;  %v3225_v27 = vsel %vm3193_vm4, %v3177_v23, %v3209_v5 }
 0xf24   :  { %v7173_v19 = vadd.f32 %v7881_v37, %v3225_v27 }
 0xf25   :  { %3268 = vmax.xlane.f32.xlu2 %v7169_v41  ;;  %v3161_v36 = vpop.permute.xlu1 %3160 }
 0xf26   :  { %v3179_v54 = vadd.f32 %v7091_v2, %v3161_v36  ;;  %3266 = vmax.xlane.f32.xlu1 %v3239_v20  ;;  %3270 = vmax.xlane.f32.xlu0 %v7173_v19 }
 0xf28   :  { %vm3195_vm6 = vcmp.gt.f32.partialorder %v3179_v54, 0.0  ;;  %v3211_v21 = vmul.f32 0.2, %v3179_v54 }
 0xf2a   :  { %v3227_v61 = vsel %vm3195_vm6, %v3179_v54, %v3211_v21 }
 0xf2b   :  { %v7179_v28 = vadd.f32 %v7882_v62, %v3227_v61 }
 0xf2d   :  { %3274 = vmax.xlane.f32.xlu2 %v7179_v28 }
 0xf2e   :  { %3272 = vmax.xlane.f32.xlu1 %v7182_v24 }
 0xf58   :  { %v3245_v44 = vpop.xlane.xlu0 %3244 }
 0xf59   :  { %v3276_v2 = vsub.f32 %v7099_v8, %v3245_v44 }
 0xf5b   :  { %v3292_v23 = vmul.f32 1.442695, %v3276_v2 }
 0xf5d   :  { %4663 = vpow2.f32 %v3292_v23 }
 0xf63   :  { %v7187_v38 = vpop.eup %4663 }
 0xf64   :  { %3324 = vadd.xlane.f32.xlu0 %v7187_v38 }
 0xf78   :  { %v3247_v15 = vpop.xlane.xlu2 %3246 }
 0xf79   :  { %v3277_v5 = vsub.f32 %v7117_v3, %v3247_v15 }
 0xf7b   :  { %v3294_v6 = vmul.f32 1.442695, %v3277_v5 }
 0xf7d   :  { %4665 = vpow2.f32 %v3294_v6 }
 0xf80   :  { %v3251_v31 = vpop.xlane.xlu2 %3250  ;;  %v3253_v27 = vpop.xlane.xlu0 %3252 }
 0xf81   :  { %v3279_v36 = vsub.f32 %v7124_v45, %v3251_v31  ;;  %v3249_v54 = vpop.xlane.xlu1 %3248  ;;  %v3280_v8 = vsub.f32 %v7127_v30, %v3253_v27 }
 0xf82   :  { %v3278_v21 = vsub.f32 %v7130_v60, %v3249_v54 }
 0xf83   :  { %v7194_v9 = vpop.eup %4665  ;;  %v3298_v61 = vmul.f32 1.442695, %v3279_v36  ;;  %v3300_v44 = vmul.f32 1.442695, %v3280_v8 }
 0xf84   :  { %v3296_v3 = vmul.f32 1.442695, %v3278_v21  ;;  %3326 = vadd.xlane.f32.xlu1 %v7194_v9 }
 0xf85   :  { %4667 = vpow2.f32 %v3298_v61 }
 0xf86   :  { %4669 = vpow2.f32 %v3296_v3  ;;  %v4811_v3 = vld [vmem:[%s7663_s0 + $0x18] sm:$0xff] }
 0xf87   :  { %4671 = vpow2.f32 %v3300_v44 }
 0xf89   :  { %v7199_v45 = vpop.xlane.xlu1 %3254  ;;  %v7201_v23 = vpop.xlane.xlu0 %3258 }
 0xf8b   :  { %v7203_v30 = vpop.eup %4667 }
 0xf8c   :  { %v7205_v60 = vpop.eup %4669  ;;  %3330 = vadd.xlane.f32.xlu0 %v7203_v30 }
 0xf8d   :  { %v7208_v15 = vpop.eup %4671  ;;  %3328 = vadd.xlane.f32.xlu2 %v7205_v60 }
 0xf8e   :  { %3332 = vadd.xlane.f32.xlu1 %v7208_v15 }
 0xf91   :  { %v7214_v6 = vpop.xlane.xlu1 %3260  ;;  %v3265_v31 = vpop.xlane.xlu0 %3264 }
 0xf92   :  { %v3286_v27 = vsub.f32 %v7160_v59, %v3265_v31  ;;  %v4807_v59 = vld [vmem:[%s7663_s0 + $0x38] sm:$0xff]  ;;  %v4812_v31 = vld [vmem:[%s7663_s0 + $0x10] sm:$0xff] }
 0xf94   :  { %v3312_v4 = vmul.f32 1.442695, %v3286_v27  ;;  %v7254_v27 = vpop.xlane.xlu2 %3256 }
 0xf96   :  { %4673 = vpow2.f32 %v3312_v4 }
 0xf99   :  { %v3267_v36 = vpop.xlane.xlu1 %3266 }
 0xf9a   :  { %v3287_v54 = vsub.f32 %v3239_v20, %v3267_v36  ;;  %v4810_v20 = vld [vmem:[%s7663_s0 + $0x20] sm:$0xff] }
 0xf9c   :  { %v3314_v8 = vmul.f32 1.442695, %v3287_v54  ;;  %v7218_v21 = vpop.eup %4673  ;;  %v7257_v4 = vpop.xlane.xlu2 %3262 }
 0xf9e   :  { %4675 = vpow2.f32 %v3314_v8 }
 0xfa0   :  { %3571 = vperm.xlu0 %4277, %v5000_v39   ;;  %v4808_v39 = vld [vmem:[%s7663_s0 + $0x28] sm:$0xff] }
 0xfa4   :  { %v7220_v61 = vpop.eup %4675  ;;  %v7260_v36 = vpop.xlane.xlu2 %3268 }
 0xfa5   :  { %3567 = vperm.xlu2 %4276, %v4984_v33   ;;  %v4809_v33 = vld [vmem:[%s7663_s0 + $0x30] sm:$0xff] }
 0xfa7   :  { %3845 = vrot.lane.b32.xlu1 %v4807_v59, %s4833_s3 }
 0xfa8   :  { %3841 = vrot.lane.b32.xlu0 %v4808_v39, %s4833_s3 }
 0xfad   :  { %3843 = vrot.lane.b32.xlu2 %v4809_v33, %s4833_s3 }
 0xfaf   :  { %3839 = vrot.lane.b32.xlu1 %v4810_v20, %s4833_s3 }
 0xfb0   :  { %3837 = vrot.lane.b32.xlu0 %v4811_v3, %s4833_s3 }
 0xfb5   :  { %3378 = vrot.lane.b32.xlu2 %v4807_v59, %s4834_s8  ;;  %v7271_v59 = vperm.slane %v7778_v7, 7  ;;  %v7281_v7 = vpop.xlane.xlu1 %3272 }
 0xfb8   :  { %3376 = vrot.lane.b32.xlu0 %v4809_v33, %s4834_s8 }
 0xfc0   :  { %3591 = vperm.xlu0 %4277, %v5002_v40   ;;  %v7262_v40 = vpop.xlane.xlu2 %3274 }
 0xfc8   :  { %3595 = vperm.xlu0 %4277, %v7773_v51   ;;  %v7264_v51 = vpop.xlane.xlu0 %3270 }
 0xfd0   :  { %3835 = vrot.lane.b32.xlu0 %v4812_v31, %s4833_s3 }
 0xfd7   :  { %v7268_v8 = vpop.xlane.xlu0 %3324 }
 0xfd8   :  { %3374 = vrot.lane.b32.xlu0 %v4808_v39, %s4834_s8 }
 0xfe0   :  { %3372 = vrot.lane.b32.xlu0 %v4810_v20, %s4834_s8 }
 0xfe8   :  { %3370 = vrot.lane.b32.xlu0 %v4811_v3, %s4834_s8 }
 0xfff   :  { %v7274_v20 = vpop.xlane.xlu0 %3330 }
0x1000   :  { %v7266_v54 = vpop.xlane.xlu2 %3328  ;;  %7885 = vst [vmem:[#allocation22_spill] sm:$0xff] %v7274_v20  ;;  %v7284_v20 = vpop.xlane.xlu1 %3326 }
0x1001   :  { %7884 = vst [vmem:[#allocation16_spill] sm:$0xff] %v7266_v54 }
0x1002   :  { %7886 = vst [vmem:[#allocation13_spill] sm:$0xff] %v7284_v20 }
0x1008   :  { %v3568_v39 = vpop.permute.xlu2 %3567  ;;  %v7286_v37 = vpop.xlane.xlu1 %3332 }
0x1009   :  { %v3631_v33 = vadd.f32 %v7271_v59, %v3568_v39  ;;  %7887 = vst [vmem:[#allocation21_spill] sm:$0xff] %v7286_v37 }
0x100b   :  { %vm3647_vm7 = vcmp.gt.f32.partialorder %v3631_v33, 0.0  ;;  %v3663_v3 = vmul.f32 0.2, %v3631_v33 }
0x100d   :  { %v3679_v44 = vsel %vm3647_vm7, %v3631_v33, %v3663_v3  ;;  %vm3549_vm7 = vcmask 454016  }
0x100e   :  { %v7277_v5 = vadd.f32 %v7783_v25, %v3679_v44 }
0x1010   :  { %3711 = vmax.xlane.f32.xlu1 %v7277_v5 }
0x1012   :  { %v3572_v2 = vpop.permute.xlu0 %3571 }
0x1013   :  { %v3632_v54 = vadd.f32 %v7271_v59, %v3572_v2  ;;  %v4813_v2 = vld [vmem:[%s7663_s0 + $0x8] sm:$0xff] }
0x1015   :  { %vm3648_vm8 = vcmp.gt.f32.partialorder %v3632_v54, 0.0  ;;  %v3664_v62 = vmul.f32 0.2, %v3632_v54 }
0x1017   :  { %v3680_v57 = vsel %vm3648_vm8, %v3632_v54, %v3664_v62  ;;  %v3844_v62 = vpop.permute.xlu2 %3843  ;;  %v4814_v54 = vld [vmem:[%s7663_s0] sm:$0xff]  ;;  %s4835_s0 = smov 48   ;;  %vm4016_vm8 = vcmask 519616  }
0x1018   :  { %v3696_v39 = vadd.f32 %v7786_v53, %v3680_v57 }
0x1019   :  { %v3846_v44 = vpop.permute.xlu1 %3845 }
0x101a   :  { %3713 = vmax.xlane.f32.xlu2 %v3696_v39  ;;  %v3842_v25 = vpop.permute.xlu0 %3841  ;;  %3855 = vmatpush.bf16.msra.mxu0 %v3846_v44 }
0x101e   :  { %3856 = vmatpush.bf16.msra.mxu0 %v3844_v62 }
0x101f   :  { %v3379_v57 = vpop.permute.xlu2 %3378 }
0x1020   :  { %3388 = vmatpush.bf16.msra.mxu1 %v3379_v57  ;;  %4215 = vmatpush.bf16.msrb.mxu3 %v3379_v57 }
0x1022   :  { %v3838_v53 = vpop.permute.xlu0 %3837  ;;  %3857 = vmatpush.bf16.msra.mxu0 %v3842_v25 }
0x1029   :  { %3575 = vperm.xlu1 %4278, %v5009_v42  }
0x102a   :  { %v3377_v42 = vpop.permute.xlu0 %3376 }
0x102b   :  { %3389 = vmatpush.bf16.msra.mxu1 %v3377_v42  ;;  %4216 = vmatpush.bf16.msrb.mxu3 %v3377_v42 }
0x1031   :  { %3833 = vrot.lane.b32.xlu1 %v4813_v2, %s4833_s3 }
0x1032   :  { %3579 = vperm.xlu2 %4276, %v7775_v49   ;;  %v3840_v49 = vpop.permute.xlu1 %3839 }
0x1033   :  { %3858 = vmatpush.bf16.msra.mxu0 %v3840_v49 }
0x1037   :  { %3859 = vmatpush.bf16.msra.mxu0 %v3838_v53 }
0x103a   :  { %3583 = vperm.xlu2 %4276, %v7768_v1   ;;  %v3592_v1 = vpop.permute.xlu0 %3591 }
0x1042   :  { %3831 = vrot.lane.b32.xlu2 %v4814_v54, %s4833_s3  ;;  %v7304_v33 = vpop.permute.xlu0 %3595 }
0x104a   :  { %3368 = vrot.lane.b32.xlu2 %v4812_v31, %s4834_s8  ;;  %v3836_v3 = vpop.permute.xlu0 %3835 }
0x104b   :  { %3860 = vmatpush.bf16.msra.mxu0 %v3836_v3 }
0x1052   :  { %3599 = vperm.xlu2 %4276, %v7779_v32   ;;  %v3375_v44 = vpop.permute.xlu0 %3374 }
0x1053   :  { %3390 = vmatpush.bf16.msra.mxu1 %v3375_v44  ;;  %4217 = vmatpush.bf16.msrb.mxu3 %v3375_v44 }
0x105a   :  { %3603 = vperm.xlu2 %4276, %v5022_v46   ;;  %v3373_v57 = vpop.permute.xlu0 %3372 }
0x105b   :  { %3391 = vmatpush.bf16.msra.mxu1 %v3373_v57  ;;  %4218 = vmatpush.bf16.msrb.mxu3 %v3373_v57 }
0x1062   :  { %3366 = vrot.lane.b32.xlu2 %v4813_v2, %s4834_s8  ;;  %v3371_v20 = vpop.permute.xlu0 %3370 }
0x1063   :  { %3392 = vmatpush.bf16.msra.mxu1 %v3371_v20  ;;  %4219 = vmatpush.bf16.msrb.mxu3 %v3371_v20 }
0x106a   :  { %3364 = vrot.lane.b32.xlu2 %v4814_v54, %s4834_s8 }
0x1083   :  { %v3712_v31 = vpop.xlane.xlu1 %3711 }
0x1084   :  { %v3743_v2 = vsub.f32 %v7277_v5, %v3712_v31 }
0x108d   :  { %v3714_v25 = vpop.xlane.xlu2 %3713 }
0x108e   :  { %v3744_v32 = vsub.f32 %v3696_v39, %v3714_v25 }
0x1090   :  { %v3761_v3 = vmul.f32 1.442695, %v3744_v32 }
0x1092   :  { %4677 = vpow2.f32 %v3761_v3 }
0x1095   :  { %v3580_v62 = vpop.permute.xlu2 %3579 }
0x1096   :  { %v3634_v53 = vadd.f32 %v7271_v59, %v3580_v62  ;;  %v3759_v62 = vmul.f32 1.442695, %v3743_v2 }
0x1098   :  { %vm3650_vm9 = vcmp.gt.f32.partialorder %v3634_v53, 0.0  ;;  %v3666_v46 = vmul.f32 0.2, %v3634_v53  ;;  %4679 = vpow2.f32 %v3759_v62  ;;  %v7318_v32 = vpop.eup %4677 }
0x109a   :  { %v3682_v42 = vsel %vm3650_vm9, %v3634_v53, %v3666_v46 }
0x109b   :  { %v3576_v54 = vpop.permute.xlu1 %3575  ;;  %v7309_v49 = vadd.f32 %v7810_v10, %v3682_v42 }
0x109c   :  { %v3633_v44 = vadd.f32 %v7271_v59, %v3576_v54 }
0x109d   :  { %3717 = vmax.xlane.f32.xlu1 %v7309_v49  ;;  %v3584_v37 = vpop.permute.xlu2 %3583 }
0x109e   :  { %vm3649_vm10 = vcmp.gt.f32.partialorder %v3633_v44, 0.0  ;;  %v3665_v39 = vmul.f32 0.2, %v3633_v44  ;;  %v3635_v25 = vadd.f32 %v7271_v59, %v3584_v37  ;;  %v3637_v37 = vadd.f32 %v7271_v59, %v3592_v1  ;;  %v7321_v2 = vpop.eup %4679 }
0x109f   :  { %v3823_v20 = vpack.c.bf16 %v7318_v32, %v7321_v2 }
0x10a0   :  { %v3681_v57 = vsel %vm3649_vm10, %v3633_v44, %v3665_v39  ;;  %v3667_v10 = vmul.f32 0.2, %v3635_v25  ;;  %vm3651_vm11 = vcmp.gt.f32.partialorder %v3635_v25, 0.0  ;;  %v3669_v42 = vmul.f32 0.2, %v3637_v37 }
0x10a1   :  { %v7315_v5 = vadd.f32 %v7780_v55, %v3681_v57  ;;  %vm3653_vm12 = vcmp.gt.f32.partialorder %v3637_v37, 0.0  ;;  %v3290_v39 = vsub.f32 %v7182_v24, %v7281_v7 }
0x10a2   :  { %v3683_v46 = vsel %vm3651_vm11, %v3635_v25, %v3667_v10  ;;  %v3685_v3 = vsel %vm3653_vm12, %v3637_v37, %v3669_v42 }
0x10a3   :  { %3715 = vmax.xlane.f32.xlu0 %v7315_v5  ;;  %v3834_v31 = vpop.permute.xlu1 %3833  ;;  %v7324_v55 = vadd.f32 %v7812_v50, %v3683_v46  ;;  %v7330_v1 = vadd.f32 %v7813_v56, %v3685_v3  ;;  %v3291_v50 = vsub.f32 %v7179_v28, %v7262_v40  ;;  %v3320_v57 = vmul.f32 1.442695, %v3290_v39 }
0x10a4   :  { %3861 = vmatpush.bf16.msra.mxu0 %v3834_v31  ;;  %v3281_v40 = vsub.f32 %v7142_v22, %v7199_v45  ;;  %v7889_v31 = vpack.c.bf16 %v7203_v30, %v7205_v60  ;;  %v3282_v45 = vsub.f32 %v7139_v43, %v7254_v27  ;;  %v3283_v30 = vsub.f32 %v7145_v63, %v7201_v23 }
0x10a5   :  { %v3832_v53 = vpop.permute.xlu2 %3831  ;;  %v3322_v25 = vmul.f32 1.442695, %v3291_v50  ;;  %v3285_v43 = vsub.f32 %v7154_v12, %v7257_v4  ;;  %v3284_v63 = vsub.f32 %v7157_v17, %v7214_v6  ;;  %v3288_v39 = vsub.f32 %v7169_v41, %v7260_v36 }
0x10a6   :  { %v3304_v37 = vmul.f32 1.442695, %v3282_v45  ;;  %v3306_v46 = vmul.f32 1.442695, %v3283_v30 }
0x10a7   :  { %4681 = vpow2.f32 %v3322_v25  ;;  %v3310_v23 = vmul.f32 1.442695, %v3285_v43 }
0x10a8   :  { %3862 = vmatpush.bf16.msra.mxu0 %v3832_v53  ;;  %4683 = vpow2.f32 %v3320_v57 }
0x10ab   :  { %3719 = vmax.xlane.f32.xlu0 %v7324_v55  ;;  %3863 = vmatmul.bf16.vlgmr.msra.gmra.mxu0 %v3823_v20 }
0x10ad   :  { %v3369_v54 = vpop.permute.xlu2 %3368  ;;  %v7342_v10 = vpop.eup %4681 }
0x10ae   :  { %3393 = vmatpush.bf16.msra.mxu1 %v3369_v54  ;;  %4220 = vmatpush.bf16.msrb.mxu3 %v3369_v54 }
0x10b3   :  { %3723 = vmax.xlane.f32.xlu0 %v7330_v1 }
0x10b5   :  { %v7333_v44 = vpop.permute.xlu2 %3599 }
0x10b6   :  { %3587 = vperm.xlu1 %4278, %v7777_v26   ;;  %v7344_v26 = vpop.eup %4683 }
0x10b7   :  { %v3363_v24 = vpack.c.bf16 %v7342_v10, %v7344_v26 }
0x10bd   :  { %v3604_v62 = vpop.permute.xlu2 %3603 }
0x10be   :  { %3611 = vperm.xlu1 %4278, %v7781_v58   ;;  %v7888_v58 = vpack.c.bf16 %v7194_v9, %v7187_v38  ;;  %v3640_v53 = vadd.f32 %v7271_v59, %v3604_v62 }
0x10c0   :  { %vm3656_vm14 = vcmp.gt.f32.partialorder %v3640_v53, 0.0 }
0x10c5   :  { %v3367_v56 = vpop.permute.xlu2 %3366 }
0x10c6   :  { %3394 = vmatpush.bf16.msra.mxu1 %v3367_v56  ;;  %4221 = vmatpush.bf16.msrb.mxu3 %v3367_v56  ;;  %v3316_v56 = vmul.f32 1.442695, %v3288_v39 }
0x10c7   :  { %3607 = vperm.xlu0 %4277, %v7774_v0   ;;  %v3638_v0 = vadd.f32 %v7271_v59, %v7304_v33 }
0x10c9   :  { %v3670_v7 = vmul.f32 0.2, %v3638_v0  ;;  %vm3654_vm13 = vcmp.gt.f32.partialorder %v3638_v0, 0.0 }
0x10cb   :  { %v3686_v38 = vsel %vm3654_vm13, %v3638_v0, %v3670_v7 }
0x10cc   :  { %v7362_v9 = vadd.f32 %v7854_v18, %v3686_v38 }
0x10cd   :  { %v3365_v28 = vpop.permute.xlu2 %3364 }
0x10ce   :  { %3395 = vmatpush.bf16.msra.mxu1 %v3365_v28  ;;  %4222 = vmatpush.bf16.msrb.mxu3 %v3365_v28 }
0x10cf   :  { %3619 = vperm.xlu0 %4277, %v7776_v13   ;;  %v3302_v13 = vmul.f32 1.442695, %v3281_v40 }
0x10d1   :  { %3396 = vmatmul.bf16.vlgmr.msra.gmra.mxu1 %v7888_v58  ;;  %3431 = vmatmul.bf16.vlgmr.msrb.gmra.mxu3 %v3363_v24  ;;  %4685 = vpow2.f32 %v3302_v13 }
0x10d2   :  { %4687 = vpow2.f32 %v3304_v37 }
0x10d3   :  { %4689 = vpow2.f32 %v3306_v46 }
0x10d4   :  { %4691 = vpow2.f32 %v3310_v23 }
0x10d7   :  { %3627 = vperm.xlu0 %4277, %v7772_v47   ;;  %v3672_v47 = vmul.f32 0.2, %v3640_v53  ;;  %v7365_v22 = vpop.eup %4685 }
0x10d8   :  { %v3358_v18 = vpack.c.bf16 %v7365_v22, %v7208_v15  ;;  %v7377_v20 = vpop.eup %4687  ;;  %v3308_v15 = vmul.f32 1.442695, %v3284_v63 }
0x10d9   :  { %v3688_v33 = vsel %vm3656_vm14, %v3640_v53, %v3672_v47  ;;  %v7379_v42 = vpop.eup %4689 }
0x10da   :  { %v7372_v60 = vadd.f32 %v7876_v14, %v3688_v33  ;;  %v3359_v14 = vpack.c.bf16 %v7379_v42, %v7377_v20  ;;  %4693 = vpow2.f32 %v3308_v15  ;;  %v7388_v27 = vpop.eup %4691 }
0x10e0   :  { %v4694_v54 = vpop.eup %4693 }
0x10e1   :  { %3401 = vmatmul.bf16.gmra.mxu1 %v7889_v31  ;;  %v3360_v3 = vpack.c.bf16 %v7388_v27, %v4694_v54 }
0x10e8   :  { %3725 = vmax.xlane.f32.xlu1 %v7362_v9 }
0x10f0   :  { %3729 = vmax.xlane.f32.xlu1 %v7372_v60 }
0x10f1   :  { %3406 = vmatmul.bf16.gmra.mxu1 %v3358_v18 }
0x1101   :  { %3411 = vmatmul.bf16.gmra.mxu1 %v3359_v14 }
0x1109   :  { %3623 = vperm.xlu1 %4278, %v7782_v16   ;;  %v3289_v16 = vsub.f32 %v7173_v19, %v7264_v51 }
0x110b   :  { %v3318_v28 = vmul.f32 1.442695, %v3289_v16 }
0x1110   :  { %v3718_v50 = vpop.xlane.xlu1 %3717 }
0x1111   :  { %3416 = vmatmul.bf16.gmra.mxu1 %v3360_v3  ;;  %v3746_v12 = vsub.f32 %v7309_v49, %v3718_v50  ;;  %v7890_v49 = vpack.c.bf16 %v7220_v61, %v7218_v21 }
0x1113   :  { %v3765_v17 = vmul.f32 1.442695, %v3746_v12 }
0x1115   :  { %4695 = vpow2.f32 %v3765_v17 }
0x1116   :  { %v3716_v6 = vpop.xlane.xlu0 %3715 }
0x1117   :  { %v3745_v4 = vsub.f32 %v7315_v5, %v3716_v6 }
0x1119   :  { %v3763_v62 = vmul.f32 1.442695, %v3745_v4 }
0x111b   :  { %4697 = vpow2.f32 %v3763_v62  ;;  %v7397_v25 = vpop.eup %4695 }
0x111c   :  { %4699 = vpow2.f32 %v3316_v56 }
0x111d   :  { %4701 = vpow2.f32 %v3318_v28 }
0x111e   :  { %v3720_v41 = vpop.xlane.xlu0 %3719  ;;  %4703 = vrcp.f32 %v7268_v8 }
0x1121   :  { %v7399_v57 = vpop.eup %4697  ;;  %3421 = vmatmul.bf16.gmra.mxu1 %v7890_v49 }
0x1122   :  { %v3824_v5 = vpack.c.bf16 %v7397_v25, %v7399_v57  ;;  %v7407_v51 = vpop.eup %4699 }
0x1123   :  { %v4702_v58 = vpop.eup %4701 }
0x1124   :  { %3868 = vmatmul.bf16.gmra.mxu0 %v3824_v5  ;;  %v3362_v7 = vpack.c.bf16 %v4702_v58, %v7407_v51 }
0x1126   :  { %v3724_v13 = vpop.xlane.xlu0 %3723 }
0x1127   :  { %v3749_v14 = vsub.f32 %v7330_v1, %v3724_v13  ;;  %v7892_v13 = vld [vmem:[#allocation20_spill] sm:$0xff] }
0x1128   :  { %v3588_v36 = vpop.permute.xlu1 %3587 }
0x1129   :  { %v3636_v19 = vadd.f32 %v7271_v59, %v3588_v36 }
0x112b   :  { %vm3652_vm15 = vcmp.gt.f32.partialorder %v3636_v19, 0.0  ;;  %v3668_v24 = vmul.f32 0.2, %v3636_v19 }
0x112d   :  { %v3684_v0 = vsel %vm3652_vm15, %v3636_v19, %v3668_v24 }
0x112e   :  { %v7410_v40 = vadd.f32 %v7789_v34, %v3684_v0 }
0x1130   :  { %3721 = vmax.xlane.f32.xlu2 %v7410_v40  ;;  %v3612_v31 = vpop.permute.xlu1 %3611 }
0x1131   :  { %v3642_v53 = vadd.f32 %v7271_v59, %v3612_v31  ;;  %3426 = vmatmul.bf16.gmra.mxu1 %v3362_v7 }
0x1133   :  { %vm3658_vm0 = vcmp.gt.f32.partialorder %v3642_v53, 0.0  ;;  %v3674_v38 = vmul.f32 0.2, %v3642_v53 }
0x1135   :  { %v3690_v47 = vsel %vm3658_vm0, %v3642_v53, %v3674_v38 }
0x1136   :  { %v7416_v33 = vadd.f32 %v7880_v52, %v3690_v47  ;;  %v4704_v52 = vpop.eup %4703 }
0x1138   :  { %3733 = vmax.xlane.f32.xlu1 %v7416_v33 }
0x1139   :  { %v3608_v45 = vpop.permute.xlu0 %3607 }
0x113a   :  { %v3641_v34 = vadd.f32 %v7271_v59, %v3608_v45  ;;  %v7893_v45 = vld [vmem:[#allocation24_spill] sm:$0xff] }
0x113c   :  { %vm3657_vm1 = vcmp.gt.f32.partialorder %v3641_v34, 0.0  ;;  %v3673_v30 = vmul.f32 0.2, %v3641_v34 }
0x113e   :  { %v3689_v18 = vsel %vm3657_vm1, %v3641_v34, %v3673_v30 }
0x113f   :  { %v7421_v37 = vadd.f32 %v7878_v48, %v3689_v18  ;;  %v3747_v48 = vsub.f32 %v7324_v55, %v3720_v41  ;;  %v3639_v55 = vadd.f32 %v7271_v59, %v7333_v44 }
0x1140   :  { %3340 = vadd.xlane.f32.xlu1 %v4694_v54 }
0x1141   :  { %3731 = vmax.xlane.f32.xlu0 %v7421_v37  ;;  %v3767_v63 = vmul.f32 1.442695, %v3747_v48  ;;  %vm3655_vm2 = vcmp.gt.f32.partialorder %v3639_v55, 0.0  ;;  %v3620_v50 = vpop.permute.xlu0 %3619 }
0x1142   :  { %v3644_v39 = vadd.f32 %v7271_v59, %v3620_v50 }
0x1143   :  { %4705 = vpow2.f32 %v3767_v63 }
0x1144   :  { %v3676_v49 = vmul.f32 0.2, %v3644_v39  ;;  %vm3660_vm4 = vcmp.gt.f32.partialorder %v3644_v39, 0.0 }
0x1146   :  { %v3692_v19 = vsel %vm3660_vm4, %v3644_v39, %v3676_v49 }
0x1148   :  { %3615 = vperm.xlu2 %4276, %v4989_v35   ;;  %3346 = vadd.xlane.f32.xlu1 %v7220_v61  ;;  %v3771_v35 = vmul.f32 1.442695, %v3749_v14 }
0x1149   :  { %3334 = vadd.xlane.f32.xlu0 %v7365_v22  ;;  %v4706_v23 = vpop.eup %4705  ;;  %v3628_v4 = vpop.permute.xlu0 %3627 }
0x114a   :  { %4707 = vpow2.f32 %v3771_v35  ;;  %v3646_v7 = vadd.f32 %v7271_v59, %v3628_v4 }
0x114c   :  { %v3678_v38 = vmul.f32 0.2, %v3646_v7  ;;  %vm3662_vm6 = vcmp.gt.f32.partialorder %v3646_v7, 0.0 }
0x114e   :  { %v3397_v46 = vpop.f32.mrf.mxu1  ;;  %v3694_v47 = vsel %vm3662_vm6, %v3646_v7, %v3678_v38 }
0x114f   :  { %v7428_v43 = vmul.f32 %v4704_v52, %v3397_v46  ;;  %v3710_v34 = vadd.f32 %v7893_v45, %v3694_v47  ;;  %v7897_v45 = vld [vmem:[#allocation21_spill] sm:$0xff] }
0x1150   :  { %3352 = vadd.xlane.f32.xlu1 %v7344_v26  ;;  %v4708_v26 = vpop.eup %4707 }
0x1151   :  { %3338 = vadd.xlane.f32.xlu0 %v7379_v42 }
0x1158   :  { %3793 = vadd.xlane.f32.xlu1 %v7318_v32  ;;  %v3671_v32 = vmul.f32 0.2, %v3639_v55 }
0x1159   :  { %3344 = vadd.xlane.f32.xlu0 %v7218_v21 }
0x115a   :  { %v3687_v21 = vsel %vm3655_vm2, %v3639_v55, %v3671_v32 }
0x115b   :  { %v3726_v61 = vpop.xlane.xlu1 %3725 }
0x115c   :  { %v3750_v8 = vsub.f32 %v7362_v9, %v3726_v61  ;;  %v3703_v9 = vadd.f32 %v7877_v11, %v3687_v21 }
0x115e   :  { %v3773_v22 = vmul.f32 1.442695, %v3750_v8 }
0x1160   :  { %4709 = vpow2.f32 %v3773_v22  ;;  %3799 = vadd.xlane.f32.xlu1 %v4706_v23 }
0x1161   :  { %3350 = vadd.xlane.f32.xlu0 %v4702_v58  ;;  %v7891_v58 = vld [vmem:[#allocation18_spill] sm:$0xff] }
0x1162   :  { %v3708_v0 = vadd.f32 %v7891_v58, %v3692_v19  ;;  %v3469_v19 = vpack.c.bf16 %v7428_v43, %v7428_v43 }
0x1163   :  { %v3730_v15 = vpop.xlane.xlu1 %3729 }
0x1164   :  { %v3752_v54 = vsub.f32 %v7372_v60, %v3730_v15 }
0x1166   :  { %v4710_v1 = vpop.eup %4709  ;;  %v3777_v3 = vmul.f32 1.442695, %v3752_v54 }
0x1167   :  { %v3826_v42 = vpack.c.bf16 %v4710_v1, %v4708_v26 }
0x1168   :  { %3805 = vadd.xlane.f32.xlu1 %v4710_v1  ;;  %4711 = vpow2.f32 %v3777_v3 }
0x1169   :  { %3791 = vadd.xlane.f32.xlu0 %v7321_v2 }
0x116e   :  { %v4712_v44 = vpop.eup %4711 }
0x1171   :  { %3797 = vadd.xlane.f32.xlu0 %v7397_v25  ;;  %3727 = vmax.xlane.f32.xlu2 %v3703_v9 }
0x1179   :  { %3803 = vadd.xlane.f32.xlu0 %v4708_v26 }
0x117b   :  { %v3624_v28 = vpop.permute.xlu1 %3623 }
0x117c   :  { %v3645_v36 = vadd.f32 %v7271_v59, %v3624_v28 }
0x117e   :  { %vm3661_vm5 = vcmp.gt.f32.partialorder %v3645_v36, 0.0 }
0x1181   :  { %3809 = vadd.xlane.f32.xlu0 %v4712_v44 }
0x11a3   :  { %v3722_v12 = vpop.xlane.xlu2 %3721 }
0x11a4   :  { %v3748_v17 = vsub.f32 %v7410_v40, %v3722_v12  ;;  %v3677_v40 = vmul.f32 0.2, %v3645_v36 }
0x11a6   :  { %v3769_v6 = vmul.f32 1.442695, %v3748_v17 }
0x11a8   :  { %4713 = vpow2.f32 %v3769_v6 }
0x11ab   :  { %v3616_v2 = vpop.permute.xlu2 %3615 }
0x11ac   :  { %v3643_v11 = vadd.f32 %v7271_v59, %v3616_v2 }
0x11ae   :  { %v4714_v62 = vpop.eup %4713  ;;  %vm3659_vm3 = vcmp.gt.f32.partialorder %v3643_v11, 0.0  ;;  %v3675_v60 = vmul.f32 0.2, %v3643_v11 }
0x11af   :  { %v3825_v16 = vpack.c.bf16 %v4714_v62, %v4706_v23  ;;  %v7463_v23 = vpop.f32.mrf.mxu0 }
0x11b0   :  { %v3691_v25 = vsel %vm3659_vm3, %v3643_v11, %v3675_v60 }
0x11b1   :  { %3873 = vmatmul.bf16.gmra.mxu0 %v3825_v16  ;;  %v3707_v56 = vadd.f32 %v7879_v29, %v3691_v25  ;;  %v3693_v29 = vsel %vm3661_vm5, %v3645_v36, %v3677_v40  ;;  %v7894_v25 = vld [vmem:[#allocation13_spill] sm:$0xff]  ;;  %v7896_v36 = vld [vmem:[#allocation16_spill] sm:$0xff] }
0x11b2   :  { %v3709_v53 = vadd.f32 %v7892_v13, %v3693_v29 }
0x11b3   :  { %3735 = vmax.xlane.f32.xlu2 %v3707_v56 }
0x11b4   :  { %v3732_v5 = vpop.xlane.xlu0 %3731 }
0x11b5   :  { %v3753_v41 = vsub.f32 %v7421_v37, %v3732_v5  ;;  %v3734_v37 = vpop.xlane.xlu1 %3733 }
0x11b6   :  { %v3754_v48 = vsub.f32 %v7416_v33, %v3734_v37 }
0x11b7   :  { %v3779_v24 = vmul.f32 1.442695, %v3753_v41  ;;  %v7467_v32 = vpop.f32.mrf.mxu0 }
0x11b8   :  { %v3781_v63 = vmul.f32 1.442695, %v3754_v48 }
0x11b9   :  { %4715 = vpow2.f32 %v3779_v24 }
0x11bb   :  { %3737 = vmax.xlane.f32.xlu2 %v3708_v0 }
0x11bc   :  { %v3335_v39 = vpop.xlane.xlu0 %3334 }
0x11bd   :  { %v3341_v41 = vpop.xlane.xlu1 %3340 }
0x11bf   :  { %v4716_v31 = vpop.eup %4715  ;;  %v7471_v50 = vpop.f32.mrf.mxu0 }
0x11c0   :  { %3811 = vadd.xlane.f32.xlu1 %v4716_v31 }
0x11c1   :  { %3878 = vmatmul.bf16.gmra.mxu0 %v3826_v42 }
0x11c3   :  { %3739 = vmax.xlane.f32.xlu2 %v3709_v53 }
0x11c4   :  { %v3339_v24 = vpop.xlane.xlu0 %3338 }
0x11c7   :  { %v7473_v11 = vpop.f32.mrf.mxu0 }
0x11cb   :  { %3741 = vmax.xlane.f32.xlu2 %v3710_v34 }
0x11d3   :  { %3336 = vadd.xlane.f32.xlu2 %v7377_v20  ;;  %v3399_v20 = vpop.f32.mrf.mxu1 }
0x11db   :  { %3342 = vadd.xlane.f32.xlu2 %v7388_v27  ;;  %v3402_v14 = vpop.f32.mrf.mxu1 }
0x11e3   :  { %3348 = vadd.xlane.f32.xlu2 %v7407_v51  ;;  %v3404_v35 = vpop.f32.mrf.mxu1 }
0x11e4   :  { %v3728_v59 = vpop.xlane.xlu2 %3727 }
0x11e5   :  { %v3751_v30 = vsub.f32 %v3703_v9, %v3728_v59 }
0x11e7   :  { %v3775_v18 = vmul.f32 1.442695, %v3751_v30  ;;  %v3347_v30 = vpop.xlane.xlu1 %3346 }
0x11e9   :  { %4717 = vpow2.f32 %v3775_v18 }
0x11ea   :  { %4719 = vpow2.f32 %v3781_v63 }
0x11eb   :  { %3354 = vadd.xlane.f32.xlu2 %v7342_v10  ;;  %v7459_v10 = vpop.f32.mrf.mxu1 }
0x11ef   :  { %v4718_v52 = vpop.eup %4717 }
0x11f0   :  { %v3827_v46 = vpack.c.bf16 %v4712_v44, %v4718_v52  ;;  %v4720_v27 = vpop.eup %4719 }
0x11f1   :  { %v3828_v51 = vpack.c.bf16 %v4720_v27, %v4716_v31 }
0x11f2   :  { %3883 = vmatmul.bf16.gmra.mxu0 %v3827_v46 }
0x11f3   :  { %3795 = vadd.xlane.f32.xlu2 %v7399_v57  ;;  %v7461_v61 = vpop.f32.mrf.mxu1 }
0x11fb   :  { %3801 = vadd.xlane.f32.xlu2 %v4714_v62  ;;  %v7465_v26 = vpop.f32.mrf.mxu1 }
0x1202   :  { %3888 = vmatmul.bf16.gmra.mxu0 %v3828_v51 }
0x1203   :  { %3807 = vadd.xlane.f32.xlu2 %v4718_v52  ;;  %v7469_v3 = vpop.f32.mrf.mxu1  ;;  %v3345_v52 = vpop.xlane.xlu0 %3344 }
0x120b   :  { %3813 = vadd.xlane.f32.xlu2 %v4720_v27  ;;  %v3417_v4 = vpop.f32.mrf.mxu1 }
0x1213   :  { %v3419_v49 = vpop.f32.mrf.mxu1 }
0x1226   :  { %v3736_v8 = vpop.xlane.xlu2 %3735 }
0x1227   :  { %v3755_v33 = vsub.f32 %v3707_v56, %v3736_v8  ;;  %v7895_v56 = vld [vmem:[#allocation22_spill] sm:$0xff] }
0x1229   :  { %v3783_v22 = vmul.f32 1.442695, %v3755_v33 }
0x122b   :  { %4721 = vpow2.f32 %v3783_v22 }
0x122e   :  { %v3738_v57 = vpop.xlane.xlu2 %3737  ;;  %v7477_v28 = vpop.f32.mrf.mxu0 }
0x122f   :  { %v3756_v55 = vsub.f32 %v3708_v0, %v3738_v57  ;;  %v3353_v57 = vpop.xlane.xlu1 %3352 }
0x1231   :  { %v4722_v1 = vpop.eup %4721  ;;  %v3785_v42 = vmul.f32 1.442695, %v3756_v55 }
0x1232   :  { %3815 = vadd.xlane.f32.xlu0 %v4722_v1 }
0x1233   :  { %4723 = vpow2.f32 %v3785_v42 }
0x1236   :  { %v3740_v21 = vpop.xlane.xlu2 %3739  ;;  %v7483_v38 = vpop.f32.mrf.mxu0 }
0x1237   :  { %v3757_v15 = vsub.f32 %v3709_v53, %v3740_v21  ;;  %v3422_v53 = vpop.f32.mrf.mxu1 }
0x1239   :  { %v4724_v9 = vpop.eup %4723  ;;  %v3787_v54 = vmul.f32 1.442695, %v3757_v15 }
0x123a   :  { %3817 = vadd.xlane.f32.xlu1 %v4724_v9  ;;  %v3829_v44 = vpack.c.bf16 %v4724_v9, %v4722_v1 }
0x123b   :  { %4725 = vpow2.f32 %v3787_v54  ;;  %v3432_v54 = vpop.f32.mrf.mxu3 }
0x123c   :  { %3893 = vmatmul.bf16.gmra.mxu0 %v3829_v44 }
0x123e   :  { %v3742_v12 = vpop.xlane.xlu2 %3741  ;;  %v7492_v8 = vpop.f32.mrf.mxu0 }
0x123f   :  { %v3758_v17 = vsub.f32 %v3710_v34, %v3742_v12 }
0x1241   :  { %v4726_v6 = vpop.eup %4725  ;;  %v3789_v2 = vmul.f32 1.442695, %v3758_v17 }
0x1242   :  { %3819 = vadd.xlane.f32.xlu2 %v4726_v6 }
0x1243   :  { %4727 = vpow2.f32 %v3789_v2 }
0x1244   :  { %4729 = vrcp.f32 %v7894_v25 }
0x1245   :  { %4731 = vrcp.f32 %v7895_v56 }
0x1246   :  { %v3337_v62 = vpop.xlane.xlu2 %3336  ;;  %4733 = vrcp.f32 %v7896_v36  ;;  %v7500_v17 = vpop.f32.mrf.mxu0 }
0x1247   :  { %4735 = vrcp.f32 %v3335_v39 }
0x1248   :  { %4737 = vrcp.f32 %v3337_v62 }
0x1249   :  { %v4728_v60 = vpop.eup %4727  ;;  %4739 = vrcp.f32 %v7897_v45 }
0x124a   :  { %3821 = vadd.xlane.f32.xlu0 %v4728_v60  ;;  %v3830_v16 = vpack.c.bf16 %v4728_v60, %v4726_v6  ;;  %v4730_v58 = vpop.eup %4729  ;;  %4741 = vrcp.f32 %v3341_v41 }
0x124b   :  { %v4732_v0 = vpop.eup %4731  ;;  %v3454_v40 = vmul.f32 %v4730_v58, %v3399_v20 }
0x124c   :  { %3898 = vmatmul.bf16.gmra.mxu0 %v3830_v16  ;;  %v3456_v7 = vmul.f32 %v4732_v0, %v3404_v35  ;;  %v4734_v29 = vpop.eup %4733  ;;  %v3424_v35 = vpop.f32.mrf.mxu1 }
0x124d   :  { %v3470_v31 = vpack.c.bf16 %v3454_v40, %v3454_v40  ;;  %v3455_v13 = vmul.f32 %v4734_v29, %v3402_v14  ;;  %v4736_v47 = vpop.eup %4735 }
0x124e   :  { %v3343_v5 = vpop.xlane.xlu2 %3342  ;;  %v3472_v43 = vpack.c.bf16 %v3456_v7, %v3456_v7  ;;  %v4738_v59 = vpop.eup %4737  ;;  %v3458_v37 = vmul.f32 %v4736_v47, %v7461_v61 }
0x124f   :  { %v3471_v18 = vpack.c.bf16 %v3455_v13, %v3455_v13  ;;  %4743 = vrcp.f32 %v3343_v5  ;;  %v3459_v46 = vmul.f32 %v4738_v59, %v7465_v26  ;;  %v4740_v48 = vpop.eup %4739  ;;  %v3434_v5 = vpop.f32.mrf.mxu3 }
0x1250   :  { %4745 = vrcp.f32 %v3339_v24  ;;  %v3457_v63 = vmul.f32 %v4740_v48, %v7459_v10  ;;  %v3474_v20 = vpack.c.bf16 %v3458_v37, %v3458_v37  ;;  %v4742_v27 = vpop.eup %4741  ;;  %v3351_v10 = vpop.xlane.xlu0 %3350 }
0x1251   :  { %v3475_v51 = vpack.c.bf16 %v3459_v46, %v3459_v46  ;;  %4747 = vrcp.f32 %v3347_v30  ;;  %v3461_v22 = vmul.f32 %v4742_v27, %v3417_v4 }
0x1252   :  { %v3473_v33 = vpack.c.bf16 %v3457_v63, %v3457_v63 }
0x1253   :  { %3501 = vrot.lane.b32.xlu1 %v3469_v19, %s4835_s0  ;;  %v3477_v42 = vpack.c.bf16 %v3461_v22, %v3461_v22 }
0x1254   :  { %v3427_v44 = vpop.f32.mrf.mxu1 }
0x1255   :  { %v4744_v14 = vpop.eup %4743 }
0x1256   :  { %v3349_v34 = vpop.xlane.xlu2 %3348  ;;  %v4746_v55 = vpop.eup %4745  ;;  %v3462_v26 = vmul.f32 %v4744_v14, %v3419_v49 }
0x1257   :  { %4749 = vrcp.f32 %v3349_v34  ;;  %v3460_v1 = vmul.f32 %v4746_v55, %v7469_v3  ;;  %v4748_v21 = vpop.eup %4747  ;;  %v3794_v3 = vpop.xlane.xlu1 %3793 }
0x1258   :  { %4751 = vrcp.f32 %v3345_v52  ;;  %v3478_v15 = vpack.c.bf16 %v3462_v26, %v3462_v26  ;;  %v3464_v12 = vmul.f32 %v4748_v21, %v3424_v35  ;;  %v3792_v60 = vpop.xlane.xlu0 %3791 }
0x1259   :  { %4753 = vrcp.f32 %v3353_v57  ;;  %v3476_v6 = vpack.c.bf16 %v3460_v1, %v3460_v1 }
0x125a   :  { %3503 = vrot.lane.b32.xlu2 %v3470_v31, %s4835_s0  ;;  %v3480_v16 = vpack.c.bf16 %v3464_v12, %v3464_v12 }
0x125b   :  { %3507 = vrot.lane.b32.xlu1 %v3472_v43, %s4835_s0 }
0x125c   :  { %v3429_v0 = vpop.f32.mrf.mxu1 }
0x125d   :  { %v4750_v9 = vpop.eup %4749 }
0x125e   :  { %3505 = vrot.lane.b32.xlu0 %v3471_v18, %s4835_s0  ;;  %v3355_v61 = vpop.xlane.xlu2 %3354  ;;  %v4752_v2 = vpop.eup %4751  ;;  %v3465_v4 = vmul.f32 %v4750_v9, %v3427_v44 }
0x125f   :  { %4755 = vrcp.f32 %v3355_v61  ;;  %v3463_v39 = vmul.f32 %v4752_v2, %v3422_v53  ;;  %v4754_v25 = vpop.eup %4753  ;;  %v3800_v7 = vpop.xlane.xlu1 %3799 }
0x1260   :  { %4757 = vrcp.f32 %v3351_v10  ;;  %v3481_v56 = vpack.c.bf16 %v3465_v4, %v3465_v4  ;;  %v3467_v41 = vmul.f32 %v4754_v25, %v3432_v54  ;;  %v3798_v45 = vpop.xlane.xlu0 %3797 }
0x1261   :  { %4759 = vrcp.f32 %v3794_v3  ;;  %v3479_v19 = vpack.c.bf16 %v3463_v39, %v3463_v39 }
0x1262   :  { %3511 = vrot.lane.b32.xlu2 %v3474_v20, %s4835_s0  ;;  %v3483_v31 = vpack.c.bf16 %v3467_v41, %v3467_v41 }
0x1263   :  { %3513 = vrot.lane.b32.xlu1 %v3475_v51, %s4835_s0 }
0x1265   :  { %v4756_v49 = vpop.eup %4755 }
0x1266   :  { %3509 = vrot.lane.b32.xlu0 %v3473_v33, %s4835_s0  ;;  %v3796_v62 = vpop.xlane.xlu2 %3795  ;;  %v4758_v24 = vpop.eup %4757  ;;  %v3468_v58 = vmul.f32 %v4756_v49, %v3434_v5 }
0x1267   :  { %4761 = vrcp.f32 %v3796_v62  ;;  %v3466_v29 = vmul.f32 %v4758_v24, %v3429_v0  ;;  %v4760_v13 = vpop.eup %4759  ;;  %v3806_v20 = vpop.xlane.xlu1 %3805 }
0x1268   :  { %4763 = vrcp.f32 %v3792_v60  ;;  %v3484_v53 = vpack.c.bf16 %v3468_v58, %v3468_v58  ;;  %v3921_v43 = vmul.f32 %v4760_v13, %v7467_v32  ;;  %v3804_v27 = vpop.xlane.xlu0 %3803 }
0x1269   :  { %v3482_v34 = vpack.c.bf16 %v3466_v29, %v3466_v29 }
0x126a   :  { %3517 = vrot.lane.b32.xlu2 %v3477_v42, %s4835_s0  ;;  %v3937_v52 = vpack.c.bf16 %v3921_v43, %v3921_v43 }
0x126b   :  { %3519 = vrot.lane.b32.xlu1 %v3478_v15, %s4835_s0 }
0x126d   :  { %v4762_v47 = vpop.eup %4761 }
0x126e   :  { %3515 = vrot.lane.b32.xlu0 %v3476_v6, %s4835_s0  ;;  %v3802_v40 = vpop.xlane.xlu2 %3801  ;;  %v4764_v59 = vpop.eup %4763  ;;  %v3922_v30 = vmul.f32 %v4762_v47, %v7471_v50 }
0x126f   :  { %v3884_v36 = vpop.f32.mrf.mxu0  ;;  %4765 = vrcp.f32 %v3802_v40  ;;  %v3920_v37 = vmul.f32 %v4764_v59, %v7463_v23  ;;  %v3812_v55 = vpop.xlane.xlu1 %3811 }
0x1270   :  { %4767 = vrcp.f32 %v3800_v7  ;;  %v3938_v48 = vpack.c.bf16 %v3922_v30, %v3922_v30  ;;  %v3810_v42 = vpop.xlane.xlu0 %3809 }
0x1271   :  { %4769 = vrcp.f32 %v3798_v45  ;;  %v3936_v51 = vpack.c.bf16 %v3920_v37, %v3920_v37 }
0x1272   :  { %3523 = vrot.lane.b32.xlu2 %v3480_v16, %s4835_s0 }
0x1273   :  { %3525 = vrot.lane.b32.xlu1 %v3481_v56, %s4835_s0 }
0x1275   :  { %v4766_v63 = vpop.eup %4765 }
0x1276   :  { %3521 = vrot.lane.b32.xlu0 %v3479_v19, %s4835_s0  ;;  %v3808_v46 = vpop.xlane.xlu2 %3807  ;;  %v4768_v32 = vpop.eup %4767  ;;  %v3925_v23 = vmul.f32 %v4766_v63, %v7483_v38 }
0x1277   :  { %v3886_v18 = vpop.f32.mrf.mxu0  ;;  %v3924_v50 = vmul.f32 %v4768_v32, %v7477_v28  ;;  %4771 = vrcp.f32 %v3808_v46  ;;  %v4770_v14 = vpop.eup %4769 }
0x1278   :  { %4773 = vrcp.f32 %v3806_v20  ;;  %v3923_v35 = vmul.f32 %v4770_v14, %v7473_v11  ;;  %v3941_v22 = vpack.c.bf16 %v3925_v23, %v3925_v23 }
0x1279   :  { %v3940_v61 = vpack.c.bf16 %v3924_v50, %v3924_v50  ;;  %4775 = vrcp.f32 %v3804_v27 }
0x127a   :  { %3529 = vrot.lane.b32.xlu2 %v3483_v31, %s4835_s0  ;;  %v3939_v1 = vpack.c.bf16 %v3923_v35, %v3923_v35  ;;  %4777 = vrcp.f32 %v3812_v55 }
0x127b   :  { %3531 = vrot.lane.b32.xlu1 %v3484_v53, %s4835_s0 }
0x127d   :  { %v4772_v57 = vpop.eup %4771 }
0x127e   :  { %3527 = vrot.lane.b32.xlu0 %v3482_v34, %s4835_s0  ;;  %v4774_v26 = vpop.eup %4773  ;;  %v3814_v28 = vpop.xlane.xlu2 %3813  ;;  %v3928_v38 = vmul.f32 %v4772_v57, %v3884_v36 }
0x127f   :  { %v3889_v33 = vpop.f32.mrf.mxu0  ;;  %v3927_v10 = vmul.f32 %v4774_v26, %v7500_v17  ;;  %4779 = vrcp.f32 %v3814_v28  ;;  %v4776_v11 = vpop.eup %4775 }
0x1280   :  { %v3926_v21 = vmul.f32 %v4776_v11, %v7492_v8  ;;  %4781 = vrcp.f32 %v3810_v42  ;;  %v3944_v9 = vpack.c.bf16 %v3928_v38, %v3928_v38  ;;  %v4778_v44 = vpop.eup %4777 }
0x1281   :  { %v3943_v15 = vpack.c.bf16 %v3927_v10, %v3927_v10  ;;  %v3930_v6 = vmul.f32 %v4778_v44, %v3889_v33 }
0x1282   :  { %3970 = vrot.lane.b32.xlu2 %v3937_v52, %s4836_s15  ;;  %v3942_v17 = vpack.c.bf16 %v3926_v21, %v3926_v21 }
0x1283   :  { %3972 = vrot.lane.b32.xlu1 %v3938_v48, %s4836_s15  ;;  %v3946_v3 = vpack.c.bf16 %v3930_v6, %v3930_v6 }
0x1285   :  { %v4780_v12 = vpop.eup %4779 }
0x1286   :  { %3968 = vrot.lane.b32.xlu0 %v3936_v51, %s4836_s15  ;;  %v4782_v4 = vpop.eup %4781 }
0x1287   :  { %v3891_v54 = vpop.f32.mrf.mxu0  ;;  %v3929_v62 = vmul.f32 %v4782_v4, %v3886_v18 }
0x1288   :  { %v3931_v2 = vmul.f32 %v4780_v12, %v3891_v54 }
0x1289   :  { %v3945_v8 = vpack.c.bf16 %v3929_v62, %v3929_v62 }
0x128a   :  { %3976 = vrot.lane.b32.xlu2 %v3940_v61, %s4836_s15  ;;  %v3947_v39 = vpack.c.bf16 %v3931_v2, %v3931_v2 }
0x128b   :  { %3978 = vrot.lane.b32.xlu1 %v3941_v22, %s4836_s15 }
0x128e   :  { %3974 = vrot.lane.b32.xlu0 %v3939_v1, %s4836_s15 }
0x1292   :  { %3982 = vrot.lane.b32.xlu2 %v3943_v15, %s4836_s15 }
0x1293   :  { %3984 = vrot.lane.b32.xlu1 %v3944_v9, %s4836_s15 }
0x1296   :  { %3980 = vrot.lane.b32.xlu0 %v3942_v17, %s4836_s15 }
0x129a   :  { %3988 = vrot.lane.b32.xlu2 %v3946_v3, %s4836_s15 }
0x129b   :  { %3990 = vrot.lane.b32.xlu1 %v3947_v39, %s4836_s15 }
0x129e   :  { %3986 = vrot.lane.b32.xlu0 %v3945_v8, %s4836_s15 }
0x12a5   :  { %v3816_v60 = vpop.xlane.xlu0 %3815 }
0x12a6   :  { %4783 = vrcp.f32 %v3816_v60 }
0x12ac   :  { %v4784_v56 = vpop.eup %4783 }
0x12ad   :  { %v3818_v25 = vpop.xlane.xlu1 %3817 }
0x12ae   :  { %4785 = vrcp.f32 %v3818_v25 }
0x12b4   :  { %v4786_v19 = vpop.eup %4785 }
0x12b5   :  { %v3820_v16 = vpop.xlane.xlu2 %3819 }
0x12b6   :  { %4787 = vrcp.f32 %v3820_v16 }
0x12b9   :  { %v3894_v49 = vpop.f32.mrf.mxu0 }
0x12ba   :  { %v3932_v5 = vmul.f32 %v4784_v56, %v3894_v49 }
0x12bc   :  { %v3948_v41 = vpack.c.bf16 %v3932_v5, %v3932_v5  ;;  %v4788_v31 = vpop.eup %4787 }
0x12bd   :  { %v3504_v36 = vpop.permute.xlu2 %3503  ;;  %v3822_v29 = vpop.xlane.xlu0 %3821 }
0x12be   :  { %3551 = vst.msk [vmem:[%s7665_s4 + $0x4] sm:$0xf] %vm3549_vm7, %v3504_v36  ;;  %3992 = vrot.lane.b32.xlu0 %v3948_v41, %s4836_s15  ;;  %4789 = vrcp.f32 %v3822_v29 }
0x12c1   :  { %v3896_v24 = vpop.f32.mrf.mxu0 }
0x12c2   :  { %v3933_v58 = vmul.f32 %v4786_v19, %v3896_v24 }
0x12c4   :  { %v3949_v0 = vpack.c.bf16 %v3933_v58, %v3933_v58  ;;  %v4790_v59 = vpop.eup %4789 }
0x12c5   :  { %v3502_v40 = vpop.permute.xlu1 %3501  ;;  %v3512_v7 = vpop.permute.xlu2 %3511 }
0x12c6   :  { %3550 = vst.msk [vmem:[%s7665_s4] sm:$0xf] %vm3549_vm7, %v3502_v40  ;;  %3994 = vrot.lane.b32.xlu2 %v3949_v0, %s4836_s15 }
0x12c7   :  { %3555 = vst.msk [vmem:[%s7665_s4 + $0x14] sm:$0xf] %vm3549_vm7, %v3512_v7 }
0x12c9   :  { %v3899_v13 = vpop.f32.mrf.mxu0 }
0x12ca   :  { %v3934_v53 = vmul.f32 %v4788_v31, %v3899_v13 }
0x12cc   :  { %v3950_v47 = vpack.c.bf16 %v3934_v53, %v3934_v53 }
0x12cd   :  { %v3508_v45 = vpop.permute.xlu1 %3507  ;;  %v3518_v43 = vpop.permute.xlu2 %3517 }
0x12ce   :  { %3553 = vst.msk [vmem:[%s7665_s4 + $0xc] sm:$0xf] %vm3549_vm7, %v3508_v45  ;;  %3996 = vrot.lane.b32.xlu1 %v3950_v47, %s4836_s15 }
0x12cf   :  { %3558 = vst.msk [vmem:[%s7665_s4 + $0x20] sm:$0xf] %vm3549_vm7, %v3518_v43 }
0x12d0   :  { %v3506_v34 = vpop.permute.xlu0 %3505 }
0x12d1   :  { %3552 = vst.msk [vmem:[%s7665_s4 + $0x8] sm:$0xf] %vm3549_vm7, %v3506_v34  ;;  %v3901_v30 = vpop.f32.mrf.mxu0 }
0x12d2   :  { %v3935_v18 = vmul.f32 %v4790_v59, %v3901_v30 }
0x12d4   :  { %v3951_v37 = vpack.c.bf16 %v3935_v18, %v3935_v18 }
0x12d5   :  { %v3514_v52 = vpop.permute.xlu1 %3513  ;;  %v3524_v46 = vpop.permute.xlu2 %3523 }
0x12d6   :  { %3556 = vst.msk [vmem:[%s7665_s4 + $0x18] sm:$0xf] %vm3549_vm7, %v3514_v52  ;;  %3998 = vrot.lane.b32.xlu0 %v3951_v37, %s4836_s15 }
0x12d7   :  { %3561 = vst.msk [vmem:[%s7665_s4 + $0x2c] sm:$0xf] %vm3549_vm7, %v3524_v46 }
0x12d8   :  { %v3510_v48 = vpop.permute.xlu0 %3509 }
0x12d9   :  { %3554 = vst.msk [vmem:[%s7665_s4 + $0x10] sm:$0xf] %vm3549_vm7, %v3510_v48 }
0x12dd   :  { %v3520_v63 = vpop.permute.xlu1 %3519  ;;  %v3530_v20 = vpop.permute.xlu2 %3529 }
0x12de   :  { %3559 = vst.msk [vmem:[%s7665_s4 + $0x24] sm:$0xf] %vm3549_vm7, %v3520_v63 }
0x12df   :  { %3564 = vst.msk [vmem:[%s7665_s4 + $0x38] sm:$0xf] %vm3549_vm7, %v3530_v20 }
0x12e0   :  { %v3516_v32 = vpop.permute.xlu0 %3515 }
0x12e1   :  { %3557 = vst.msk [vmem:[%s7665_s4 + $0x1c] sm:$0xf] %vm3549_vm7, %v3516_v32 }
0x12e5   :  { %v3526_v27 = vpop.permute.xlu1 %3525  ;;  %v3971_v50 = vpop.permute.xlu2 %3970 }
0x12e6   :  { %3562 = vst.msk [vmem:[%s7665_s4 + $0x30] sm:$0xf] %vm3549_vm7, %v3526_v27 }
0x12e7   :  { %4018 = vst.msk [vmem:[%s7665_s4 + $0x4] sm:$0xf] %vm4016_vm8, %v3971_v50 }
0x12e8   :  { %v3522_v51 = vpop.permute.xlu0 %3521 }
0x12e9   :  { %3560 = vst.msk [vmem:[%s7665_s4 + $0x28] sm:$0xf] %vm3549_vm7, %v3522_v51 }
0x12ed   :  { %v3532_v14 = vpop.permute.xlu1 %3531  ;;  %v3977_v23 = vpop.permute.xlu2 %3976 }
0x12ee   :  { %3565 = vst.msk [vmem:[%s7665_s4 + $0x3c] sm:$0xf] %vm3549_vm7, %v3532_v14 }
0x12ef   :  { %4021 = vst.msk [vmem:[%s7665_s4 + $0x10] sm:$0xf] %vm4016_vm8, %v3977_v23 }
0x12f0   :  { %v3528_v35 = vpop.permute.xlu0 %3527 }
0x12f1   :  { %3563 = vst.msk [vmem:[%s7665_s4 + $0x34] sm:$0xf] %vm3549_vm7, %v3528_v35 }
0x12f5   :  { %v3973_v61 = vpop.permute.xlu1 %3972  ;;  %v3983_v33 = vpop.permute.xlu2 %3982 }
0x12f6   :  { %4019 = vst.msk [vmem:[%s7665_s4 + $0x8] sm:$0xf] %vm4016_vm8, %v3973_v61 }
0x12f7   :  { %4024 = vst.msk [vmem:[%s7665_s4 + $0x1c] sm:$0xf] %vm4016_vm8, %v3983_v33 }
0x12f8   :  { %v3969_v22 = vpop.permute.xlu0 %3968 }
0x12f9   :  { %4017 = vst.msk [vmem:[%s7665_s4] sm:$0xf] %vm4016_vm8, %v3969_v22 }
0x12fd   :  { %v3979_v57 = vpop.permute.xlu1 %3978  ;;  %v3989_v55 = vpop.permute.xlu2 %3988 }
0x12fe   :  { %4022 = vst.msk [vmem:[%s7665_s4 + $0x14] sm:$0xf] %vm4016_vm8, %v3979_v57 }
0x12ff   :  { %4027 = vst.msk [vmem:[%s7665_s4 + $0x28] sm:$0xf] %vm4016_vm8, %v3989_v55 }
0x1300   :  { %v3975_v26 = vpop.permute.xlu0 %3974 }
0x1301   :  { %4020 = vst.msk [vmem:[%s7665_s4 + $0xc] sm:$0xf] %vm4016_vm8, %v3975_v26 }
0x1305   :  { %v3985_v28 = vpop.permute.xlu1 %3984 }
0x1306   :  { %4025 = vst.msk [vmem:[%s7665_s4 + $0x20] sm:$0xf] %vm4016_vm8, %v3985_v28 }
0x1308   :  { %v3981_v10 = vpop.permute.xlu0 %3980 }
0x1309   :  { %4023 = vst.msk [vmem:[%s7665_s4 + $0x18] sm:$0xf] %vm4016_vm8, %v3981_v10 }
0x130d   :  { %v3991_v1 = vpop.permute.xlu1 %3990 }
0x130e   :  { %4028 = vst.msk [vmem:[%s7665_s4 + $0x2c] sm:$0xf] %vm4016_vm8, %v3991_v1 }
0x1310   :  { %v3987_v38 = vpop.permute.xlu0 %3986 }
0x1311   :  { %4026 = vst.msk [vmem:[%s7665_s4 + $0x24] sm:$0xf] %vm4016_vm8, %v3987_v38 }
0x1320   :  { %v3995_v42 = vpop.permute.xlu2 %3994 }
0x1321   :  { %4030 = vst.msk [vmem:[%s7665_s4 + $0x34] sm:$0xf] %vm4016_vm8, %v3995_v42 }
0x1330   :  { %v3993_v11 = vpop.permute.xlu0 %3992 }
0x1331   :  { %4029 = vst.msk [vmem:[%s7665_s4 + $0x30] sm:$0xf] %vm4016_vm8, %v3993_v11 }
0x1340   :  { %v3997_v21 = vpop.permute.xlu1 %3996 }
0x1341   :  { %4031 = vst.msk [vmem:[%s7665_s4 + $0x38] sm:$0xf] %vm4016_vm8, %v3997_v21 }
0x1348   :  { %v3999_v15 = vpop.permute.xlu0 %3998 }
0x1349   :  { %4032 = vst.msk [vmem:[%s7665_s4 + $0x3c] sm:$0xf] %vm4016_vm8, %v3999_v15 }

</bundles_post_ra>
